<compile_context>
chip_gen: v7x
topology: tpu7x:2x2x1
jax: 0.10.0
libtpu: 0.0.40
codegen_flags: <defaults>
</compile_context>

<pallas_src>
import functools

import jax
import jax.numpy as jnp
from jax.experimental import pallas as pl
from jax.experimental.pallas import tpu as pltpu


def _round_up(v, m):
    return (v + m - 1) // m * m


# ---------------------------------------------------------------------------
# Kernel 1: the two 1x1-spatial first blocks (ConvT k=4,s=1,p=0 + BN + ReLU),
# fused into ONE pallas_call that emits the channel-concatenated activation.
# ---------------------------------------------------------------------------
def _first_blocks_kernel(z_ref, l_ref, wz_ref, wl_ref, gz_ref, bz_ref,
                         gl_ref, bl_ref, o_ref, *, N, Co, eps):
    def branch(x_ref, w_ref, g_ref, b_ref):
        conv = jnp.dot(x_ref[...], w_ref[...],
                       preferred_element_type=jnp.float32)      # (N, 16*Co)
        c = conv.reshape(N * 16, Co)                             # (N*4*4, Co)
        mean = jnp.mean(c, axis=0, keepdims=True)
        var = jnp.mean((c - mean) ** 2, axis=0, keepdims=True)
        out = (c - mean) * jax.lax.rsqrt(var + eps) * g_ref[...] + b_ref[...]
        return jnp.maximum(out, 0.0).reshape(N, 4, 4, Co)

    oz = branch(z_ref, wz_ref, gz_ref, bz_ref)
    ol = branch(l_ref, wl_ref, gl_ref, bl_ref)
    o_ref[...] = jnp.concatenate([oz, ol], axis=-1).astype(o_ref.dtype)


def _first_blocks(z, label, p, eps):
    N = z.shape[0]
    Cz, Cl = z.shape[1], label.shape[1]
    C_out = p["wz1"].shape[1]
    Co = _round_up(C_out, 128)
    Czp, Clp = _round_up(Cz, 128), _round_up(Cl, 128)

    z2 = jnp.pad(z.reshape(N, Cz).astype(jnp.float32),
                 ((0, 0), (0, Czp - Cz))).astype(jnp.bfloat16)
    l2 = jnp.pad(label.reshape(N, Cl).astype(jnp.float32),
                 ((0, 0), (0, Clp - Cl))).astype(jnp.bfloat16)

    def mat(w, cip):
        cin, cout = w.shape[0], w.shape[1]
        wp = jnp.pad(w.astype(jnp.float32),
                     ((0, cip - cin), (0, Co - cout), (0, 0), (0, 0)))
        # (Cin_p, Co_p, 4, 4) -> (Cin_p, 4, 4, Co_p) -> (Cin_p, 16*Co_p)
        return jnp.transpose(wp, (0, 2, 3, 1)).reshape(cip, 16 * Co) \
                  .astype(jnp.bfloat16)

    def vec(v):
        return jnp.pad(v.astype(jnp.float32), (0, Co - v.shape[0])).reshape(1, Co)

    wz, wl = mat(p["wz1"], Czp), mat(p["wy1"], Clp)
    gz, bz, gl, bl = vec(p["gz1"]), vec(p["bz1"]), vec(p["gy1"]), vec(p["by1"])

    out = pl.pallas_call(
        functools.partial(_first_blocks_kernel, N=N, Co=Co, eps=eps),
        out_shape=jax.ShapeDtypeStruct((N, 4, 4, 2 * Co), jnp.bfloat16),
        grid_spec=pltpu.PrefetchScalarGridSpec(
            num_scalar_prefetch=0,
            grid=(1,),
            in_specs=[
                pl.BlockSpec((N, Czp), lambda i: (0, 0)),
                pl.BlockSpec((N, Clp), lambda i: (0, 0)),
                pl.BlockSpec((Czp, 16 * Co), lambda i: (0, 0)),
                pl.BlockSpec((Clp, 16 * Co), lambda i: (0, 0)),
                pl.BlockSpec((1, Co), lambda i: (0, 0)),
                pl.BlockSpec((1, Co), lambda i: (0, 0)),
                pl.BlockSpec((1, Co), lambda i: (0, 0)),
                pl.BlockSpec((1, Co), lambda i: (0, 0)),
            ],
            out_specs=pl.BlockSpec((N, 4, 4, 2 * Co), lambda i: (0, 0, 0, 0)),
        ),
        compiler_params=pltpu.CompilerParams(
            dimension_semantics=("arbitrary",)),
    )(z2, l2, wz, wl, gz, bz, gl, bl)
    # z-branch real channels at [0:C_out], label-branch at [Co:Co+C_out]
    return out, C_out, Co


# ---------------------------------------------------------------------------
# Kernel 2: stride-2, padding-1, K=4 transposed conv, all 4 output phases per
# grid step, previous layer's BN-apply+ReLU fused into the prologue, optional
# tanh epilogue, optional (sum, sumsq) moment emission for this layer's BN.
# ---------------------------------------------------------------------------
def _convt_compute(x_ref, sc_ref, sh_ref, w_ref, y_ref, mom_ref, pad_scr,
                   *, H, W, Cin, Co, apply_tanh):
    p_h = pl.program_id(0)
    Hp, Wp = H + 2, W + 2

    # Prologue: previous layer's BN-apply + ReLU, written into a VMEM scratch
    # with a zero spatial halo of 1 (keeps the halo zero in post-act domain).
    pad_scr[...] = jnp.zeros((Hp, Wp, Cin), pad_scr.dtype)
    act = jnp.maximum(
        x_ref[0].astype(jnp.float32) * sc_ref[...] + sh_ref[...], 0.0)
    pad_scr[pl.ds(1, H), pl.ds(1, W), :] = act.astype(pad_scr.dtype)

    cols = []
    mom = None
    for p_w in range(2):                                   # column phase
        acc = jnp.zeros((H * W, Co), jnp.float32)
        for dj in range(2):                                # row tap
            for di in range(2):                            # col tap
                tap = dj * 2 + di
                win = pad_scr[pl.ds(p_h + dj, H), pl.ds(p_w + di, W), :]
                acc = acc + jnp.dot(
                    win.reshape(H * W, Cin),
                    w_ref[0, p_w, pl.ds(tap * Cin, Cin), :],
                    preferred_element_type=jnp.float32)
        if mom_ref is not None:
            m = jnp.concatenate(
                [jnp.sum(acc, axis=0, keepdims=True),
                 jnp.sum(acc * acc, axis=0, keepdims=True)], axis=0)  # (2, Co)
            mom = m if mom is None else mom + m
        if apply_tanh:
            acc = jnp.tanh(acc)
        cols.append(acc.reshape(H, W, Co))

    # Both column phases side by side in the lane dim -> (H, W, 2*Co); together
    # with the (N, H, 2, W, 2*Co) output layout this makes the interleaved
    # NHWC output a pure contiguous reshape in the wrapper.
    y_ref[0, :, 0, :, :] = jnp.concatenate(cols, axis=-1).astype(y_ref.dtype)
    if mom_ref is not None:
        mom_ref[0, 0] = mom


def _convt_kernel_mom(x_ref, sc_ref, sh_ref, w_ref, y_ref, mom_ref, pad_scr, **kw):
    _convt_compute(x_ref, sc_ref, sh_ref, w_ref, y_ref, mom_ref, pad_scr, **kw)


def _convt_kernel_nomom(x_ref, sc_ref, sh_ref, w_ref, y_ref, pad_scr, **kw):
    _convt_compute(x_ref, sc_ref, sh_ref, w_ref, y_ref, None, pad_scr, **kw)


def _pack_convt_weights(w_placed, Co_pad):
    """(Cin_pad, C_out, 4, 4) -> (2, 2, 4*Cin_pad, Co_pad) bf16 fused sub-kernels.

    For phase (p_h, p_w) and tap (dj, di) the kernel element used is
    w[:, :, (3 - p_h) - 2*dj, (3 - p_w) - 2*di]; row blocks ordered tap = 2*dj+di.
    """
    Cin_pad, C_out = w_placed.shape[0], w_placed.shape[1]
    wp = jnp.pad(w_placed.astype(jnp.float32),
                 ((0, 0), (0, Co_pad - C_out), (0, 0), (0, 0)))
    rows = []
    for p_h in range(2):
        cols = []
        for p_w in range(2):
            taps = []
            for dj in range(2):
                kh = (3 - p_h) - 2 * dj
                for di in range(2):
                    kw = (3 - p_w) - 2 * di
                    taps.append(wp[:, :, kh, kw])          # (Cin_pad, Co_pad)
            cols.append(jnp.concatenate(taps, axis=0))     # (4*Cin_pad, Co_pad)
        rows.append(jnp.stack(cols, axis=0))
    return jnp.stack(rows, axis=0).astype(jnp.bfloat16)


def _convt2x2_layer(x_raw, scale, shift, w_placed, C_out, *,
                    with_moments, apply_tanh):
    """One merged-phase ConvTranspose2d(k=4, s=2, p=1) layer.

    x_raw  : (N, H, W, Cin_pad) bf16 — previous layer's raw conv output (or an
             already-activated tensor, in which case scale=1, shift=0).
    scale/shift : (Cin_pad,) f32 — BN-apply of the producing layer (prologue).
    Returns NHWC raw conv output (N, 2H, 2W, Co_pad) bf16 (tanh applied if
    requested) and, if with_moments, the f32 per-channel (sum, sumsq).
    """
    N, H, W, Cin = x_raw.shape
    Co = _round_up(C_out, 128)
    w_all = _pack_convt_weights(w_placed, Co)
    sc = scale.reshape(1, 1, Cin).astype(jnp.float32)
    sh = shift.reshape(1, 1, Cin).astype(jnp.float32)

    kw = dict(H=H, W=W, Cin=Cin, Co=Co, apply_tanh=apply_tanh)
    in_specs = [
        pl.BlockSpec((1, H, W, Cin), lambda ph, n: (n, 0, 0, 0)),
        pl.BlockSpec((1, 1, Cin), lambda ph, n: (0, 0, 0)),
        pl.BlockSpec((1, 1, Cin), lambda ph, n: (0, 0, 0)),
        pl.BlockSpec((1, 2, 4 * Cin, Co), lambda ph, n: (ph, 0, 0, 0)),
    ]
    y_spec = pl.BlockSpec((1, H, 1, W, 2 * Co), lambda ph, n: (n, 0, ph, 0, 0))
    y_shape = jax.ShapeDtypeStruct((N, H, 2, W, 2 * Co), jnp.bfloat16)

    if with_moments:
        out_shape = (y_shape, jax.ShapeDtypeStruct((2, N, 2, Co), jnp.float32))
        out_specs = [y_spec,
                     pl.BlockSpec((1, 1, 2, Co), lambda ph, n: (ph, n, 0, 0))]
        kernel = functools.partial(_convt_kernel_mom, **kw)
    else:
        out_shape = y_shape
        out_specs = y_spec
        kernel = functools.partial(_convt_kernel_nomom, **kw)

    res = pl.pallas_call(
        kernel,
        out_shape=out_shape,
        grid_spec=pltpu.PrefetchScalarGridSpec(
            num_scalar_prefetch=0,
            grid=(2, N),
            in_specs=in_specs,
            out_specs=out_specs,
            scratch_shapes=[pltpu.VMEM((H + 2, W + 2, Cin), jnp.bfloat16)],
        ),
        compiler_params=pltpu.CompilerParams(
            dimension_semantics=("parallel", "parallel")),
    )(x_raw, sc, sh, w_all)

    if with_moments:
        y_int, mom = res
    else:
        y_int, mom = res, None

    # Phase-major (N, H, 2, W, 2*Co) -> interleaved NHWC, contiguous reshape.
    y = y_int.reshape(N, 2 * H, 2 * W, Co)
    if with_moments:
        s = jnp.sum(mom[:, :, 0, :], axis=(0, 1))
        ss = jnp.sum(mom[:, :, 1, :], axis=(0, 1))
        return y, s, ss
    return y


def _bn_affine(s, ss, count, gamma, beta, Co_pad, eps):
    mean = s / count
    # TODO(synk): single-pass variance (sumsq/count - mean^2); adequate at these
    # scales, switch to a shifted two-pass formulation if BN accuracy matters.
    var = jnp.maximum(ss / count - mean * mean, 0.0)
    inv = jax.lax.rsqrt(var + eps)
    g = jnp.pad(gamma.astype(jnp.float32), (0, Co_pad - gamma.shape[0]))
    b = jnp.pad(beta.astype(jnp.float32), (0, Co_pad - beta.shape[0]))
    scale = g * inv
    shift = b - mean * scale
    return scale, shift


# ---------------------------------------------------------------------------
# Generator forward
# ---------------------------------------------------------------------------
def generator_forward(z, label, p, eps=1e-5):
    # TODO(synk): BatchNorm running_mean/running_var buffers are not tracked or
    # updated — training-mode forward with batch statistics (nn.BatchNorm2d.train()).
    # --- deconv_z1 / deconv_y1 (1x1 spatial) + channel concat, one kernel ----
    act01, C1, Co1 = _first_blocks(z, label, p, eps)       # (N, 4, 4, 2*Co1)
    Cin2 = act01.shape[-1]

    # --- deconv_2 (input already activated -> identity prologue) -------------
    C_out2 = p["w2"].shape[1]
    w2 = p["w2"].astype(jnp.float32)
    w2_placed = jnp.zeros((Cin2, C_out2, 4, 4), jnp.float32)
    w2_placed = w2_placed.at[:C1].set(w2[:C1])              # z-branch channels
    w2_placed = w2_placed.at[Co1:Co1 + C1].set(w2[C1:2 * C1])  # label branch
    y2, s2, ss2 = _convt2x2_layer(
        act01, jnp.ones((Cin2,), jnp.float32), jnp.zeros((Cin2,), jnp.float32),
        w2_placed, C_out2, with_moments=True, apply_tanh=False)
    sc2, sh2 = _bn_affine(s2, ss2, y2.shape[0] * y2.shape[1] * y2.shape[2],
                          p["g2"], p["b2"], y2.shape[-1], eps)

    # --- deconv_3 (BN2-apply + ReLU folded into its prologue) ----------------
    C_in3, C_out3 = p["w3"].shape[0], p["w3"].shape[1]
    w3_placed = jnp.pad(p["w3"].astype(jnp.float32),
                        ((0, y2.shape[-1] - C_in3), (0, 0), (0, 0), (0, 0)))
    y3, s3, ss3 = _convt2x2_layer(y2, sc2, sh2, w3_placed, C_out3,
                                  with_moments=True, apply_tanh=False)
    sc3, sh3 = _bn_affine(s3, ss3, y3.shape[0] * y3.shape[1] * y3.shape[2],
                          p["g3"], p["b3"], y3.shape[-1], eps)

    # --- deconv_4 + tanh (BN3-apply + ReLU folded into its prologue) ---------
    C_in4, C_out4 = p["w4"].shape[0], p["w4"].shape[1]
    w4_placed = jnp.pad(p["w4"].astype(jnp.float32),
                        ((0, y3.shape[-1] - C_in4), (0, 0), (0, 0), (0, 0)))
    y4 = _convt2x2_layer(y3, sc3, sh3, w4_placed, C_out4,
                         with_moments=False, apply_tanh=True)

    out = y4[:, :, :, :C_out4]
    return jnp.transpose(out, (0, 3, 1, 2)).astype(jnp.float32)   # NCHW


# ---------------------------------------------------------------------------
# Pure-JAX reference (mirrors the bf16 casts of the Pallas pipeline)
# ---------------------------------------------------------------------------
def _bf16_round(x):
    return x.astype(jnp.bfloat16).astype(jnp.float32)


def _ref_conv_transpose(x, w, stride, padding):
    K = w.shape[2]
    wf = jnp.transpose(jnp.flip(w, axis=(2, 3)), (1, 0, 2, 3))   # OIHW
    pad = K - 1 - padding
    return jax.lax.conv_general_dilated(
        x, wf, window_strides=(1, 1),
        padding=((pad, pad), (pad, pad)),
        lhs_dilation=(stride, stride),
        dimension_numbers=("NCHW", "OIHW", "NCHW"),
        precision=jax.lax.Precision.HIGHEST)


def _ref_first_block(x, w, g, b, eps=1e-5):
    N, Cin = x.shape[0], x.shape[1]
    conv = jnp.einsum("nc,cokl->nokl", _bf16_round(x.reshape(N, Cin)),
                      _bf16_round(w), precision=jax.lax.Precision.HIGHEST)
    mean = conv.mean(axis=(0, 2, 3), keepdims=True)
    var = ((conv - mean) ** 2).mean(axis=(0, 2, 3), keepdims=True)
    out = (conv - mean) * jax.lax.rsqrt(var + eps) * g.reshape(1, -1, 1, 1) \
        + b.reshape(1, -1, 1, 1)
    return _bf16_round(jnp.maximum(out, 0.0))


def _ref_s2_block(x_act, w, g, b, eps=1e-5):
    conv = _ref_conv_transpose(_bf16_round(x_act), _bf16_round(w), 2, 1)
    mean = conv.mean(axis=(0, 2, 3), keepdims=True)
    var = ((conv - mean) ** 2).mean(axis=(0, 2, 3), keepdims=True)
    y = _bf16_round(conv)                 # bf16 raw conv storage between layers
    out = (y - mean) * jax.lax.rsqrt(var + eps) * g.reshape(1, -1, 1, 1) \
        + b.reshape(1, -1, 1, 1)
    return _bf16_round(jnp.maximum(out, 0.0))


def _ref_generator(z, label, p, eps=1e-5):
    oz = _ref_first_block(z, p["wz1"], p["gz1"], p["bz1"], eps)
    oy = _ref_first_block(label, p["wy1"], p["gy1"], p["by1"], eps)
    o = jnp.concatenate([oz, oy], axis=1)
    a2 = _ref_s2_block(o, p["w2"], p["g2"], p["b2"], eps)
    a3 = _ref_s2_block(a2, p["w3"], p["g3"], p["b3"], eps)
    conv4 = _ref_conv_transpose(_bf16_round(a3), _bf16_round(p["w4"]), 2, 1)
    return _bf16_round(jnp.tanh(conv4))


# ---------------------------------------------------------------------------
if __name__ == "__main__":
    key = jax.random.PRNGKey(0)
    ks = jax.random.split(key, 16)

    # Small shapes consistent with the Generator: z/label are (N, C, 1, 1)
    # latent / one-hot style maps; spatial upsampling 1 -> 4 -> 8 -> 16 -> 32.
    N, latent_dim, n_classes, base_width, input_ch = 2, 16, 10, 16, 3

    def w_init(k, cin, cout):
        return 0.1 * jax.random.normal(k, (cin, cout, 4, 4), jnp.float32)

    params = {
        "wz1": w_init(ks[0], latent_dim, base_width * 2),
        "gz1": 1.0 + 0.1 * jax.random.normal(ks[1], (base_width * 2,), jnp.float32),
        "bz1": 0.1 * jax.random.normal(ks[2], (base_width * 2,), jnp.float32),
        "wy1": w_init(ks[3], n_classes, base_width * 2),
        "gy1": 1.0 + 0.1 * jax.random.normal(ks[4], (base_width * 2,), jnp.float32),
        "by1": 0.1 * jax.random.normal(ks[5], (base_width * 2,), jnp.float32),
        "w2": w_init(ks[6], base_width * 4, base_width * 2),
        "g2": 1.0 + 0.1 * jax.random.normal(ks[7], (base_width * 2,), jnp.float32),
        "b2": 0.1 * jax.random.normal(ks[8], (base_width * 2,), jnp.float32),
        "w3": w_init(ks[9], base_width * 2, base_width),
        "g3": 1.0 + 0.1 * jax.random.normal(ks[10], (base_width,), jnp.float32),
        "b3": 0.1 * jax.random.normal(ks[11], (base_width,), jnp.float32),
        "w4": w_init(ks[12], base_width, input_ch),
    }
    z = jax.random.normal(ks[13], (N, latent_dim, 1, 1), jnp.float32)
    label = jax.random.normal(ks[14], (N, n_classes, 1, 1), jnp.float32)

    gen = jax.jit(generator_forward)
    out = jax.block_until_ready(gen(z, label, params))
    assert out.shape == (N, input_ch, 32, 32), out.shape

    ref = _ref_generator(z, label, params)
    err = float(jnp.max(jnp.abs(out - ref)))
    assert err < 1e-1, err
    print("KERNEL_OK")
</pallas_src>

<mosaic_0001>
module attributes {stable_mosaic.version = 11 : i64} {
  func.func @_first_blocks_kernel(%arg0: i32, %arg1: memref<2x128xbf16, #tpu.memory_space<vmem>>, %arg2: memref<2x128xbf16, #tpu.memory_space<vmem>>, %arg3: memref<128x2048xbf16, #tpu.memory_space<vmem>>, %arg4: memref<128x2048xbf16, #tpu.memory_space<vmem>>, %arg5: memref<1x128xf32, #tpu.memory_space<vmem>>, %arg6: memref<1x128xf32, #tpu.memory_space<vmem>>, %arg7: memref<1x128xf32, #tpu.memory_space<vmem>>, %arg8: memref<1x128xf32, #tpu.memory_space<vmem>>, %arg9: memref<2x4x4x256xbf16, #tpu.memory_space<vmem>>) attributes {dimension_semantics = [#tpu.dimension_semantics<arbitrary>], iteration_bounds = array<i64: 1>, scalar_prefetch = 0 : i64, scratch_operands = 0 : i64, tpu.core_type = #tpu.core_type<tc>, window_params = [{pipeline_mode = #tpu.pipeline_mode<synchronous>, transform_indices = @transform_0, window_bounds = array<i64: 2, 128>}, {pipeline_mode = #tpu.pipeline_mode<synchronous>, transform_indices = @transform_1, window_bounds = array<i64: 2, 128>}, {pipeline_mode = #tpu.pipeline_mode<synchronous>, transform_indices = @transform_2, window_bounds = array<i64: 128, 2048>}, {pipeline_mode = #tpu.pipeline_mode<synchronous>, transform_indices = @transform_3, window_bounds = array<i64: 128, 2048>}, {pipeline_mode = #tpu.pipeline_mode<synchronous>, transform_indices = @transform_4, window_bounds = array<i64: 1, 128>}, {pipeline_mode = #tpu.pipeline_mode<synchronous>, transform_indices = @transform_5, window_bounds = array<i64: 1, 128>}, {pipeline_mode = #tpu.pipeline_mode<synchronous>, transform_indices = @transform_6, window_bounds = array<i64: 1, 128>}, {pipeline_mode = #tpu.pipeline_mode<synchronous>, transform_indices = @transform_7, window_bounds = array<i64: 1, 128>}, {pipeline_mode = #tpu.pipeline_mode<synchronous>, transform_indices = @transform_8, window_bounds = array<i64: 2, 4, 4, 256>}]} {
    %c0 = arith.constant 0 : index
    %c0_0 = arith.constant 0 : index
    %0 = vector.load %arg1[%c0, %c0_0] : memref<2x128xbf16, #tpu.memory_space<vmem>>, vector<2x128xbf16>
    %c0_1 = arith.constant 0 : index
    %c0_2 = arith.constant 0 : index
    %1 = vector.load %arg3[%c0_1, %c0_2] : memref<128x2048xbf16, #tpu.memory_space<vmem>>, vector<128x2048xbf16>
    %cst = arith.constant dense<0.000000e+00> : vector<2x2048xf32>
    %2 = tpu.matmul %0, %1, %cst {dimension_numbers = #tpu.dot_dimension_numbers<[1], [0], [0], [1], [0, 0, 1, 1], [], []>} : vector<2x128xbf16>, vector<128x2048xbf16>, vector<2x2048xf32> -> vector<2x2048xf32>
    %3 = vector.shape_cast %2 : vector<2x2048xf32> to vector<32x128xf32>
    %cst_3 = arith.constant dense<0.000000e+00> : vector<128xf32>
    %4 = vector.multi_reduction <add>, %3, %cst_3 [0] : vector<32x128xf32> to vector<128xf32>
    %5 = vector.shape_cast %4 : vector<128xf32> to vector<1x128xf32>
    %cst_4 = arith.constant 3.200000e+01 : f32
    %6 = vector.broadcast %cst_4 : f32 to vector<1x128xf32>
    %7 = arith.divf %5, %6 : vector<1x128xf32>
    %8 = vector.broadcast %7 : vector<1x128xf32> to vector<32x128xf32>
    %9 = arith.subf %3, %8 : vector<32x128xf32>
    %10 = arith.mulf %9, %9 : vector<32x128xf32>
    %cst_5 = arith.constant dense<0.000000e+00> : vector<128xf32>
    %11 = vector.multi_reduction <add>, %10, %cst_5 [0] : vector<32x128xf32> to vector<128xf32>
    %12 = vector.shape_cast %11 : vector<128xf32> to vector<1x128xf32>
    %cst_6 = arith.constant 3.200000e+01 : f32
    %13 = vector.broadcast %cst_6 : f32 to vector<1x128xf32>
    %14 = arith.divf %12, %13 : vector<1x128xf32>
    %15 = vector.broadcast %7 : vector<1x128xf32> to vector<32x128xf32>
    %16 = arith.subf %3, %15 : vector<32x128xf32>
    %cst_7 = arith.constant 9.99999974E-6 : f32
    %17 = vector.broadcast %cst_7 : f32 to vector<1x128xf32>
    %18 = arith.addf %14, %17 : vector<1x128xf32>
    %19 = math.rsqrt %18 : vector<1x128xf32>
    %20 = vector.broadcast %19 : vector<1x128xf32> to vector<32x128xf32>
    %21 = arith.mulf %16, %20 : vector<32x128xf32>
    %c0_8 = arith.constant 0 : index
    %c0_9 = arith.constant 0 : index
    %22 = vector.load %arg5[%c0_8, %c0_9] : memref<1x128xf32, #tpu.memory_space<vmem>>, vector<1x128xf32>
    %23 = vector.broadcast %22 : vector<1x128xf32> to vector<32x128xf32>
    %24 = arith.mulf %21, %23 : vector<32x128xf32>
    %c0_10 = arith.constant 0 : index
    %c0_11 = arith.constant 0 : index
    %25 = vector.load %arg6[%c0_10, %c0_11] : memref<1x128xf32, #tpu.memory_space<vmem>>, vector<1x128xf32>
    %26 = vector.broadcast %25 : vector<1x128xf32> to vector<32x128xf32>
    %27 = arith.addf %24, %26 : vector<32x128xf32>
    %cst_12 = arith.constant 0.000000e+00 : f32
    %28 = vector.broadcast %cst_12 : f32 to vector<32x128xf32>
    %29 = arith.maximumf %27, %28 : vector<32x128xf32>
    %30 = vector.shape_cast %29 : vector<32x128xf32> to vector<2x4x4x128xf32>
    %c0_13 = arith.constant 0 : index
    %c0_14 = arith.constant 0 : index
    %31 = vector.load %arg2[%c0_13, %c0_14] : memref<2x128xbf16, #tpu.memory_space<vmem>>, vector<2x128xbf16>
    %c0_15 = arith.constant 0 : index
    %c0_16 = arith.constant 0 : index
    %32 = vector.load %arg4[%c0_15, %c0_16] : memref<128x2048xbf16, #tpu.memory_space<vmem>>, vector<128x2048xbf16>
    %cst_17 = arith.constant dense<0.000000e+00> : vector<2x2048xf32>
    %33 = tpu.matmul %31, %32, %cst_17 {dimension_numbers = #tpu.dot_dimension_numbers<[1], [0], [0], [1], [0, 0, 1, 1], [], []>} : vector<2x128xbf16>, vector<128x2048xbf16>, vector<2x2048xf32> -> vector<2x2048xf32>
    %34 = vector.shape_cast %33 : vector<2x2048xf32> to vector<32x128xf32>
    %cst_18 = arith.constant dense<0.000000e+00> : vector<128xf32>
    %35 = vector.multi_reduction <add>, %34, %cst_18 [0] : vector<32x128xf32> to vector<128xf32>
    %36 = vector.shape_cast %35 : vector<128xf32> to vector<1x128xf32>
    %cst_19 = arith.constant 3.200000e+01 : f32
    %37 = vector.broadcast %cst_19 : f32 to vector<1x128xf32>
    %38 = arith.divf %36, %37 : vector<1x128xf32>
    %39 = vector.broadcast %38 : vector<1x128xf32> to vector<32x128xf32>
    %40 = arith.subf %34, %39 : vector<32x128xf32>
    %41 = arith.mulf %40, %40 : vector<32x128xf32>
    %cst_20 = arith.constant dense<0.000000e+00> : vector<128xf32>
    %42 = vector.multi_reduction <add>, %41, %cst_20 [0] : vector<32x128xf32> to vector<128xf32>
    %43 = vector.shape_cast %42 : vector<128xf32> to vector<1x128xf32>
    %cst_21 = arith.constant 3.200000e+01 : f32
    %44 = vector.broadcast %cst_21 : f32 to vector<1x128xf32>
    %45 = arith.divf %43, %44 : vector<1x128xf32>
    %46 = vector.broadcast %38 : vector<1x128xf32> to vector<32x128xf32>
    %47 = arith.subf %34, %46 : vector<32x128xf32>
    %cst_22 = arith.constant 9.99999974E-6 : f32
    %48 = vector.broadcast %cst_22 : f32 to vector<1x128xf32>
    %49 = arith.addf %45, %48 : vector<1x128xf32>
    %50 = math.rsqrt %49 : vector<1x128xf32>
    %51 = vector.broadcast %50 : vector<1x128xf32> to vector<32x128xf32>
    %52 = arith.mulf %47, %51 : vector<32x128xf32>
    %c0_23 = arith.constant 0 : index
    %c0_24 = arith.constant 0 : index
    %53 = vector.load %arg7[%c0_23, %c0_24] : memref<1x128xf32, #tpu.memory_space<vmem>>, vector<1x128xf32>
    %54 = vector.broadcast %53 : vector<1x128xf32> to vector<32x128xf32>
    %55 = arith.mulf %52, %54 : vector<32x128xf32>
    %c0_25 = arith.constant 0 : index
    %c0_26 = arith.constant 0 : index
    %56 = vector.load %arg8[%c0_25, %c0_26] : memref<1x128xf32, #tpu.memory_space<vmem>>, vector<1x128xf32>
    %57 = vector.broadcast %56 : vector<1x128xf32> to vector<32x128xf32>
    %58 = arith.addf %55, %57 : vector<32x128xf32>
    %cst_27 = arith.constant 0.000000e+00 : f32
    %59 = vector.broadcast %cst_27 : f32 to vector<32x128xf32>
    %60 = arith.maximumf %58, %59 : vector<32x128xf32>
    %61 = vector.shape_cast %60 : vector<32x128xf32> to vector<2x4x4x128xf32>
    %62 = tpu.concatenate %30, %61 in 3 : vector<2x4x4x128xf32>, vector<2x4x4x128xf32> -> vector<2x4x4x256xf32>
    %63 = arith.truncf %62 : vector<2x4x4x256xf32> to vector<2x4x4x256xbf16>
    %c0_28 = arith.constant 0 : index
    %c0_29 = arith.constant 0 : index
    %c0_30 = arith.constant 0 : index
    %c0_31 = arith.constant 0 : index
    %64 = vector.load %arg9[%c0_28, %c0_29, %c0_30, %c0_31] : memref<2x4x4x256xbf16, #tpu.memory_space<vmem>>, vector<2x4x4x256xbf16>
    tpu.vector_store %arg9[%c0_28, %c0_29, %c0_30, %c0_31], %63 {strides = array<i32>} : memref<2x4x4x256xbf16, #tpu.memory_space<vmem>>, vector<2x4x4x256xbf16>,
    return
  }
  func.func @transform_0(%arg0: i32) -> (i32, i32) {
    %c0_i32 = arith.constant 0 : i32
    %c0_i32_0 = arith.constant 0 : i32
    %c0_i32_1 = arith.constant 0 : i32
    return %c0_i32, %c0_i32_0 : i32, i32
  }
  func.func @transform_1(%arg0: i32) -> (i32, i32) {
    %c0_i32 = arith.constant 0 : i32
    %c0_i32_0 = arith.constant 0 : i32
    %c0_i32_1 = arith.constant 0 : i32
    return %c0_i32, %c0_i32_0 : i32, i32
  }
  func.func @transform_2(%arg0: i32) -> (i32, i32) {
    %c0_i32 = arith.constant 0 : i32
    %c0_i32_0 = arith.constant 0 : i32
    %c0_i32_1 = arith.constant 0 : i32
    return %c0_i32, %c0_i32_0 : i32, i32
  }
  func.func @transform_3(%arg0: i32) -> (i32, i32) {
    %c0_i32 = arith.constant 0 : i32
    %c0_i32_0 = arith.constant 0 : i32
    %c0_i32_1 = arith.constant 0 : i32
    return %c0_i32, %c0_i32_0 : i32, i32
  }
  func.func @transform_4(%arg0: i32) -> (i32, i32) {
    %c0_i32 = arith.constant 0 : i32
    %c0_i32_0 = arith.constant 0 : i32
    %c0_i32_1 = arith.constant 0 : i32
    return %c0_i32, %c0_i32_0 : i32, i32
  }
  func.func @transform_5(%arg0: i32) -> (i32, i32) {
    %c0_i32 = arith.constant 0 : i32
    %c0_i32_0 = arith.constant 0 : i32
    %c0_i32_1 = arith.constant 0 : i32
    return %c0_i32, %c0_i32_0 : i32, i32
  }
  func.func @transform_6(%arg0: i32) -> (i32, i32) {
    %c0_i32 = arith.constant 0 : i32
    %c0_i32_0 = arith.constant 0 : i32
    %c0_i32_1 = arith.constant 0 : i32
    return %c0_i32, %c0_i32_0 : i32, i32
  }
  func.func @transform_7(%arg0: i32) -> (i32, i32) {
    %c0_i32 = arith.constant 0 : i32
    %c0_i32_0 = arith.constant 0 : i32
    %c0_i32_1 = arith.constant 0 : i32
    return %c0_i32, %c0_i32_0 : i32, i32
  }
  func.func @transform_8(%arg0: i32) -> (i32, i32, i32, i32) {
    %c0_i32 = arith.constant 0 : i32
    %c0_i32_0 = arith.constant 0 : i32
    %c0_i32_1 = arith.constant 0 : i32
    %c0_i32_2 = arith.constant 0 : i32
    %c0_i32_3 = arith.constant 0 : i32
    return %c0_i32, %c0_i32_0, %c0_i32_1, %c0_i32_2 : i32, i32, i32, i32
  }
}

module attributes {stable_mosaic.version = 11 : i64} {
  func.func @_convt_kernel_mom(%arg0: i32, %arg1: i32, %arg2: memref<1x4x4x256xbf16, #tpu.memory_space<vmem>>, %arg3: memref<1x1x256xf32, #tpu.memory_space<vmem>>, %arg4: memref<1x1x256xf32, #tpu.memory_space<vmem>>, %arg5: memref<1x2x1024x128xbf16, #tpu.memory_space<vmem>>, %arg6: memref<1x4x1x4x256xbf16, #tpu.memory_space<vmem>>, %arg7: memref<1x1x2x128xf32, #tpu.memory_space<vmem>>, %arg8: memref<6x6x256xbf16, #tpu.memory_space<vmem>>) attributes {dimension_semantics = [#tpu.dimension_semantics<parallel>, #tpu.dimension_semantics<parallel>], iteration_bounds = array<i64: 2, 2>, scalar_prefetch = 0 : i64, scratch_operands = 1 : i64, tpu.core_type = #tpu.core_type<tc>, window_params = [{transform_indices = @transform_0, window_bounds = array<i64: 1, 4, 4, 256>}, {pipeline_mode = #tpu.pipeline_mode<synchronous>, transform_indices = @transform_1, window_bounds = array<i64: 1, 1, 256>}, {pipeline_mode = #tpu.pipeline_mode<synchronous>, transform_indices = @transform_2, window_bounds = array<i64: 1, 1, 256>}, {transform_indices = @transform_3, window_bounds = array<i64: 1, 2, 1024, 128>}, {transform_indices = @transform_4, window_bounds = array<i64: 1, 4, 1, 4, 256>}, {transform_indices = @transform_5, window_bounds = array<i64: 1, 1, 2, 128>}]} {
    %cst = arith.constant 0.000000e+00 : bf16
    %0 = vector.broadcast %cst : bf16 to vector<6x6x256xbf16>
    %c0 = arith.constant 0 : index
    %c0_0 = arith.constant 0 : index
    %c0_1 = arith.constant 0 : index
    %1 = vector.load %arg8[%c0, %c0_0, %c0_1] : memref<6x6x256xbf16, #tpu.memory_space<vmem>>, vector<6x6x256xbf16>
    tpu.vector_store %arg8[%c0, %c0_0, %c0_1], %0 {strides = array<i32>} : memref<6x6x256xbf16, #tpu.memory_space<vmem>>, vector<6x6x256xbf16>,
    %c0_2 = arith.constant 0 : index
    %c0_3 = arith.constant 0 : index
    %c0_4 = arith.constant 0 : index
    %c0_5 = arith.constant 0 : index
    %2 = vector.load %arg2[%c0_2, %c0_3, %c0_4, %c0_5] : memref<1x4x4x256xbf16, #tpu.memory_space<vmem>>, vector<1x4x4x256xbf16>
    %3 = vector.shape_cast %2 : vector<1x4x4x256xbf16> to vector<4x4x256xbf16>
    %4 = arith.extf %3 : vector<4x4x256xbf16> to vector<4x4x256xf32>
    %c0_6 = arith.constant 0 : index
    %c0_7 = arith.constant 0 : index
    %c0_8 = arith.constant 0 : index
    %5 = vector.load %arg3[%c0_6, %c0_7, %c0_8] : memref<1x1x256xf32, #tpu.memory_space<vmem>>, vector<1x1x256xf32>
    %6 = vector.broadcast %5 : vector<1x1x256xf32> to vector<4x4x256xf32>
    %7 = arith.mulf %4, %6 : vector<4x4x256xf32>
    %c0_9 = arith.constant 0 : index
    %c0_10 = arith.constant 0 : index
    %c0_11 = arith.constant 0 : index
    %8 = vector.load %arg4[%c0_9, %c0_10, %c0_11] : memref<1x1x256xf32, #tpu.memory_space<vmem>>, vector<1x1x256xf32>
    %9 = vector.broadcast %8 : vector<1x1x256xf32> to vector<4x4x256xf32>
    %10 = arith.addf %7, %9 : vector<4x4x256xf32>
    %cst_12 = arith.constant 0.000000e+00 : f32
    %11 = vector.broadcast %cst_12 : f32 to vector<4x4x256xf32>
    %12 = arith.maximumf %10, %11 : vector<4x4x256xf32>
    %13 = arith.truncf %12 : vector<4x4x256xf32> to vector<4x4x256xbf16>
    %c1 = arith.constant 1 : index
    %c1_13 = arith.constant 1 : index
    %c0_14 = arith.constant 0 : index
    %14 = vector.load %arg8[%c1, %c1_13, %c0_14] : memref<6x6x256xbf16, #tpu.memory_space<vmem>>, vector<4x4x256xbf16>
    tpu.vector_store %arg8[%c1, %c1_13, %c0_14], %13 {strides = array<i32>} : memref<6x6x256xbf16, #tpu.memory_space<vmem>>, vector<4x4x256xbf16>,
    %cst_15 = arith.constant 0.000000e+00 : f32
    %15 = vector.broadcast %cst_15 : f32 to vector<16x128xf32>
    %c0_i32 = arith.constant 0 : i32
    %16 = arith.addi %arg0, %c0_i32 : i32
    %17 = arith.index_cast %16 : i32 to index
    %c0_16 = arith.constant 0 : index
    %c0_17 = arith.constant 0 : index
    %18 = vector.load %arg8[%17, %c0_16, %c0_17] : memref<6x6x256xbf16, #tpu.memory_space<vmem>>, vector<4x4x256xbf16>
    %19 = vector.shape_cast %18 : vector<4x4x256xbf16> to vector<16x256xbf16>
    %c0_18 = arith.constant 0 : index
    %c0_19 = arith.constant 0 : index
    %c0_20 = arith.constant 0 : index
    %c0_21 = arith.constant 0 : index
    %20 = vector.load %arg5[%c0_18, %c0_19, %c0_20, %c0_21] : memref<1x2x1024x128xbf16, #tpu.memory_space<vmem>>, vector<1x1x256x128xbf16>
    %21 = vector.shape_cast %20 : vector<1x1x256x128xbf16> to vector<256x128xbf16>
    %cst_22 = arith.constant dense<0.000000e+00> : vector<16x128xf32>
    %22 = tpu.matmul %19, %21, %cst_22 {dimension_numbers = #tpu.dot_dimension_numbers<[1], [0], [0], [1], [0, 0, 1, 1], [], []>} : vector<16x256xbf16>, vector<256x128xbf16>, vector<16x128xf32> -> vector<16x128xf32>
    %23 = arith.addf %15, %22 : vector<16x128xf32>
    %c0_i32_23 = arith.constant 0 : i32
    %24 = arith.addi %arg0, %c0_i32_23 : i32
    %25 = arith.index_cast %24 : i32 to index
    %c1_24 = arith.constant 1 : index
    %c0_25 = arith.constant 0 : index
    %26 = vector.load %arg8[%25, %c1_24, %c0_25] : memref<6x6x256xbf16, #tpu.memory_space<vmem>>, vector<4x4x256xbf16>
    %27 = vector.shape_cast %26 : vector<4x4x256xbf16> to vector<16x256xbf16>
    %c0_26 = arith.constant 0 : index
    %c0_27 = arith.constant 0 : index
    %c256 = arith.constant 256 : index
    %c0_28 = arith.constant 0 : index
    %28 = vector.load %arg5[%c0_26, %c0_27, %c256, %c0_28] : memref<1x2x1024x128xbf16, #tpu.memory_space<vmem>>, vector<1x1x256x128xbf16>
    %29 = vector.shape_cast %28 : vector<1x1x256x128xbf16> to vector<256x128xbf16>
    %cst_29 = arith.constant dense<0.000000e+00> : vector<16x128xf32>
    %30 = tpu.matmul %27, %29, %cst_29 {dimension_numbers = #tpu.dot_dimension_numbers<[1], [0], [0], [1], [0, 0, 1, 1], [], []>} : vector<16x256xbf16>, vector<256x128xbf16>, vector<16x128xf32> -> vector<16x128xf32>
    %31 = arith.addf %23, %30 : vector<16x128xf32>
    %c1_i32 = arith.constant 1 : i32
    %32 = arith.addi %arg0, %c1_i32 : i32
    %33 = arith.index_cast %32 : i32 to index
    %c0_30 = arith.constant 0 : index
    %c0_31 = arith.constant 0 : index
    %34 = vector.load %arg8[%33, %c0_30, %c0_31] : memref<6x6x256xbf16, #tpu.memory_space<vmem>>, vector<4x4x256xbf16>
    %35 = vector.shape_cast %34 : vector<4x4x256xbf16> to vector<16x256xbf16>
    %c0_32 = arith.constant 0 : index
    %c0_33 = arith.constant 0 : index
    %c512 = arith.constant 512 : index
    %c0_34 = arith.constant 0 : index
    %36 = vector.load %arg5[%c0_32, %c0_33, %c512, %c0_34] : memref<1x2x1024x128xbf16, #tpu.memory_space<vmem>>, vector<1x1x256x128xbf16>
    %37 = vector.shape_cast %36 : vector<1x1x256x128xbf16> to vector<256x128xbf16>
    %cst_35 = arith.constant dense<0.000000e+00> : vector<16x128xf32>
    %38 = tpu.matmul %35, %37, %cst_35 {dimension_numbers = #tpu.dot_dimension_numbers<[1], [0], [0], [1], [0, 0, 1, 1], [], []>} : vector<16x256xbf16>, vector<256x128xbf16>, vector<16x128xf32> -> vector<16x128xf32>
    %39 = arith.addf %31, %38 : vector<16x128xf32>
    %c1_i32_36 = arith.constant 1 : i32
    %40 = arith.addi %arg0, %c1_i32_36 : i32
    %41 = arith.index_cast %40 : i32 to index
    %c1_37 = arith.constant 1 : index
    %c0_38 = arith.constant 0 : index
    %42 = vector.load %arg8[%41, %c1_37, %c0_38] : memref<6x6x256xbf16, #tpu.memory_space<vmem>>, vector<4x4x256xbf16>
    %43 = vector.shape_cast %42 : vector<4x4x256xbf16> to vector<16x256xbf16>
    %c0_39 = arith.constant 0 : index
    %c0_40 = arith.constant 0 : index
    %c768 = arith.constant 768 : index
    %c0_41 = arith.constant 0 : index
    %44 = vector.load %arg5[%c0_39, %c0_40, %c768, %c0_41] : memref<1x2x1024x128xbf16, #tpu.memory_space<vmem>>, vector<1x1x256x128xbf16>
    %45 = vector.shape_cast %44 : vector<1x1x256x128xbf16> to vector<256x128xbf16>
    %cst_42 = arith.constant dense<0.000000e+00> : vector<16x128xf32>
    %46 = tpu.matmul %43, %45, %cst_42 {dimension_numbers = #tpu.dot_dimension_numbers<[1], [0], [0], [1], [0, 0, 1, 1], [], []>} : vector<16x256xbf16>, vector<256x128xbf16>, vector<16x128xf32> -> vector<16x128xf32>
    %47 = arith.addf %39, %46 : vector<16x128xf32>
    %cst_43 = arith.constant dense<0.000000e+00> : vector<128xf32>
    %48 = vector.multi_reduction <add>, %47, %cst_43 [0] : vector<16x128xf32> to vector<128xf32>
    %49 = vector.shape_cast %48 : vector<128xf32> to vector<1x128xf32>
    %50 = arith.mulf %47, %47 : vector<16x128xf32>
    %cst_44 = arith.constant dense<0.000000e+00> : vector<128xf32>
    %51 = vector.multi_reduction <add>, %50, %cst_44 [0] : vector<16x128xf32> to vector<128xf32>
    %52 = vector.shape_cast %51 : vector<128xf32> to vector<1x128xf32>
    %53 = tpu.concatenate %49, %52 in 0 : vector<1x128xf32>, vector<1x128xf32> -> vector<2x128xf32>
    %54 = vector.shape_cast %47 : vector<16x128xf32> to vector<4x4x128xf32>
    %cst_45 = arith.constant 0.000000e+00 : f32
    %55 = vector.broadcast %cst_45 : f32 to vector<16x128xf32>
    %c0_i32_46 = arith.constant 0 : i32
    %56 = arith.addi %arg0, %c0_i32_46 : i32
    %57 = arith.index_cast %56 : i32 to index
    %c1_47 = arith.constant 1 : index
    %c0_48 = arith.constant 0 : index
    %58 = vector.load %arg8[%57, %c1_47, %c0_48] : memref<6x6x256xbf16, #tpu.memory_space<vmem>>, vector<4x4x256xbf16>
    %59 = vector.shape_cast %58 : vector<4x4x256xbf16> to vector<16x256xbf16>
    %c0_49 = arith.constant 0 : index
    %c1_50 = arith.constant 1 : index
    %c0_51 = arith.constant 0 : index
    %c0_52 = arith.constant 0 : index
    %60 = vector.load %arg5[%c0_49, %c1_50, %c0_51, %c0_52] : memref<1x2x1024x128xbf16, #tpu.memory_space<vmem>>, vector<1x1x256x128xbf16>
    %61 = vector.shape_cast %60 : vector<1x1x256x128xbf16> to vector<256x128xbf16>
    %cst_53 = arith.constant dense<0.000000e+00> : vector<16x128xf32>
    %62 = tpu.matmul %59, %61, %cst_53 {dimension_numbers = #tpu.dot_dimension_numbers<[1], [0], [0], [1], [0, 0, 1, 1], [], []>} : vector<16x256xbf16>, vector<256x128xbf16>, vector<16x128xf32> -> vector<16x128xf32>
    %63 = arith.addf %55, %62 : vector<16x128xf32>
    %c0_i32_54 = arith.constant 0 : i32
    %64 = arith.addi %arg0, %c0_i32_54 : i32
    %65 = arith.index_cast %64 : i32 to index
    %c2 = arith.constant 2 : index
    %c0_55 = arith.constant 0 : index
    %66 = vector.load %arg8[%65, %c2, %c0_55] : memref<6x6x256xbf16, #tpu.memory_space<vmem>>, vector<4x4x256xbf16>
    %67 = vector.shape_cast %66 : vector<4x4x256xbf16> to vector<16x256xbf16>
    %c0_56 = arith.constant 0 : index
    %c1_57 = arith.constant 1 : index
    %c256_58 = arith.constant 256 : index
    %c0_59 = arith.constant 0 : index
    %68 = vector.load %arg5[%c0_56, %c1_57, %c256_58, %c0_59] : memref<1x2x1024x128xbf16, #tpu.memory_space<vmem>>, vector<1x1x256x128xbf16>
    %69 = vector.shape_cast %68 : vector<1x1x256x128xbf16> to vector<256x128xbf16>
    %cst_60 = arith.constant dense<0.000000e+00> : vector<16x128xf32>
    %70 = tpu.matmul %67, %69, %cst_60 {dimension_numbers = #tpu.dot_dimension_numbers<[1], [0], [0], [1], [0, 0, 1, 1], [], []>} : vector<16x256xbf16>, vector<256x128xbf16>, vector<16x128xf32> -> vector<16x128xf32>
    %71 = arith.addf %63, %70 : vector<16x128xf32>
    %c1_i32_61 = arith.constant 1 : i32
    %72 = arith.addi %arg0, %c1_i32_61 : i32
    %73 = arith.index_cast %72 : i32 to index
    %c1_62 = arith.constant 1 : index
    %c0_63 = arith.constant 0 : index
    %74 = vector.load %arg8[%73, %c1_62, %c0_63] : memref<6x6x256xbf16, #tpu.memory_space<vmem>>, vector<4x4x256xbf16>
    %75 = vector.shape_cast %74 : vector<4x4x256xbf16> to vector<16x256xbf16>
    %c0_64 = arith.constant 0 : index
    %c1_65 = arith.constant 1 : index
    %c512_66 = arith.constant 512 : index
    %c0_67 = arith.constant 0 : index
    %76 = vector.load %arg5[%c0_64, %c1_65, %c512_66, %c0_67] : memref<1x2x1024x128xbf16, #tpu.memory_space<vmem>>, vector<1x1x256x128xbf16>
    %77 = vector.shape_cast %76 : vector<1x1x256x128xbf16> to vector<256x128xbf16>
    %cst_68 = arith.constant dense<0.000000e+00> : vector<16x128xf32>
    %78 = tpu.matmul %75, %77, %cst_68 {dimension_numbers = #tpu.dot_dimension_numbers<[1], [0], [0], [1], [0, 0, 1, 1], [], []>} : vector<16x256xbf16>, vector<256x128xbf16>, vector<16x128xf32> -> vector<16x128xf32>
    %79 = arith.addf %71, %78 : vector<16x128xf32>
    %c1_i32_69 = arith.constant 1 : i32
    %80 = arith.addi %arg0, %c1_i32_69 : i32
    %81 = arith.index_cast %80 : i32 to index
    %c2_70 = arith.constant 2 : index
    %c0_71 = arith.constant 0 : index
    %82 = vector.load %arg8[%81, %c2_70, %c0_71] : memref<6x6x256xbf16, #tpu.memory_space<vmem>>, vector<4x4x256xbf16>
    %83 = vector.shape_cast %82 : vector<4x4x256xbf16> to vector<16x256xbf16>
    %c0_72 = arith.constant 0 : index
    %c1_73 = arith.constant 1 : index
    %c768_74 = arith.constant 768 : index
    %c0_75 = arith.constant 0 : index
    %84 = vector.load %arg5[%c0_72, %c1_73, %c768_74, %c0_75] : memref<1x2x1024x128xbf16, #tpu.memory_space<vmem>>, vector<1x1x256x128xbf16>
    %85 = vector.shape_cast %84 : vector<1x1x256x128xbf16> to vector<256x128xbf16>
    %cst_76 = arith.constant dense<0.000000e+00> : vector<16x128xf32>
    %86 = tpu.matmul %83, %85, %cst_76 {dimension_numbers = #tpu.dot_dimension_numbers<[1], [0], [0], [1], [0, 0, 1, 1], [], []>} : vector<16x256xbf16>, vector<256x128xbf16>, vector<16x128xf32> -> vector<16x128xf32>
    %87 = arith.addf %79, %86 : vector<16x128xf32>
    %cst_77 = arith.constant dense<0.000000e+00> : vector<128xf32>
    %88 = vector.multi_reduction <add>, %87, %cst_77 [0] : vector<16x128xf32> to vector<128xf32>
    %89 = vector.shape_cast %88 : vector<128xf32> to vector<1x128xf32>
    %90 = arith.mulf %87, %87 : vector<16x128xf32>
    %cst_78 = arith.constant dense<0.000000e+00> : vector<128xf32>
    %91 = vector.multi_reduction <add>, %90, %cst_78 [0] : vector<16x128xf32> to vector<128xf32>
    %92 = vector.shape_cast %91 : vector<128xf32> to vector<1x128xf32>
    %93 = tpu.concatenate %89, %92 in 0 : vector<1x128xf32>, vector<1x128xf32> -> vector<2x128xf32>
    %94 = arith.addf %53, %93 : vector<2x128xf32>
    %95 = vector.shape_cast %87 : vector<16x128xf32> to vector<4x4x128xf32>
    %96 = tpu.concatenate %54, %95 in 2 : vector<4x4x128xf32>, vector<4x4x128xf32> -> vector<4x4x256xf32>
    %97 = arith.truncf %96 : vector<4x4x256xf32> to vector<4x4x256xbf16>
    %c0_79 = arith.constant 0 : index
    %c0_80 = arith.constant 0 : index
    %c0_81 = arith.constant 0 : index
    %c0_82 = arith.constant 0 : index
    %c0_83 = arith.constant 0 : index
    %98 = vector.load %arg6[%c0_79, %c0_80, %c0_81, %c0_82, %c0_83] : memref<1x4x1x4x256xbf16, #tpu.memory_space<vmem>>, vector<1x4x1x4x256xbf16>
    %99 = vector.shape_cast %98 : vector<1x4x1x4x256xbf16> to vector<4x4x256xbf16>
    %100 = vector.shape_cast %97 : vector<4x4x256xbf16> to vector<1x4x1x4x256xbf16>
    tpu.vector_store %arg6[%c0_79, %c0_80, %c0_81, %c0_82, %c0_83], %100 {strides = array<i32>} : memref<1x4x1x4x256xbf16, #tpu.memory_space<vmem>>, vector<1x4x1x4x256xbf16>,
    %c0_84 = arith.constant 0 : index
    %c0_85 = arith.constant 0 : index
    %c0_86 = arith.constant 0 : index
    %c0_87 = arith.constant 0 : index
    %101 = vector.load %arg7[%c0_84, %c0_85, %c0_86, %c0_87] : memref<1x1x2x128xf32, #tpu.memory_space<vmem>>, vector<1x1x2x128xf32>
    %102 = vector.shape_cast %101 : vector<1x1x2x128xf32> to vector<2x128xf32>
    %103 = vector.shape_cast %94 : vector<2x128xf32> to vector<1x1x2x128xf32>
    tpu.vector_store %arg7[%c0_84, %c0_85, %c0_86, %c0_87], %103 {strides = array<i32>} : memref<1x1x2x128xf32, #tpu.memory_space<vmem>>, vector<1x1x2x128xf32>,
    return
  }
  func.func @transform_0(%arg0: i32, %arg1: i32) -> (i32, i32, i32, i32) {
    %c0_i32 = arith.constant 0 : i32
    %c0_i32_0 = arith.constant 0 : i32
    %c0_i32_1 = arith.constant 0 : i32
    %c0_i32_2 = arith.constant 0 : i32
    return %arg1, %c0_i32, %c0_i32_0, %c0_i32_1 : i32, i32, i32, i32
  }
  func.func @transform_1(%arg0: i32, %arg1: i32) -> (i32, i32, i32) {
    %c0_i32 = arith.constant 0 : i32
    %c0_i32_0 = arith.constant 0 : i32
    %c0_i32_1 = arith.constant 0 : i32
    %c0_i32_2 = arith.constant 0 : i32
    return %c0_i32, %c0_i32_0, %c0_i32_1 : i32, i32, i32
  }
  func.func @transform_2(%arg0: i32, %arg1: i32) -> (i32, i32, i32) {
    %c0_i32 = arith.constant 0 : i32
    %c0_i32_0 = arith.constant 0 : i32
    %c0_i32_1 = arith.constant 0 : i32
    %c0_i32_2 = arith.constant 0 : i32
    return %c0_i32, %c0_i32_0, %c0_i32_1 : i32, i32, i32
  }
  func.func @transform_3(%arg0: i32, %arg1: i32) -> (i32, i32, i32, i32) {
    %c0_i32 = arith.constant 0 : i32
    %c0_i32_0 = arith.constant 0 : i32
    %c0_i32_1 = arith.constant 0 : i32
    %c0_i32_2 = arith.constant 0 : i32
    return %arg0, %c0_i32, %c0_i32_0, %c0_i32_1 : i32, i32, i32, i32
  }
  func.func @transform_4(%arg0: i32, %arg1: i32) -> (i32, i32, i32, i32, i32) {
    %c0_i32 = arith.constant 0 : i32
    %c0_i32_0 = arith.constant 0 : i32
    %c0_i32_1 = arith.constant 0 : i32
    %c0_i32_2 = arith.constant 0 : i32
    return %arg1, %c0_i32, %arg0, %c0_i32_0, %c0_i32_1 : i32, i32, i32, i32, i32
  }
  func.func @transform_5(%arg0: i32, %arg1: i32) -> (i32, i32, i32, i32) {
    %c0_i32 = arith.constant 0 : i32
    %c0_i32_0 = arith.constant 0 : i32
    %c0_i32_1 = arith.constant 0 : i32
    return %arg0, %arg1, %c0_i32, %c0_i32_0 : i32, i32, i32, i32
  }
}

module attributes {stable_mosaic.version = 11 : i64} {
  func.func @_convt_kernel_mom(%arg0: i32, %arg1: i32, %arg2: memref<1x8x8x128xbf16, #tpu.memory_space<vmem>>, %arg3: memref<1x1x128xf32, #tpu.memory_space<vmem>>, %arg4: memref<1x1x128xf32, #tpu.memory_space<vmem>>, %arg5: memref<1x2x512x128xbf16, #tpu.memory_space<vmem>>, %arg6: memref<1x8x1x8x256xbf16, #tpu.memory_space<vmem>>, %arg7: memref<1x1x2x128xf32, #tpu.memory_space<vmem>>, %arg8: memref<10x10x128xbf16, #tpu.memory_space<vmem>>) attributes {dimension_semantics = [#tpu.dimension_semantics<parallel>, #tpu.dimension_semantics<parallel>], iteration_bounds = array<i64: 2, 2>, scalar_prefetch = 0 : i64, scratch_operands = 1 : i64, tpu.core_type = #tpu.core_type<tc>, window_params = [{transform_indices = @transform_0, window_bounds = array<i64: 1, 8, 8, 128>}, {pipeline_mode = #tpu.pipeline_mode<synchronous>, transform_indices = @transform_1, window_bounds = array<i64: 1, 1, 128>}, {pipeline_mode = #tpu.pipeline_mode<synchronous>, transform_indices = @transform_2, window_bounds = array<i64: 1, 1, 128>}, {transform_indices = @transform_3, window_bounds = array<i64: 1, 2, 512, 128>}, {transform_indices = @transform_4, window_bounds = array<i64: 1, 8, 1, 8, 256>}, {transform_indices = @transform_5, window_bounds = array<i64: 1, 1, 2, 128>}]} {
    %cst = arith.constant 0.000000e+00 : bf16
    %0 = vector.broadcast %cst : bf16 to vector<10x10x128xbf16>
    %c0 = arith.constant 0 : index
    %c0_0 = arith.constant 0 : index
    %c0_1 = arith.constant 0 : index
    %1 = vector.load %arg8[%c0, %c0_0, %c0_1] : memref<10x10x128xbf16, #tpu.memory_space<vmem>>, vector<10x10x128xbf16>
    tpu.vector_store %arg8[%c0, %c0_0, %c0_1], %0 {strides = array<i32>} : memref<10x10x128xbf16, #tpu.memory_space<vmem>>, vector<10x10x128xbf16>,
    %c0_2 = arith.constant 0 : index
    %c0_3 = arith.constant 0 : index
    %c0_4 = arith.constant 0 : index
    %c0_5 = arith.constant 0 : index
    %2 = vector.load %arg2[%c0_2, %c0_3, %c0_4, %c0_5] : memref<1x8x8x128xbf16, #tpu.memory_space<vmem>>, vector<1x8x8x128xbf16>
    %3 = vector.shape_cast %2 : vector<1x8x8x128xbf16> to vector<8x8x128xbf16>
    %4 = arith.extf %3 : vector<8x8x128xbf16> to vector<8x8x128xf32>
    %c0_6 = arith.constant 0 : index
    %c0_7 = arith.constant 0 : index
    %c0_8 = arith.constant 0 : index
    %5 = vector.load %arg3[%c0_6, %c0_7, %c0_8] : memref<1x1x128xf32, #tpu.memory_space<vmem>>, vector<1x1x128xf32>
    %6 = vector.broadcast %5 : vector<1x1x128xf32> to vector<8x8x128xf32>
    %7 = arith.mulf %4, %6 : vector<8x8x128xf32>
    %c0_9 = arith.constant 0 : index
    %c0_10 = arith.constant 0 : index
    %c0_11 = arith.constant 0 : index
    %8 = vector.load %arg4[%c0_9, %c0_10, %c0_11] : memref<1x1x128xf32, #tpu.memory_space<vmem>>, vector<1x1x128xf32>
    %9 = vector.broadcast %8 : vector<1x1x128xf32> to vector<8x8x128xf32>
    %10 = arith.addf %7, %9 : vector<8x8x128xf32>
    %cst_12 = arith.constant 0.000000e+00 : f32
    %11 = vector.broadcast %cst_12 : f32 to vector<8x8x128xf32>
    %12 = arith.maximumf %10, %11 : vector<8x8x128xf32>
    %13 = arith.truncf %12 : vector<8x8x128xf32> to vector<8x8x128xbf16>
    %c1 = arith.constant 1 : index
    %c1_13 = arith.constant 1 : index
    %c0_14 = arith.constant 0 : index
    %14 = vector.load %arg8[%c1, %c1_13, %c0_14] : memref<10x10x128xbf16, #tpu.memory_space<vmem>>, vector<8x8x128xbf16>
    tpu.vector_store %arg8[%c1, %c1_13, %c0_14], %13 {strides = array<i32>} : memref<10x10x128xbf16, #tpu.memory_space<vmem>>, vector<8x8x128xbf16>,
    %cst_15 = arith.constant 0.000000e+00 : f32
    %15 = vector.broadcast %cst_15 : f32 to vector<64x128xf32>
    %c0_i32 = arith.constant 0 : i32
    %16 = arith.addi %arg0, %c0_i32 : i32
    %17 = arith.index_cast %16 : i32 to index
    %c0_16 = arith.constant 0 : index
    %c0_17 = arith.constant 0 : index
    %18 = vector.load %arg8[%17, %c0_16, %c0_17] : memref<10x10x128xbf16, #tpu.memory_space<vmem>>, vector<8x8x128xbf16>
    %19 = vector.shape_cast %18 : vector<8x8x128xbf16> to vector<64x128xbf16>
    %c0_18 = arith.constant 0 : index
    %c0_19 = arith.constant 0 : index
    %c0_20 = arith.constant 0 : index
    %c0_21 = arith.constant 0 : index
    %20 = vector.load %arg5[%c0_18, %c0_19, %c0_20, %c0_21] : memref<1x2x512x128xbf16, #tpu.memory_space<vmem>>, vector<1x1x128x128xbf16>
    %21 = vector.shape_cast %20 : vector<1x1x128x128xbf16> to vector<128x128xbf16>
    %cst_22 = arith.constant dense<0.000000e+00> : vector<64x128xf32>
    %22 = tpu.matmul %19, %21, %cst_22 {dimension_numbers = #tpu.dot_dimension_numbers<[1], [0], [0], [1], [0, 0, 1, 1], [], []>} : vector<64x128xbf16>, vector<128x128xbf16>, vector<64x128xf32> -> vector<64x128xf32>
    %23 = arith.addf %15, %22 : vector<64x128xf32>
    %c0_i32_23 = arith.constant 0 : i32
    %24 = arith.addi %arg0, %c0_i32_23 : i32
    %25 = arith.index_cast %24 : i32 to index
    %c1_24 = arith.constant 1 : index
    %c0_25 = arith.constant 0 : index
    %26 = vector.load %arg8[%25, %c1_24, %c0_25] : memref<10x10x128xbf16, #tpu.memory_space<vmem>>, vector<8x8x128xbf16>
    %27 = vector.shape_cast %26 : vector<8x8x128xbf16> to vector<64x128xbf16>
    %c0_26 = arith.constant 0 : index
    %c0_27 = arith.constant 0 : index
    %c128 = arith.constant 128 : index
    %c0_28 = arith.constant 0 : index
    %28 = vector.load %arg5[%c0_26, %c0_27, %c128, %c0_28] : memref<1x2x512x128xbf16, #tpu.memory_space<vmem>>, vector<1x1x128x128xbf16>
    %29 = vector.shape_cast %28 : vector<1x1x128x128xbf16> to vector<128x128xbf16>
    %cst_29 = arith.constant dense<0.000000e+00> : vector<64x128xf32>
    %30 = tpu.matmul %27, %29, %cst_29 {dimension_numbers = #tpu.dot_dimension_numbers<[1], [0], [0], [1], [0, 0, 1, 1], [], []>} : vector<64x128xbf16>, vector<128x128xbf16>, vector<64x128xf32> -> vector<64x128xf32>
    %31 = arith.addf %23, %30 : vector<64x128xf32>
    %c1_i32 = arith.constant 1 : i32
    %32 = arith.addi %arg0, %c1_i32 : i32
    %33 = arith.index_cast %32 : i32 to index
    %c0_30 = arith.constant 0 : index
    %c0_31 = arith.constant 0 : index
    %34 = vector.load %arg8[%33, %c0_30, %c0_31] : memref<10x10x128xbf16, #tpu.memory_space<vmem>>, vector<8x8x128xbf16>
    %35 = vector.shape_cast %34 : vector<8x8x128xbf16> to vector<64x128xbf16>
    %c0_32 = arith.constant 0 : index
    %c0_33 = arith.constant 0 : index
    %c256 = arith.constant 256 : index
    %c0_34 = arith.constant 0 : index
    %36 = vector.load %arg5[%c0_32, %c0_33, %c256, %c0_34] : memref<1x2x512x128xbf16, #tpu.memory_space<vmem>>, vector<1x1x128x128xbf16>
    %37 = vector.shape_cast %36 : vector<1x1x128x128xbf16> to vector<128x128xbf16>
    %cst_35 = arith.constant dense<0.000000e+00> : vector<64x128xf32>
    %38 = tpu.matmul %35, %37, %cst_35 {dimension_numbers = #tpu.dot_dimension_numbers<[1], [0], [0], [1], [0, 0, 1, 1], [], []>} : vector<64x128xbf16>, vector<128x128xbf16>, vector<64x128xf32> -> vector<64x128xf32>
    %39 = arith.addf %31, %38 : vector<64x128xf32>
    %c1_i32_36 = arith.constant 1 : i32
    %40 = arith.addi %arg0, %c1_i32_36 : i32
    %41 = arith.index_cast %40 : i32 to index
    %c1_37 = arith.constant 1 : index
    %c0_38 = arith.constant 0 : index
    %42 = vector.load %arg8[%41, %c1_37, %c0_38] : memref<10x10x128xbf16, #tpu.memory_space<vmem>>, vector<8x8x128xbf16>
    %43 = vector.shape_cast %42 : vector<8x8x128xbf16> to vector<64x128xbf16>
    %c0_39 = arith.constant 0 : index
    %c0_40 = arith.constant 0 : index
    %c384 = arith.constant 384 : index
    %c0_41 = arith.constant 0 : index
    %44 = vector.load %arg5[%c0_39, %c0_40, %c384, %c0_41] : memref<1x2x512x128xbf16, #tpu.memory_space<vmem>>, vector<1x1x128x128xbf16>
    %45 = vector.shape_cast %44 : vector<1x1x128x128xbf16> to vector<128x128xbf16>
    %cst_42 = arith.constant dense<0.000000e+00> : vector<64x128xf32>
    %46 = tpu.matmul %43, %45, %cst_42 {dimension_numbers = #tpu.dot_dimension_numbers<[1], [0], [0], [1], [0, 0, 1, 1], [], []>} : vector<64x128xbf16>, vector<128x128xbf16>, vector<64x128xf32> -> vector<64x128xf32>
    %47 = arith.addf %39, %46 : vector<64x128xf32>
    %cst_43 = arith.constant dense<0.000000e+00> : vector<128xf32>
    %48 = vector.multi_reduction <add>, %47, %cst_43 [0] : vector<64x128xf32> to vector<128xf32>
    %49 = vector.shape_cast %48 : vector<128xf32> to vector<1x128xf32>
    %50 = arith.mulf %47, %47 : vector<64x128xf32>
    %cst_44 = arith.constant dense<0.000000e+00> : vector<128xf32>
    %51 = vector.multi_reduction <add>, %50, %cst_44 [0] : vector<64x128xf32> to vector<128xf32>
    %52 = vector.shape_cast %51 : vector<128xf32> to vector<1x128xf32>
    %53 = tpu.concatenate %49, %52 in 0 : vector<1x128xf32>, vector<1x128xf32> -> vector<2x128xf32>
    %54 = vector.shape_cast %47 : vector<64x128xf32> to vector<8x8x128xf32>
    %cst_45 = arith.constant 0.000000e+00 : f32
    %55 = vector.broadcast %cst_45 : f32 to vector<64x128xf32>
    %c0_i32_46 = arith.constant 0 : i32
    %56 = arith.addi %arg0, %c0_i32_46 : i32
    %57 = arith.index_cast %56 : i32 to index
    %c1_47 = arith.constant 1 : index
    %c0_48 = arith.constant 0 : index
    %58 = vector.load %arg8[%57, %c1_47, %c0_48] : memref<10x10x128xbf16, #tpu.memory_space<vmem>>, vector<8x8x128xbf16>
    %59 = vector.shape_cast %58 : vector<8x8x128xbf16> to vector<64x128xbf16>
    %c0_49 = arith.constant 0 : index
    %c1_50 = arith.constant 1 : index
    %c0_51 = arith.constant 0 : index
    %c0_52 = arith.constant 0 : index
    %60 = vector.load %arg5[%c0_49, %c1_50, %c0_51, %c0_52] : memref<1x2x512x128xbf16, #tpu.memory_space<vmem>>, vector<1x1x128x128xbf16>
    %61 = vector.shape_cast %60 : vector<1x1x128x128xbf16> to vector<128x128xbf16>
    %cst_53 = arith.constant dense<0.000000e+00> : vector<64x128xf32>
    %62 = tpu.matmul %59, %61, %cst_53 {dimension_numbers = #tpu.dot_dimension_numbers<[1], [0], [0], [1], [0, 0, 1, 1], [], []>} : vector<64x128xbf16>, vector<128x128xbf16>, vector<64x128xf32> -> vector<64x128xf32>
    %63 = arith.addf %55, %62 : vector<64x128xf32>
    %c0_i32_54 = arith.constant 0 : i32
    %64 = arith.addi %arg0, %c0_i32_54 : i32
    %65 = arith.index_cast %64 : i32 to index
    %c2 = arith.constant 2 : index
    %c0_55 = arith.constant 0 : index
    %66 = vector.load %arg8[%65, %c2, %c0_55] : memref<10x10x128xbf16, #tpu.memory_space<vmem>>, vector<8x8x128xbf16>
    %67 = vector.shape_cast %66 : vector<8x8x128xbf16> to vector<64x128xbf16>
    %c0_56 = arith.constant 0 : index
    %c1_57 = arith.constant 1 : index
    %c128_58 = arith.constant 128 : index
    %c0_59 = arith.constant 0 : index
    %68 = vector.load %arg5[%c0_56, %c1_57, %c128_58, %c0_59] : memref<1x2x512x128xbf16, #tpu.memory_space<vmem>>, vector<1x1x128x128xbf16>
    %69 = vector.shape_cast %68 : vector<1x1x128x128xbf16> to vector<128x128xbf16>
    %cst_60 = arith.constant dense<0.000000e+00> : vector<64x128xf32>
    %70 = tpu.matmul %67, %69, %cst_60 {dimension_numbers = #tpu.dot_dimension_numbers<[1], [0], [0], [1], [0, 0, 1, 1], [], []>} : vector<64x128xbf16>, vector<128x128xbf16>, vector<64x128xf32> -> vector<64x128xf32>
    %71 = arith.addf %63, %70 : vector<64x128xf32>
    %c1_i32_61 = arith.constant 1 : i32
    %72 = arith.addi %arg0, %c1_i32_61 : i32
    %73 = arith.index_cast %72 : i32 to index
    %c1_62 = arith.constant 1 : index
    %c0_63 = arith.constant 0 : index
    %74 = vector.load %arg8[%73, %c1_62, %c0_63] : memref<10x10x128xbf16, #tpu.memory_space<vmem>>, vector<8x8x128xbf16>
    %75 = vector.shape_cast %74 : vector<8x8x128xbf16> to vector<64x128xbf16>
    %c0_64 = arith.constant 0 : index
    %c1_65 = arith.constant 1 : index
    %c256_66 = arith.constant 256 : index
    %c0_67 = arith.constant 0 : index
    %76 = vector.load %arg5[%c0_64, %c1_65, %c256_66, %c0_67] : memref<1x2x512x128xbf16, #tpu.memory_space<vmem>>, vector<1x1x128x128xbf16>
    %77 = vector.shape_cast %76 : vector<1x1x128x128xbf16> to vector<128x128xbf16>
    %cst_68 = arith.constant dense<0.000000e+00> : vector<64x128xf32>
    %78 = tpu.matmul %75, %77, %cst_68 {dimension_numbers = #tpu.dot_dimension_numbers<[1], [0], [0], [1], [0, 0, 1, 1], [], []>} : vector<64x128xbf16>, vector<128x128xbf16>, vector<64x128xf32> -> vector<64x128xf32>
    %79 = arith.addf %71, %78 : vector<64x128xf32>
    %c1_i32_69 = arith.constant 1 : i32
    %80 = arith.addi %arg0, %c1_i32_69 : i32
    %81 = arith.index_cast %80 : i32 to index
    %c2_70 = arith.constant 2 : index
    %c0_71 = arith.constant 0 : index
    %82 = vector.load %arg8[%81, %c2_70, %c0_71] : memref<10x10x128xbf16, #tpu.memory_space<vmem>>, vector<8x8x128xbf16>
    %83 = vector.shape_cast %82 : vector<8x8x128xbf16> to vector<64x128xbf16>
    %c0_72 = arith.constant 0 : index
    %c1_73 = arith.constant 1 : index
    %c384_74 = arith.constant 384 : index
    %c0_75 = arith.constant 0 : index
    %84 = vector.load %arg5[%c0_72, %c1_73, %c384_74, %c0_75] : memref<1x2x512x128xbf16, #tpu.memory_space<vmem>>, vector<1x1x128x128xbf16>
    %85 = vector.shape_cast %84 : vector<1x1x128x128xbf16> to vector<128x128xbf16>
    %cst_76 = arith.constant dense<0.000000e+00> : vector<64x128xf32>
    %86 = tpu.matmul %83, %85, %cst_76 {dimension_numbers = #tpu.dot_dimension_numbers<[1], [0], [0], [1], [0, 0, 1, 1], [], []>} : vector<64x128xbf16>, vector<128x128xbf16>, vector<64x128xf32> -> vector<64x128xf32>
    %87 = arith.addf %79, %86 : vector<64x128xf32>
    %cst_77 = arith.constant dense<0.000000e+00> : vector<128xf32>
    %88 = vector.multi_reduction <add>, %87, %cst_77 [0] : vector<64x128xf32> to vector<128xf32>
    %89 = vector.shape_cast %88 : vector<128xf32> to vector<1x128xf32>
    %90 = arith.mulf %87, %87 : vector<64x128xf32>
    %cst_78 = arith.constant dense<0.000000e+00> : vector<128xf32>
    %91 = vector.multi_reduction <add>, %90, %cst_78 [0] : vector<64x128xf32> to vector<128xf32>
    %92 = vector.shape_cast %91 : vector<128xf32> to vector<1x128xf32>
    %93 = tpu.concatenate %89, %92 in 0 : vector<1x128xf32>, vector<1x128xf32> -> vector<2x128xf32>
    %94 = arith.addf %53, %93 : vector<2x128xf32>
    %95 = vector.shape_cast %87 : vector<64x128xf32> to vector<8x8x128xf32>
    %96 = tpu.concatenate %54, %95 in 2 : vector<8x8x128xf32>, vector<8x8x128xf32> -> vector<8x8x256xf32>
    %97 = arith.truncf %96 : vector<8x8x256xf32> to vector<8x8x256xbf16>
    %c0_79 = arith.constant 0 : index
    %c0_80 = arith.constant 0 : index
    %c0_81 = arith.constant 0 : index
    %c0_82 = arith.constant 0 : index
    %c0_83 = arith.constant 0 : index
    %98 = vector.load %arg6[%c0_79, %c0_80, %c0_81, %c0_82, %c0_83] : memref<1x8x1x8x256xbf16, #tpu.memory_space<vmem>>, vector<1x8x1x8x256xbf16>
    %99 = vector.shape_cast %98 : vector<1x8x1x8x256xbf16> to vector<8x8x256xbf16>
    %100 = vector.shape_cast %97 : vector<8x8x256xbf16> to vector<1x8x1x8x256xbf16>
    tpu.vector_store %arg6[%c0_79, %c0_80, %c0_81, %c0_82, %c0_83], %100 {strides = array<i32>} : memref<1x8x1x8x256xbf16, #tpu.memory_space<vmem>>, vector<1x8x1x8x256xbf16>,
    %c0_84 = arith.constant 0 : index
    %c0_85 = arith.constant 0 : index
    %c0_86 = arith.constant 0 : index
    %c0_87 = arith.constant 0 : index
    %101 = vector.load %arg7[%c0_84, %c0_85, %c0_86, %c0_87] : memref<1x1x2x128xf32, #tpu.memory_space<vmem>>, vector<1x1x2x128xf32>
    %102 = vector.shape_cast %101 : vector<1x1x2x128xf32> to vector<2x128xf32>
    %103 = vector.shape_cast %94 : vector<2x128xf32> to vector<1x1x2x128xf32>
    tpu.vector_store %arg7[%c0_84, %c0_85, %c0_86, %c0_87], %103 {strides = array<i32>} : memref<1x1x2x128xf32, #tpu.memory_space<vmem>>, vector<1x1x2x128xf32>,
    return
  }
  func.func @transform_0(%arg0: i32, %arg1: i32) -> (i32, i32, i32, i32) {
    %c0_i32 = arith.constant 0 : i32
    %c0_i32_0 = arith.constant 0 : i32
    %c0_i32_1 = arith.constant 0 : i32
    %c0_i32_2 = arith.constant 0 : i32
    return %arg1, %c0_i32, %c0_i32_0, %c0_i32_1 : i32, i32, i32, i32
  }
  func.func @transform_1(%arg0: i32, %arg1: i32) -> (i32, i32, i32) {
    %c0_i32 = arith.constant 0 : i32
    %c0_i32_0 = arith.constant 0 : i32
    %c0_i32_1 = arith.constant 0 : i32
    %c0_i32_2 = arith.constant 0 : i32
    return %c0_i32, %c0_i32_0, %c0_i32_1 : i32, i32, i32
  }
  func.func @transform_2(%arg0: i32, %arg1: i32) -> (i32, i32, i32) {
    %c0_i32 = arith.constant 0 : i32
    %c0_i32_0 = arith.constant 0 : i32
    %c0_i32_1 = arith.constant 0 : i32
    %c0_i32_2 = arith.constant 0 : i32
    return %c0_i32, %c0_i32_0, %c0_i32_1 : i32, i32, i32
  }
  func.func @transform_3(%arg0: i32, %arg1: i32) -> (i32, i32, i32, i32) {
    %c0_i32 = arith.constant 0 : i32
    %c0_i32_0 = arith.constant 0 : i32
    %c0_i32_1 = arith.constant 0 : i32
    %c0_i32_2 = arith.constant 0 : i32
    return %arg0, %c0_i32, %c0_i32_0, %c0_i32_1 : i32, i32, i32, i32
  }
  func.func @transform_4(%arg0: i32, %arg1: i32) -> (i32, i32, i32, i32, i32) {
    %c0_i32 = arith.constant 0 : i32
    %c0_i32_0 = arith.constant 0 : i32
    %c0_i32_1 = arith.constant 0 : i32
    %c0_i32_2 = arith.constant 0 : i32
    return %arg1, %c0_i32, %arg0, %c0_i32_0, %c0_i32_1 : i32, i32, i32, i32, i32
  }
  func.func @transform_5(%arg0: i32, %arg1: i32) -> (i32, i32, i32, i32) {
    %c0_i32 = arith.constant 0 : i32
    %c0_i32_0 = arith.constant 0 : i32
    %c0_i32_1 = arith.constant 0 : i32
    return %arg0, %arg1, %c0_i32, %c0_i32_0 : i32, i32, i32, i32
  }
}

module attributes {stable_mosaic.version = 11 : i64} {
  func.func @_convt_kernel_nomom(%arg0: i32, %arg1: i32, %arg2: memref<1x16x16x128xbf16, #tpu.memory_space<vmem>>, %arg3: memref<1x1x128xf32, #tpu.memory_space<vmem>>, %arg4: memref<1x1x128xf32, #tpu.memory_space<vmem>>, %arg5: memref<1x2x512x128xbf16, #tpu.memory_space<vmem>>, %arg6: memref<1x16x1x16x256xbf16, #tpu.memory_space<vmem>>, %arg7: memref<18x18x128xbf16, #tpu.memory_space<vmem>>) attributes {dimension_semantics = [#tpu.dimension_semantics<parallel>, #tpu.dimension_semantics<parallel>], iteration_bounds = array<i64: 2, 2>, scalar_prefetch = 0 : i64, scratch_operands = 1 : i64, tpu.core_type = #tpu.core_type<tc>, window_params = [{transform_indices = @transform_0, window_bounds = array<i64: 1, 16, 16, 128>}, {pipeline_mode = #tpu.pipeline_mode<synchronous>, transform_indices = @transform_1, window_bounds = array<i64: 1, 1, 128>}, {pipeline_mode = #tpu.pipeline_mode<synchronous>, transform_indices = @transform_2, window_bounds = array<i64: 1, 1, 128>}, {transform_indices = @transform_3, window_bounds = array<i64: 1, 2, 512, 128>}, {transform_indices = @transform_4, window_bounds = array<i64: 1, 16, 1, 16, 256>}]} {
    %cst = arith.constant 0.000000e+00 : bf16
    %0 = vector.broadcast %cst : bf16 to vector<18x18x128xbf16>
    %c0 = arith.constant 0 : index
    %c0_0 = arith.constant 0 : index
    %c0_1 = arith.constant 0 : index
    %1 = vector.load %arg7[%c0, %c0_0, %c0_1] : memref<18x18x128xbf16, #tpu.memory_space<vmem>>, vector<18x18x128xbf16>
    tpu.vector_store %arg7[%c0, %c0_0, %c0_1], %0 {strides = array<i32>} : memref<18x18x128xbf16, #tpu.memory_space<vmem>>, vector<18x18x128xbf16>,
    %c0_2 = arith.constant 0 : index
    %c0_3 = arith.constant 0 : index
    %c0_4 = arith.constant 0 : index
    %c0_5 = arith.constant 0 : index
    %2 = vector.load %arg2[%c0_2, %c0_3, %c0_4, %c0_5] : memref<1x16x16x128xbf16, #tpu.memory_space<vmem>>, vector<1x16x16x128xbf16>
    %3 = vector.shape_cast %2 : vector<1x16x16x128xbf16> to vector<16x16x128xbf16>
    %4 = arith.extf %3 : vector<16x16x128xbf16> to vector<16x16x128xf32>
    %c0_6 = arith.constant 0 : index
    %c0_7 = arith.constant 0 : index
    %c0_8 = arith.constant 0 : index
    %5 = vector.load %arg3[%c0_6, %c0_7, %c0_8] : memref<1x1x128xf32, #tpu.memory_space<vmem>>, vector<1x1x128xf32>
    %6 = vector.broadcast %5 : vector<1x1x128xf32> to vector<16x16x128xf32>
    %7 = arith.mulf %4, %6 : vector<16x16x128xf32>
    %c0_9 = arith.constant 0 : index
    %c0_10 = arith.constant 0 : index
    %c0_11 = arith.constant 0 : index
    %8 = vector.load %arg4[%c0_9, %c0_10, %c0_11] : memref<1x1x128xf32, #tpu.memory_space<vmem>>, vector<1x1x128xf32>
    %9 = vector.broadcast %8 : vector<1x1x128xf32> to vector<16x16x128xf32>
    %10 = arith.addf %7, %9 : vector<16x16x128xf32>
    %cst_12 = arith.constant 0.000000e+00 : f32
    %11 = vector.broadcast %cst_12 : f32 to vector<16x16x128xf32>
    %12 = arith.maximumf %10, %11 : vector<16x16x128xf32>
    %13 = arith.truncf %12 : vector<16x16x128xf32> to vector<16x16x128xbf16>
    %c1 = arith.constant 1 : index
    %c1_13 = arith.constant 1 : index
    %c0_14 = arith.constant 0 : index
    %14 = vector.load %arg7[%c1, %c1_13, %c0_14] : memref<18x18x128xbf16, #tpu.memory_space<vmem>>, vector<16x16x128xbf16>
    tpu.vector_store %arg7[%c1, %c1_13, %c0_14], %13 {strides = array<i32>} : memref<18x18x128xbf16, #tpu.memory_space<vmem>>, vector<16x16x128xbf16>,
    %cst_15 = arith.constant 0.000000e+00 : f32
    %15 = vector.broadcast %cst_15 : f32 to vector<256x128xf32>
    %c0_i32 = arith.constant 0 : i32
    %16 = arith.addi %arg0, %c0_i32 : i32
    %17 = arith.index_cast %16 : i32 to index
    %c0_16 = arith.constant 0 : index
    %c0_17 = arith.constant 0 : index
    %18 = vector.load %arg7[%17, %c0_16, %c0_17] : memref<18x18x128xbf16, #tpu.memory_space<vmem>>, vector<16x16x128xbf16>
    %19 = vector.shape_cast %18 : vector<16x16x128xbf16> to vector<256x128xbf16>
    %c0_18 = arith.constant 0 : index
    %c0_19 = arith.constant 0 : index
    %c0_20 = arith.constant 0 : index
    %c0_21 = arith.constant 0 : index
    %20 = vector.load %arg5[%c0_18, %c0_19, %c0_20, %c0_21] : memref<1x2x512x128xbf16, #tpu.memory_space<vmem>>, vector<1x1x128x128xbf16>
    %21 = vector.shape_cast %20 : vector<1x1x128x128xbf16> to vector<128x128xbf16>
    %cst_22 = arith.constant dense<0.000000e+00> : vector<256x128xf32>
    %22 = tpu.matmul %19, %21, %cst_22 {dimension_numbers = #tpu.dot_dimension_numbers<[1], [0], [0], [1], [0, 0, 1, 1], [], []>} : vector<256x128xbf16>, vector<128x128xbf16>, vector<256x128xf32> -> vector<256x128xf32>
    %23 = arith.addf %15, %22 : vector<256x128xf32>
    %c0_i32_23 = arith.constant 0 : i32
    %24 = arith.addi %arg0, %c0_i32_23 : i32
    %25 = arith.index_cast %24 : i32 to index
    %c1_24 = arith.constant 1 : index
    %c0_25 = arith.constant 0 : index
    %26 = vector.load %arg7[%25, %c1_24, %c0_25] : memref<18x18x128xbf16, #tpu.memory_space<vmem>>, vector<16x16x128xbf16>
    %27 = vector.shape_cast %26 : vector<16x16x128xbf16> to vector<256x128xbf16>
    %c0_26 = arith.constant 0 : index
    %c0_27 = arith.constant 0 : index
    %c128 = arith.constant 128 : index
    %c0_28 = arith.constant 0 : index
    %28 = vector.load %arg5[%c0_26, %c0_27, %c128, %c0_28] : memref<1x2x512x128xbf16, #tpu.memory_space<vmem>>, vector<1x1x128x128xbf16>
    %29 = vector.shape_cast %28 : vector<1x1x128x128xbf16> to vector<128x128xbf16>
    %cst_29 = arith.constant dense<0.000000e+00> : vector<256x128xf32>
    %30 = tpu.matmul %27, %29, %cst_29 {dimension_numbers = #tpu.dot_dimension_numbers<[1], [0], [0], [1], [0, 0, 1, 1], [], []>} : vector<256x128xbf16>, vector<128x128xbf16>, vector<256x128xf32> -> vector<256x128xf32>
    %31 = arith.addf %23, %30 : vector<256x128xf32>
    %c1_i32 = arith.constant 1 : i32
    %32 = arith.addi %arg0, %c1_i32 : i32
    %33 = arith.index_cast %32 : i32 to index
    %c0_30 = arith.constant 0 : index
    %c0_31 = arith.constant 0 : index
    %34 = vector.load %arg7[%33, %c0_30, %c0_31] : memref<18x18x128xbf16, #tpu.memory_space<vmem>>, vector<16x16x128xbf16>
    %35 = vector.shape_cast %34 : vector<16x16x128xbf16> to vector<256x128xbf16>
    %c0_32 = arith.constant 0 : index
    %c0_33 = arith.constant 0 : index
    %c256 = arith.constant 256 : index
    %c0_34 = arith.constant 0 : index
    %36 = vector.load %arg5[%c0_32, %c0_33, %c256, %c0_34] : memref<1x2x512x128xbf16, #tpu.memory_space<vmem>>, vector<1x1x128x128xbf16>
    %37 = vector.shape_cast %36 : vector<1x1x128x128xbf16> to vector<128x128xbf16>
    %cst_35 = arith.constant dense<0.000000e+00> : vector<256x128xf32>
    %38 = tpu.matmul %35, %37, %cst_35 {dimension_numbers = #tpu.dot_dimension_numbers<[1], [0], [0], [1], [0, 0, 1, 1], [], []>} : vector<256x128xbf16>, vector<128x128xbf16>, vector<256x128xf32> -> vector<256x128xf32>
    %39 = arith.addf %31, %38 : vector<256x128xf32>
    %c1_i32_36 = arith.constant 1 : i32
    %40 = arith.addi %arg0, %c1_i32_36 : i32
    %41 = arith.index_cast %40 : i32 to index
    %c1_37 = arith.constant 1 : index
    %c0_38 = arith.constant 0 : index
    %42 = vector.load %arg7[%41, %c1_37, %c0_38] : memref<18x18x128xbf16, #tpu.memory_space<vmem>>, vector<16x16x128xbf16>
    %43 = vector.shape_cast %42 : vector<16x16x128xbf16> to vector<256x128xbf16>
    %c0_39 = arith.constant 0 : index
    %c0_40 = arith.constant 0 : index
    %c384 = arith.constant 384 : index
    %c0_41 = arith.constant 0 : index
    %44 = vector.load %arg5[%c0_39, %c0_40, %c384, %c0_41] : memref<1x2x512x128xbf16, #tpu.memory_space<vmem>>, vector<1x1x128x128xbf16>
    %45 = vector.shape_cast %44 : vector<1x1x128x128xbf16> to vector<128x128xbf16>
    %cst_42 = arith.constant dense<0.000000e+00> : vector<256x128xf32>
    %46 = tpu.matmul %43, %45, %cst_42 {dimension_numbers = #tpu.dot_dimension_numbers<[1], [0], [0], [1], [0, 0, 1, 1], [], []>} : vector<256x128xbf16>, vector<128x128xbf16>, vector<256x128xf32> -> vector<256x128xf32>
    %47 = arith.addf %39, %46 : vector<256x128xf32>
    %48 = math.tanh %47 : vector<256x128xf32>
    %49 = vector.shape_cast %48 : vector<256x128xf32> to vector<16x16x128xf32>
    %cst_43 = arith.constant 0.000000e+00 : f32
    %50 = vector.broadcast %cst_43 : f32 to vector<256x128xf32>
    %c0_i32_44 = arith.constant 0 : i32
    %51 = arith.addi %arg0, %c0_i32_44 : i32
    %52 = arith.index_cast %51 : i32 to index
    %c1_45 = arith.constant 1 : index
    %c0_46 = arith.constant 0 : index
    %53 = vector.load %arg7[%52, %c1_45, %c0_46] : memref<18x18x128xbf16, #tpu.memory_space<vmem>>, vector<16x16x128xbf16>
    %54 = vector.shape_cast %53 : vector<16x16x128xbf16> to vector<256x128xbf16>
    %c0_47 = arith.constant 0 : index
    %c1_48 = arith.constant 1 : index
    %c0_49 = arith.constant 0 : index
    %c0_50 = arith.constant 0 : index
    %55 = vector.load %arg5[%c0_47, %c1_48, %c0_49, %c0_50] : memref<1x2x512x128xbf16, #tpu.memory_space<vmem>>, vector<1x1x128x128xbf16>
    %56 = vector.shape_cast %55 : vector<1x1x128x128xbf16> to vector<128x128xbf16>
    %cst_51 = arith.constant dense<0.000000e+00> : vector<256x128xf32>
    %57 = tpu.matmul %54, %56, %cst_51 {dimension_numbers = #tpu.dot_dimension_numbers<[1], [0], [0], [1], [0, 0, 1, 1], [], []>} : vector<256x128xbf16>, vector<128x128xbf16>, vector<256x128xf32> -> vector<256x128xf32>
    %58 = arith.addf %50, %57 : vector<256x128xf32>
    %c0_i32_52 = arith.constant 0 : i32
    %59 = arith.addi %arg0, %c0_i32_52 : i32
    %60 = arith.index_cast %59 : i32 to index
    %c2 = arith.constant 2 : index
    %c0_53 = arith.constant 0 : index
    %61 = vector.load %arg7[%60, %c2, %c0_53] : memref<18x18x128xbf16, #tpu.memory_space<vmem>>, vector<16x16x128xbf16>
    %62 = vector.shape_cast %61 : vector<16x16x128xbf16> to vector<256x128xbf16>
    %c0_54 = arith.constant 0 : index
    %c1_55 = arith.constant 1 : index
    %c128_56 = arith.constant 128 : index
    %c0_57 = arith.constant 0 : index
    %63 = vector.load %arg5[%c0_54, %c1_55, %c128_56, %c0_57] : memref<1x2x512x128xbf16, #tpu.memory_space<vmem>>, vector<1x1x128x128xbf16>
    %64 = vector.shape_cast %63 : vector<1x1x128x128xbf16> to vector<128x128xbf16>
    %cst_58 = arith.constant dense<0.000000e+00> : vector<256x128xf32>
    %65 = tpu.matmul %62, %64, %cst_58 {dimension_numbers = #tpu.dot_dimension_numbers<[1], [0], [0], [1], [0, 0, 1, 1], [], []>} : vector<256x128xbf16>, vector<128x128xbf16>, vector<256x128xf32> -> vector<256x128xf32>
    %66 = arith.addf %58, %65 : vector<256x128xf32>
    %c1_i32_59 = arith.constant 1 : i32
    %67 = arith.addi %arg0, %c1_i32_59 : i32
    %68 = arith.index_cast %67 : i32 to index
    %c1_60 = arith.constant 1 : index
    %c0_61 = arith.constant 0 : index
    %69 = vector.load %arg7[%68, %c1_60, %c0_61] : memref<18x18x128xbf16, #tpu.memory_space<vmem>>, vector<16x16x128xbf16>
    %70 = vector.shape_cast %69 : vector<16x16x128xbf16> to vector<256x128xbf16>
    %c0_62 = arith.constant 0 : index
    %c1_63 = arith.constant 1 : index
    %c256_64 = arith.constant 256 : index
    %c0_65 = arith.constant 0 : index
    %71 = vector.load %arg5[%c0_62, %c1_63, %c256_64, %c0_65] : memref<1x2x512x128xbf16, #tpu.memory_space<vmem>>, vector<1x1x128x128xbf16>
    %72 = vector.shape_cast %71 : vector<1x1x128x128xbf16> to vector<128x128xbf16>
    %cst_66 = arith.constant dense<0.000000e+00> : vector<256x128xf32>
    %73 = tpu.matmul %70, %72, %cst_66 {dimension_numbers = #tpu.dot_dimension_numbers<[1], [0], [0], [1], [0, 0, 1, 1], [], []>} : vector<256x128xbf16>, vector<128x128xbf16>, vector<256x128xf32> -> vector<256x128xf32>
    %74 = arith.addf %66, %73 : vector<256x128xf32>
    %c1_i32_67 = arith.constant 1 : i32
    %75 = arith.addi %arg0, %c1_i32_67 : i32
    %76 = arith.index_cast %75 : i32 to index
    %c2_68 = arith.constant 2 : index
    %c0_69 = arith.constant 0 : index
    %77 = vector.load %arg7[%76, %c2_68, %c0_69] : memref<18x18x128xbf16, #tpu.memory_space<vmem>>, vector<16x16x128xbf16>
    %78 = vector.shape_cast %77 : vector<16x16x128xbf16> to vector<256x128xbf16>
    %c0_70 = arith.constant 0 : index
    %c1_71 = arith.constant 1 : index
    %c384_72 = arith.constant 384 : index
    %c0_73 = arith.constant 0 : index
    %79 = vector.load %arg5[%c0_70, %c1_71, %c384_72, %c0_73] : memref<1x2x512x128xbf16, #tpu.memory_space<vmem>>, vector<1x1x128x128xbf16>
    %80 = vector.shape_cast %79 : vector<1x1x128x128xbf16> to vector<128x128xbf16>
    %cst_74 = arith.constant dense<0.000000e+00> : vector<256x128xf32>
    %81 = tpu.matmul %78, %80, %cst_74 {dimension_numbers = #tpu.dot_dimension_numbers<[1], [0], [0], [1], [0, 0, 1, 1], [], []>} : vector<256x128xbf16>, vector<128x128xbf16>, vector<256x128xf32> -> vector<256x128xf32>
    %82 = arith.addf %74, %81 : vector<256x128xf32>
    %83 = math.tanh %82 : vector<256x128xf32>
    %84 = vector.shape_cast %83 : vector<256x128xf32> to vector<16x16x128xf32>
    %85 = tpu.concatenate %49, %84 in 2 : vector<16x16x128xf32>, vector<16x16x128xf32> -> vector<16x16x256xf32>
    %86 = arith.truncf %85 : vector<16x16x256xf32> to vector<16x16x256xbf16>
    %c0_75 = arith.constant 0 : index
    %c0_76 = arith.constant 0 : index
    %c0_77 = arith.constant 0 : index
    %c0_78 = arith.constant 0 : index
    %c0_79 = arith.constant 0 : index
    %87 = vector.load %arg6[%c0_75, %c0_76, %c0_77, %c0_78, %c0_79] : memref<1x16x1x16x256xbf16, #tpu.memory_space<vmem>>, vector<1x16x1x16x256xbf16>
    %88 = vector.shape_cast %87 : vector<1x16x1x16x256xbf16> to vector<16x16x256xbf16>
    %89 = vector.shape_cast %86 : vector<16x16x256xbf16> to vector<1x16x1x16x256xbf16>
    tpu.vector_store %arg6[%c0_75, %c0_76, %c0_77, %c0_78, %c0_79], %89 {strides = array<i32>} : memref<1x16x1x16x256xbf16, #tpu.memory_space<vmem>>, vector<1x16x1x16x256xbf16>,
    return
  }
  func.func @transform_0(%arg0: i32, %arg1: i32) -> (i32, i32, i32, i32) {
    %c0_i32 = arith.constant 0 : i32
    %c0_i32_0 = arith.constant 0 : i32
    %c0_i32_1 = arith.constant 0 : i32
    %c0_i32_2 = arith.constant 0 : i32
    return %arg1, %c0_i32, %c0_i32_0, %c0_i32_1 : i32, i32, i32, i32
  }
  func.func @transform_1(%arg0: i32, %arg1: i32) -> (i32, i32, i32) {
    %c0_i32 = arith.constant 0 : i32
    %c0_i32_0 = arith.constant 0 : i32
    %c0_i32_1 = arith.constant 0 : i32
    %c0_i32_2 = arith.constant 0 : i32
    return %c0_i32, %c0_i32_0, %c0_i32_1 : i32, i32, i32
  }
  func.func @transform_2(%arg0: i32, %arg1: i32) -> (i32, i32, i32) {
    %c0_i32 = arith.constant 0 : i32
    %c0_i32_0 = arith.constant 0 : i32
    %c0_i32_1 = arith.constant 0 : i32
    %c0_i32_2 = arith.constant 0 : i32
    return %c0_i32, %c0_i32_0, %c0_i32_1 : i32, i32, i32
  }
  func.func @transform_3(%arg0: i32, %arg1: i32) -> (i32, i32, i32, i32) {
    %c0_i32 = arith.constant 0 : i32
    %c0_i32_0 = arith.constant 0 : i32
    %c0_i32_1 = arith.constant 0 : i32
    %c0_i32_2 = arith.constant 0 : i32
    return %arg0, %c0_i32, %c0_i32_0, %c0_i32_1 : i32, i32, i32, i32
  }
  func.func @transform_4(%arg0: i32, %arg1: i32) -> (i32, i32, i32, i32, i32) {
    %c0_i32 = arith.constant 0 : i32
    %c0_i32_0 = arith.constant 0 : i32
    %c0_i32_1 = arith.constant 0 : i32
    %c0_i32_2 = arith.constant 0 : i32
    return %arg1, %c0_i32, %arg0, %c0_i32_0, %c0_i32_1 : i32, i32, i32, i32, i32
  }
}

</mosaic_0001>

<bundles_post_ra>
// kernel: generator_forward.4
= control target key start
LH: loop header
LB: loop body
LE: loop exit
PB: predicated region body
PF: predicated region fallthrough
CT: control target
= control target key end

     0   :  { %v3071_v3 = vmov 0   ;;  %s4010_s2 = inlined_call_operand.vmem [shape: bf16[128,2048], index: 2, kind: input, shape index: {}]   ;;  %s4011_s0 = inlined_call_operand.vmem [shape: bf16[2,128], index: 0, kind: input, shape index: {}]   ;;  %s4012_s3 = inlined_call_operand.vmem [shape: bf16[128,2048], index: 3, kind: input, shape index: {}]   ;;  %s4013_s1 = inlined_call_operand.vmem [shape: bf16[2,128], index: 1, kind: input, shape index: {}]   ;;  %s4014_s4 = inlined_call_operand.vmem [shape: f32[1,128], index: 4, kind: input, shape index: {}]   ;;  %s4015_s5 = inlined_call_operand.vmem [shape: f32[1,128], index: 5, kind: input, shape index: {}]   ;;  %s4016_s6 = inlined_call_operand.vmem [shape: f32[1,128], index: 6, kind: input, shape index: {}]   ;;  %s4017_s7 = inlined_call_operand.vmem [shape: f32[1,128], index: 7, kind: input, shape index: {}]   ;;  %s4018_s8 = inlined_call_operand.vmem [shape: bf16[2,4,4,256], index: 8, kind: output, shape index: {}]  }
   0x1   :  { %v31_v0 = vld [vmem:[%s4010_s2] sm:$0xff]  ;;  %v32_v2 = vld [vmem:[%s4010_s2 + $0x8] sm:$0xff]  ;;  %831 = vmatprep.mubr.bf16.mxu0 %v3071_v3  ;;  %872 = vmatprep.mubr.bf16.mxu1 %v3071_v3  ;;  %v33_v63 = vld [vmem:[%s4010_s2 + $0x10] sm:$0xff] }
   0x2   :  { %v39_v1 = vld [vmem:[%s4010_s2 + $0x40] sm:$0xff]  ;;  %v40_v5 = vld [vmem:[%s4010_s2 + $0x48] sm:$0xff] }
   0x3   :  { %v2790_v4 = vcombine.high %v31_v0, %v39_v1  ;;  %v2789_v6 = vcombine.low %v31_v0, %v39_v1  ;;  %v47_v7 = vld [vmem:[%s4010_s2 + $0x80] sm:$0xff]  ;;  %v2792_v9 = vcombine.high %v32_v2, %v40_v5  ;;  %v2791_v10 = vcombine.low %v32_v2, %v40_v5  ;;  %v48_v12 = vld [vmem:[%s4010_s2 + $0x88] sm:$0xff]  ;;  %v41_v0 = vld [vmem:[%s4010_s2 + $0x50] sm:$0xff] }
   0x4   :  { %v55_v8 = vld [vmem:[%s4010_s2 + $0xc0] sm:$0xff]  ;;  %v56_v13 = vld [vmem:[%s4010_s2 + $0xc8] sm:$0xff]  ;;  %v34_v1 = vld [vmem:[%s4010_s2 + $0x18] sm:$0xff] }
   0x5   :  { %v2806_v11 = vcombine.high %v47_v7, %v55_v8  ;;  %v63_v14 = vld [vmem:[%s4010_s2 + $0x100] sm:$0xff]  ;;  %799 = vmatprep.subr.bf16.mxu0 %v2790_v4  ;;  %v2808_v15 = vcombine.high %v48_v12, %v56_v13  ;;  %v64_v17 = vld [vmem:[%s4010_s2 + $0x108] sm:$0xff]  ;;  %840 = vmatprep.subr.bf16.mxu1 %v2792_v9  ;;  %v2805_v19 = vcombine.low %v47_v7, %v55_v8  ;;  %v42_v2 = vld [vmem:[%s4010_s2 + $0x58] sm:$0xff] }
   0x6   :  { %v71_v16 = vld [vmem:[%s4010_s2 + $0x140] sm:$0xff]  ;;  %v72_v18 = vld [vmem:[%s4010_s2 + $0x148] sm:$0xff]  ;;  %800 = vmatpush1.bf16.msra.mxu0 %v2789_v6  ;;  %841 = vmatpush1.bf16.msra.mxu1 %v2791_v10  ;;  %v2807_v20 = vcombine.low %v48_v12, %v56_v13  ;;  %v2794_v6 = vcombine.high %v33_v63, %v41_v0  ;;  %v2796_v7 = vcombine.high %v34_v1, %v42_v2  ;;  %v49_v8 = vld [vmem:[%s4010_s2 + $0x90] sm:$0xff] }
   0x7   :  { %801 = vmatprep.subr.bf16.mxu0 %v2806_v11  ;;  %v2822_v21 = vcombine.high %v63_v14, %v71_v16  ;;  %842 = vmatprep.subr.bf16.mxu1 %v2808_v15  ;;  %v2824_v22 = vcombine.high %v64_v17, %v72_v18  ;;  %v79_v23 = vld [vmem:[%s4010_s2 + $0x180] sm:$0xff]  ;;  %v80_v25 = vld [vmem:[%s4010_s2 + $0x188] sm:$0xff]  ;;  %v2821_v27 = vcombine.low %v63_v14, %v71_v16  ;;  %v57_v9 = vld [vmem:[%s4010_s2 + $0xd0] sm:$0xff] }
   0x8   :  { %v87_v24 = vld [vmem:[%s4010_s2 + $0x1c0] sm:$0xff]  ;;  %v88_v26 = vld [vmem:[%s4010_s2 + $0x1c8] sm:$0xff]  ;;  %v2823_v28 = vcombine.low %v64_v17, %v72_v18  ;;  %v50_v10 = vld [vmem:[%s4010_s2 + $0x98] sm:$0xff]  ;;  %v2793_v13 = vcombine.low %v33_v63, %v41_v0  ;;  %v2795_v14 = vcombine.low %v34_v1, %v42_v2  ;;  %v2810_v15 = vcombine.high %v49_v8, %v57_v9 }
   0x9   :  { %v2838_v29 = vcombine.high %v79_v23, %v87_v24  ;;  %v2840_v30 = vcombine.high %v80_v25, %v88_v26  ;;  %v95_v31 = vld [vmem:[%s4010_s2 + $0x200] sm:$0xff]  ;;  %v96_v33 = vld [vmem:[%s4010_s2 + $0x208] sm:$0xff]  ;;  %v2837_v35 = vcombine.low %v79_v23, %v87_v24  ;;  %v2839_v36 = vcombine.low %v80_v25, %v88_v26  ;;  %v58_v11 = vld [vmem:[%s4010_s2 + $0xd8] sm:$0xff] }
   0xa   :  { %802 = vmatpush1.bf16.msra.mxu0 %v2805_v19  ;;  %843 = vmatpush1.bf16.msra.mxu1 %v2807_v20  ;;  %v103_v32 = vld [vmem:[%s4010_s2 + $0x240] sm:$0xff]  ;;  %v104_v34 = vld [vmem:[%s4010_s2 + $0x248] sm:$0xff]  ;;  %v2812_v16 = vcombine.high %v50_v10, %v58_v11  ;;  %v65_v17 = vld [vmem:[%s4010_s2 + $0x110] sm:$0xff] }
   0xb   :  { %803 = vmatprep.subr.bf16.mxu0 %v2822_v21  ;;  %844 = vmatprep.subr.bf16.mxu1 %v2824_v22  ;;  %v2854_v37 = vcombine.high %v95_v31, %v103_v32  ;;  %v2856_v38 = vcombine.high %v96_v33, %v104_v34  ;;  %v111_v39 = vld [vmem:[%s4010_s2 + $0x280] sm:$0xff]  ;;  %v112_v41 = vld [vmem:[%s4010_s2 + $0x288] sm:$0xff]  ;;  %v2853_v43 = vcombine.low %v95_v31, %v103_v32  ;;  %v73_v18 = vld [vmem:[%s4010_s2 + $0x150] sm:$0xff] }
   0xc   :  { %v119_v40 = vld [vmem:[%s4010_s2 + $0x2c0] sm:$0xff]  ;;  %v120_v42 = vld [vmem:[%s4010_s2 + $0x2c8] sm:$0xff]  ;;  %v2855_v44 = vcombine.low %v96_v33, %v104_v34  ;;  %v66_v19 = vld [vmem:[%s4010_s2 + $0x118] sm:$0xff]  ;;  %v2809_v21 = vcombine.low %v49_v8, %v57_v9  ;;  %v2811_v22 = vcombine.low %v50_v10, %v58_v11  ;;  %v2826_v23 = vcombine.high %v65_v17, %v73_v18 }
   0xd   :  { %v2870_v45 = vcombine.high %v111_v39, %v119_v40  ;;  %v2872_v46 = vcombine.high %v112_v41, %v120_v42  ;;  %v127_v47 = vld [vmem:[%s4010_s2 + $0x300] sm:$0xff]  ;;  %v128_v49 = vld [vmem:[%s4010_s2 + $0x308] sm:$0xff]  ;;  %v2869_v51 = vcombine.low %v111_v39, %v119_v40  ;;  %v2871_v52 = vcombine.low %v112_v41, %v120_v42  ;;  %v74_v20 = vld [vmem:[%s4010_s2 + $0x158] sm:$0xff] }
   0xe   :  { %804 = vmatpush1.bf16.msra.mxu0 %v2821_v27  ;;  %845 = vmatpush1.bf16.msra.mxu1 %v2823_v28  ;;  %v135_v48 = vld [vmem:[%s4010_s2 + $0x340] sm:$0xff]  ;;  %v136_v50 = vld [vmem:[%s4010_s2 + $0x348] sm:$0xff]  ;;  %v2828_v24 = vcombine.high %v66_v19, %v74_v20  ;;  %v81_v25 = vld [vmem:[%s4010_s2 + $0x190] sm:$0xff] }
   0xf   :  { %805 = vmatprep.subr.bf16.mxu0 %v2838_v29  ;;  %846 = vmatprep.subr.bf16.mxu1 %v2840_v30  ;;  %v2886_v53 = vcombine.high %v127_v47, %v135_v48  ;;  %v2888_v54 = vcombine.high %v128_v49, %v136_v50  ;;  %v143_v55 = vld [vmem:[%s4010_s2 + $0x380] sm:$0xff]  ;;  %v144_v57 = vld [vmem:[%s4010_s2 + $0x388] sm:$0xff]  ;;  %v2885_v59 = vcombine.low %v127_v47, %v135_v48  ;;  %v89_v26 = vld [vmem:[%s4010_s2 + $0x1d0] sm:$0xff] }
  0x10   :  { %v151_v56 = vld [vmem:[%s4010_s2 + $0x3c0] sm:$0xff]  ;;  %v152_v58 = vld [vmem:[%s4010_s2 + $0x3c8] sm:$0xff]  ;;  %v2887_v60 = vcombine.low %v128_v49, %v136_v50  ;;  %v82_v27 = vld [vmem:[%s4010_s2 + $0x198] sm:$0xff]  ;;  %v2825_v29 = vcombine.low %v65_v17, %v73_v18  ;;  %v2827_v30 = vcombine.low %v66_v19, %v74_v20  ;;  %v2842_v31 = vcombine.high %v81_v25, %v89_v26 }
  0x11   :  { %v2902_v61 = vcombine.high %v143_v55, %v151_v56  ;;  %v2904_v62 = vcombine.high %v144_v57, %v152_v58  ;;  %v2901_v4 = vcombine.low %v143_v55, %v151_v56  ;;  %v2903_v5 = vcombine.low %v144_v57, %v152_v58  ;;  %v3243_v12 = vld [vmem:[%s4011_s0] sm:$0x1]  ;;  %v90_v28 = vld [vmem:[%s4010_s2 + $0x1d8] sm:$0xff]  ;;  %v97_v33 = vld [vmem:[%s4010_s2 + $0x210] sm:$0xff] }
  0x12   :  { %806 = vmatpush1.bf16.msra.mxu0 %v2837_v35  ;;  %847 = vmatpush1.bf16.msra.mxu1 %v2839_v36  ;;  %v2844_v32 = vcombine.high %v82_v27, %v90_v28  ;;  %v105_v34 = vld [vmem:[%s4010_s2 + $0x250] sm:$0xff]  ;;  %v98_v35 = vld [vmem:[%s4010_s2 + $0x218] sm:$0xff]  ;;  %v35_v1 = vld [vmem:[%s4010_s2 + $0x20] sm:$0xff] }
  0x13   :  { %807 = vmatprep.subr.bf16.mxu0 %v2854_v37  ;;  %848 = vmatprep.subr.bf16.mxu1 %v2856_v38  ;;  %v106_v36 = vld [vmem:[%s4010_s2 + $0x258] sm:$0xff]  ;;  %v2841_v37 = vcombine.low %v81_v25, %v89_v26  ;;  %v2843_v38 = vcombine.low %v82_v27, %v90_v28  ;;  %v2858_v39 = vcombine.high %v97_v33, %v105_v34  ;;  %v113_v41 = vld [vmem:[%s4010_s2 + $0x290] sm:$0xff]  ;;  %v43_v2 = vld [vmem:[%s4010_s2 + $0x60] sm:$0xff] }
  0x14   :  { %v2860_v40 = vcombine.high %v98_v35, %v106_v36  ;;  %v121_v42 = vld [vmem:[%s4010_s2 + $0x2d0] sm:$0xff]  ;;  %v2798_v8 = vcombine.high %v35_v1, %v43_v2  ;;  %v51_v10 = vld [vmem:[%s4010_s2 + $0xa0] sm:$0xff] }
  0x15   :  { %v2874_v47 = vcombine.high %v113_v41, %v121_v42  ;;  %v129_v49 = vld [vmem:[%s4010_s2 + $0x310] sm:$0xff]  ;;  %v59_v11 = vld [vmem:[%s4010_s2 + $0xe0] sm:$0xff] }
  0x16   :  { %808 = vmatpush1.bf16.msra.mxu0 %v2853_v43  ;;  %849 = vmatpush1.bf16.msra.mxu1 %v2855_v44  ;;  %v114_v43 = vld [vmem:[%s4010_s2 + $0x298] sm:$0xff]  ;;  %v137_v50 = vld [vmem:[%s4010_s2 + $0x350] sm:$0xff]  ;;  %v2814_v17 = vcombine.high %v51_v10, %v59_v11  ;;  %v67_v19 = vld [vmem:[%s4010_s2 + $0x120] sm:$0xff] }
  0x17   :  { %809 = vmatprep.subr.bf16.mxu0 %v2870_v45  ;;  %850 = vmatprep.subr.bf16.mxu1 %v2872_v46  ;;  %v122_v44 = vld [vmem:[%s4010_s2 + $0x2d8] sm:$0xff]  ;;  %v2857_v45 = vcombine.low %v97_v33, %v105_v34  ;;  %v2859_v46 = vcombine.low %v98_v35, %v106_v36  ;;  %v2890_v55 = vcombine.high %v129_v49, %v137_v50  ;;  %v145_v57 = vld [vmem:[%s4010_s2 + $0x390] sm:$0xff]  ;;  %v75_v20 = vld [vmem:[%s4010_s2 + $0x160] sm:$0xff] }
  0x18   :  { %v2876_v48 = vcombine.high %v114_v43, %v122_v44  ;;  %v153_v58 = vld [vmem:[%s4010_s2 + $0x3d0] sm:$0xff]  ;;  %v2830_v25 = vcombine.high %v67_v19, %v75_v20  ;;  %v83_v27 = vld [vmem:[%s4010_s2 + $0x1a0] sm:$0xff] }
  0x19   :  { %v2906_v63 = vcombine.high %v145_v57, %v153_v58  ;;  %v91_v28 = vld [vmem:[%s4010_s2 + $0x1e0] sm:$0xff] }
  0x1a   :  { %810 = vmatpush1.bf16.msra.mxu0 %v2869_v51  ;;  %851 = vmatpush1.bf16.msra.mxu1 %v2871_v52  ;;  %v130_v51 = vld [vmem:[%s4010_s2 + $0x318] sm:$0xff]  ;;  %v2846_v33 = vcombine.high %v83_v27, %v91_v28  ;;  %v99_v35 = vld [vmem:[%s4010_s2 + $0x220] sm:$0xff] }
  0x1b   :  { %811 = vmatprep.subr.bf16.mxu0 %v2886_v53  ;;  %852 = vmatprep.subr.bf16.mxu1 %v2888_v54  ;;  %v138_v52 = vld [vmem:[%s4010_s2 + $0x358] sm:$0xff]  ;;  %v2873_v53 = vcombine.low %v113_v41, %v121_v42  ;;  %v2875_v54 = vcombine.low %v114_v43, %v122_v44  ;;  %v107_v36 = vld [vmem:[%s4010_s2 + $0x260] sm:$0xff] }
  0x1c   :  { %v2892_v56 = vcombine.high %v130_v51, %v138_v52  ;;  %v2862_v41 = vcombine.high %v99_v35, %v107_v36  ;;  %v115_v43 = vld [vmem:[%s4010_s2 + $0x2a0] sm:$0xff] }
  0x1d   :  { %v123_v44 = vld [vmem:[%s4010_s2 + $0x2e0] sm:$0xff] }
  0x1e   :  { %812 = vmatpush1.bf16.msra.mxu0 %v2885_v59  ;;  %853 = vmatpush1.bf16.msra.mxu1 %v2887_v60  ;;  %v146_v59 = vld [vmem:[%s4010_s2 + $0x398] sm:$0xff] }
  0x1f   :  { %813 = vmatprep.subr.bf16.mxu0 %v2902_v61  ;;  %854 = vmatprep.subr.bf16.mxu1 %v2904_v62  ;;  %v154_v60 = vld [vmem:[%s4010_s2 + $0x3d8] sm:$0xff]  ;;  %v2889_v61 = vcombine.low %v129_v49, %v137_v50  ;;  %v2891_v62 = vcombine.low %v130_v51, %v138_v52  ;;  %v2878_v49 = vcombine.high %v115_v43, %v123_v44  ;;  %v131_v51 = vld [vmem:[%s4010_s2 + $0x320] sm:$0xff] }
  0x20   :  { %v2908_v0 = vcombine.high %v146_v59, %v154_v60  ;;  %v139_v52 = vld [vmem:[%s4010_s2 + $0x360] sm:$0xff] }
  0x22   :  { %814 = vmatpush1.bf16.msra.mxu0 %v2901_v4  ;;  %855 = vmatpush1.bf16.msra.mxu1 %v2903_v5  ;;  %v36_v4 = vld [vmem:[%s4010_s2 + $0x28] sm:$0xff] }
  0x23   :  { %881 = vmatprep.subr.bf16.mxu0 %v2794_v6  ;;  %922 = vmatprep.subr.bf16.mxu1 %v2796_v7  ;;  %v44_v5 = vld [vmem:[%s4010_s2 + $0x68] sm:$0xff]  ;;  %v2905_v6 = vcombine.low %v145_v57, %v153_v58  ;;  %v2907_v7 = vcombine.low %v146_v59, %v154_v60  ;;  %v2894_v57 = vcombine.high %v131_v51, %v139_v52  ;;  %v147_v59 = vld [vmem:[%s4010_s2 + $0x3a0] sm:$0xff] }
  0x24   :  { %v2800_v9 = vcombine.high %v36_v4, %v44_v5  ;;  %v155_v60 = vld [vmem:[%s4010_s2 + $0x3e0] sm:$0xff] }
  0x25   :  { %832 = vmatmul.mubr.bf16.vlgmr.msra.gmra.mrb[0].mxu0 %v3243_v12  ;;  %873 = vmatmul.mubr.bf16.vlgmr.msra.gmra.mrb[0].mxu1 %v3243_v12 }
  0x26   :  { %882 = vmatpush1.bf16.msra.mxu0 %v2793_v13  ;;  %923 = vmatpush1.bf16.msra.mxu1 %v2795_v14  ;;  %v52_v13 = vld [vmem:[%s4010_s2 + $0xa8] sm:$0xff] }
  0x27   :  { %883 = vmatprep.subr.bf16.mxu0 %v2810_v15  ;;  %924 = vmatprep.subr.bf16.mxu1 %v2812_v16  ;;  %v60_v14 = vld [vmem:[%s4010_s2 + $0xe8] sm:$0xff]  ;;  %v2797_v15 = vcombine.low %v35_v1, %v43_v2  ;;  %v2799_v16 = vcombine.low %v36_v4, %v44_v5  ;;  %v2910_v1 = vcombine.high %v147_v59, %v155_v60  ;;  %v37_v4 = vld [vmem:[%s4010_s2 + $0x30] sm:$0xff] }
  0x28   :  { %913 = vmatprep.mubr.bf16.mxu0 %v3071_v3  ;;  %954 = vmatprep.mubr.bf16.mxu1 %v3071_v3  ;;  %v2816_v18 = vcombine.high %v52_v13, %v60_v14  ;;  %v45_v5 = vld [vmem:[%s4010_s2 + $0x70] sm:$0xff] }
  0x2a   :  { %884 = vmatpush1.bf16.msra.mxu0 %v2809_v21  ;;  %925 = vmatpush1.bf16.msra.mxu1 %v2811_v22  ;;  %v68_v21 = vld [vmem:[%s4010_s2 + $0x128] sm:$0xff] }
  0x2b   :  { %885 = vmatprep.subr.bf16.mxu0 %v2826_v23  ;;  %926 = vmatprep.subr.bf16.mxu1 %v2828_v24  ;;  %v76_v22 = vld [vmem:[%s4010_s2 + $0x168] sm:$0xff]  ;;  %v2813_v23 = vcombine.low %v51_v10, %v59_v11  ;;  %v2815_v24 = vcombine.low %v52_v13, %v60_v14  ;;  %v2802_v10 = vcombine.high %v37_v4, %v45_v5  ;;  %v53_v13 = vld [vmem:[%s4010_s2 + $0xb0] sm:$0xff] }
  0x2c   :  { %v2832_v26 = vcombine.high %v68_v21, %v76_v22  ;;  %v61_v14 = vld [vmem:[%s4010_s2 + $0xf0] sm:$0xff] }
  0x2e   :  { %886 = vmatpush1.bf16.msra.mxu0 %v2825_v29  ;;  %927 = vmatpush1.bf16.msra.mxu1 %v2827_v30  ;;  %v84_v29 = vld [vmem:[%s4010_s2 + $0x1a8] sm:$0xff] }
  0x2f   :  { %887 = vmatprep.subr.bf16.mxu0 %v2842_v31  ;;  %928 = vmatprep.subr.bf16.mxu1 %v2844_v32  ;;  %v92_v30 = vld [vmem:[%s4010_s2 + $0x1e8] sm:$0xff]  ;;  %v2829_v31 = vcombine.low %v67_v19, %v75_v20  ;;  %v2831_v32 = vcombine.low %v68_v21, %v76_v22  ;;  %v2818_v19 = vcombine.high %v53_v13, %v61_v14  ;;  %v69_v21 = vld [vmem:[%s4010_s2 + $0x130] sm:$0xff] }
  0x30   :  { %v2848_v34 = vcombine.high %v84_v29, %v92_v30  ;;  %v77_v22 = vld [vmem:[%s4010_s2 + $0x170] sm:$0xff] }
  0x32   :  { %888 = vmatpush1.bf16.msra.mxu0 %v2841_v37  ;;  %929 = vmatpush1.bf16.msra.mxu1 %v2843_v38  ;;  %v100_v37 = vld [vmem:[%s4010_s2 + $0x228] sm:$0xff] }
  0x33   :  { %889 = vmatprep.subr.bf16.mxu0 %v2858_v39  ;;  %930 = vmatprep.subr.bf16.mxu1 %v2860_v40  ;;  %v108_v38 = vld [vmem:[%s4010_s2 + $0x268] sm:$0xff]  ;;  %v2845_v39 = vcombine.low %v83_v27, %v91_v28  ;;  %v2847_v40 = vcombine.low %v84_v29, %v92_v30  ;;  %v2834_v27 = vcombine.high %v69_v21, %v77_v22  ;;  %v85_v29 = vld [vmem:[%s4010_s2 + $0x1b0] sm:$0xff] }
  0x34   :  { %v2864_v42 = vcombine.high %v100_v37, %v108_v38  ;;  %v93_v30 = vld [vmem:[%s4010_s2 + $0x1f0] sm:$0xff] }
  0x36   :  { %890 = vmatpush1.bf16.msra.mxu0 %v2857_v45  ;;  %931 = vmatpush1.bf16.msra.mxu1 %v2859_v46  ;;  %v116_v45 = vld [vmem:[%s4010_s2 + $0x2a8] sm:$0xff] }
  0x37   :  { %891 = vmatprep.subr.bf16.mxu0 %v2874_v47  ;;  %932 = vmatprep.subr.bf16.mxu1 %v2876_v48  ;;  %v124_v46 = vld [vmem:[%s4010_s2 + $0x2e8] sm:$0xff]  ;;  %v2861_v47 = vcombine.low %v99_v35, %v107_v36  ;;  %v2863_v48 = vcombine.low %v100_v37, %v108_v38  ;;  %v2850_v35 = vcombine.high %v85_v29, %v93_v30  ;;  %v101_v37 = vld [vmem:[%s4010_s2 + $0x230] sm:$0xff] }
  0x38   :  { %v2880_v50 = vcombine.high %v116_v45, %v124_v46  ;;  %v109_v38 = vld [vmem:[%s4010_s2 + $0x270] sm:$0xff] }
  0x3a   :  { %892 = vmatpush1.bf16.msra.mxu0 %v2873_v53  ;;  %933 = vmatpush1.bf16.msra.mxu1 %v2875_v54  ;;  %v132_v53 = vld [vmem:[%s4010_s2 + $0x328] sm:$0xff] }
  0x3b   :  { %893 = vmatprep.subr.bf16.mxu0 %v2890_v55  ;;  %934 = vmatprep.subr.bf16.mxu1 %v2892_v56  ;;  %v140_v54 = vld [vmem:[%s4010_s2 + $0x368] sm:$0xff]  ;;  %v2877_v55 = vcombine.low %v115_v43, %v123_v44  ;;  %v2879_v56 = vcombine.low %v116_v45, %v124_v46  ;;  %v2866_v43 = vcombine.high %v101_v37, %v109_v38  ;;  %v117_v45 = vld [vmem:[%s4010_s2 + $0x2b0] sm:$0xff] }
  0x3c   :  { %v2896_v58 = vcombine.high %v132_v53, %v140_v54  ;;  %v125_v46 = vld [vmem:[%s4010_s2 + $0x2f0] sm:$0xff] }
  0x3e   :  { %894 = vmatpush1.bf16.msra.mxu0 %v2889_v61  ;;  %935 = vmatpush1.bf16.msra.mxu1 %v2891_v62  ;;  %v148_v61 = vld [vmem:[%s4010_s2 + $0x3a8] sm:$0xff] }
  0x3f   :  { %895 = vmatprep.subr.bf16.mxu0 %v2906_v63  ;;  %936 = vmatprep.subr.bf16.mxu1 %v2908_v0  ;;  %v156_v62 = vld [vmem:[%s4010_s2 + $0x3e8] sm:$0xff]  ;;  %v2893_v63 = vcombine.low %v131_v51, %v139_v52  ;;  %v2895_v0 = vcombine.low %v132_v53, %v140_v54  ;;  %v2882_v51 = vcombine.high %v117_v45, %v125_v46  ;;  %v133_v53 = vld [vmem:[%s4010_s2 + $0x330] sm:$0xff] }
  0x40   :  { %v2912_v2 = vcombine.high %v148_v61, %v156_v62  ;;  %v141_v54 = vld [vmem:[%s4010_s2 + $0x370] sm:$0xff] }
  0x42   :  { %896 = vmatpush1.bf16.msra.mxu0 %v2905_v6  ;;  %937 = vmatpush1.bf16.msra.mxu1 %v2907_v7  ;;  %v38_v6 = vld [vmem:[%s4010_s2 + $0x38] sm:$0xff] }
  0x43   :  { %963 = vmatprep.subr.bf16.mxu0 %v2798_v8  ;;  %1004 = vmatprep.subr.bf16.mxu1 %v2800_v9  ;;  %v46_v7 = vld [vmem:[%s4010_s2 + $0x78] sm:$0xff]  ;;  %v2909_v8 = vcombine.low %v147_v59, %v155_v60  ;;  %v2911_v9 = vcombine.low %v148_v61, %v156_v62  ;;  %v2898_v59 = vcombine.high %v133_v53, %v141_v54  ;;  %v149_v61 = vld [vmem:[%s4010_s2 + $0x3b0] sm:$0xff] }
  0x44   :  { %v2804_v11 = vcombine.high %v38_v6, %v46_v7  ;;  %v157_v62 = vld [vmem:[%s4010_s2 + $0x3f0] sm:$0xff] }
  0x45   :  { %914 = vmatmul.mubr.bf16.vlgmr.msra.gmra.mrb[4].mxu0 %v3243_v12  ;;  %955 = vmatmul.mubr.bf16.vlgmr.msra.gmra.mrb[4].mxu1 %v3243_v12 }
  0x46   :  { %964 = vmatpush1.bf16.msra.mxu0 %v2797_v15  ;;  %1005 = vmatpush1.bf16.msra.mxu1 %v2799_v16  ;;  %v54_v15 = vld [vmem:[%s4010_s2 + $0xb8] sm:$0xff] }
  0x47   :  { %965 = vmatprep.subr.bf16.mxu0 %v2814_v17  ;;  %1006 = vmatprep.subr.bf16.mxu1 %v2816_v18  ;;  %v62_v16 = vld [vmem:[%s4010_s2 + $0xf8] sm:$0xff]  ;;  %v2801_v17 = vcombine.low %v37_v4, %v45_v5  ;;  %v2803_v18 = vcombine.low %v38_v6, %v46_v7  ;;  %v2914_v4 = vcombine.high %v149_v61, %v157_v62  ;;  %v1353_v6 = vld [vmem:[%s4012_s3] sm:$0xff] }
  0x48   :  { %995 = vmatprep.mubr.bf16.mxu0 %v3071_v3  ;;  %1036 = vmatprep.mubr.bf16.mxu1 %v3071_v3  ;;  %v2820_v20 = vcombine.high %v54_v15, %v62_v16  ;;  %v1361_v7 = vld [vmem:[%s4012_s3 + $0x40] sm:$0xff] }
  0x4a   :  { %966 = vmatpush1.bf16.msra.mxu0 %v2813_v23  ;;  %1007 = vmatpush1.bf16.msra.mxu1 %v2815_v24  ;;  %v70_v23 = vld [vmem:[%s4010_s2 + $0x138] sm:$0xff] }
  0x4b   :  { %967 = vmatprep.subr.bf16.mxu0 %v2830_v25  ;;  %1008 = vmatprep.subr.bf16.mxu1 %v2832_v26  ;;  %v78_v24 = vld [vmem:[%s4010_s2 + $0x178] sm:$0xff]  ;;  %v2817_v25 = vcombine.low %v53_v13, %v61_v14  ;;  %v2819_v26 = vcombine.low %v54_v15, %v62_v16  ;;  %v2920_v13 = vcombine.high %v1353_v6, %v1361_v7  ;;  %v1369_v15 = vld [vmem:[%s4012_s3 + $0x80] sm:$0xff] }
  0x4c   :  { %v2836_v28 = vcombine.high %v70_v23, %v78_v24  ;;  %v1377_v16 = vld [vmem:[%s4012_s3 + $0xc0] sm:$0xff] }
  0x4e   :  { %968 = vmatpush1.bf16.msra.mxu0 %v2829_v31  ;;  %1009 = vmatpush1.bf16.msra.mxu1 %v2831_v32  ;;  %v86_v31 = vld [vmem:[%s4010_s2 + $0x1b8] sm:$0xff] }
  0x4f   :  { %969 = vmatprep.subr.bf16.mxu0 %v2846_v33  ;;  %1010 = vmatprep.subr.bf16.mxu1 %v2848_v34  ;;  %v94_v32 = vld [vmem:[%s4010_s2 + $0x1f8] sm:$0xff]  ;;  %v2833_v33 = vcombine.low %v69_v21, %v77_v22  ;;  %v2835_v34 = vcombine.low %v70_v23, %v78_v24  ;;  %v2936_v21 = vcombine.high %v1369_v15, %v1377_v16  ;;  %v1385_v23 = vld [vmem:[%s4012_s3 + $0x100] sm:$0xff] }
  0x50   :  { %v2852_v36 = vcombine.high %v86_v31, %v94_v32  ;;  %v1393_v24 = vld [vmem:[%s4012_s3 + $0x140] sm:$0xff] }
  0x52   :  { %970 = vmatpush1.bf16.msra.mxu0 %v2845_v39  ;;  %1011 = vmatpush1.bf16.msra.mxu1 %v2847_v40  ;;  %v102_v39 = vld [vmem:[%s4010_s2 + $0x238] sm:$0xff] }
  0x53   :  { %971 = vmatprep.subr.bf16.mxu0 %v2862_v41  ;;  %1012 = vmatprep.subr.bf16.mxu1 %v2864_v42  ;;  %v110_v40 = vld [vmem:[%s4010_s2 + $0x278] sm:$0xff]  ;;  %v2849_v41 = vcombine.low %v85_v29, %v93_v30  ;;  %v2851_v42 = vcombine.low %v86_v31, %v94_v32  ;;  %v2952_v29 = vcombine.high %v1385_v23, %v1393_v24  ;;  %v1401_v31 = vld [vmem:[%s4012_s3 + $0x180] sm:$0xff] }
  0x54   :  { %v2868_v44 = vcombine.high %v102_v39, %v110_v40  ;;  %v1409_v32 = vld [vmem:[%s4012_s3 + $0x1c0] sm:$0xff] }
  0x56   :  { %972 = vmatpush1.bf16.msra.mxu0 %v2861_v47  ;;  %1013 = vmatpush1.bf16.msra.mxu1 %v2863_v48  ;;  %v118_v47 = vld [vmem:[%s4010_s2 + $0x2b8] sm:$0xff] }
  0x57   :  { %973 = vmatprep.subr.bf16.mxu0 %v2878_v49  ;;  %1014 = vmatprep.subr.bf16.mxu1 %v2880_v50  ;;  %v126_v48 = vld [vmem:[%s4010_s2 + $0x2f8] sm:$0xff]  ;;  %v2865_v49 = vcombine.low %v101_v37, %v109_v38  ;;  %v2867_v50 = vcombine.low %v102_v39, %v110_v40  ;;  %v1417_v38 = vld [vmem:[%s4012_s3 + $0x200] sm:$0xff]  ;;  %v1418_v40 = vld [vmem:[%s4012_s3 + $0x208] sm:$0xff] }
  0x58   :  { %v2884_v52 = vcombine.high %v118_v47, %v126_v48  ;;  %v1425_v39 = vld [vmem:[%s4012_s3 + $0x240] sm:$0xff] }
  0x5a   :  { %974 = vmatpush1.bf16.msra.mxu0 %v2877_v55  ;;  %1015 = vmatpush1.bf16.msra.mxu1 %v2879_v56  ;;  %v134_v55 = vld [vmem:[%s4010_s2 + $0x338] sm:$0xff] }
  0x5b   :  { %975 = vmatprep.subr.bf16.mxu0 %v2894_v57  ;;  %1016 = vmatprep.subr.bf16.mxu1 %v2896_v58  ;;  %v142_v56 = vld [vmem:[%s4010_s2 + $0x378] sm:$0xff]  ;;  %v2881_v57 = vcombine.low %v117_v45, %v125_v46  ;;  %v2883_v58 = vcombine.low %v118_v47, %v126_v48  ;;  %v1433_v46 = vld [vmem:[%s4012_s3 + $0x280] sm:$0xff]  ;;  %v1434_v48 = vld [vmem:[%s4012_s3 + $0x288] sm:$0xff] }
  0x5c   :  { %v2900_v60 = vcombine.high %v134_v55, %v142_v56  ;;  %v1441_v47 = vld [vmem:[%s4012_s3 + $0x2c0] sm:$0xff] }
  0x5e   :  { %976 = vmatpush1.bf16.msra.mxu0 %v2893_v63  ;;  %1017 = vmatpush1.bf16.msra.mxu1 %v2895_v0  ;;  %v150_v63 = vld [vmem:[%s4010_s2 + $0x3b8] sm:$0xff] }
  0x5f   :  { %977 = vmatprep.subr.bf16.mxu0 %v2910_v1  ;;  %1018 = vmatprep.subr.bf16.mxu1 %v2912_v2  ;;  %v158_v0 = vld [vmem:[%s4010_s2 + $0x3f8] sm:$0xff]  ;;  %v2897_v1 = vcombine.low %v133_v53, %v141_v54  ;;  %v2899_v2 = vcombine.low %v134_v55, %v142_v56  ;;  %v1449_v54 = vld [vmem:[%s4012_s3 + $0x300] sm:$0xff]  ;;  %v1450_v56 = vld [vmem:[%s4012_s3 + $0x308] sm:$0xff] }
  0x60   :  { %v2916_v5 = vcombine.high %v150_v63, %v158_v0  ;;  %v1457_v55 = vld [vmem:[%s4012_s3 + $0x340] sm:$0xff] }
  0x62   :  { %978 = vmatpush1.bf16.msra.mxu0 %v2909_v8  ;;  %1019 = vmatpush1.bf16.msra.mxu1 %v2911_v9  ;;  %v1354_v8 = vld [vmem:[%s4012_s3 + $0x8] sm:$0xff] }
  0x63   :  { %1045 = vmatprep.subr.bf16.mxu0 %v2802_v10  ;;  %1086 = vmatprep.subr.bf16.mxu1 %v2804_v11  ;;  %v1362_v9 = vld [vmem:[%s4012_s3 + $0x48] sm:$0xff]  ;;  %v2913_v10 = vcombine.low %v149_v61, %v157_v62  ;;  %v2915_v11 = vcombine.low %v150_v63, %v158_v0  ;;  %v1465_v62 = vld [vmem:[%s4012_s3 + $0x380] sm:$0xff] }
  0x64   :  { %v2922_v14 = vcombine.high %v1354_v8, %v1362_v9  ;;  %v1473_v63 = vld [vmem:[%s4012_s3 + $0x3c0] sm:$0xff]  ;;  %v1466_v0 = vld [vmem:[%s4012_s3 + $0x388] sm:$0xff] }
  0x65   :  { %996 = vmatmul.mubr.bf16.vlgmr.msra.gmra.mrb[8].mxu0 %v3243_v12  ;;  %1037 = vmatmul.mubr.bf16.vlgmr.msra.gmra.mrb[8].mxu1 %v3243_v12 }
  0x66   :  { %1046 = vmatpush1.bf16.msra.mxu0 %v2801_v17  ;;  %1087 = vmatpush1.bf16.msra.mxu1 %v2803_v18  ;;  %v1370_v17 = vld [vmem:[%s4012_s3 + $0x88] sm:$0xff] }
  0x67   :  { %1047 = vmatprep.subr.bf16.mxu0 %v2818_v19  ;;  %1088 = vmatprep.subr.bf16.mxu1 %v2820_v20  ;;  %v1378_v18 = vld [vmem:[%s4012_s3 + $0xc8] sm:$0xff]  ;;  %v2919_v19 = vcombine.low %v1353_v6, %v1361_v7  ;;  %v2921_v20 = vcombine.low %v1354_v8, %v1362_v9  ;;  %v1355_v7 = vld [vmem:[%s4012_s3 + $0x10] sm:$0xff]  ;;  %v1356_v9 = vld [vmem:[%s4012_s3 + $0x18] sm:$0xff] }
  0x68   :  { %1077 = vmatprep.mubr.bf16.mxu0 %v3071_v3  ;;  %1118 = vmatprep.mubr.bf16.mxu1 %v3071_v3  ;;  %v2938_v22 = vcombine.high %v1370_v17, %v1378_v18  ;;  %v1363_v8 = vld [vmem:[%s4012_s3 + $0x50] sm:$0xff] }
  0x6a   :  { %1048 = vmatpush1.bf16.msra.mxu0 %v2817_v25  ;;  %1089 = vmatpush1.bf16.msra.mxu1 %v2819_v26  ;;  %v1386_v25 = vld [vmem:[%s4012_s3 + $0x108] sm:$0xff] }
  0x6b   :  { %1049 = vmatprep.subr.bf16.mxu0 %v2834_v27  ;;  %1090 = vmatprep.subr.bf16.mxu1 %v2836_v28  ;;  %v1394_v26 = vld [vmem:[%s4012_s3 + $0x148] sm:$0xff]  ;;  %v2935_v27 = vcombine.low %v1369_v15, %v1377_v16  ;;  %v2937_v28 = vcombine.low %v1370_v17, %v1378_v18  ;;  %v1371_v16 = vld [vmem:[%s4012_s3 + $0x90] sm:$0xff]  ;;  %v1372_v18 = vld [vmem:[%s4012_s3 + $0x98] sm:$0xff] }
  0x6c   :  { %v2954_v30 = vcombine.high %v1386_v25, %v1394_v26  ;;  %v1379_v17 = vld [vmem:[%s4012_s3 + $0xd0] sm:$0xff] }
  0x6e   :  { %1050 = vmatpush1.bf16.msra.mxu0 %v2833_v33  ;;  %1091 = vmatpush1.bf16.msra.mxu1 %v2835_v34  ;;  %v1410_v33 = vld [vmem:[%s4012_s3 + $0x1c8] sm:$0xff]  ;;  %v2951_v34 = vcombine.low %v1385_v23, %v1393_v24  ;;  %v2940_v23 = vcombine.high %v1371_v16, %v1379_v17 }
  0x6f   :  { %1051 = vmatprep.subr.bf16.mxu0 %v2850_v35  ;;  %1092 = vmatprep.subr.bf16.mxu1 %v2852_v36  ;;  %v2953_v35 = vcombine.low %v1386_v25, %v1394_v26  ;;  %v2968_v36 = vcombine.high %v1401_v31, %v1409_v32  ;;  %v1387_v25 = vld [vmem:[%s4012_s3 + $0x110] sm:$0xff] }
  0x70   :  { %v1395_v26 = vld [vmem:[%s4012_s3 + $0x150] sm:$0xff] }
  0x72   :  { %1052 = vmatpush1.bf16.msra.mxu0 %v2849_v41  ;;  %1093 = vmatpush1.bf16.msra.mxu1 %v2851_v42  ;;  %v1426_v41 = vld [vmem:[%s4012_s3 + $0x248] sm:$0xff]  ;;  %v2967_v42 = vcombine.low %v1401_v31, %v1409_v32  ;;  %v2956_v31 = vcombine.high %v1387_v25, %v1395_v26 }
  0x73   :  { %1053 = vmatprep.subr.bf16.mxu0 %v2866_v43  ;;  %1094 = vmatprep.subr.bf16.mxu1 %v2868_v44  ;;  %v2984_v44 = vcombine.high %v1417_v38, %v1425_v39  ;;  %v2986_v45 = vcombine.high %v1418_v40, %v1426_v41 }
  0x76   :  { %1054 = vmatpush1.bf16.msra.mxu0 %v2865_v49  ;;  %1095 = vmatpush1.bf16.msra.mxu1 %v2867_v50  ;;  %v1442_v49 = vld [vmem:[%s4012_s3 + $0x2c8] sm:$0xff]  ;;  %v2983_v50 = vcombine.low %v1417_v38, %v1425_v39 }
  0x77   :  { %1055 = vmatprep.subr.bf16.mxu0 %v2882_v51  ;;  %1096 = vmatprep.subr.bf16.mxu1 %v2884_v52  ;;  %v2985_v51 = vcombine.low %v1418_v40, %v1426_v41  ;;  %v3000_v52 = vcombine.high %v1433_v46, %v1441_v47  ;;  %v3002_v53 = vcombine.high %v1434_v48, %v1442_v49  ;;  %v1419_v40 = vld [vmem:[%s4012_s3 + $0x210] sm:$0xff] }
  0x78   :  { %v1427_v41 = vld [vmem:[%s4012_s3 + $0x250] sm:$0xff] }
  0x7a   :  { %1056 = vmatpush1.bf16.msra.mxu0 %v2881_v57  ;;  %1097 = vmatpush1.bf16.msra.mxu1 %v2883_v58  ;;  %v1458_v57 = vld [vmem:[%s4012_s3 + $0x348] sm:$0xff]  ;;  %v2999_v58 = vcombine.low %v1433_v46, %v1441_v47  ;;  %v2988_v46 = vcombine.high %v1419_v40, %v1427_v41 }
  0x7b   :  { %1057 = vmatprep.subr.bf16.mxu0 %v2898_v59  ;;  %1098 = vmatprep.subr.bf16.mxu1 %v2900_v60  ;;  %v3001_v59 = vcombine.low %v1434_v48, %v1442_v49  ;;  %v3016_v60 = vcombine.high %v1449_v54, %v1457_v55  ;;  %v3018_v61 = vcombine.high %v1450_v56, %v1458_v57  ;;  %v1435_v48 = vld [vmem:[%s4012_s3 + $0x290] sm:$0xff] }
  0x7c   :  { %v1443_v49 = vld [vmem:[%s4012_s3 + $0x2d0] sm:$0xff] }
  0x7e   :  { %1058 = vmatpush1.bf16.msra.mxu0 %v2897_v1  ;;  %1099 = vmatpush1.bf16.msra.mxu1 %v2899_v2  ;;  %v1474_v1 = vld [vmem:[%s4012_s3 + $0x3c8] sm:$0xff]  ;;  %v3015_v2 = vcombine.low %v1449_v54, %v1457_v55  ;;  %v3004_v54 = vcombine.high %v1435_v48, %v1443_v49 }
  0x7f   :  { %1059 = vmatprep.subr.bf16.mxu0 %v2914_v4  ;;  %1100 = vmatprep.subr.bf16.mxu1 %v2916_v5  ;;  %v3017_v4 = vcombine.low %v1450_v56, %v1458_v57  ;;  %v3032_v5 = vcombine.high %v1465_v62, %v1473_v63  ;;  %v3034_v6 = vcombine.high %v1466_v0, %v1474_v1  ;;  %v1451_v56 = vld [vmem:[%s4012_s3 + $0x310] sm:$0xff] }
  0x80   :  { %v1459_v57 = vld [vmem:[%s4012_s3 + $0x350] sm:$0xff] }
  0x82   :  { %1060 = vmatpush1.bf16.msra.mxu0 %v2913_v10  ;;  %1101 = vmatpush1.bf16.msra.mxu1 %v2915_v11  ;;  %v1364_v10 = vld [vmem:[%s4012_s3 + $0x58] sm:$0xff]  ;;  %v3031_v11 = vcombine.low %v1465_v62, %v1473_v63  ;;  %v3020_v62 = vcombine.high %v1451_v56, %v1459_v57 }
  0x83   :  { %2121 = vmatprep.subr.bf16.mxu0 %v2920_v13  ;;  %2162 = vmatprep.subr.bf16.mxu1 %v2922_v14  ;;  %v3033_v13 = vcombine.low %v1466_v0, %v1474_v1  ;;  %v2924_v14 = vcombine.high %v1355_v7, %v1363_v8  ;;  %v2926_v15 = vcombine.high %v1356_v9, %v1364_v10  ;;  %v1467_v0 = vld [vmem:[%s4012_s3 + $0x390] sm:$0xff] }
  0x84   :  { %v1475_v1 = vld [vmem:[%s4012_s3 + $0x3d0] sm:$0xff] }
  0x85   :  { %1078 = vmatmul.mubr.bf16.vlgmr.msra.gmra.mrb[12].mxu0 %v3243_v12  ;;  %1119 = vmatmul.mubr.bf16.vlgmr.msra.gmra.mrb[12].mxu1 %v3243_v12  ;;  %v1402_v12 = vld [vmem:[%s4012_s3 + $0x188] sm:$0xff] }
  0x86   :  { %2122 = vmatpush1.bf16.msra.mxu0 %v2919_v19  ;;  %2163 = vmatpush1.bf16.msra.mxu1 %v2921_v20  ;;  %v2970_v37 = vcombine.high %v1402_v12, %v1410_v33  ;;  %v2969_v43 = vcombine.low %v1402_v12, %v1410_v33  ;;  %v1380_v19 = vld [vmem:[%s4012_s3 + $0xd8] sm:$0xff]  ;;  %v3648_v20 = vld [vmem:[%s4013_s1] sm:$0x1]  ;;  %v1403_v12 = vld [vmem:[%s4012_s3 + $0x190] sm:$0xff] }
  0x87   :  { %2123 = vmatprep.subr.bf16.mxu0 %v2936_v21  ;;  %2164 = vmatprep.subr.bf16.mxu1 %v2938_v22  ;;  %v2923_v21 = vcombine.low %v1355_v7, %v1363_v8  ;;  %v2925_v22 = vcombine.low %v1356_v9, %v1364_v10  ;;  %v2942_v24 = vcombine.high %v1372_v18, %v1380_v19  ;;  %v1411_v33 = vld [vmem:[%s4012_s3 + $0x1d0] sm:$0xff]  ;;  %v1357_v9 = vld [vmem:[%s4012_s3 + $0x20] sm:$0xff] }
  0x88   :  { %2153 = vmatprep.mubr.bf16.mxu0 %v3071_v3  ;;  %2194 = vmatprep.mubr.bf16.mxu1 %v3071_v3  ;;  %v2972_v38 = vcombine.high %v1403_v12, %v1411_v33  ;;  %v3036_v7 = vcombine.high %v1467_v0, %v1475_v1  ;;  %v1365_v10 = vld [vmem:[%s4012_s3 + $0x60] sm:$0xff] }
  0x8a   :  { %2124 = vmatpush1.bf16.msra.mxu0 %v2935_v27  ;;  %2165 = vmatpush1.bf16.msra.mxu1 %v2937_v28  ;;  %v1388_v27 = vld [vmem:[%s4012_s3 + $0x118] sm:$0xff] }
  0x8b   :  { %2125 = vmatprep.subr.bf16.mxu0 %v2952_v29  ;;  %2166 = vmatprep.subr.bf16.mxu1 %v2954_v30  ;;  %v1396_v28 = vld [vmem:[%s4012_s3 + $0x158] sm:$0xff]  ;;  %v2939_v29 = vcombine.low %v1371_v16, %v1379_v17  ;;  %v2941_v30 = vcombine.low %v1372_v18, %v1380_v19  ;;  %v2928_v16 = vcombine.high %v1357_v9, %v1365_v10  ;;  %v1373_v18 = vld [vmem:[%s4012_s3 + $0xa0] sm:$0xff] }
  0x8c   :  { %v2958_v32 = vcombine.high %v1388_v27, %v1396_v28  ;;  %v1381_v19 = vld [vmem:[%s4012_s3 + $0xe0] sm:$0xff] }
  0x8e   :  { %2126 = vmatpush1.bf16.msra.mxu0 %v2951_v34  ;;  %2167 = vmatpush1.bf16.msra.mxu1 %v2953_v35  ;;  %v1404_v34 = vld [vmem:[%s4012_s3 + $0x198] sm:$0xff] }
  0x8f   :  { %2127 = vmatprep.subr.bf16.mxu0 %v2968_v36  ;;  %2168 = vmatprep.subr.bf16.mxu1 %v2970_v37  ;;  %v1412_v35 = vld [vmem:[%s4012_s3 + $0x1d8] sm:$0xff]  ;;  %v2955_v36 = vcombine.low %v1387_v25, %v1395_v26  ;;  %v2957_v37 = vcombine.low %v1388_v27, %v1396_v28  ;;  %v2944_v25 = vcombine.high %v1373_v18, %v1381_v19  ;;  %v1389_v27 = vld [vmem:[%s4012_s3 + $0x120] sm:$0xff] }
  0x90   :  { %v2974_v39 = vcombine.high %v1404_v34, %v1412_v35  ;;  %v1397_v28 = vld [vmem:[%s4012_s3 + $0x160] sm:$0xff] }
  0x92   :  { %2128 = vmatpush1.bf16.msra.mxu0 %v2967_v42  ;;  %2169 = vmatpush1.bf16.msra.mxu1 %v2969_v43  ;;  %v1420_v42 = vld [vmem:[%s4012_s3 + $0x218] sm:$0xff] }
  0x93   :  { %2129 = vmatprep.subr.bf16.mxu0 %v2984_v44  ;;  %2170 = vmatprep.subr.bf16.mxu1 %v2986_v45  ;;  %v1428_v43 = vld [vmem:[%s4012_s3 + $0x258] sm:$0xff]  ;;  %v2971_v44 = vcombine.low %v1403_v12, %v1411_v33  ;;  %v2973_v45 = vcombine.low %v1404_v34, %v1412_v35  ;;  %v2960_v12 = vcombine.high %v1389_v27, %v1397_v28  ;;  %v1405_v34 = vld [vmem:[%s4012_s3 + $0x1a0] sm:$0xff] }
  0x94   :  { %v2990_v47 = vcombine.high %v1420_v42, %v1428_v43  ;;  %v1413_v35 = vld [vmem:[%s4012_s3 + $0x1e0] sm:$0xff] }
  0x96   :  { %2130 = vmatpush1.bf16.msra.mxu0 %v2983_v50  ;;  %2171 = vmatpush1.bf16.msra.mxu1 %v2985_v51  ;;  %v1436_v50 = vld [vmem:[%s4012_s3 + $0x298] sm:$0xff] }
  0x97   :  { %2131 = vmatprep.subr.bf16.mxu0 %v3000_v52  ;;  %2172 = vmatprep.subr.bf16.mxu1 %v3002_v53  ;;  %v1444_v51 = vld [vmem:[%s4012_s3 + $0x2d8] sm:$0xff]  ;;  %v2987_v52 = vcombine.low %v1419_v40, %v1427_v41  ;;  %v2989_v53 = vcombine.low %v1420_v42, %v1428_v43  ;;  %v2976_v40 = vcombine.high %v1405_v34, %v1413_v35  ;;  %v1421_v42 = vld [vmem:[%s4012_s3 + $0x220] sm:$0xff] }
  0x98   :  { %v3006_v55 = vcombine.high %v1436_v50, %v1444_v51  ;;  %v1429_v43 = vld [vmem:[%s4012_s3 + $0x260] sm:$0xff] }
  0x9a   :  { %2132 = vmatpush1.bf16.msra.mxu0 %v2999_v58  ;;  %2173 = vmatpush1.bf16.msra.mxu1 %v3001_v59  ;;  %v1452_v58 = vld [vmem:[%s4012_s3 + $0x318] sm:$0xff] }
  0x9b   :  { %2133 = vmatprep.subr.bf16.mxu0 %v3016_v60  ;;  %2174 = vmatprep.subr.bf16.mxu1 %v3018_v61  ;;  %v1460_v59 = vld [vmem:[%s4012_s3 + $0x358] sm:$0xff]  ;;  %v3003_v60 = vcombine.low %v1435_v48, %v1443_v49  ;;  %v3005_v61 = vcombine.low %v1436_v50, %v1444_v51  ;;  %v2992_v48 = vcombine.high %v1421_v42, %v1429_v43  ;;  %v1437_v50 = vld [vmem:[%s4012_s3 + $0x2a0] sm:$0xff] }
  0x9c   :  { %v3022_v63 = vcombine.high %v1452_v58, %v1460_v59  ;;  %v1445_v51 = vld [vmem:[%s4012_s3 + $0x2e0] sm:$0xff] }
  0x9e   :  { %2134 = vmatpush1.bf16.msra.mxu0 %v3015_v2  ;;  %2175 = vmatpush1.bf16.msra.mxu1 %v3017_v4  ;;  %v1468_v2 = vld [vmem:[%s4012_s3 + $0x398] sm:$0xff] }
  0x9f   :  { %2135 = vmatprep.subr.bf16.mxu0 %v3032_v5  ;;  %2176 = vmatprep.subr.bf16.mxu1 %v3034_v6  ;;  %v1476_v4 = vld [vmem:[%s4012_s3 + $0x3d8] sm:$0xff]  ;;  %v3019_v5 = vcombine.low %v1451_v56, %v1459_v57  ;;  %v3021_v6 = vcombine.low %v1452_v58, %v1460_v59  ;;  %v3008_v56 = vcombine.high %v1437_v50, %v1445_v51  ;;  %v1453_v58 = vld [vmem:[%s4012_s3 + $0x320] sm:$0xff] }
  0xa0   :  { %v3038_v8 = vcombine.high %v1468_v2, %v1476_v4  ;;  %v1461_v59 = vld [vmem:[%s4012_s3 + $0x360] sm:$0xff] }
  0xa2   :  { %2136 = vmatpush1.bf16.msra.mxu0 %v3031_v11  ;;  %2177 = vmatpush1.bf16.msra.mxu1 %v3033_v13  ;;  %v1358_v11 = vld [vmem:[%s4012_s3 + $0x28] sm:$0xff] }
  0xa3   :  { %2203 = vmatprep.subr.bf16.mxu0 %v2924_v14  ;;  %2244 = vmatprep.subr.bf16.mxu1 %v2926_v15  ;;  %v1366_v13 = vld [vmem:[%s4012_s3 + $0x68] sm:$0xff]  ;;  %v3035_v14 = vcombine.low %v1467_v0, %v1475_v1  ;;  %v3037_v15 = vcombine.low %v1468_v2, %v1476_v4  ;;  %v3024_v0 = vcombine.high %v1453_v58, %v1461_v59  ;;  %v1469_v2 = vld [vmem:[%s4012_s3 + $0x3a0] sm:$0xff] }
  0xa4   :  { %v2930_v17 = vcombine.high %v1358_v11, %v1366_v13  ;;  %v1477_v4 = vld [vmem:[%s4012_s3 + $0x3e0] sm:$0xff] }
  0xa5   :  { %2154 = vmatmul.mubr.bf16.vlgmr.msra.gmra.mrb[16].mxu0 %v3648_v20  ;;  %2195 = vmatmul.mubr.bf16.vlgmr.msra.gmra.mrb[16].mxu1 %v3648_v20 }
  0xa6   :  { %2204 = vmatpush1.bf16.msra.mxu0 %v2923_v21  ;;  %2245 = vmatpush1.bf16.msra.mxu1 %v2925_v22  ;;  %v1374_v21 = vld [vmem:[%s4012_s3 + $0xa8] sm:$0xff] }
  0xa7   :  { %2205 = vmatprep.subr.bf16.mxu0 %v2940_v23  ;;  %2246 = vmatprep.subr.bf16.mxu1 %v2942_v24  ;;  %v1382_v22 = vld [vmem:[%s4012_s3 + $0xe8] sm:$0xff]  ;;  %v2927_v23 = vcombine.low %v1357_v9, %v1365_v10  ;;  %v2929_v24 = vcombine.low %v1358_v11, %v1366_v13  ;;  %v3040_v9 = vcombine.high %v1469_v2, %v1477_v4  ;;  %v1359_v11 = vld [vmem:[%s4012_s3 + $0x30] sm:$0xff] }
  0xa8   :  { %2235 = vmatprep.mubr.bf16.mxu0 %v3071_v3  ;;  %2276 = vmatprep.mubr.bf16.mxu1 %v3071_v3  ;;  %v2946_v26 = vcombine.high %v1374_v21, %v1382_v22  ;;  %v1367_v13 = vld [vmem:[%s4012_s3 + $0x70] sm:$0xff] }
  0xaa   :  { %2206 = vmatpush1.bf16.msra.mxu0 %v2939_v29  ;;  %2247 = vmatpush1.bf16.msra.mxu1 %v2941_v30  ;;  %v1390_v29 = vld [vmem:[%s4012_s3 + $0x128] sm:$0xff] }
  0xab   :  { %2207 = vmatprep.subr.bf16.mxu0 %v2956_v31  ;;  %2248 = vmatprep.subr.bf16.mxu1 %v2958_v32  ;;  %v1398_v30 = vld [vmem:[%s4012_s3 + $0x168] sm:$0xff]  ;;  %v2943_v31 = vcombine.low %v1373_v18, %v1381_v19  ;;  %v2945_v32 = vcombine.low %v1374_v21, %v1382_v22  ;;  %v2932_v18 = vcombine.high %v1359_v11, %v1367_v13  ;;  %v1375_v21 = vld [vmem:[%s4012_s3 + $0xb0] sm:$0xff] }
  0xac   :  { %v2962_v33 = vcombine.high %v1390_v29, %v1398_v30  ;;  %v1383_v22 = vld [vmem:[%s4012_s3 + $0xf0] sm:$0xff] }
  0xae   :  { %2208 = vmatpush1.bf16.msra.mxu0 %v2955_v36  ;;  %2249 = vmatpush1.bf16.msra.mxu1 %v2957_v37  ;;  %v1406_v36 = vld [vmem:[%s4012_s3 + $0x1a8] sm:$0xff] }
  0xaf   :  { %2209 = vmatprep.subr.bf16.mxu0 %v2972_v38  ;;  %2250 = vmatprep.subr.bf16.mxu1 %v2974_v39  ;;  %v1414_v37 = vld [vmem:[%s4012_s3 + $0x1e8] sm:$0xff]  ;;  %v2959_v38 = vcombine.low %v1389_v27, %v1397_v28  ;;  %v2961_v39 = vcombine.low %v1390_v29, %v1398_v30  ;;  %v2948_v27 = vcombine.high %v1375_v21, %v1383_v22  ;;  %v1391_v29 = vld [vmem:[%s4012_s3 + $0x130] sm:$0xff] }
  0xb0   :  { %v2978_v41 = vcombine.high %v1406_v36, %v1414_v37  ;;  %v1399_v30 = vld [vmem:[%s4012_s3 + $0x170] sm:$0xff] }
  0xb2   :  { %2210 = vmatpush1.bf16.msra.mxu0 %v2971_v44  ;;  %2251 = vmatpush1.bf16.msra.mxu1 %v2973_v45  ;;  %v1422_v44 = vld [vmem:[%s4012_s3 + $0x228] sm:$0xff] }
  0xb3   :  { %2211 = vmatprep.subr.bf16.mxu0 %v2988_v46  ;;  %2252 = vmatprep.subr.bf16.mxu1 %v2990_v47  ;;  %v1430_v45 = vld [vmem:[%s4012_s3 + $0x268] sm:$0xff]  ;;  %v2975_v46 = vcombine.low %v1405_v34, %v1413_v35  ;;  %v2977_v47 = vcombine.low %v1406_v36, %v1414_v37  ;;  %v2964_v34 = vcombine.high %v1391_v29, %v1399_v30  ;;  %v1407_v36 = vld [vmem:[%s4012_s3 + $0x1b0] sm:$0xff] }
  0xb4   :  { %v2994_v49 = vcombine.high %v1422_v44, %v1430_v45  ;;  %v1415_v37 = vld [vmem:[%s4012_s3 + $0x1f0] sm:$0xff] }
  0xb6   :  { %2212 = vmatpush1.bf16.msra.mxu0 %v2987_v52  ;;  %2253 = vmatpush1.bf16.msra.mxu1 %v2989_v53  ;;  %v1438_v52 = vld [vmem:[%s4012_s3 + $0x2a8] sm:$0xff] }
  0xb7   :  { %2213 = vmatprep.subr.bf16.mxu0 %v3004_v54  ;;  %2254 = vmatprep.subr.bf16.mxu1 %v3006_v55  ;;  %v1446_v53 = vld [vmem:[%s4012_s3 + $0x2e8] sm:$0xff]  ;;  %v2991_v54 = vcombine.low %v1421_v42, %v1429_v43  ;;  %v2993_v55 = vcombine.low %v1422_v44, %v1430_v45  ;;  %v2980_v42 = vcombine.high %v1407_v36, %v1415_v37  ;;  %v1423_v44 = vld [vmem:[%s4012_s3 + $0x230] sm:$0xff] }
  0xb8   :  { %v3010_v57 = vcombine.high %v1438_v52, %v1446_v53  ;;  %v1431_v45 = vld [vmem:[%s4012_s3 + $0x270] sm:$0xff] }
  0xba   :  { %2214 = vmatpush1.bf16.msra.mxu0 %v3003_v60  ;;  %2255 = vmatpush1.bf16.msra.mxu1 %v3005_v61  ;;  %v1454_v60 = vld [vmem:[%s4012_s3 + $0x328] sm:$0xff] }
  0xbb   :  { %2215 = vmatprep.subr.bf16.mxu0 %v3020_v62  ;;  %2256 = vmatprep.subr.bf16.mxu1 %v3022_v63  ;;  %v1462_v61 = vld [vmem:[%s4012_s3 + $0x368] sm:$0xff]  ;;  %v3007_v62 = vcombine.low %v1437_v50, %v1445_v51  ;;  %v3009_v63 = vcombine.low %v1438_v52, %v1446_v53  ;;  %v3072_v51 = vmov 1966171168   ;;  %v1150_v53 = vlaneseq }
  0xbc   :  { %v3026_v1 = vcombine.high %v1454_v60, %v1462_v61  ;;  %v1148_v52 = vunpack.c.l.s4 %v3072_v51 }
  0xbe   :  { %2216 = vmatpush1.bf16.msra.mxu0 %v3019_v5  ;;  %2257 = vmatpush1.bf16.msra.mxu1 %v3021_v6  ;;  %v1470_v5 = vld [vmem:[%s4012_s3 + $0x3a8] sm:$0xff] }
  0xbf   :  { %2217 = vmatprep.subr.bf16.mxu0 %v3036_v7  ;;  %2258 = vmatprep.subr.bf16.mxu1 %v3038_v8  ;;  %v1478_v6 = vld [vmem:[%s4012_s3 + $0x3e8] sm:$0xff]  ;;  %v3023_v7 = vcombine.low %v1453_v58, %v1461_v59  ;;  %v3025_v8 = vcombine.low %v1454_v60, %v1462_v61  ;;  %v2995_v58 = vcombine.low %v1423_v44, %v1431_v45  ;;  %v1149_v61 = vunpack.c.0.s8 %v1148_v52 }
  0xc0   :  { %v3042_v10 = vcombine.high %v1470_v5, %v1478_v6 }
  0xc2   :  { %2218 = vmatpush1.bf16.msra.mxu0 %v3035_v14  ;;  %2259 = vmatpush1.bf16.msra.mxu1 %v3037_v15  ;;  %v1360_v14 = vld [vmem:[%s4012_s3 + $0x38] sm:$0xff] }
  0xc3   :  { %2285 = vmatprep.subr.bf16.mxu0 %v2928_v16  ;;  %2326 = vmatprep.subr.bf16.mxu1 %v2930_v17  ;;  %v1368_v15 = vld [vmem:[%s4012_s3 + $0x78] sm:$0xff]  ;;  %v3039_v16 = vcombine.low %v1469_v2, %v1477_v4  ;;  %v3041_v17 = vcombine.low %v1470_v5, %v1478_v6 }
  0xc4   :  { %v2934_v19 = vcombine.high %v1360_v14, %v1368_v15  ;;  %v1456_v2 = vld [vmem:[%s4012_s3 + $0x338] sm:$0xff] }
  0xc5   :  { %2236 = vmatmul.mubr.bf16.vlgmr.msra.gmra.mrb[20].mxu0 %v3648_v20  ;;  %2277 = vmatmul.mubr.bf16.vlgmr.msra.gmra.mrb[20].mxu1 %v3648_v20  ;;  %v1464_v4 = vld [vmem:[%s4012_s3 + $0x378] sm:$0xff] }
  0xc6   :  { %2286 = vmatpush1.bf16.msra.mxu0 %v2927_v23  ;;  %2327 = vmatpush1.bf16.msra.mxu1 %v2929_v24  ;;  %v1376_v23 = vld [vmem:[%s4012_s3 + $0xb8] sm:$0xff] }
  0xc7   :  { %2287 = vmatprep.subr.bf16.mxu0 %v2944_v25  ;;  %2328 = vmatprep.subr.bf16.mxu1 %v2946_v26  ;;  %v1384_v24 = vld [vmem:[%s4012_s3 + $0xf8] sm:$0xff]  ;;  %v2931_v25 = vcombine.low %v1359_v11, %v1367_v13  ;;  %v2933_v26 = vcombine.low %v1360_v14, %v1368_v15  ;;  %v1471_v11 = vld [vmem:[%s4012_s3 + $0x3b0] sm:$0xff] }
  0xc8   :  { %2317 = vmatprep.mubr.bf16.mxu0 %v3071_v3  ;;  %2358 = vmatprep.mubr.bf16.mxu1 %v3071_v3  ;;  %v2950_v28 = vcombine.high %v1376_v23, %v1384_v24  ;;  %v1479_v13 = vld [vmem:[%s4012_s3 + $0x3f0] sm:$0xff] }
  0xca   :  { %2288 = vmatpush1.bf16.msra.mxu0 %v2943_v31  ;;  %2329 = vmatpush1.bf16.msra.mxu1 %v2945_v32  ;;  %v1392_v31 = vld [vmem:[%s4012_s3 + $0x138] sm:$0xff] }
  0xcb   :  { %2289 = vmatprep.subr.bf16.mxu0 %v2960_v12  ;;  %2330 = vmatprep.subr.bf16.mxu1 %v2962_v33  ;;  %v1400_v32 = vld [vmem:[%s4012_s3 + $0x178] sm:$0xff]  ;;  %v2947_v12 = vcombine.low %v1375_v21, %v1383_v22  ;;  %v2949_v33 = vcombine.low %v1376_v23, %v1384_v24 }
  0xcc   :  { %v2966_v35 = vcombine.high %v1392_v31, %v1400_v32 }
  0xce   :  { %2290 = vmatpush1.bf16.msra.mxu0 %v2959_v38  ;;  %2331 = vmatpush1.bf16.msra.mxu1 %v2961_v39  ;;  %v1408_v38 = vld [vmem:[%s4012_s3 + $0x1b8] sm:$0xff] }
  0xcf   :  { %2291 = vmatprep.subr.bf16.mxu0 %v2976_v40  ;;  %2332 = vmatprep.subr.bf16.mxu1 %v2978_v41  ;;  %v1416_v39 = vld [vmem:[%s4012_s3 + $0x1f8] sm:$0xff]  ;;  %v2963_v40 = vcombine.low %v1391_v29, %v1399_v30  ;;  %v2965_v41 = vcombine.low %v1392_v31, %v1400_v32  ;;  %v3043_v32 = vcombine.low %v1471_v11, %v1479_v13 }
  0xd0   :  { %v2982_v43 = vcombine.high %v1408_v38, %v1416_v39 }
  0xd2   :  { %2292 = vmatpush1.bf16.msra.mxu0 %v2975_v46  ;;  %2333 = vmatpush1.bf16.msra.mxu1 %v2977_v47  ;;  %v1432_v46 = vld [vmem:[%s4012_s3 + $0x278] sm:$0xff]  ;;  %v2979_v47 = vcombine.low %v1407_v36, %v1415_v37 }
  0xd3   :  { %2293 = vmatprep.subr.bf16.mxu0 %v2992_v48  ;;  %2334 = vmatprep.subr.bf16.mxu1 %v2994_v49  ;;  %v2981_v48 = vcombine.low %v1408_v38, %v1416_v39  ;;  %v2996_v49 = vcombine.high %v1423_v44, %v1431_v45 }
  0xd6   :  { %2294 = vmatpush1.bf16.msra.mxu0 %v2991_v54  ;;  %2335 = vmatpush1.bf16.msra.mxu1 %v2993_v55  ;;  %v1439_v54 = vld [vmem:[%s4012_s3 + $0x2b0] sm:$0xff] }
  0xd7   :  { %2295 = vmatprep.subr.bf16.mxu0 %v3008_v56  ;;  %2336 = vmatprep.subr.bf16.mxu1 %v3010_v57  ;;  %v1447_v55 = vld [vmem:[%s4012_s3 + $0x2f0] sm:$0xff]  ;;  %v1440_v56 = vld [vmem:[%s4012_s3 + $0x2b8] sm:$0xff] }
  0xd8   :  { %v1448_v57 = vld [vmem:[%s4012_s3 + $0x2f8] sm:$0xff]  ;;  %v3012_v60 = vcombine.high %v1439_v54, %v1447_v55  ;;  %v3011_v5 = vcombine.low %v1439_v54, %v1447_v55 }
  0xd9   :  { %v3013_v6 = vcombine.low %v1440_v56, %v1448_v57 }
  0xda   :  { %2296 = vmatpush1.bf16.msra.mxu0 %v3007_v62  ;;  %2337 = vmatpush1.bf16.msra.mxu1 %v3009_v63  ;;  %v1151_v62 = vshrl.u32 %v1150_v53, 7  ;;  %v3014_v63 = vcombine.high %v1440_v56, %v1448_v57 }
  0xdb   :  { %2297 = vmatprep.subr.bf16.mxu0 %v3024_v0  ;;  %2338 = vmatprep.subr.bf16.mxu1 %v3026_v1  ;;  %v1455_v0 = vld [vmem:[%s4012_s3 + $0x330] sm:$0xff] }
  0xdc   :  { %v1463_v1 = vld [vmem:[%s4012_s3 + $0x370] sm:$0xff] }
  0xdd   :  { %v3027_v22 = vcombine.low %v1455_v0, %v1463_v1 }
  0xde   :  { %2298 = vmatpush1.bf16.msra.mxu0 %v3023_v7  ;;  %2339 = vmatpush1.bf16.msra.mxu1 %v3025_v8  ;;  %v3028_v7 = vcombine.high %v1455_v0, %v1463_v1 }
  0xdf   :  { %2299 = vmatprep.subr.bf16.mxu0 %v3040_v9  ;;  %2340 = vmatprep.subr.bf16.mxu1 %v3042_v10  ;;  %v3914_v9 = vsub.s32 %v1149_v61, %v1151_v62  ;;  %v3030_v10 = vcombine.high %v1456_v2, %v1464_v4 }
  0xe2   :  { %2300 = vmatpush1.bf16.msra.mxu0 %v3039_v16  ;;  %2341 = vmatpush1.bf16.msra.mxu1 %v3041_v17  ;;  %v1472_v16 = vld [vmem:[%s4012_s3 + $0x3b8] sm:$0xff] }
  0xe3   :  { %2367 = vmatprep.subr.bf16.mxu0 %v2932_v18  ;;  %2408 = vmatprep.subr.bf16.mxu1 %v2934_v19  ;;  %v1480_v17 = vld [vmem:[%s4012_s3 + $0x3f8] sm:$0xff] }
  0xe4   :  { %v3046_v30 = vcombine.high %v1472_v16, %v1480_v17 }
  0xe5   :  { %2318 = vmatmul.mubr.bf16.vlgmr.msra.gmra.mrb[24].mxu0 %v3648_v20  ;;  %2359 = vmatmul.mubr.bf16.vlgmr.msra.gmra.mrb[24].mxu1 %v3648_v20 }
  0xe6   :  { %2368 = vmatpush1.bf16.msra.mxu0 %v2931_v25  ;;  %2409 = vmatpush1.bf16.msra.mxu1 %v2933_v26  ;;  %v3029_v26 = vcombine.low %v1456_v2, %v1464_v4 }
  0xe7   :  { %2369 = vmatprep.subr.bf16.mxu0 %v2948_v27  ;;  %2410 = vmatprep.subr.bf16.mxu1 %v2950_v28  ;;  %v3044_v27 = vcombine.high %v1471_v11, %v1479_v13 }
  0xe8   :  { %2399 = vmatprep.mubr.bf16.mxu0 %v3071_v3  ;;  %2440 = vmatprep.mubr.bf16.mxu1 %v3071_v3  ;;  %v1424_v3 = vld [vmem:[%s4012_s3 + $0x238] sm:$0xff] }
  0xe9   :  { %v2998_v50 = vcombine.high %v1424_v3, %v1432_v46  ;;  %v2997_v59 = vcombine.low %v1424_v3, %v1432_v46 }
  0xea   :  { %2370 = vmatpush1.bf16.msra.mxu0 %v2947_v12  ;;  %2411 = vmatpush1.bf16.msra.mxu1 %v2949_v33 }
  0xeb   :  { %2371 = vmatprep.subr.bf16.mxu0 %v2964_v34  ;;  %2412 = vmatprep.subr.bf16.mxu1 %v2966_v35  ;;  %v3045_v34 = vcombine.low %v1472_v16, %v1480_v17 }
  0xee   :  { %2372 = vmatpush1.bf16.msra.mxu0 %v2963_v40  ;;  %2413 = vmatpush1.bf16.msra.mxu1 %v2965_v41 }
  0xef   :  { %2373 = vmatprep.subr.bf16.mxu0 %v2980_v42  ;;  %2414 = vmatprep.subr.bf16.mxu1 %v2982_v43 }
  0xf2   :  { %2374 = vmatpush1.bf16.msra.mxu0 %v2979_v47  ;;  %2415 = vmatpush1.bf16.msra.mxu1 %v2981_v48 }
  0xf3   :  { %2375 = vmatprep.subr.bf16.mxu0 %v2996_v49  ;;  %2416 = vmatprep.subr.bf16.mxu1 %v2998_v50 }
  0xf6   :  { %2376 = vmatpush1.bf16.msra.mxu0 %v2995_v58  ;;  %2417 = vmatpush1.bf16.msra.mxu1 %v2997_v59 }
  0xf7   :  { %2377 = vmatprep.subr.bf16.mxu0 %v3012_v60  ;;  %2418 = vmatprep.subr.bf16.mxu1 %v3014_v63 }
  0xf8   :  { %v833_v8 = vpop.f32.mrb[0].mxu0  ;;  %v874_v14 = vpop.f32.mrb[0].mxu1 }
  0xf9   :  { %v835_v15 = vpop.f32.mrb[1].mxu0  ;;  %v876_v19 = vpop.f32.mrb[1].mxu1 }
  0xfa   :  { %v1143_v18 = vcombine.low %v833_v8, %v835_v15  ;;  %v837_v21 = vpop.f32.mrb[2].mxu0  ;;  %2378 = vmatpush1.bf16.msra.mxu0 %v3011_v5  ;;  %v1144_v23 = vcombine.low %v874_v14, %v876_v19  ;;  %v878_v24 = vpop.f32.mrb[2].mxu1  ;;  %2419 = vmatpush1.bf16.msra.mxu1 %v3013_v6 }
  0xfb   :  { %v838_v25 = vpop.f32.mrb[3].mxu0  ;;  %2379 = vmatprep.subr.bf16.mxu0 %v3028_v7  ;;  %v879_v29 = vpop.f32.mrb[3].mxu1  ;;  %2420 = vmatprep.subr.bf16.mxu1 %v3030_v10 }
  0xfc   :  { %v1153_v28 = vrot.slane %v1143_v18, %v3914_v9  ;;  %v1160_v31 = vrot.slane %v1144_v23, %v3914_v9 }
  0xfe   :  { %2380 = vmatpush1.bf16.msra.mxu0 %v3027_v22  ;;  %v1175_v12 = vcombine.low %v1153_v28, %v1160_v31  ;;  %v1176_v33 = vcombine.high %v1153_v28, %v1160_v31  ;;  %2421 = vmatpush1.bf16.msra.mxu1 %v3029_v26 }
  0xff   :  { %2381 = vmatprep.subr.bf16.mxu0 %v3044_v27  ;;  %2422 = vmatprep.subr.bf16.mxu1 %v3046_v30 }
 0x100   :  { %v1185_v48 = vrot.slane %v1175_v12, %v3914_v9 }
 0x102   :  { %2382 = vmatpush1.bf16.msra.mxu0 %v3043_v32  ;;  %2423 = vmatpush1.bf16.msra.mxu1 %v3045_v34 }
 0x105   :  { %2400 = vmatmul.mubr.bf16.vlgmr.msra.gmra.mrb[28].mxu0 %v3648_v20  ;;  %2441 = vmatmul.mubr.bf16.vlgmr.msra.gmra.mrb[28].mxu1 %v3648_v20  ;;  %v1192_v20 = vrot.slane %v1176_v33, %v3914_v9 }
 0x118   :  { %v915_v35 = vpop.f32.mrb[4].mxu0  ;;  %v956_v36 = vpop.f32.mrb[4].mxu1 }
 0x119   :  { %v917_v37 = vpop.f32.mrb[5].mxu0  ;;  %v958_v39 = vpop.f32.mrb[5].mxu1 }
 0x11a   :  { %v1145_v38 = vcombine.low %v915_v35, %v917_v37  ;;  %v919_v40 = vpop.f32.mrb[6].mxu0  ;;  %v1146_v41 = vcombine.low %v956_v36, %v958_v39  ;;  %v960_v42 = vpop.f32.mrb[6].mxu1 }
 0x11b   :  { %v920_v43 = vpop.f32.mrb[7].mxu0  ;;  %v961_v45 = vpop.f32.mrb[7].mxu1 }
 0x11c   :  { %v1167_v44 = vrot.slane %v1145_v38, %v3914_v9  ;;  %v1174_v3 = vrot.slane %v1146_v41, %v3914_v9 }
 0x11e   :  { %v1177_v46 = vcombine.low %v1167_v44, %v1174_v3  ;;  %v1178_v47 = vcombine.high %v1167_v44, %v1174_v3 }
 0x120   :  { %v1199_v49 = vrot.slane %v1177_v46, %v3914_v9  ;;  %v1206_v50 = vrot.slane %v1178_v47, %v3914_v9 }
 0x122   :  { %v1207_v51 = vcombine.low %v1185_v48, %v1199_v49  ;;  %v1208_v52 = vcombine.low %v1192_v20, %v1206_v50 }
 0x138   :  { %v997_v53 = vpop.f32.mrb[8].mxu0  ;;  %v1038_v54 = vpop.f32.mrb[8].mxu1 }
 0x139   :  { %v999_v55 = vpop.f32.mrb[9].mxu0  ;;  %v1040_v57 = vpop.f32.mrb[9].mxu1 }
 0x13a   :  { %v1209_v56 = vcombine.low %v997_v53, %v999_v55  ;;  %v1001_v58 = vpop.f32.mrb[10].mxu0  ;;  %v1210_v59 = vcombine.low %v1038_v54, %v1040_v57  ;;  %v1042_v60 = vpop.f32.mrb[10].mxu1 }
 0x13b   :  { %v1002_v61 = vpop.f32.mrb[11].mxu0  ;;  %v1043_v63 = vpop.f32.mrb[11].mxu1 }
 0x13c   :  { %v1219_v62 = vrot.slane %v1209_v56, %v3914_v9  ;;  %v1226_v0 = vrot.slane %v1210_v59, %v3914_v9 }
 0x13e   :  { %v1241_v1 = vcombine.low %v1219_v62, %v1226_v0  ;;  %v1242_v2 = vcombine.high %v1219_v62, %v1226_v0 }
 0x140   :  { %v1251_v21 = vrot.slane %v1241_v1, %v3914_v9  ;;  %v1258_v22 = vrot.slane %v1242_v2, %v3914_v9 }
 0x158   :  { %v1079_v4 = vpop.f32.mrb[12].mxu0  ;;  %v1120_v5 = vpop.f32.mrb[12].mxu1 }
 0x159   :  { %v1081_v6 = vpop.f32.mrb[13].mxu0  ;;  %v1122_v8 = vpop.f32.mrb[13].mxu1 }
 0x15a   :  { %v1211_v7 = vcombine.low %v1079_v4, %v1081_v6  ;;  %v1083_v10 = vpop.f32.mrb[14].mxu0  ;;  %v1212_v11 = vcombine.low %v1120_v5, %v1122_v8  ;;  %v1124_v13 = vpop.f32.mrb[14].mxu1 }
 0x15b   :  { %v1084_v14 = vpop.f32.mrb[15].mxu0  ;;  %v1125_v16 = vpop.f32.mrb[15].mxu1 }
 0x15c   :  { %v1233_v15 = vrot.slane %v1211_v7, %v3914_v9  ;;  %v1240_v17 = vrot.slane %v1212_v11, %v3914_v9 }
 0x15e   :  { %v1243_v18 = vcombine.low %v1233_v15, %v1240_v17  ;;  %v1244_v19 = vcombine.high %v1233_v15, %v1240_v17 }
 0x160   :  { %v1265_v23 = vrot.slane %v1243_v18, %v3914_v9  ;;  %v1272_v24 = vrot.slane %v1244_v19, %v3914_v9 }
 0x162   :  { %v1273_v25 = vcombine.low %v1251_v21, %v1265_v23  ;;  %v1274_v26 = vcombine.low %v1258_v22, %v1272_v24 }
 0x164   :  { %v1279_v27 = vadd.f32 %v1273_v25, %v1207_v51 }
 0x166   :  { %v1280_v28 = vadd.f32 %v1279_v27, %v1208_v52 }
 0x168   :  { %v1281_v29 = vadd.f32 %v1280_v28, %v1274_v26 }
 0x16a   :  { %v1282_v30 = vrot.slane %v1281_v29, 4 }
 0x16c   :  { %v1283_v31 = vadd.f32 %v1282_v30, %v1281_v29 }
 0x16e   :  { %v1284_v32 = vrot.slane %v1283_v31, 2 }
 0x170   :  { %v1285_v12 = vadd.f32 %v1284_v32, %v1283_v31 }
 0x172   :  { %v1286_v33 = vrot.slane %v1285_v12, 1 }
 0x174   :  { %v1287_v34 = vadd.f32 %v1286_v33, %v1285_v12 }
 0x176   :  { %v1289_v35 = vmul.f32 0.03125, %v1287_v34 }
 0x178   :  { %v2155_v36 = vpop.f32.mrb[16].mxu0  ;;  %v1290_v37 = vsub.f32 %v1207_v51, %v1289_v35  ;;  %v1291_v38 = vsub.f32 %v1273_v25, %v1289_v35  ;;  %v1292_v39 = vsub.f32 %v1208_v52, %v1289_v35  ;;  %v1293_v40 = vsub.f32 %v1274_v26, %v1289_v35  ;;  %v2196_v41 = vpop.f32.mrb[16].mxu1 }
 0x179   :  { %v2157_v42 = vpop.f32.mrb[17].mxu0  ;;  %v2198_v44 = vpop.f32.mrb[17].mxu1 }
 0x17a   :  { %v2465_v43 = vcombine.low %v2155_v36, %v2157_v42  ;;  %v2159_v45 = vpop.f32.mrb[18].mxu0  ;;  %v1294_v3 = vmul.f32 %v1290_v37, %v1290_v37  ;;  %v1295_v46 = vmul.f32 %v1291_v38, %v1291_v38  ;;  %v2200_v47 = vpop.f32.mrb[18].mxu1  ;;  %v2466_v49 = vcombine.low %v2196_v41, %v2198_v44 }
 0x17b   :  { %v2160_v48 = vpop.f32.mrb[19].mxu0  ;;  %v2201_v50 = vpop.f32.mrb[19].mxu1  ;;  %v1296_v53 = vmul.f32 %v1292_v39, %v1292_v39  ;;  %v1297_v55 = vmul.f32 %v1293_v40, %v1293_v40 }
 0x17c   :  { %v2475_v20 = vrot.slane %v2465_v43, %v3914_v9  ;;  %v1298_v54 = vadd.f32 %v1295_v46, %v1294_v3  ;;  %v2482_v51 = vrot.slane %v2466_v49, %v3914_v9 }
 0x17e   :  { %v1299_v52 = vadd.f32 %v1298_v54, %v1296_v53  ;;  %v2497_v56 = vcombine.low %v2475_v20, %v2482_v51  ;;  %v2498_v57 = vcombine.high %v2475_v20, %v2482_v51 }
 0x180   :  { %v1300_v58 = vadd.f32 %v1299_v52, %v1297_v55  ;;  %v2507_v26 = vrot.slane %v2497_v56, %v3914_v9  ;;  %v2514_v27 = vrot.slane %v2498_v57, %v3914_v9 }
 0x182   :  { %v1301_v59 = vrot.slane %v1300_v58, 4 }
 0x184   :  { %v1302_v60 = vadd.f32 %v1301_v59, %v1300_v58 }
 0x186   :  { %v1303_v61 = vrot.slane %v1302_v60, 2 }
 0x188   :  { %v1304_v62 = vadd.f32 %v1303_v61, %v1302_v60 }
 0x18a   :  { %v1305_v63 = vrot.slane %v1304_v62, 1 }
 0x18c   :  { %v1306_v0 = vadd.f32 %v1305_v63, %v1304_v62 }
 0x18e   :  { %v1307_v1 = vmul.f32 0.03125, %v1306_v0 }
 0x190   :  { %v1308_v2 = vadd.f32 1e-05, %v1307_v1 }
 0x192   :  { %3067 = vrsqrt.f32 %v1308_v2 }
 0x198   :  { %v2237_v4 = vpop.f32.mrb[20].mxu0  ;;  %v2278_v5 = vpop.f32.mrb[20].mxu1 }
 0x199   :  { %v2239_v6 = vpop.f32.mrb[21].mxu0  ;;  %v2280_v8 = vpop.f32.mrb[21].mxu1 }
 0x19a   :  { %v2467_v7 = vcombine.low %v2237_v4, %v2239_v6  ;;  %v2241_v10 = vpop.f32.mrb[22].mxu0  ;;  %v2468_v11 = vcombine.low %v2278_v5, %v2280_v8  ;;  %v2282_v13 = vpop.f32.mrb[22].mxu1 }
 0x19b   :  { %v2242_v14 = vpop.f32.mrb[23].mxu0  ;;  %v2283_v16 = vpop.f32.mrb[23].mxu1 }
 0x19c   :  { %v2489_v15 = vrot.slane %v2467_v7, %v3914_v9  ;;  %v3068_v17 = vpop.eup %3067  ;;  %v2496_v18 = vrot.slane %v2468_v11, %v3914_v9 }
 0x19d   :  { %v3950_v19 = vmul.f32 %v3068_v17, %v1290_v37  ;;  %v3952_v21 = vmul.f32 %v3068_v17, %v1291_v38  ;;  %v3954_v22 = vmul.f32 %v3068_v17, %v1292_v39  ;;  %v3956_v23 = vmul.f32 %v3068_v17, %v1293_v40 }
 0x19e   :  { %v2499_v24 = vcombine.low %v2489_v15, %v2496_v18  ;;  %v2500_v25 = vcombine.high %v2489_v15, %v2496_v18 }
 0x1a0   :  { %v2521_v28 = vrot.slane %v2499_v24, %v3914_v9  ;;  %v2528_v29 = vrot.slane %v2500_v25, %v3914_v9 }
 0x1a2   :  { %v2529_v30 = vcombine.low %v2507_v26, %v2521_v28  ;;  %v2530_v31 = vcombine.low %v2514_v27, %v2528_v29 }
 0x1b8   :  { %v2319_v32 = vpop.f32.mrb[24].mxu0  ;;  %v2360_v12 = vpop.f32.mrb[24].mxu1 }
 0x1b9   :  { %v2321_v33 = vpop.f32.mrb[25].mxu0  ;;  %v2362_v35 = vpop.f32.mrb[25].mxu1 }
 0x1ba   :  { %v2531_v34 = vcombine.low %v2319_v32, %v2321_v33  ;;  %v2323_v36 = vpop.f32.mrb[26].mxu0  ;;  %v2532_v37 = vcombine.low %v2360_v12, %v2362_v35  ;;  %v2364_v38 = vpop.f32.mrb[26].mxu1 }
 0x1bb   :  { %v2324_v39 = vpop.f32.mrb[27].mxu0  ;;  %v2365_v41 = vpop.f32.mrb[27].mxu1 }
 0x1bc   :  { %v2541_v40 = vrot.slane %v2531_v34, %v3914_v9  ;;  %v2548_v42 = vrot.slane %v2532_v37, %v3914_v9  ;;  %v2918_v39 = vld [vmem:[%s4015_s5] ss:$0 sm:$0xff] }
 0x1be   :  { %v2563_v43 = vcombine.low %v2541_v40, %v2548_v42  ;;  %v2564_v44 = vcombine.high %v2541_v40, %v2548_v42 }
 0x1c0   :  { %v2573_v57 = vrot.slane %v2563_v43, %v3914_v9  ;;  %v2580_v58 = vrot.slane %v2564_v44, %v3914_v9 }
 0x1d8   :  { %v2401_v45 = vpop.f32.mrb[28].mxu0  ;;  %v2442_v3 = vpop.f32.mrb[28].mxu1 }
 0x1d9   :  { %v2403_v46 = vpop.f32.mrb[29].mxu0  ;;  %v2444_v48 = vpop.f32.mrb[29].mxu1 }
 0x1da   :  { %v2533_v47 = vcombine.low %v2401_v45, %v2403_v46  ;;  %v2405_v20 = vpop.f32.mrb[30].mxu0  ;;  %v2534_v49 = vcombine.low %v2442_v3, %v2444_v48  ;;  %v2446_v50 = vpop.f32.mrb[30].mxu1  ;;  %v3047_v45 = vld [vmem:[%s4016_s6] ss:$0 sm:$0xff] }
 0x1db   :  { %v2406_v53 = vpop.f32.mrb[31].mxu0  ;;  %v2447_v51 = vpop.f32.mrb[31].mxu1 }
 0x1dc   :  { %v2555_v54 = vrot.slane %v2533_v47, %v3914_v9  ;;  %v2562_v55 = vrot.slane %v2534_v49, %v3914_v9 }
 0x1de   :  { %v2565_v52 = vcombine.low %v2555_v54, %v2562_v55  ;;  %v2566_v56 = vcombine.high %v2555_v54, %v2562_v55 }
 0x1e0   :  { %v2587_v59 = vrot.slane %v2565_v52, %v3914_v9  ;;  %v2594_v60 = vrot.slane %v2566_v56, %v3914_v9 }
 0x1e2   :  { %v2595_v61 = vcombine.low %v2573_v57, %v2587_v59  ;;  %v2596_v62 = vcombine.low %v2580_v58, %v2594_v60 }
 0x1e4   :  { %v2601_v63 = vadd.f32 %v2595_v61, %v2529_v30 }
 0x1e6   :  { %v2602_v0 = vadd.f32 %v2601_v63, %v2530_v31 }
 0x1e8   :  { %v2603_v1 = vadd.f32 %v2602_v0, %v2596_v62 }
 0x1ea   :  { %v2604_v2 = vrot.slane %v2603_v1, 4 }
 0x1ec   :  { %v2605_v4 = vadd.f32 %v2604_v2, %v2603_v1 }
 0x1ee   :  { %v2606_v5 = vrot.slane %v2605_v4, 2 }
 0x1f0   :  { %v2607_v6 = vadd.f32 %v2606_v5, %v2605_v4 }
 0x1f2   :  { %v2608_v7 = vrot.slane %v2607_v6, 1 }
 0x1f4   :  { %v2609_v8 = vadd.f32 %v2608_v7, %v2607_v6 }
 0x1f6   :  { %v2610_v10 = vmul.f32 0.03125, %v2609_v8 }
 0x1f8   :  { %v2611_v11 = vsub.f32 %v2529_v30, %v2610_v10  ;;  %v2612_v13 = vsub.f32 %v2595_v61, %v2610_v10  ;;  %v2613_v14 = vsub.f32 %v2530_v31, %v2610_v10  ;;  %v2614_v15 = vsub.f32 %v2596_v62, %v2610_v10  ;;  %v2917_v30 = vld [vmem:[%s4014_s4] ss:$0 sm:$0xff] }
 0x1f9   :  { %v1321_v31 = vmul.f32 %v2917_v30, %v3950_v19  ;;  %v1322_v36 = vmul.f32 %v2917_v30, %v3952_v21  ;;  %v1323_v37 = vmul.f32 %v2917_v30, %v3954_v22  ;;  %v1324_v38 = vmul.f32 %v2917_v30, %v3956_v23  ;;  %v3048_v22 = vld [vmem:[%s4017_s7] ss:$0 sm:$0xff] }
 0x1fa   :  { %v2615_v16 = vmul.f32 %v2611_v11, %v2611_v11  ;;  %v2616_v17 = vmul.f32 %v2612_v13, %v2612_v13  ;;  %v2617_v18 = vmul.f32 %v2613_v14, %v2613_v14  ;;  %v2618_v24 = vmul.f32 %v2614_v15, %v2614_v15 }
 0x1fb   :  { %v1332_v41 = vadd.f32 %v2918_v39, %v1321_v31  ;;  %v1333_v42 = vadd.f32 %v2918_v39, %v1322_v36  ;;  %v1334_v43 = vadd.f32 %v2918_v39, %v1323_v37  ;;  %v1335_v44 = vadd.f32 %v2918_v39, %v1324_v38 }
 0x1fc   :  { %v2619_v9 = vadd.f32 %v2616_v17, %v2615_v16 }
 0x1fd   :  { %v1336_v49 = vmax.f32 %v1332_v41, 0.0  ;;  %v1337_v50 = vmax.f32 %v1333_v42, 0.0  ;;  %v1338_v53 = vmax.f32 %v1334_v43, 0.0  ;;  %v1339_v54 = vmax.f32 %v1335_v44, 0.0 }
 0x1fe   :  { %v2620_v25 = vadd.f32 %v2619_v9, %v2617_v18 }
 0x1ff   :  { %v1344_v61 = vcombine.high %v1336_v49, %v1336_v49  ;;  %v1345_v62 = vcombine.high %v1337_v50, %v1337_v50  ;;  %v1346_v63 = vcombine.high %v1338_v53, %v1338_v53  ;;  %v1347_v0 = vcombine.high %v1339_v54, %v1339_v54 }
 0x200   :  { %v2621_v26 = vadd.f32 %v2620_v25, %v2618_v24 }
 0x202   :  { %v2622_v27 = vrot.slane %v2621_v26, 4 }
 0x204   :  { %v2623_v28 = vadd.f32 %v2622_v27, %v2621_v26 }
 0x206   :  { %v2624_v29 = vrot.slane %v2623_v28, 2 }
 0x208   :  { %v2625_v32 = vadd.f32 %v2624_v29, %v2623_v28 }
 0x20a   :  { %v2626_v12 = vrot.slane %v2625_v32, 1 }
 0x20c   :  { %v2627_v33 = vadd.f32 %v2626_v12, %v2625_v32 }
 0x20e   :  { %v2628_v34 = vmul.f32 0.03125, %v2627_v33 }
 0x210   :  { %v2629_v35 = vadd.f32 1e-05, %v2628_v34 }
 0x212   :  { %3069 = vrsqrt.f32 %v2629_v35 }
 0x21c   :  { %v3070_v40 = vpop.eup %3069 }
 0x21d   :  { %v2631_v19 = vmul.f32 %v3070_v40, %v2611_v11  ;;  %v2632_v3 = vmul.f32 %v3070_v40, %v2612_v13  ;;  %v2633_v21 = vmul.f32 %v3070_v40, %v2613_v14  ;;  %v2634_v46 = vmul.f32 %v3070_v40, %v2614_v15 }
 0x21f   :  { %v2642_v23 = vmul.f32 %v3047_v45, %v2631_v19  ;;  %v2643_v47 = vmul.f32 %v3047_v45, %v2632_v3  ;;  %v2644_v48 = vmul.f32 %v3047_v45, %v2633_v21  ;;  %v2645_v20 = vmul.f32 %v3047_v45, %v2634_v46 }
 0x221   :  { %v2653_v51 = vadd.f32 %v3048_v22, %v2642_v23  ;;  %v2654_v55 = vadd.f32 %v3048_v22, %v2643_v47  ;;  %v2655_v52 = vadd.f32 %v3048_v22, %v2644_v48  ;;  %v2656_v56 = vadd.f32 %v3048_v22, %v2645_v20 }
 0x223   :  { %v2657_v57 = vmax.f32 %v2653_v51, 0.0  ;;  %v2658_v58 = vmax.f32 %v2654_v55, 0.0  ;;  %v2659_v59 = vmax.f32 %v2655_v52, 0.0  ;;  %v2660_v60 = vmax.f32 %v2656_v56, 0.0 }
 0x225   :  { %v2665_v1 = vcombine.high %v2657_v57, %v2657_v57  ;;  %v2666_v2 = vcombine.high %v2658_v58, %v2658_v58  ;;  %v2667_v4 = vcombine.high %v2659_v59, %v2659_v59  ;;  %v2668_v5 = vcombine.high %v2660_v60, %v2660_v60 }
 0x226   :  { %v3049_v6 = vpack.c.bf16 %v2657_v57, %v1336_v49  ;;  %v3051_v7 = vpack.c.bf16 %v2658_v58, %v1337_v50  ;;  %v3053_v8 = vpack.c.bf16 %v2659_v59, %v1338_v53  ;;  %v3055_v10 = vpack.c.bf16 %v2660_v60, %v1339_v54 }
 0x227   :  { %v3050_v11 = vpack.c.bf16 %v2665_v1, %v1344_v61  ;;  %v3052_v13 = vpack.c.bf16 %v2666_v2, %v1345_v62  ;;  %v3054_v14 = vpack.c.bf16 %v2667_v4, %v1346_v63  ;;  %v3056_v15 = vpack.c.bf16 %v2668_v5, %v1347_v0 }
 0x228   :  { %3057 = vst.sshfl [vmem:[%s4018_s8] sm:$0x33 pattern:$0x76325410] %v3049_v6 }
 0x229   :  { %3059 = vst.sshfl [vmem:[%s4018_s8 + $0x8] sm:$0x33 pattern:$0x76325410] %v3051_v7 }
 0x22a   :  { %3061 = vst.sshfl [vmem:[%s4018_s8 + $0x10] sm:$0x33 pattern:$0x76325410] %v3053_v8 }
 0x22b   :  { %3063 = vst.sshfl [vmem:[%s4018_s8 + $0x18] sm:$0x33 pattern:$0x76325410] %v3055_v10 }
 0x22c   :  { %3058 = vst.sshfl [vmem:[%s4018_s8 + $0x4] sm:$0x33 pattern:$0x76325410] %v3050_v11 }
 0x22d   :  { %3060 = vst.sshfl [vmem:[%s4018_s8 + $0xc] sm:$0x33 pattern:$0x76325410] %v3052_v13 }
 0x22e   :  { %3062 = vst.sshfl [vmem:[%s4018_s8 + $0x14] sm:$0x33 pattern:$0x76325410] %v3054_v14 }
 0x22f   :  { %3064 = vst.sshfl [vmem:[%s4018_s8 + $0x1c] sm:$0x33 pattern:$0x76325410] %v3056_v15 }

// kernel: generator_forward.5
= control target key start
LH: loop header
LB: loop body
LE: loop exit
PB: predicated region body
PF: predicated region fallthrough
CT: control target
= control target key end

     0   :  { %s3391_s18 = smov 0   ;;  %s3393_s19 = smov 0   ;;  %s3800_s0 = inlined_call_operand.vmem [shape: bf16[2,4,4,256], index: 0, kind: input, shape index: {}]   ;;  %s3801_s1 = inlined_call_operand.vmem [shape: f32[1,1,256], index: 1, kind: input, shape index: {}]   ;;  %s3802_s2 = inlined_call_operand.vmem [shape: f32[1,1,256], index: 2, kind: input, shape index: {}]   ;;  %s3803_s3 = inlined_call_operand.vmem [shape: bf16[2,2,1024,128], index: 3, kind: input, shape index: {}]   ;;  %s3804_s4 = inlined_call_operand.vmem [shape: bf16[2,4,2,4,256], index: 4, kind: output, shape index: {0}]   ;;  %s3805_s5 = inlined_call_operand.vmem [shape: f32[2,2,2,128], index: 5, kind: output, shape index: {1}]  }
   0x1   :  { %s3395_s20 = smov 0   ;;  %s3397_s21 = smov 0  }
   0x2   :  { %s3399_s22 = smov 0   ;;  %s3401_s23 = smov 0  }
   0x3   :  { %s3403_s24 = smov 0  }
   0x4 LB: > { %s25_s25 = sadd.s32 1, %s3349_s22  ;;  %s28_s26 = sadd.s32 1, %s3353_s23  ;;  %s3357_s24 = sphi %s3403_s24, %s16_s24   ;;  %s3353_s23 = sphi %s3401_s23, %s3822_s23   ;;  %s3349_s22 = sphi %s3399_s22, %s3821_s22   ;;  %s3345_s21 = sphi %s3397_s21, %s3820_s21   ;;  %s3341_s20 = sphi %s3395_s20, %s3819_s20   ;;  %s3337_s19 = sphi %s3393_s19, %s3818_s19   ;;  %s3333_s18 = sphi %s3391_s18, %s3817_s18  }
   0x5   : > { %p26_p0 = scmp.ge.s32.totalorder %s25_s25, 2  ;;  %s2592_s27 = sadd.s32 4294967295, %s3357_s24  }
   0x6   : > { %p141_p1 = scmp.ne.s32.totalorder %s3337_s19, %s3333_s18  ;;  %p142_p2 = scmp.eq.s32.totalorder %s2592_s27, 3 }
   0x7   : > { %s3824_s25 = smov (%p26_p0, %s25_s25), 0  ;;  %s3826_s26 = smov (!%p26_p0, %s28_s26), %s3353_s23 }
   0x8   : > { %s126_s28 = ssub.s32 %s3349_s22, %s3824_s25  ;;  %p30_p3 = scmp.ge.s32.totalorder %s3826_s26, 2 }
   0x9   : > { %p2596_p4 = scmp.ge.s32.totalorder %s3357_s24, 1  ;;  %p3437_p5 = por %p142_p2, %p141_p1 }
   0xa   : > { %p216_p6 = scmp.lt.s32.totalorder %s3357_s24, 5  ;;  %s3828_s26 = smov (%p30_p3, %s3826_s26), 0 }
   0xb   : > { %s127_s30 = ssub.s32 %s3353_s23, %s3828_s26  ;;  %s131_s7 = sadd.s32 1, %s3337_s19 }
   0xc   : > { %p217_p7 = pnand %p2596_p4, %p216_p6  ;;  %s128_s6 = sor.u32 %s127_s30, %s126_s28 }
   0xd   : > { %p129_p8 = scmp.eq.s32.totalorder %s128_s6, 0  ;;  %p261_p9 = scmp.lt.s32.totalorder (!%p217_p7), %s3345_s21, 1  ;;  %v3359_v0 = vmov (!%p217_p7), 0   ;;  %v291_v16 = vlaneseq (!%p217_p7)  ;;  %v289_v26 = vld [vmem:[%s3801_s1] sm:$0x3] (!%p217_p7)  ;;  %vm398_vm1 = vcmask (!%p217_p7), 1042432  }
   0xe   : > { %220 = sbr.rel (%p217_p7) target bundleno = 426 (0x1aa), region = 36  ;;  %275 = vst [vmem:[#allocation2] sm:$0x77] (!%p217_p7), %v3359_v0  ;;  %276 = vst [vmem:[#allocation2 + $0x8] sm:$0x77] (!%p217_p7), %v3359_v0  ;;  %p256_p10 = scmp.lt.s32.totalorder (!%p217_p7), %s3341_s20, 1 }
   0xf   : > { %s3448_s8 = scalar_select %p129_p8, %s3337_s19, %s131_s7  }
  0x10   : > { %277 = vst [vmem:[#allocation2 + $0x10] sm:$0x77] (!%p217_p7), %v3359_v0  ;;  %278 = vst [vmem:[#allocation2 + $0x18] sm:$0x77] (!%p217_p7), %v3359_v0  ;;  %v3480_v21 = vshrl.u32 (!%p217_p7), %v291_v16, 7  ;;  %vm401_vm2 = vcmask (!%p217_p7), 1046532  }
  0x11   : > { %279 = vst [vmem:[#allocation2 + $0x20] sm:$0x77] (!%p217_p7), %v3359_v0  ;;  %280 = vst [vmem:[#allocation2 + $0x28] sm:$0x77] (!%p217_p7), %v3359_v0  ;;  %v305_v30 = vld [vmem:[%s3802_s2] sm:$0x3] (!%p217_p7) }
  0x12   : > { %v293_v27 = vsub.s32 (!%p217_p7), 0, %v3480_v21  ;;  %v297_v29 = vsub.s32 (!%p217_p7), 1, %v3480_v21  ;;  %vm399_vm0 = vsmask.f32 (!%p217_p7), 2306  ;;  %vm402_vm3 = vsmask.f32 (!%p217_p7), 6418 }
  0x13   : > { %vm3513_vm4 = vmand (!%p217_p7), %vm398_vm1, %vm399_vm0  ;;  %vm528_vm7 = vsmask.f32 (!%p217_p7), 1280  ;;  %vm529_vm8 = vsmask.f32 (!%p217_p7), 3336  ;;  %vm531_vm9 = vsmask.f32 (!%p217_p7), 5392 }
  0x14   : > { %v294_v35 = vrot.slane (!%p217_p7), %v289_v26, %v293_v27  ;;  %v298_v36 = vrot.slane (!%p217_p7), %v289_v26, %v297_v29  ;;  %v310_v38 = vrot.slane (!%p217_p7), %v305_v30, %v293_v27  ;;  %v314_v39 = vrot.slane (!%p217_p7), %v305_v30, %v297_v29  ;;  %vm403_vm5 = vmand (!%p217_p7), %vm401_vm2, %vm402_vm3  ;;  %s243_s12 = sand.u32 (!%p217_p7), 1, %s3333_s18  }
  0x15   : > { %s3452_s9 = scalar_select %p261_p9, %s3345_s21, 1  ;;  %vm404_vm6 = vmor %vm403_vm5, %vm3513_vm4  ;;  %vm533_vm10 = vsmask.f32 7448  ;;  %vm1471_vm14 = vcmask 1040384   ;;  %vm1553_vm15 = vcmask 1042434   ;;  %vm1555_vm1 = vcmask 1044484  }
  0x16   : > { %s3486_s14 = scalar_select %p256_p10, %s3341_s20, 1  ;;  %v299_v43 = vcombine.low %v294_v35, %v298_v36  ;;  %v315_v46 = vcombine.low %v310_v38, %v314_v39  ;;  %v3360_v35 = vmov 1983009808   ;;  %vm530_vm11 = vmor %vm528_vm7, %vm529_vm8  ;;  %vm1557_vm3 = vcmask 1046534  }
  0x17   : > { %s2926_s10 = sshll.u32 %s3452_s9, 10  ;;  %v626_v36 = vunpack.c.l.s4 %v3360_v35  ;;  %vm532_vm12 = vmor %vm530_vm11, %vm531_vm9  ;;  %s2602_s18 = sshll.u32 %s3452_s9, 1 }
  0x18   : > { %s3458_s13 = scalar_lea.vmem %s3803_s3, %s2926_s10  ;;  %s2925_s28 = sshll.u32 %s3486_s14, 4  ;;  %v414_v26 = vld [vmem:[#allocation2 + $0x20] sm:$0x77]  ;;  %vm3547_vm13 = vmor %vm532_vm12, %vm533_vm10 }
  0x19   : > { %v3175_v1 = vld [vmem:[%s3458_s13 + $0x40] sm:$0xff]   ;;  %v3179_v5 = vld [vmem:[%s3458_s13 + $0x48] sm:$0xff]   ;;  %v3183_v9 = vld [vmem:[%s3458_s13 + $0x50] sm:$0xff]   ;;  %s260_s7 = scalar_lea.vmem %s3800_s0, %s2925_s28  ;;  %s2931_s10 = sshll.u32 %s3345_s21, 3 }
  0x1a   : > { %v3176_v2 = vld [vmem:[%s3458_s13 + $0xc0] sm:$0xff]   ;;  %2963 = vmatprep.subr.bf16.mxu1 %v3175_v1  ;;  %v3180_v6 = vld [vmem:[%s3458_s13 + $0xc8] sm:$0xff]   ;;  %v3184_v10 = vld [vmem:[%s3458_s13 + $0xd0] sm:$0xff]   ;;  %s3521_s11 = scalar_lea.vmem [#allocation2], %s2931_s10  ;;  %s271_s16 = sadd.s32 %s2602_s18, %s3486_s14 }
  0x1b   : > { %v3177_v3 = vld [vmem:[%s3458_s13] sm:$0xff]   ;;  %2941 = vmatprep.subr.bf16.mxu0 %v3176_v2  ;;  %v3181_v7 = vld [vmem:[%s3458_s13 + $0x8] sm:$0xff]   ;;  %v3185_v11 = vld [vmem:[%s3458_s13 + $0x10] sm:$0xff]   ;;  %s2603_s17 = sshll.u32 %s271_s16, 1  ;;  %s2920_s9 = sshll.u32 (%p3437_p5), %s3345_s21, 1 }
  0x1c   : > { %v3178_v4 = vld [vmem:[%s3458_s13 + $0x80] sm:$0xff]   ;;  %2964 = vmatpush3.bf16.msra.mxu1 %v3177_v3  ;;  %v3182_v8 = vld [vmem:[%s3458_s13 + $0x88] sm:$0xff]   ;;  %v3186_v12 = vld [vmem:[%s3458_s13 + $0x90] sm:$0xff]   ;;  %s273_s30 = scalar_lea.vmem %s3805_s5, %s2603_s17  ;;  %s2921_s14 = sshll.u32 (%p3437_p5), %s3341_s20, 4 }
  0x1d   : > { %2942 = vmatpush3.bf16.msra.mxu0 %v3178_v4  ;;  %2965 = vmatprep.subr.bf16.mxu1 %v3179_v5  ;;  %v3187_v13 = vld [vmem:[%s3458_s13 + $0x58] sm:$0xff]   ;;  %v3191_v18 = vld [vmem:[%s3458_s13 + $0x60] sm:$0xff]   ;;  %v3195_v23 = vld [vmem:[%s3458_s13 + $0x68] sm:$0xff]   ;;  %s2417_s6 = sadd.s32 (%p3437_p5), %s2921_s14, %s2920_s9 }
  0x1e   : > { %2943 = vmatprep.subr.bf16.mxu0 %v3180_v6  ;;  %v3188_v14 = vld [vmem:[%s3458_s13 + $0xd8] sm:$0xff]   ;;  %v3192_v19 = vld [vmem:[%s3458_s13 + $0xe0] sm:$0xff]   ;;  %v3196_v24 = vld [vmem:[%s3458_s13 + $0xe8] sm:$0xff]  }
  0x1f   : > { %v3189_v15 = vld [vmem:[%s3458_s13 + $0x18] sm:$0xff]   ;;  %v3193_v20 = vld [vmem:[%s3458_s13 + $0x20] sm:$0xff]   ;;  %v3197_v25 = vld [vmem:[%s3458_s13 + $0x28] sm:$0xff]  }
  0x20   : > { %2966 = vmatpush3.bf16.msra.mxu1 %v3181_v7  ;;  %v3190_v17 = vld [vmem:[%s3458_s13 + $0x98] sm:$0xff]   ;;  %v3194_v22 = vld [vmem:[%s3458_s13 + $0xa0] sm:$0xff]   ;;  %v3198_v28 = vld [vmem:[%s3458_s13 + $0xa8] sm:$0xff]  }
  0x21   : > { %2944 = vmatpush3.bf16.msra.mxu0 %v3182_v8  ;;  %2967 = vmatprep.subr.bf16.mxu1 %v3183_v9  ;;  %v3199_v31 = vld [vmem:[%s3458_s13 + $0x70] sm:$0xff]   ;;  %v3203_v37 = vld [vmem:[%s3458_s13 + $0x78] sm:$0xff]   ;;  %v2933_v44 = vld [vmem:[%s260_s7] sm:$0xff]  }
  0x22   : > { %2945 = vmatprep.subr.bf16.mxu0 %v3184_v10  ;;  %v3200_v32 = vld [vmem:[%s3458_s13 + $0xf0] sm:$0xff]   ;;  %v3204_v40 = vld [vmem:[%s3458_s13 + $0xf8] sm:$0xff]   ;;  %v2940_v45 = vld [vmem:[%s260_s7 + $0x8] sm:$0xff]   ;;  %v2934_v47 = vunpack.c.l.bf16 %v2933_v44  ;;  %v2935_v48 = vunpack.c.h.bf16 %v2933_v44  ;;  %s2922_s7 = sshll.u32 (%p3437_p5), %s2417_s6, 1 }
  0x23   : > { %v3201_v33 = vld [vmem:[%s3458_s13 + $0x30] sm:$0xff]   ;;  %v3205_v41 = vld [vmem:[%s3458_s13 + $0x38] sm:$0xff]   ;;  %v2938_v49 = vunpack.c.l.bf16 %v2940_v45  ;;  %v2939_v50 = vunpack.c.h.bf16 %v2940_v45  ;;  %v3207_v51 = vld [vmem:[%s3458_s13 + $0x1c0] sm:$0xff]  }
  0x24   : > { %2968 = vmatpush3.bf16.msra.mxu1 %v3185_v11  ;;  %v3202_v34 = vld [vmem:[%s3458_s13 + $0xb0] sm:$0xff]   ;;  %v3206_v42 = vld [vmem:[%s3458_s13 + $0xb8] sm:$0xff]   ;;  %v301_v52 = vmul.f32 %v2934_v47, %v299_v43  ;;  %v302_v53 = vmul.f32 %v2935_v48, %v299_v43  ;;  %v3208_v56 = vld [vmem:[%s3458_s13 + $0x140] sm:$0xff]  }
  0x25   : > { %2946 = vmatpush3.bf16.msra.mxu0 %v3186_v12  ;;  %2969 = vmatprep.subr.bf16.mxu1 %v3187_v13  ;;  %v303_v54 = vmul.f32 %v2938_v49, %v299_v43  ;;  %v304_v55 = vmul.f32 %v2939_v50, %v299_v43  ;;  %vm3600_vm0 = vmor %vm1471_vm14, %vm1553_vm15 }
  0x26   : > { %2947 = vmatprep.subr.bf16.mxu0 %v3188_v14  ;;  %v317_v57 = vadd.f32 %v315_v46, %v301_v52  ;;  %v318_v58 = vadd.f32 %v315_v46, %v302_v53  ;;  %vm3620_vm2 = vmor %vm3600_vm0, %vm1555_vm1 }
  0x27   : > { %v319_v59 = vadd.f32 %v315_v46, %v303_v54  ;;  %v320_v60 = vadd.f32 %v315_v46, %v304_v55  ;;  %vm3645_vm4 = vmor %vm3620_vm2, %vm1557_vm3 }
  0x28   : > { %2970 = vmatpush3.bf16.msra.mxu1 %v3189_v15  ;;  %v321_v61 = vmax.f32 %v317_v57, 0.0  ;;  %v322_v62 = vmax.f32 %v318_v58, 0.0 }
  0x29   : > { %2948 = vmatpush3.bf16.msra.mxu0 %v3190_v17  ;;  %2971 = vmatprep.subr.bf16.mxu1 %v3191_v18  ;;  %v323_v63 = vmax.f32 %v319_v59, 0.0  ;;  %v324_v0 = vmax.f32 %v320_v60, 0.0  ;;  %v405_v18 = vld [vmem:[#allocation2 + $0x8] sm:$0x77] }
  0x2a   : > { %2949 = vmatprep.subr.bf16.mxu0 %v3192_v19  ;;  %v329_v1 = vcombine.high %v321_v61, %v321_v61  ;;  %v330_v2 = vcombine.high %v322_v62, %v322_v62  ;;  %v408_v19 = vld [vmem:[#allocation2 + $0x10] sm:$0x77] }
  0x2b   : > { %v331_v3 = vcombine.high %v323_v63, %v323_v63  ;;  %v332_v4 = vcombine.high %v324_v0, %v324_v0 }
  0x2c   : > { %2972 = vmatpush3.bf16.msra.mxu1 %v3193_v20  ;;  %v2927_v5 = vpack.c.bf16 %v329_v1, %v321_v61  ;;  %v2928_v6 = vpack.c.bf16 %v330_v2, %v322_v62 }
  0x2d   : > { %2950 = vmatpush3.bf16.msra.mxu0 %v3194_v22  ;;  %2973 = vmatprep.subr.bf16.mxu1 %v3195_v23  ;;  %v2929_v7 = vpack.c.bf16 %v331_v3, %v323_v63  ;;  %v2930_v8 = vpack.c.bf16 %v332_v4, %v324_v0  ;;  %v411_v23 = vld [vmem:[#allocation2 + $0x18] sm:$0x77]  ;;  %v3216_v3 = vld [vmem:[%s3458_s13 + $0x150] sm:$0xff]  }
  0x2e   : > { %2951 = vmatprep.subr.bf16.mxu0 %v3196_v24  ;;  %v366_v10 = vshrl.u32 %v2927_v5, 16  ;;  %v369_v11 = vshll.u32 %v2927_v5, 16  ;;  %v373_v12 = vshrl.u32 %v2928_v6, 16  ;;  %v376_v13 = vshll.u32 %v2928_v6, 16 }
  0x2f   : > { %v380_v14 = vshrl.u32 %v2929_v7, 16  ;;  %v383_v15 = vshll.u32 %v2929_v7, 16  ;;  %v387_v16 = vshrl.u32 %v2930_v8, 16  ;;  %v390_v17 = vshll.u32 %v2930_v8, 16 }
  0x30   : > { %2974 = vmatpush3.bf16.msra.mxu1 %v3197_v25  ;;  %v368_v20 = vrot.slane %v366_v10, 7  ;;  %v375_v22 = vrot.slane %v373_v12, 7  ;;  %v3209_v12 = vld [vmem:[%s3458_s13 + $0x180] sm:$0xff]  }
  0x31   : > { %2952 = vmatpush3.bf16.msra.mxu0 %v3198_v28  ;;  %2975 = vmatprep.subr.bf16.mxu1 %v3199_v31  ;;  %v382_v24 = vrot.slane %v380_v14, 7  ;;  %v389_v25 = vrot.slane %v387_v16, 7  ;;  %v3211_v16 = vld [vmem:[%s3458_s13 + $0x1c8] sm:$0xff]  }
  0x32   : > { %2953 = vmatprep.subr.bf16.mxu0 %v3200_v32  ;;  %v371_v27 = vor.u32 %v369_v11, %v368_v20  ;;  %v378_v28 = vor.u32 %v376_v13, %v375_v22 }
  0x33   : > { %v385_v29 = vor.u32 %v383_v15, %v382_v24  ;;  %v392_v30 = vor.u32 %v390_v17, %v389_v25  ;;  %v3213_v25 = vld [vmem:[%s3458_s13 + $0x188] sm:$0xff]  }
  0x34   : > { %2976 = vmatpush3.bf16.msra.mxu1 %v3201_v33  ;;  %v406_v31 = vsel %vm404_vm6, %v371_v27, %v405_v18  ;;  %v409_v32 = vsel %vm404_vm6, %v378_v28, %v408_v19  ;;  %v3215_v27 = vld [vmem:[%s3458_s13 + $0x1d0] sm:$0xff]  }
  0x35   : > { %2954 = vmatpush3.bf16.msra.mxu0 %v3202_v34  ;;  %2977 = vmatprep.subr.bf16.mxu1 %v3203_v37  ;;  %407 = vst [vmem:[#allocation2 + $0x8] sm:$0x77] %v406_v31  ;;  %410 = vst [vmem:[#allocation2 + $0x10] sm:$0x77] %v409_v32  ;;  %v412_v33 = vsel %vm404_vm6, %v385_v29, %v411_v23  ;;  %v415_v34 = vsel %vm404_vm6, %v392_v30, %v414_v26  ;;  %v627_v37 = vunpack.c.0.s8 %v626_v36 }
  0x36   : > { %2955 = vmatprep.subr.bf16.mxu0 %v3204_v40  ;;  %413 = vst [vmem:[#allocation2 + $0x18] sm:$0x77] %v412_v33  ;;  %416 = vst [vmem:[#allocation2 + $0x20] sm:$0x77] %v415_v34 }
  0x37   : > { %v3525_v39 = vsub.s32 %v627_v37, %v3480_v21 }
  0x38   : > { %2978 = vmatpush3.bf16.msra.mxu1 %v3205_v41 }
  0x39   : > { %2956 = vmatpush3.bf16.msra.mxu0 %v3206_v42  ;;  %3007 = vmatprep.subr.bf16.mxu1 %v3207_v51 }
  0x3a   : > { %2985 = vmatprep.subr.bf16.mxu0 %v3208_v56 }
  0x3d   : > { %v2610_v38 = vld.sshfl [vmem:[%s3521_s11] sm:$0xf pattern:$0x76325410] }
  0x3e   : > { %v3528_v40 = vld.sshfl [vmem:[%s3521_s11 + $0x8] sm:$0xf pattern:$0x76325410] }
  0x3f   : > { %v3531_v41 = vld.sshfl [vmem:[%s3521_s11 + $0x10] sm:$0xf pattern:$0x76325410]  ;;  %v780_v42 = vcombine.low %v2610_v38, %v3528_v40 }
  0x40   : > { %v3535_v43 = vld.sshfl [vmem:[%s3521_s11 + $0x18] sm:$0xf pattern:$0x76325410]  ;;  %v1009_v35 = vcombine.low %v3528_v40, %v3531_v41 }
  0x41   : > { %v781_v44 = vcombine.low %v3531_v41, %v3535_v43  ;;  %v788_v45 = vrot.slane %v780_v42, %v3525_v39  ;;  %v2614_v46 = vld.sshfl [vmem:[%s3521_s11] sm:$0x5f pattern:$0x76325410] }
  0x42   : > { %v2615_v47 = vld.sshfl [vmem:[%s3521_s11 + $0x8] sm:$0x5f pattern:$0x76325410]  ;;  %v503_v21 = vcombine.high %v2614_v46, %v2614_v46  ;;  %v536_v48 = vshrl.u32 %v2614_v46, 16  ;;  %v539_v49 = vshll.u32 %v2614_v46, 16 }
  0x43   : > { %v795_v50 = vrot.slane %v781_v44, %v3525_v39  ;;  %v2616_v51 = vld.sshfl [vmem:[%s3521_s11 + $0x10] sm:$0x5f pattern:$0x76325410]  ;;  %v511_v52 = vcombine.high %v2615_v47, %v2615_v47  ;;  %v550_v53 = vshrl.u32 %v2615_v47, 16  ;;  %v553_v54 = vshll.u32 %v2615_v47, 16 }
  0x44   : > { %v2617_v55 = vld.sshfl [vmem:[%s3521_s11 + $0x18] sm:$0x5f pattern:$0x76325410]  ;;  %v519_v56 = vcombine.high %v2616_v51, %v2616_v51  ;;  %v538_v57 = vrot.slane %v536_v48, 6  ;;  %v541_v58 = vrot.slane %v539_v49, 7  ;;  %v3572_v49 = vrot.slane %v1009_v35, %v3525_v39 }
  0x45   : > { %v797_v59 = vcombine.high %v788_v45, %v795_v50  ;;  %v527_v60 = vcombine.high %v2617_v55, %v2617_v55  ;;  %v545_v61 = vshll.u32 %v503_v21, 16  ;;  %v552_v62 = vrot.slane %v550_v53, 6  ;;  %v2658_v32 = vld.sshfl [vmem:[%s3521_s11 + $0x20] sm:$0xf pattern:$0x76325410] }
  0x46   : > { %v542_v63 = vor.u32 %v541_v58, %v538_v57  ;;  %v555_v0 = vrot.slane %v553_v54, 7  ;;  %v559_v1 = vshll.u32 %v511_v52, 16  ;;  %v564_v2 = vshrl.u32 %v2616_v51, 16  ;;  %v3217_v47 = vld [vmem:[%s3458_s13 + $0x190] sm:$0xff]   ;;  %v3219_v48 = vld [vmem:[%s3458_s13 + $0x1d8] sm:$0xff]   ;;  %v3210_v52 = vld [vmem:[%s3458_s13 + $0x100] sm:$0xff]  }
  0x47   : > { %928 = vmatprep.mubr.bf16.mxu1 %v797_v59  ;;  %v547_v4 = vrot.slane %v545_v61, 7  ;;  %v567_v5 = vshll.u32 %v2616_v51, 16  ;;  %v573_v6 = vshll.u32 %v519_v56, 16  ;;  %v578_v7 = vshrl.u32 %v2617_v55, 16  ;;  %v3223_v59 = vld [vmem:[%s3458_s13 + $0x1e0] sm:$0xff]   ;;  %v3212_v61 = vld [vmem:[%s3458_s13 + $0x148] sm:$0xff]  }
  0x48   : > { %v543_v8 = vrot.slane %v542_v63, 2  ;;  %v556_v9 = vor.u32 %v555_v0, %v552_v62  ;;  %v561_v10 = vrot.slane %v559_v1, 7  ;;  %v566_v11 = vrot.slane %v564_v2, 6  ;;  %v3214_v63 = vld [vmem:[%s3458_s13 + $0x108] sm:$0xff]   ;;  %v3225_v1 = vld [vmem:[%s3458_s13 + $0x1a0] sm:$0xff]   ;;  %v3249_v35 = vld [vmem:[%s3458_s13 + $0x210] sm:$0xff]  }
  0x49   : > { %v569_v13 = vrot.slane %v567_v5, 7  ;;  %v580_v14 = vrot.slane %v578_v7, 6  ;;  %v581_v15 = vshll.u32 %v2617_v55, 16  ;;  %v587_v19 = vshll.u32 %v527_v60, 16  ;;  %v3221_v55 = vld [vmem:[%s3458_s13 + $0x198] sm:$0xff]   ;;  %v3227_v5 = vld [vmem:[%s3458_s13 + $0x1e8] sm:$0xff]  }
  0x4a   : > { %v548_v17 = vsel %vm3547_vm13, %v543_v8, %v547_v4  ;;  %v557_v18 = vrot.slane %v556_v9, 2  ;;  %v796_v20 = vcombine.low %v788_v45, %v795_v50  ;;  %v575_v23 = vrot.slane %v573_v6, 7  ;;  %v2682_v37 = vld.sshfl [vmem:[%s3521_s11 + $0x20] sm:$0x5f pattern:$0x76325410] }
  0x4b   : > { %v570_v22 = vor.u32 %v569_v13, %v566_v11  ;;  %v583_v24 = vrot.slane %v581_v15, 7  ;;  %v589_v30 = vrot.slane %v587_v19, 7  ;;  %v1010_v36 = vcombine.low %v3535_v43, %v2658_v32  ;;  %v3218_v7 = vld [vmem:[%s3458_s13 + $0x110] sm:$0xff]   ;;  %v3229_v9 = vld [vmem:[%s3458_s13 + $0x1a8] sm:$0xff]   ;;  %v3222_v13 = vld [vmem:[%s3458_s13 + $0x118] sm:$0xff]  }
  0x4c   : > { %v562_v26 = vsel %vm3547_vm13, %v557_v18, %v561_v10  ;;  %929 = vmatmul.mubr.bf16.vlgmr.msra.gmra.mrb[0].mxu1 %v796_v20  ;;  %v1207_v38 = vcombine.high %v2682_v37, %v2682_v37  ;;  %v1251_v42 = vshrl.u32 %v2682_v37, 16  ;;  %v1254_v44 = vshll.u32 %v2682_v37, 16  ;;  %v3231_v11 = vld [vmem:[%s3458_s13 + $0x1f0] sm:$0xff]   ;;  %v3235_v15 = vld [vmem:[%s3458_s13 + $0x1f8] sm:$0xff]   ;;  %v3239_v19 = vld [vmem:[%s3458_s13 + $0x240] sm:$0xff]  }
  0x4d   : > { %v571_v28 = vrot.slane %v570_v22, 2  ;;  %v584_v29 = vor.u32 %v583_v24, %v580_v14  ;;  %v623_v31 = vcombine.low %v548_v17, %v562_v26  ;;  %3008 = vmatpush3.bf16.msra.mxu1 %v3209_v12  ;;  %v3575_v50 = vrot.slane %v1010_v36, %v3525_v39  ;;  %v3220_v12 = vld [vmem:[%s3458_s13 + $0x158] sm:$0xff]   ;;  %v3233_v14 = vld [vmem:[%s3458_s13 + $0x1b0] sm:$0xff]   ;;  %v3226_v17 = vld [vmem:[%s3458_s13 + $0x120] sm:$0xff]  }
  0x4e   : > { %3009 = vmatprep.subr.bf16.mxu1 %v3211_v16  ;;  %v1253_v40 = vrot.slane %v1251_v42, 6  ;;  %v1256_v41 = vrot.slane %v1254_v44, 7  ;;  %v1260_v43 = vshll.u32 %v1207_v38, 16  ;;  %v3224_v16 = vld [vmem:[%s3458_s13 + $0x160] sm:$0xff]   ;;  %v3237_v18 = vld [vmem:[%s3458_s13 + $0x1b8] sm:$0xff]   ;;  %v3228_v20 = vld [vmem:[%s3458_s13 + $0x168] sm:$0xff]  }
  0x4f   : > { %v576_v33 = vsel %vm3547_vm13, %v571_v28, %v575_v23  ;;  %v585_v34 = vrot.slane %v584_v29, 2  ;;  %v631_v46 = vrot.slane %v623_v31, %v3525_v39  ;;  %v1026_v62 = vcombine.high %v3572_v49, %v3575_v50  ;;  %v3230_v23 = vld [vmem:[%s3458_s13 + $0x128] sm:$0xff]   ;;  %v3234_v28 = vld [vmem:[%s3458_s13 + $0x130] sm:$0xff]   ;;  %v3236_v31 = vld [vmem:[%s3458_s13 + $0x178] sm:$0xff]  }
  0x50   : > { %v1257_v53 = vor.u32 %v1256_v41, %v1253_v40  ;;  %v1262_v54 = vrot.slane %v1260_v43, 7  ;;  %v1296_v56 = vcombine.low %v562_v26, %v576_v33  ;;  %v3243_v26 = vld [vmem:[%s3458_s13 + $0x248] sm:$0xff]   ;;  %v3238_v32 = vld [vmem:[%s3458_s13 + $0x138] sm:$0xff]   ;;  %v3242_v43 = vld [vmem:[%s3458_s13 + $0x280] sm:$0xff]  }
  0x51   : > { %v590_v45 = vsel %vm3547_vm13, %v585_v34, %v589_v30  ;;  %3010 = vmatpush3.bf16.msra.mxu1 %v3213_v25  ;;  %v3241_v25 = vld [vmem:[%s3458_s13 + $0x200] sm:$0xff]   ;;  %v3245_v29 = vld [vmem:[%s3458_s13 + $0x208] sm:$0xff]   ;;  %v3247_v30 = vld [vmem:[%s3458_s13 + $0x250] sm:$0xff]  }
  0x52   : > { %v624_v21 = vcombine.low %v576_v33, %v590_v45  ;;  %3011 = vmatprep.subr.bf16.mxu1 %v3215_v27  ;;  %v1258_v60 = vrot.slane %v1257_v53, 2  ;;  %v1304_v4 = vrot.slane %v1296_v56, %v3525_v39  ;;  %v3232_v27 = vld [vmem:[%s3458_s13 + $0x170] sm:$0xff]   ;;  %v2731_v33 = vld.sshfl [vmem:[%s3521_s11] sm:$0x5a pattern:$0x76325410] }
  0x53   : > { %v3240_v34 = vld [vmem:[%s3458_s13 + $0x2c0] sm:$0xff]   ;;  %v2732_v36 = vld.sshfl [vmem:[%s3521_s11 + $0x8] sm:$0x5a pattern:$0x76325410]  ;;  %v1527_v37 = vcombine.high %v2731_v33, %v2731_v33  ;;  %v2735_v38 = vrot.slane %v2731_v33, 9 }
  0x54   : > { %v638_v51 = vrot.slane %v624_v21, %v3525_v39  ;;  %v1263_v0 = vsel %vm3547_vm13, %v1258_v60, %v1262_v54  ;;  %v3251_v42 = vld [vmem:[%s3458_s13 + $0x258] sm:$0xff]   ;;  %v2733_v44 = vld.sshfl [vmem:[%s3521_s11 + $0x10] sm:$0x5a pattern:$0x76325410]  ;;  %v1025_v54 = vcombine.low %v3572_v49, %v3575_v50  ;;  %v3255_v60 = vld [vmem:[%s3458_s13 + $0x260] sm:$0xff]  }
  0x55   : > { %3012 = vmatpush3.bf16.msra.mxu1 %v3217_v47  ;;  %v1297_v2 = vcombine.low %v590_v45, %v1263_v0  ;;  %v1535_v45 = vcombine.high %v2732_v36, %v2732_v36  ;;  %v2736_v47 = vrot.slane %v2732_v36, 9  ;;  %v2734_v21 = vld.sshfl [vmem:[%s3521_s11 + $0x18] sm:$0x5a pattern:$0x76325410]  ;;  %v1561_v40 = vrot.slane %v1527_v37, 7 }
  0x56   : > { %v3580_v57 = vcombine.high %v631_v46, %v638_v51  ;;  %v3582_v58 = vcombine.low %v631_v46, %v638_v51  ;;  %3013 = vmatprep.subr.bf16.mxu1 %v3219_v48  ;;  %v1543_v48 = vcombine.high %v2733_v44, %v2733_v44  ;;  %v2737_v41 = vrot.slane %v2733_v44, 9  ;;  %v3253_v56 = vld [vmem:[%s3458_s13 + $0x218] sm:$0xff]   ;;  %v3261_v8 = vld [vmem:[%s3458_s13 + $0x228] sm:$0xff]   ;;  %v3274_v44 = vld [vmem:[%s3458_s13 + $0x300] sm:$0xff]  }
  0x57   : > { %v1311_v6 = vrot.slane %v1297_v2, %v3525_v39  ;;  %v1551_v51 = vcombine.high %v2734_v21, %v2734_v21  ;;  %v2738_v53 = vrot.slane %v2734_v21, 9  ;;  %v3262_v22 = vld [vmem:[%s3458_s13 + $0x2a8] sm:$0xff]   ;;  %v3283_v33 = vld [vmem:[%s3458_s13 + $0x3d8] sm:$0xff]  }
  0x58   : > { %771 = vmatprep.mubr.bf16.mxu0 %v3580_v57  ;;  %v3276_v21 = vld [vmem:[%s3458_s13 + $0x348] sm:$0xff]  }
  0x59   : > { %772 = vmatmul.mubr.bf16.vlgmr.msra.gmra.mrb[0].mxu0 %v3582_v58  ;;  %3014 = vmatpush3.bf16.msra.mxu1 %v3221_v55  ;;  %v3605_v10 = vcombine.high %v1304_v4, %v1311_v6  ;;  %v3625_v24 = vcombine.low %v1304_v4, %v1311_v6  ;;  %v3244_v55 = vld [vmem:[%s3458_s13 + $0x2c8] sm:$0xff]  }
  0x5a   : > { %2986 = vmatpush3.bf16.msra.mxu0 %v3210_v52  ;;  %3015 = vmatprep.subr.bf16.mxu1 %v3223_v59  ;;  %v1565_v52 = vrot.slane %v1535_v45, 7  ;;  %v1569_v59 = vrot.slane %v1543_v48, 7  ;;  %v3287_v45 = vld [vmem:[%s3458_s13 + $0x3e0] sm:$0xff]  }
  0x5b   : > { %2987 = vmatprep.subr.bf16.mxu0 %v3212_v61  ;;  %1157 = vmatprep.mubr.bf16.mxu0 %v1026_v62  ;;  %v1573_v62 = vrot.slane %v1551_v51, 7  ;;  %v3278_v51 = vld [vmem:[%s3458_s13 + $0x308] sm:$0xff]  }
  0x5c   : > { %1444 = vmatprep.mubr.bf16.mxu1 %v3605_v10  ;;  %v3660_v61 = vsel %vm3645_vm4, %v2736_v47, %v1565_v52  ;;  %v3664_v49 = vsel %vm3645_vm4, %v2737_v41, %v1569_v59  ;;  %v3291_v52 = vld [vmem:[%s3458_s13 + $0x3e8] sm:$0xff]   ;;  %v3284_v59 = vld [vmem:[%s3458_s13 + $0x358] sm:$0xff]  }
  0x5d   : > { %3016 = vmatpush3.bf16.msra.mxu1 %v3225_v1  ;;  %v3670_v0 = vsel %vm3645_vm4, %v2738_v53, %v1573_v62  ;;  %v3257_v1 = vld [vmem:[%s3458_s13 + $0x220] sm:$0xff]   ;;  %v3280_v53 = vld [vmem:[%s3458_s13 + $0x350] sm:$0xff]   ;;  %v3301_v62 = vld [vmem:[%s3458_s13 + $0x3b8] sm:$0xff]  }
  0x5e   : > { %2988 = vmatpush3.bf16.msra.mxu0 %v3214_v63  ;;  %3017 = vmatprep.subr.bf16.mxu1 %v3227_v5  ;;  %v3246_v63 = vld [vmem:[%s3458_s13 + $0x288] sm:$0xff]   ;;  %v1608_v2 = vcombine.low %v3664_v49, %v3670_v0 }
  0x5f   : > { %2989 = vmatprep.subr.bf16.mxu0 %v3216_v3  ;;  %v3259_v5 = vld [vmem:[%s3458_s13 + $0x268] sm:$0xff]   ;;  %v3248_v3 = vld [vmem:[%s3458_s13 + $0x2d0] sm:$0xff]  }
  0x60   : > { %v3681_v6 = vrot.slane %v1608_v2, %v3525_v39  ;;  %v3298_v2 = vld [vmem:[%s3458_s13 + $0x330] sm:$0xff]  }
  0x61   : > { %3018 = vmatpush3.bf16.msra.mxu1 %v3229_v9 }
  0x62   : > { %2990 = vmatpush3.bf16.msra.mxu0 %v3218_v7  ;;  %3019 = vmatprep.subr.bf16.mxu1 %v3231_v11  ;;  %v3250_v7 = vld [vmem:[%s3458_s13 + $0x290] sm:$0xff]  }
  0x63   : > { %2991 = vmatprep.subr.bf16.mxu0 %v3220_v12  ;;  %v3263_v11 = vld [vmem:[%s3458_s13 + $0x270] sm:$0xff]   ;;  %v3252_v12 = vld [vmem:[%s3458_s13 + $0x2d8] sm:$0xff]  }
  0x65   : > { %3020 = vmatpush3.bf16.msra.mxu1 %v3233_v14  ;;  %v3265_v14 = vld [vmem:[%s3458_s13 + $0x230] sm:$0xff]  }
  0x66   : > { %2992 = vmatpush3.bf16.msra.mxu0 %v3222_v13  ;;  %3021 = vmatprep.subr.bf16.mxu1 %v3235_v15  ;;  %v3254_v13 = vld [vmem:[%s3458_s13 + $0x298] sm:$0xff]  }
  0x67   : > { %2993 = vmatprep.subr.bf16.mxu0 %v3224_v16  ;;  %v3267_v15 = vld [vmem:[%s3458_s13 + $0x278] sm:$0xff]   ;;  %v3256_v16 = vld [vmem:[%s3458_s13 + $0x2e0] sm:$0xff]  }
  0x69   : > { %3022 = vmatpush3.bf16.msra.mxu1 %v3237_v18  ;;  %v3269_v18 = vld [vmem:[%s3458_s13 + $0x238] sm:$0xff]  }
  0x6a   : > { %2994 = vmatpush3.bf16.msra.mxu0 %v3226_v17  ;;  %3051 = vmatprep.subr.bf16.mxu1 %v3239_v19  ;;  %v3258_v17 = vld [vmem:[%s3458_s13 + $0x2a0] sm:$0xff]  }
  0x6b   : > { %2995 = vmatprep.subr.bf16.mxu0 %v3228_v20  ;;  %v3271_v19 = vld [vmem:[%s3458_s13 + $0x3c0] sm:$0xff]   ;;  %v3260_v20 = vld [vmem:[%s3458_s13 + $0x2e8] sm:$0xff]  }
  0x6c   : > { %1445 = vmatmul.mubr.bf16.vlgmr.msra.gmra.mrb[4].mxu1 %v3625_v24 }
  0x6d   : > { %3052 = vmatpush3.bf16.msra.mxu1 %v3241_v25  ;;  %1892 = vmatprep.mubr.bf16.mxu1 %v3580_v57  ;;  %v1562_v57 = vsel %vm3645_vm4, %v2735_v38, %v1561_v40  ;;  %v3275_v25 = vld [vmem:[%s3458_s13 + $0x3c8] sm:$0xff]   ;;  %v3285_v38 = vld [vmem:[%s3458_s13 + $0x398] sm:$0xff]   ;;  %v3289_v40 = vld [vmem:[%s3458_s13 + $0x3a0] sm:$0xff]  }
  0x6e   : > { %2996 = vmatpush3.bf16.msra.mxu0 %v3230_v23  ;;  %3053 = vmatprep.subr.bf16.mxu1 %v3243_v26  ;;  %v1607_v50 = vcombine.low %v1562_v57, %v3660_v61  ;;  %v3273_v23 = vld [vmem:[%s3458_s13 + $0x380] sm:$0xff]   ;;  %v3264_v26 = vld [vmem:[%s3458_s13 + $0x2f0] sm:$0xff]  }
  0x6f   : > { %2997 = vmatprep.subr.bf16.mxu0 %v3232_v27  ;;  %v3266_v27 = vld [vmem:[%s3458_s13 + $0x2b0] sm:$0xff]  }
  0x70   : > { %v3676_v4 = vrot.slane %v1607_v50, %v3525_v39  ;;  %v3295_v57 = vld [vmem:[%s3458_s13 + $0x3f0] sm:$0xff]   ;;  %v3292_v50 = vld [vmem:[%s3458_s13 + $0x368] sm:$0xff]  }
  0x71   : > { %3054 = vmatpush3.bf16.msra.mxu1 %v3245_v29  ;;  %v3279_v29 = vld [vmem:[%s3458_s13 + $0x3d0] sm:$0xff]  }
  0x72   : > { %2998 = vmatpush3.bf16.msra.mxu0 %v3234_v28  ;;  %3055 = vmatprep.subr.bf16.mxu1 %v3247_v30  ;;  %v1624_v9 = vcombine.high %v3676_v4, %v3681_v6  ;;  %v3277_v28 = vld [vmem:[%s3458_s13 + $0x388] sm:$0xff]   ;;  %v3268_v30 = vld [vmem:[%s3458_s13 + $0x2f8] sm:$0xff]   ;;  %v1623_v37 = vcombine.low %v3676_v4, %v3681_v6 }
  0x73   : > { %2999 = vmatprep.subr.bf16.mxu0 %v3236_v31  ;;  %v3270_v31 = vld [vmem:[%s3458_s13 + $0x2b8] sm:$0xff]  }
  0x74   : > { %v3300_v4 = vld [vmem:[%s3458_s13 + $0x378] sm:$0xff]  }
  0x75   : > { %3056 = vmatpush3.bf16.msra.mxu1 %v3249_v35 }
  0x76   : > { %3000 = vmatpush3.bf16.msra.mxu0 %v3238_v32  ;;  %3057 = vmatprep.subr.bf16.mxu1 %v3251_v42  ;;  %v3281_v32 = vld [vmem:[%s3458_s13 + $0x390] sm:$0xff]   ;;  %v2160_v42 = vcombine.low %v3660_v61, %v3664_v49  ;;  %v3288_v61 = vld [vmem:[%s3458_s13 + $0x360] sm:$0xff]  }
  0x77   : > { %3029 = vmatprep.subr.bf16.mxu0 %v3240_v34  ;;  %v2858_v34 = vld.sshfl [vmem:[%s3521_s11 + $0x20] sm:$0x5a pattern:$0x76325410] }
  0x78   : > { %v2111_v35 = vcombine.high %v2858_v34, %v2858_v34  ;;  %v2862_v36 = vrot.slane %v2858_v34, 9  ;;  %v3290_v49 = vld [vmem:[%s3458_s13 + $0x320] sm:$0xff]  }
  0x79   : > { %1158 = vmatmul.mubr.bf16.vlgmr.msra.gmra.mrb[4].mxu0 %v1025_v54  ;;  %3058 = vmatpush3.bf16.msra.mxu1 %v3253_v56  ;;  %v3293_v54 = vld [vmem:[%s3458_s13 + $0x3a8] sm:$0xff]   ;;  %v3282_v56 = vld [vmem:[%s3458_s13 + $0x310] sm:$0xff]  }
  0x7a   : > { %3030 = vmatpush3.bf16.msra.mxu0 %v3242_v43  ;;  %3059 = vmatprep.subr.bf16.mxu1 %v3255_v60  ;;  %v2126_v47 = vrot.slane %v2111_v35, 7  ;;  %v2168_v43 = vrot.slane %v2160_v42, %v3525_v39  ;;  %v3297_v60 = vld [vmem:[%s3458_s13 + $0x3b0] sm:$0xff]  }
  0x7b   : > { %3031 = vmatprep.subr.bf16.mxu0 %v3244_v55  ;;  %1755 = vmatprep.mubr.bf16.mxu0 %v1624_v9 }
  0x7c   : > { %v2127_v48 = vsel %vm3645_vm4, %v2862_v36, %v2126_v47 }
  0x7d   : > { %3060 = vmatpush3.bf16.msra.mxu1 %v3257_v1  ;;  %v2161_v41 = vcombine.low %v3670_v0, %v2127_v48  ;;  %v3294_v0 = vld [vmem:[%s3458_s13 + $0x328] sm:$0xff]   ;;  %v3296_v1 = vld [vmem:[%s3458_s13 + $0x370] sm:$0xff]  }
  0x7e   : > { %3032 = vmatpush3.bf16.msra.mxu0 %v3246_v63  ;;  %3061 = vmatprep.subr.bf16.mxu1 %v3259_v5  ;;  %v3302_v5 = vld [vmem:[%s3458_s13 + $0x338] sm:$0xff]  }
  0x7f   : > { %3033 = vmatprep.subr.bf16.mxu0 %v3248_v3  ;;  %v2175_v46 = vrot.slane %v2161_v41, %v3525_v39  ;;  %v3286_v39 = vld [vmem:[%s3458_s13 + $0x318] sm:$0xff]  }
  0x81   : > { %3062 = vmatpush3.bf16.msra.mxu1 %v3261_v8  ;;  %v2177_v55 = vcombine.high %v2168_v43, %v2175_v46  ;;  %v2176_v63 = vcombine.low %v2168_v43, %v2175_v46 }
  0x82   : > { %3034 = vmatpush3.bf16.msra.mxu0 %v3250_v7  ;;  %3063 = vmatprep.subr.bf16.mxu1 %v3263_v11 }
  0x83   : > { %3035 = vmatprep.subr.bf16.mxu0 %v3252_v12 }
  0x85   : > { %3064 = vmatpush3.bf16.msra.mxu1 %v3265_v14 }
  0x86   : > { %3036 = vmatpush3.bf16.msra.mxu0 %v3254_v13  ;;  %3065 = vmatprep.subr.bf16.mxu1 %v3267_v15 }
  0x87   : > { %3037 = vmatprep.subr.bf16.mxu0 %v3256_v16 }
  0x89   : > { %3066 = vmatpush3.bf16.msra.mxu1 %v3269_v18 }
  0x8a   : > { %3038 = vmatpush3.bf16.msra.mxu0 %v3258_v17  ;;  %3095 = vmatprep.subr.bf16.mxu1 %v3271_v19 }
  0x8b   : > { %3039 = vmatprep.subr.bf16.mxu0 %v3260_v20 }
  0x8c   : > { %1893 = vmatmul.mubr.bf16.vlgmr.msra.gmra.mrb[8].mxu1 %v3582_v58  ;;  %v3272_v58 = vld [vmem:[%s3458_s13 + $0x340] sm:$0xff]  }
  0x8d   : > { %3096 = vmatpush3.bf16.msra.mxu1 %v3273_v23  ;;  %2308 = vmatprep.mubr.bf16.mxu1 %v2177_v55 }
  0x8e   : > { %3040 = vmatpush3.bf16.msra.mxu0 %v3262_v22  ;;  %3097 = vmatprep.subr.bf16.mxu1 %v3275_v25 }
  0x8f   : > { %3041 = vmatprep.subr.bf16.mxu0 %v3264_v26 }
  0x91   : > { %3098 = vmatpush3.bf16.msra.mxu1 %v3277_v28 }
  0x92   : > { %3042 = vmatpush3.bf16.msra.mxu0 %v3266_v27  ;;  %3099 = vmatprep.subr.bf16.mxu1 %v3279_v29 }
  0x93   : > { %3043 = vmatprep.subr.bf16.mxu0 %v3268_v30 }
  0x95   : > { %3100 = vmatpush3.bf16.msra.mxu1 %v3281_v32 }
  0x96   : > { %3044 = vmatpush3.bf16.msra.mxu0 %v3270_v31  ;;  %3101 = vmatprep.subr.bf16.mxu1 %v3283_v33 }
  0x97   : > { %3073 = vmatprep.subr.bf16.mxu0 %v3272_v58 }
  0x99   : > { %1756 = vmatmul.mubr.bf16.vlgmr.msra.gmra.mrb[8].mxu0 %v1623_v37  ;;  %3102 = vmatpush3.bf16.msra.mxu1 %v3285_v38 }
  0x9a   : > { %3074 = vmatpush3.bf16.msra.mxu0 %v3274_v44  ;;  %3103 = vmatprep.subr.bf16.mxu1 %v3287_v45 }
  0x9b   : > { %3075 = vmatprep.subr.bf16.mxu0 %v3276_v21  ;;  %2061 = vmatprep.mubr.bf16.mxu0 %v3605_v10  ;;  %v3299_v10 = vld [vmem:[%s3458_s13 + $0x3f8] sm:$0xff]   ;;  %s2597_s13 = sshll.u32 %s243_s12, 4  ;;  %s2419_s12 = scalar_lea.vmem (%p3437_p5), %s3804_s4, %s2922_s7 }
  0x9c   : > { %s3755_s15 = scalar_lea.vmem [#allocation3], %s2597_s13 }
  0x9d   : > { %3104 = vmatpush3.bf16.msra.mxu1 %v3289_v40 }
  0x9e   : > { %3076 = vmatpush3.bf16.msra.mxu0 %v3278_v51  ;;  %3105 = vmatprep.subr.bf16.mxu1 %v3291_v52 }
  0x9f   : > { %3077 = vmatprep.subr.bf16.mxu0 %v3280_v53 }
  0xa1   : > { %3106 = vmatpush3.bf16.msra.mxu1 %v3293_v54 }
  0xa2   : > { %3078 = vmatpush3.bf16.msra.mxu0 %v3282_v56  ;;  %3107 = vmatprep.subr.bf16.mxu1 %v3295_v57 }
  0xa3   : > { %3079 = vmatprep.subr.bf16.mxu0 %v3284_v59 }
  0xa5   : > { %3108 = vmatpush3.bf16.msra.mxu1 %v3297_v60 }
  0xa6   : > { %3080 = vmatpush3.bf16.msra.mxu0 %v3286_v39  ;;  %3109 = vmatprep.subr.bf16.mxu1 %v3299_v10 }
  0xa7   : > { %3081 = vmatprep.subr.bf16.mxu0 %v3288_v61 }
  0xa9   : > { %3110 = vmatpush3.bf16.msra.mxu1 %v3301_v62 }
  0xaa   : > { %3082 = vmatpush3.bf16.msra.mxu0 %v3290_v49 }
  0xab   : > { %3083 = vmatprep.subr.bf16.mxu0 %v3292_v50 }
  0xac   : > { %2309 = vmatmul.mubr.bf16.vlgmr.msra.gmra.mrb[12].mxu1 %v2176_v63 }
  0xae   : > { %3084 = vmatpush3.bf16.msra.mxu0 %v3294_v0 }
  0xaf   : > { %3085 = vmatprep.subr.bf16.mxu0 %v3296_v1 }
  0xb2   : > { %3086 = vmatpush3.bf16.msra.mxu0 %v3298_v2 }
  0xb3   : > { %3087 = vmatprep.subr.bf16.mxu0 %v3300_v4 }
  0xb6   : > { %3088 = vmatpush3.bf16.msra.mxu0 %v3302_v5 }
  0xb9   : > { %2062 = vmatmul.mubr.bf16.vlgmr.msra.gmra.mrb[12].mxu0 %v3625_v24 }
 0x11f   : > { %v2979_v3 = vpop.f32.mrb[0].mxu1 }
 0x120   : > { %v2980_v6 = vpop.f32.mrb[1].mxu1 }
 0x121   : > { %v2981_v7 = vadd.f32 %v2980_v6, %v2979_v3  ;;  %v2982_v8 = vpop.f32.mrb[2].mxu1 }
 0x122   : > { %v2983_v9 = vpop.f32.mrb[3].mxu1 }
 0x123   : > { %v2984_v11 = vadd.f32 %v2983_v9, %v2982_v8 }
 0x12c   : > { %v2957_v12 = vpop.f32.mrb[0].mxu0 }
 0x12d   : > { %v2958_v13 = vpop.f32.mrb[1].mxu0 }
 0x12e   : > { %v2959_v14 = vadd.f32 %v2958_v13, %v2957_v12  ;;  %v2960_v15 = vpop.f32.mrb[2].mxu0 }
 0x12f   : > { %v2961_v16 = vpop.f32.mrb[3].mxu0 }
 0x130   : > { %v931_v17 = vadd.f32 %v2981_v7, %v2959_v14  ;;  %v2962_v18 = vadd.f32 %v2961_v16, %v2960_v15 }
 0x132   : > { %v934_v19 = vadd.f32 %v2984_v11, %v2962_v18 }
 0x13f   : > { %v3023_v20 = vpop.f32.mrb[4].mxu1 }
 0x140   : > { %v3024_v22 = vpop.f32.mrb[5].mxu1 }
 0x141   : > { %v3025_v23 = vadd.f32 %v3024_v22, %v3023_v20  ;;  %v3026_v25 = vpop.f32.mrb[6].mxu1 }
 0x142   : > { %v3027_v26 = vpop.f32.mrb[7].mxu1 }
 0x143   : > { %v3028_v24 = vadd.f32 %v3027_v26, %v3026_v25 }
 0x14c   : > { %v3001_v27 = vpop.f32.mrb[4].mxu0 }
 0x14d   : > { %v3002_v28 = vpop.f32.mrb[5].mxu0 }
 0x14e   : > { %v3003_v29 = vadd.f32 %v3002_v28, %v3001_v27  ;;  %v3004_v30 = vpop.f32.mrb[6].mxu0 }
 0x14f   : > { %v3005_v31 = vpop.f32.mrb[7].mxu0 }
 0x150   : > { %v1166_v32 = vadd.f32 %v3003_v29, %v931_v17  ;;  %v3006_v33 = vadd.f32 %v3005_v31, %v3004_v30 }
 0x152   : > { %v1453_v58 = vadd.f32 %v3025_v23, %v1166_v32  ;;  %v1167_v34 = vadd.f32 %v3006_v33, %v934_v19 }
 0x154   : > { %v3746_v35 = vadd.f32 %v3028_v24, %v1167_v34  ;;  %v1462_v36 = vmul.f32 %v1453_v58, %v1453_v58  ;;  %v1475_v18 = vcombine.high %v1453_v58, %v1453_v58 }
 0x156   : > { %v1455_v37 = vadd.f32 %v3746_v35, %v1453_v58  ;;  %v1463_v38 = vmul.f32 %v3746_v35, %v3746_v35  ;;  %v1476_v23 = vcombine.high %v3746_v35, %v3746_v35 }
 0x158   : > { %v1456_v42 = vrot.slane %v1455_v37, 4  ;;  %v1464_v44 = vadd.f32 %v1463_v38, %v1462_v36 }
 0x15a   : > { %v1457_v45 = vadd.f32 %v1456_v42, %v1455_v37  ;;  %v1465_v47 = vrot.slane %v1464_v44, 4 }
 0x15c   : > { %v1458_v21 = vrot.slane %v1457_v45, 2  ;;  %v1466_v48 = vadd.f32 %v1465_v47, %v1464_v44 }
 0x15e   : > { %v1459_v40 = vadd.f32 %v1458_v21, %v1457_v45  ;;  %v1467_v41 = vrot.slane %v1466_v48, 2 }
 0x15f   : > { %v3067_v43 = vpop.f32.mrb[8].mxu1 }
 0x160   : > { %v1460_v51 = vrot.slane %v1459_v40, 1  ;;  %v1468_v52 = vadd.f32 %v1467_v41, %v1466_v48  ;;  %v3068_v53 = vpop.f32.mrb[9].mxu1 }
 0x161   : > { %v3069_v46 = vadd.f32 %v3068_v53, %v3067_v43  ;;  %v3070_v54 = vpop.f32.mrb[10].mxu1 }
 0x162   : > { %v1469_v55 = vrot.slane %v1468_v52, 1  ;;  %v3071_v56 = vpop.f32.mrb[11].mxu1  ;;  %v1461_v59 = vadd.f32 %v1460_v51, %v1459_v40 }
 0x163   : > { %v3072_v57 = vadd.f32 %v3071_v56, %v3070_v54 }
 0x164   : > { %v1470_v60 = vadd.f32 %v1469_v55, %v1468_v52 }
 0x166   : > { %v1472_v39 = vsel %vm1471_vm14, %v1461_v59, %v1470_v60 }
 0x16c   : > { %v3045_v10 = vpop.f32.mrb[8].mxu0 }
 0x16d   : > { %v3046_v61 = vpop.f32.mrb[9].mxu0 }
 0x16e   : > { %v3047_v62 = vadd.f32 %v3046_v61, %v3045_v10  ;;  %v3048_v49 = vpop.f32.mrb[10].mxu0 }
 0x16f   : > { %v3049_v50 = vpop.f32.mrb[11].mxu0 }
 0x170   : > { %v1895_v63 = vadd.f32 %v3069_v46, %v3047_v62  ;;  %v3050_v0 = vadd.f32 %v3049_v50, %v3048_v49 }
 0x172   : > { %v1898_v1 = vadd.f32 %v3072_v57, %v3050_v0 }
 0x17f   : > { %v3111_v2 = vpop.f32.mrb[12].mxu1 }
 0x180   : > { %v3112_v4 = vpop.f32.mrb[13].mxu1 }
 0x181   : > { %v3113_v5 = vadd.f32 %v3112_v4, %v3111_v2  ;;  %v3114_v3 = vpop.f32.mrb[14].mxu1 }
 0x182   : > { %v3115_v6 = vpop.f32.mrb[15].mxu1 }
 0x183   : > { %v3116_v7 = vadd.f32 %v3115_v6, %v3114_v3 }
 0x18c   : > { %v3089_v8 = vpop.f32.mrb[12].mxu0 }
 0x18d   : > { %v3090_v9 = vpop.f32.mrb[13].mxu0 }
 0x18e   : > { %v3091_v11 = vadd.f32 %v3090_v9, %v3089_v8  ;;  %v3092_v12 = vpop.f32.mrb[14].mxu0 }
 0x18f   : > { %v3093_v13 = vpop.f32.mrb[15].mxu0 }
 0x190   : > { %v2070_v14 = vadd.f32 %v3091_v11, %v1895_v63  ;;  %v3094_v15 = vadd.f32 %v3093_v13, %v3092_v12 }
 0x192   : > { %v2317_v16 = vadd.f32 %v3113_v5, %v2070_v14  ;;  %v2071_v17 = vadd.f32 %v3094_v15, %v1898_v1 }
 0x194   : > { %v2339_v19 = vcombine.high %v2317_v16, %v2317_v16  ;;  %v2911_v20 = vpack.c.bf16 %v2317_v16, %v1453_v58  ;;  %v2318_v22 = vadd.f32 %v3116_v7, %v2071_v17  ;;  %v2326_v25 = vmul.f32 %v2317_v16, %v2317_v16 }
 0x196   : > { %v2912_v26 = vpack.c.bf16 %v2339_v19, %v1475_v18  ;;  %2915 = vst.sshfl [vmem:[%s3755_s15] sm:$0x33 pattern:$0x76325410] %v2911_v20  ;;  %v2319_v24 = vadd.f32 %v2318_v22, %v2317_v16  ;;  %v2327_v27 = vmul.f32 %v2318_v22, %v2318_v22  ;;  %v2340_v28 = vcombine.high %v2318_v22, %v2318_v22 }
 0x197   : > { %v2913_v29 = vpack.c.bf16 %v2318_v22, %v3746_v35 }
 0x198   : > { %2916 = vst.sshfl [vmem:[%s3755_s15 + $0x4] sm:$0x33 pattern:$0x76325410] %v2912_v26  ;;  %v2320_v30 = vrot.slane %v2319_v24, 4  ;;  %v2328_v31 = vadd.f32 %v2327_v27, %v2326_v25  ;;  %v2914_v32 = vpack.c.bf16 %v2340_v28, %v1476_v23 }
 0x199   : > { %2917 = vst.sshfl [vmem:[%s3755_s15 + $0x8] sm:$0x33 pattern:$0x76325410] %v2913_v29 }
 0x19a   : > { %v2321_v33 = vadd.f32 %v2320_v30, %v2319_v24  ;;  %v2329_v58 = vrot.slane %v2328_v31, 4  ;;  %2918 = vst.sshfl [vmem:[%s3755_s15 + $0xc] sm:$0x33 pattern:$0x76325410] %v2914_v32 }
 0x19c   : > { %v2322_v34 = vrot.slane %v2321_v33, 2  ;;  %v2330_v36 = vadd.f32 %v2329_v58, %v2328_v31 }
 0x19d   : > { %v2435_v40 = vld [vmem:[%s3755_s15] sm:$0xf] (%p3437_p5) }
 0x19e   : > { %v2323_v37 = vadd.f32 %v2322_v34, %v2321_v33  ;;  %v2331_v38 = vrot.slane %v2330_v36, 2  ;;  %2436 = vst [vmem:[%s2419_s12] sm:$0xf] (%p3437_p5), %v2435_v40 }
 0x19f   : > { %v2437_v41 = vld [vmem:[%s3755_s15 + $0x4] sm:$0xf] (%p3437_p5) }
 0x1a0   : > { %v2324_v42 = vrot.slane %v2323_v37, 1  ;;  %v2332_v44 = vadd.f32 %v2331_v38, %v2330_v36  ;;  %v2439_v43 = vld [vmem:[%s3755_s15 + $0x8] sm:$0xf] (%p3437_p5)  ;;  %2438 = vst [vmem:[%s2419_s12 + $0x8] sm:$0xf] (%p3437_p5), %v2437_v41 }
 0x1a1   : > { %v2441_v51 = vld [vmem:[%s3755_s15 + $0xc] sm:$0xf] (%p3437_p5)  ;;  %2440 = vst [vmem:[%s2419_s12 + $0x10] sm:$0xf] (%p3437_p5), %v2439_v43 }
 0x1a2   : > { %v2333_v45 = vrot.slane %v2332_v44, 1  ;;  %v2325_v47 = vadd.f32 %v2324_v42, %v2323_v37  ;;  %2442 = vst [vmem:[%s2419_s12 + $0x18] sm:$0xf] (%p3437_p5), %v2441_v51 }
 0x1a3   : > { %2414 = sbr.rel (!%p3437_p5) target bundleno = 426 (0x1aa), region = 40 }
 0x1a4   : > { %v2334_v35 = vadd.f32 %v2333_v45, %v2332_v44 }
 0x1a6   : > { %v2335_v21 = vsel %vm1471_vm14, %v2325_v47, %v2334_v35 }
 0x1a7   : > { %v2336_v48 = vadd.f32 %v2335_v21, %v1472_v39 }
 0x1a9   : > { %2399 = vst [vmem:[%s273_s30] sm:$0x3] %v2336_v48 }
 0x1aa PF: > { %s16_s24 = sadd.s32 1, %s3357_s24   ;;  %s3817_s18 = smov %s3337_s19 }
 0x1ab   : > { %p13_p11 = scmp.ge.s32.totalorder %s16_s24, 6   ;;  %s3818_s19 = smov %s3448_s8 }
 0x1ac   : > { %s3819_s20 = smov %s3349_s22  ;;  %s3820_s21 = smov %s3353_s23 }
 0x1ad   : > { %s3821_s22 = smov %s3824_s25  ;;  %s3822_s23 = smov %s3828_s26 }
 0x1ae   :  { %15 = sbr.rel (!%p13_p11) target bundleno = 4 (0x4), region = 126 }

// kernel: generator_forward.6
= control target key start
LH: loop header
LB: loop body
LE: loop exit
PB: predicated region body
PF: predicated region fallthrough
CT: control target
= control target key end

     0   :  { %s3257_s18 = smov 0   ;;  %s3259_s19 = smov 0   ;;  %s3761_s0 = inlined_call_operand.vmem [shape: bf16[2,8,8,128], index: 0, kind: input, shape index: {}]   ;;  %s3762_s1 = inlined_call_operand.vmem [shape: f32[1,1,128], index: 1, kind: input, shape index: {}]   ;;  %s3763_s2 = inlined_call_operand.vmem [shape: f32[1,1,128], index: 2, kind: input, shape index: {}]   ;;  %s3764_s3 = inlined_call_operand.vmem [shape: bf16[2,2,512,128], index: 3, kind: input, shape index: {}]   ;;  %s3765_s4 = inlined_call_operand.vmem [shape: bf16[2,8,2,8,256], index: 4, kind: output, shape index: {0}]   ;;  %s3766_s5 = inlined_call_operand.vmem [shape: f32[2,2,2,128], index: 5, kind: output, shape index: {1}]  }
   0x1   :  { %s3261_s20 = smov 0   ;;  %s3263_s21 = smov 0  }
   0x2   :  { %s3265_s22 = smov 0   ;;  %s3267_s23 = smov 0  }
   0x3   :  { %s3269_s24 = smov 0  }
   0x4 LB: > { %s25_s25 = sadd.s32 1, %s3216_s22  ;;  %s28_s26 = sadd.s32 1, %s3220_s23  ;;  %s3224_s24 = sphi %s3269_s24, %s16_s24   ;;  %s3220_s23 = sphi %s3267_s23, %s3781_s23   ;;  %s3216_s22 = sphi %s3265_s22, %s3780_s22   ;;  %s3212_s21 = sphi %s3263_s21, %s3779_s21   ;;  %s3208_s20 = sphi %s3261_s20, %s3778_s20   ;;  %s3204_s19 = sphi %s3259_s19, %s3777_s19   ;;  %s3200_s18 = sphi %s3257_s18, %s3776_s18  }
   0x5   : > { %p26_p0 = scmp.ge.s32.totalorder %s25_s25, 2  ;;  %s2428_s27 = sadd.s32 4294967295, %s3224_s24  }
   0x6   : > { %p141_p1 = scmp.ne.s32.totalorder %s3204_s19, %s3200_s18  ;;  %p142_p2 = scmp.eq.s32.totalorder %s2428_s27, 3 }
   0x7   : > { %s3783_s25 = smov (%p26_p0, %s25_s25), 0  ;;  %s3785_s26 = smov (!%p26_p0, %s28_s26), %s3220_s23 }
   0x8   : > { %s126_s28 = ssub.s32 %s3216_s22, %s3783_s25  ;;  %p30_p3 = scmp.ge.s32.totalorder %s3785_s26, 2 }
   0x9   : > { %p2432_p4 = scmp.ge.s32.totalorder %s3224_s24, 1  ;;  %p3303_p5 = por %p142_p2, %p141_p1 }
   0xa   : > { %p216_p6 = scmp.lt.s32.totalorder %s3224_s24, 5  ;;  %s3787_s26 = smov (%p30_p3, %s3785_s26), 0 }
   0xb   : > { %s127_s30 = ssub.s32 %s3220_s23, %s3787_s26  ;;  %s131_s7 = sadd.s32 1, %s3204_s19 }
   0xc   : > { %p217_p7 = pnand %p2432_p4, %p216_p6  ;;  %s128_s6 = sor.u32 %s127_s30, %s126_s28 }
   0xd   : > { %p129_p8 = scmp.eq.s32.totalorder %s128_s6, 0  ;;  %p261_p9 = scmp.lt.s32.totalorder (!%p217_p7), %s3212_s21, 1  ;;  %v3226_v0 = vmov (!%p217_p7), 0   ;;  %v2440_v11 = vld [vmem:[%s3762_s1] ss:$0 sm:$0xff] (!%p217_p7)  ;;  %vm462_vm0 = vcmask (!%p217_p7), 1043456  }
   0xe   : > { %220 = sbr.rel (%p217_p7) target bundleno = 431 (0x1af), region = 36  ;;  %275 = vst [vmem:[#allocation2] sm:$0xf] (!%p217_p7), %v3226_v0  ;;  %276 = vst [vmem:[#allocation2 + $0x4] sm:$0x1] (!%p217_p7), %v3226_v0  ;;  %p256_p10 = scmp.lt.s32.totalorder (!%p217_p7), %s3208_s20, 1 }
   0xf   : > { %s3314_s8 = scalar_select %p129_p8, %s3204_s19, %s131_s7  }
  0x10   : > { %277 = vst [vmem:[#allocation2 + $0x8] sm:$0xf] (!%p217_p7), %v3226_v0  ;;  %278 = vst [vmem:[#allocation2 + $0xc] sm:$0x1] (!%p217_p7), %v3226_v0  ;;  %v2441_v26 = vld [vmem:[%s3763_s2] ss:$0 sm:$0xff] (!%p217_p7) }
  0x11   : > { %279 = vst [vmem:[#allocation2 + $0x10] sm:$0xf] (!%p217_p7), %v3226_v0  ;;  %280 = vst [vmem:[#allocation2 + $0x14] sm:$0x1] (!%p217_p7), %v3226_v0  ;;  %vm463_vm1 = vsmask.f32 (!%p217_p7), 7938 }
  0x12   : > { %281 = vst [vmem:[#allocation2 + $0x18] sm:$0xf] (!%p217_p7), %v3226_v0  ;;  %282 = vst [vmem:[#allocation2 + $0x1c] sm:$0x1] (!%p217_p7), %v3226_v0  ;;  %vm468_vm2 = vcmask (!%p217_p7), 1040384   ;;  %vm1479_vm6 = vcmask (!%p217_p7), 1042432  }
  0x13   : > { %283 = vst [vmem:[#allocation2 + $0x20] sm:$0xf] (!%p217_p7), %v3226_v0  ;;  %284 = vst [vmem:[#allocation2 + $0x24] sm:$0x1] (!%p217_p7), %v3226_v0  ;;  %vm469_vm3 = vsmask.f32 (!%p217_p7), 256 }
  0x14   : > { %285 = vst [vmem:[#allocation2 + $0x28] sm:$0xf] (!%p217_p7), %v3226_v0  ;;  %286 = vst [vmem:[#allocation2 + $0x2c] sm:$0x1] (!%p217_p7), %v3226_v0  ;;  %vm1480_vm7 = vcmask (!%p217_p7), 1046532   ;;  %s243_s12 = sand.u32 (!%p217_p7), 1, %s3200_s18  }
  0x15   : > { %287 = vst [vmem:[#allocation2 + $0x30] sm:$0xf] %v3226_v0  ;;  %288 = vst [vmem:[#allocation2 + $0x34] sm:$0x1] %v3226_v0  ;;  %s3320_s9 = scalar_select %p261_p9, %s3212_s21, 1 }
  0x16   : > { %289 = vst [vmem:[#allocation2 + $0x38] sm:$0xf] %v3226_v0  ;;  %290 = vst [vmem:[#allocation2 + $0x3c] sm:$0x1] %v3226_v0  ;;  %s3336_s14 = scalar_select %p256_p10, %s3208_s20, 1 }
  0x17   : > { %291 = vst [vmem:[#allocation2 + $0x40] sm:$0xf] %v3226_v0  ;;  %292 = vst [vmem:[#allocation2 + $0x44] sm:$0x1] %v3226_v0  ;;  %s2668_s10 = sshll.u32 %s3320_s9, 9 }
  0x18   : > { %293 = vst [vmem:[#allocation2 + $0x48] sm:$0xf] %v3226_v0  ;;  %294 = vst [vmem:[#allocation2 + $0x4c] sm:$0x1] %v3226_v0  ;;  %s3326_s13 = scalar_lea.vmem %s3764_s3, %s2668_s10  ;;  %s2667_s15 = sshll.u32 %s3336_s14, 5 }
  0x19   : > { %v3098_v1 = vld [vmem:[%s3326_s13 + $0x140] sm:$0xff]   ;;  %v3100_v3 = vld [vmem:[%s3326_s13 + $0x148] sm:$0xff]   ;;  %v3102_v5 = vld [vmem:[%s3326_s13 + $0x150] sm:$0xff]   ;;  %s260_s27 = scalar_lea.vmem %s3761_s0, %s2667_s15  ;;  %s2677_s10 = sshll.u32 %s3212_s21, 3  ;;  %vm551_vm9 = vsmask.f32 3328 }
  0x1a   : > { %v3099_v2 = vld [vmem:[%s3326_s13 + $0x40] sm:$0xff]   ;;  %2897 = vmatprep.subr.bf16.mxu1 %v3098_v1  ;;  %v3101_v4 = vld [vmem:[%s3326_s13 + $0x48] sm:$0xff]   ;;  %v3103_v6 = vld [vmem:[%s3326_s13 + $0x50] sm:$0xff]   ;;  %vm552_vm10 = vsmask.f32 7440  ;;  %s3427_s11 = scalar_lea.vmem [#allocation2], %s2677_s10 }
  0x1b   : > { %2898 = vmatpush3.bf16.msra.mxu1 %v3098_v1  ;;  %2801 = vmatprep.subr.bf16.mxu0 %v3099_v2  ;;  %v3104_v7 = vld [vmem:[%s3326_s13 + $0x158] sm:$0xff]   ;;  %v3106_v9 = vld [vmem:[%s3326_s13 + $0x160] sm:$0xff]   ;;  %v3108_v12 = vld [vmem:[%s3326_s13 + $0x168] sm:$0xff]   ;;  %s2438_s15 = sshll.u32 %s3320_s9, 1  ;;  %s2662_s9 = sshll.u32 (%p3303_p5), %s3212_s21, 1 }
  0x1c   : > { %2802 = vmatpush3.bf16.msra.mxu0 %v3099_v2  ;;  %2899 = vmatprep.subr.bf16.mxu1 %v3100_v3  ;;  %v3105_v8 = vld [vmem:[%s3326_s13 + $0x58] sm:$0xff]   ;;  %v3107_v10 = vld [vmem:[%s3326_s13 + $0x60] sm:$0xff]   ;;  %v2702_v14 = vld [vmem:[%s260_s27 + $0x8] sm:$0xff]   ;;  %s271_s16 = sadd.s32 %s2438_s15, %s3336_s14  ;;  %s2663_s14 = sshll.u32 (%p3303_p5), %s3208_s20, 5 }
  0x1d   : > { %2803 = vmatprep.subr.bf16.mxu0 %v3101_v4  ;;  %v2687_v13 = vld [vmem:[%s260_s27] sm:$0xff]   ;;  %v2703_v15 = vld [vmem:[%s260_s27 + $0x10] sm:$0xff]   ;;  %v3109_v16 = vld [vmem:[%s3326_s13 + $0x68] sm:$0xff]   ;;  %v2692_v19 = vunpack.c.l.bf16 %v2702_v14  ;;  %v2693_v20 = vunpack.c.h.bf16 %v2702_v14  ;;  %s2439_s17 = sshll.u32 %s271_s16, 1  ;;  %s2244_s6 = sadd.s32 (%p3303_p5), %s2663_s14, %s2662_s9 }
  0x1e   : > { %v2688_v17 = vunpack.c.l.bf16 %v2687_v13  ;;  %v2689_v18 = vunpack.c.h.bf16 %v2687_v13  ;;  %v2704_v21 = vld [vmem:[%s260_s27 + $0x18] sm:$0xff]   ;;  %v2696_v22 = vunpack.c.l.bf16 %v2703_v15  ;;  %v2697_v23 = vunpack.c.h.bf16 %v2703_v15  ;;  %v3110_v31 = vld [vmem:[%s3326_s13 + $0x170] sm:$0xff]   ;;  %v3361_v62 = vld [vmem:[%s3326_s13 + $0x100] sm:$0xff]   ;;  %s273_s30 = scalar_lea.vmem %s3766_s5, %s2439_s17  ;;  %s2664_s29 = sshll.u32 (%p3303_p5), %s2244_s6, 2 }
  0x1f   : > { %2900 = vmatpush3.bf16.msra.mxu1 %v3100_v3  ;;  %v2700_v24 = vunpack.c.l.bf16 %v2704_v21  ;;  %v2701_v25 = vunpack.c.h.bf16 %v2704_v21  ;;  %v320_v29 = vmul.f32 %v2692_v19, %v2440_v11  ;;  %v321_v30 = vmul.f32 %v2693_v20, %v2440_v11  ;;  %v3111_v35 = vld [vmem:[%s3326_s13 + $0x70] sm:$0xff]   ;;  %v3112_v44 = vld [vmem:[%s3326_s13 + $0x178] sm:$0xff]   ;;  %v3366_v3 = vld [vmem:[%s3326_s13] sm:$0xff]  }
  0x20   : > { %2804 = vmatpush3.bf16.msra.mxu0 %v3101_v4  ;;  %2901 = vmatprep.subr.bf16.mxu1 %v3102_v5  ;;  %v318_v27 = vmul.f32 %v2688_v17, %v2440_v11  ;;  %v319_v28 = vmul.f32 %v2689_v18, %v2440_v11  ;;  %v322_v32 = vmul.f32 %v2696_v22, %v2440_v11  ;;  %v3113_v53 = vld [vmem:[%s3326_s13 + $0x78] sm:$0xff]   ;;  %vm3372_vm4 = vmand %vm462_vm0, %vm463_vm1  ;;  %v471_v22 = vld [vmem:[#allocation2 + $0xc] sm:$0x1] }
  0x21   : > { %2805 = vmatprep.subr.bf16.mxu0 %v3103_v6  ;;  %v323_v33 = vmul.f32 %v2697_v23, %v2440_v11  ;;  %v324_v34 = vmul.f32 %v2700_v24, %v2440_v11  ;;  %v325_v36 = vmul.f32 %v2701_v25, %v2440_v11  ;;  %v335_v39 = vadd.f32 %v2441_v26, %v320_v29  ;;  %v474_v23 = vld [vmem:[#allocation2 + $0x10] sm:$0xf]  ;;  %v480_v29 = vld [vmem:[#allocation2 + $0x18] sm:$0xf]  ;;  %vm3382_vm5 = vmand %vm468_vm2, %vm469_vm3 }
  0x22   : > { %v333_v37 = vadd.f32 %v2441_v26, %v318_v27  ;;  %v334_v38 = vadd.f32 %v2441_v26, %v319_v28  ;;  %v336_v40 = vadd.f32 %v2441_v26, %v321_v30  ;;  %v337_v41 = vadd.f32 %v2441_v26, %v322_v32  ;;  %v477_v28 = vld [vmem:[#allocation2 + $0x14] sm:$0x1]  ;;  %v483_v30 = vld [vmem:[#allocation2 + $0x1c] sm:$0x1]  ;;  %vm3423_vm8 = vmor %vm1479_vm6, %vm1480_vm7 }
  0x23   : > { %2902 = vmatpush3.bf16.msra.mxu1 %v3102_v5  ;;  %v338_v42 = vadd.f32 %v2441_v26, %v323_v33  ;;  %v339_v43 = vadd.f32 %v2441_v26, %v324_v34  ;;  %v340_v45 = vadd.f32 %v2441_v26, %v325_v36  ;;  %v343_v48 = vmax.f32 %v335_v39, 0.0  ;;  %v486_v36 = vld [vmem:[#allocation2 + $0x20] sm:$0xf]  ;;  %vm3476_vm11 = vmor %vm551_vm9, %vm552_vm10 }
  0x24   : > { %2806 = vmatpush3.bf16.msra.mxu0 %v3103_v6  ;;  %2903 = vmatprep.subr.bf16.mxu1 %v3104_v7  ;;  %v341_v46 = vmax.f32 %v333_v37, 0.0  ;;  %v342_v47 = vmax.f32 %v334_v38, 0.0  ;;  %v344_v49 = vmax.f32 %v336_v40, 0.0  ;;  %v345_v50 = vmax.f32 %v337_v41, 0.0  ;;  %v489_v41 = vld [vmem:[#allocation2 + $0x24] sm:$0x1] }
  0x25   : > { %2807 = vmatprep.subr.bf16.mxu0 %v3105_v8  ;;  %v346_v51 = vmax.f32 %v338_v42, 0.0  ;;  %v347_v52 = vmax.f32 %v339_v43, 0.0  ;;  %v348_v54 = vmax.f32 %v340_v45, 0.0  ;;  %v2671_v57 = vpack.c.bf16 %v343_v48, %v343_v48  ;;  %v492_v42 = vld [vmem:[#allocation2 + $0x28] sm:$0xf] }
  0x26   : > { %v2669_v55 = vpack.c.bf16 %v341_v46, %v341_v46  ;;  %v2670_v56 = vpack.c.bf16 %v342_v47, %v342_v47  ;;  %v2672_v58 = vpack.c.bf16 %v344_v49, %v344_v49  ;;  %v2673_v59 = vpack.c.bf16 %v345_v50, %v345_v50  ;;  %v495_v43 = vld [vmem:[#allocation2 + $0x2c] sm:$0x1]  ;;  %v501_v49 = vld [vmem:[#allocation2 + $0x34] sm:$0x1]  ;;  %v504_v50 = vld [vmem:[#allocation2 + $0x38] sm:$0xf] }
  0x27   : > { %2904 = vmatpush3.bf16.msra.mxu1 %v3104_v7  ;;  %v2674_v60 = vpack.c.bf16 %v346_v51, %v346_v51  ;;  %v3358_v61 = vpack.c.bf16 %v347_v52, %v347_v52  ;;  %v3363_v63 = vpack.c.bf16 %v348_v54, %v348_v54  ;;  %v398_v5 = vshrl.u32 %v2671_v57, 16  ;;  %v507_v51 = vld [vmem:[#allocation2 + $0x3c] sm:$0x1] }
  0x28   : > { %2808 = vmatpush3.bf16.msra.mxu0 %v3105_v8  ;;  %2905 = vmatprep.subr.bf16.mxu1 %v3106_v9  ;;  %v382_v0 = vshrl.u32 %v2669_v55, 16  ;;  %v385_v1 = vshll.u32 %v2669_v55, 16  ;;  %v390_v2 = vshrl.u32 %v2670_v56, 16  ;;  %v393_v4 = vshll.u32 %v2670_v56, 16 }
  0x29   : > { %2809 = vmatprep.subr.bf16.mxu0 %v3107_v10  ;;  %v401_v6 = vshll.u32 %v2671_v57, 16  ;;  %v406_v7 = vshrl.u32 %v2672_v58, 16  ;;  %v414_v11 = vshrl.u32 %v2673_v59, 16  ;;  %v417_v14 = vshll.u32 %v2673_v59, 16 }
  0x2a   : > { %v384_v8 = vrot.slane %v382_v0, 7  ;;  %v422_v15 = vshrl.u32 %v2674_v60, 16  ;;  %v425_v33 = vshll.u32 %v2674_v60, 16  ;;  %v430_v34 = vshrl.u32 %v3358_v61, 16  ;;  %v510_v60 = vld [vmem:[#allocation2 + $0x40] sm:$0xf] }
  0x2b   : > { %2906 = vmatpush3.bf16.msra.mxu1 %v3106_v9  ;;  %v392_v9 = vrot.slane %v390_v2, 7  ;;  %v3368_v13 = vrot.slane %v406_v7, 7  ;;  %v433_v37 = vshll.u32 %v3358_v61, 16  ;;  %v438_v38 = vshrl.u32 %v3363_v63, 16  ;;  %v513_v2 = vld [vmem:[#allocation2 + $0x44] sm:$0x1] }
  0x2c   : > { %2810 = vmatpush3.bf16.msra.mxu0 %v3107_v10  ;;  %2907 = vmatprep.subr.bf16.mxu1 %v3108_v12  ;;  %v409_v10 = vshll.u32 %v2672_v58, 16  ;;  %v387_v17 = vor.u32 %v385_v1, %v384_v8  ;;  %v388_v18 = vrot.slane %v384_v8, 4  ;;  %v424_v32 = vrot.slane %v422_v15, 7 }
  0x2d   : > { %2811 = vmatprep.subr.bf16.mxu0 %v3109_v16  ;;  %v395_v19 = vor.u32 %v393_v4, %v392_v9  ;;  %v396_v20 = vrot.slane %v392_v9, 4  ;;  %v412_v27 = vrot.slane %v3368_v13, 4  ;;  %v441_v39 = vshll.u32 %v3363_v63, 16 }
  0x2e   : > { %v411_v26 = vor.u32 %v409_v10, %v3368_v13  ;;  %v427_v47 = vor.u32 %v425_v33, %v424_v32  ;;  %v428_v48 = vrot.slane %v424_v32, 4  ;;  %v432_v52 = vrot.slane %v430_v34, 7 }
  0x2f   : > { %2908 = vmatpush3.bf16.msra.mxu1 %v3108_v12  ;;  %v400_v12 = vrot.slane %v398_v5, 7  ;;  %v472_v54 = vsel %vm3382_vm5, %v388_v18, %v471_v22  ;;  %v475_v55 = vsel %vm3372_vm4, %v395_v19, %v474_v23  ;;  %v478_v56 = vsel %vm3382_vm5, %v396_v20, %v477_v28 }
  0x30   : > { %2812 = vmatpush3.bf16.msra.mxu0 %v3109_v16  ;;  %2909 = vmatprep.subr.bf16.mxu1 %v3110_v31  ;;  %v465_v16 = vld [vmem:[#allocation2 + $0x8] sm:$0xf]  ;;  %473 = vst [vmem:[#allocation2 + $0xc] sm:$0x1] %v472_v54  ;;  %476 = vst [vmem:[#allocation2 + $0x10] sm:$0xf] %v475_v55  ;;  %v487_v59 = vsel %vm3372_vm4, %v411_v26, %v486_v36  ;;  %v435_v61 = vor.u32 %v433_v37, %v432_v52 }
  0x31   : > { %2813 = vmatprep.subr.bf16.mxu0 %v3111_v35  ;;  %v403_v24 = vor.u32 %v401_v6, %v400_v12  ;;  %v404_v25 = vrot.slane %v400_v12, 4  ;;  %v466_v40 = vsel %vm3372_vm4, %v387_v17, %v465_v16  ;;  %v436_v63 = vrot.slane %v432_v52, 4  ;;  %479 = vst [vmem:[#allocation2 + $0x14] sm:$0x1] %v478_v56  ;;  %488 = vst [vmem:[#allocation2 + $0x20] sm:$0xf] %v487_v59 }
  0x32   : > { %467 = vst [vmem:[#allocation2 + $0x8] sm:$0xf] %v466_v40  ;;  %v490_v4 = vsel %vm3382_vm5, %v412_v27, %v489_v41  ;;  %v502_v8 = vsel %vm3382_vm5, %v428_v48, %v501_v49  ;;  %v505_v9 = vsel %vm3372_vm4, %v435_v61, %v504_v50  ;;  %v3116_v50 = vld [vmem:[%s3326_s13 + $0x108] sm:$0xff]  }
  0x33   : > { %2910 = vmatpush3.bf16.msra.mxu1 %v3110_v31  ;;  %v416_v31 = vrot.slane %v414_v11, 7  ;;  %v481_v57 = vsel %vm3372_vm4, %v403_v24, %v480_v29  ;;  %v484_v58 = vsel %vm3382_vm5, %v404_v25, %v483_v30  ;;  %491 = vst [vmem:[#allocation2 + $0x24] sm:$0x1] %v490_v4  ;;  %v508_v10 = vsel %vm3382_vm5, %v436_v63, %v507_v51  ;;  %v3158_v63 = vld [vmem:[%s3326_s13 + $0x1d8] sm:$0xff]  }
  0x34   : > { %2814 = vmatpush3.bf16.msra.mxu0 %v3111_v35  ;;  %2911 = vmatprep.subr.bf16.mxu1 %v3112_v44  ;;  %482 = vst [vmem:[#allocation2 + $0x18] sm:$0xf] %v481_v57  ;;  %485 = vst [vmem:[#allocation2 + $0x1c] sm:$0x1] %v484_v58 }
  0x35   : > { %2815 = vmatprep.subr.bf16.mxu0 %v3113_v53  ;;  %v419_v45 = vor.u32 %v417_v14, %v416_v31  ;;  %v420_v46 = vrot.slane %v416_v31, 4  ;;  %503 = vst [vmem:[#allocation2 + $0x34] sm:$0x1] %v502_v8  ;;  %506 = vst [vmem:[#allocation2 + $0x38] sm:$0xf] %v505_v9 }
  0x36   : > { %509 = vst [vmem:[#allocation2 + $0x3c] sm:$0x1] %v508_v10 }
  0x37   : > { %2912 = vmatpush3.bf16.msra.mxu1 %v3112_v44  ;;  %v498_v44 = vld [vmem:[#allocation2 + $0x30] sm:$0xf]  ;;  %v493_v5 = vsel %vm3372_vm4, %v419_v45, %v492_v42  ;;  %v496_v6 = vsel %vm3382_vm5, %v420_v46, %v495_v43 }
  0x38   : > { %2816 = vmatpush3.bf16.msra.mxu0 %v3113_v53  ;;  %2921 = vmatprep.subr.bf16.mxu1 %v3361_v62  ;;  %v440_v53 = vrot.slane %v438_v38, 7  ;;  %v499_v7 = vsel %vm3372_vm4, %v427_v47, %v498_v44  ;;  %494 = vst [vmem:[#allocation2 + $0x28] sm:$0xf] %v493_v5  ;;  %497 = vst [vmem:[#allocation2 + $0x2c] sm:$0x1] %v496_v6  ;;  %v3118_v5 = vld [vmem:[%s3326_s13 + $0x110] sm:$0xff]  }
  0x39   : > { %2825 = vmatprep.subr.bf16.mxu0 %v3366_v3  ;;  %500 = vst [vmem:[#allocation2 + $0x30] sm:$0xf] %v499_v7 }
  0x3a   : > { %v443_v0 = vor.u32 %v441_v39, %v440_v53  ;;  %v444_v1 = vrot.slane %v440_v53, 4 }
  0x3c   : > { %v511_v11 = vsel %vm3372_vm4, %v443_v0, %v510_v60  ;;  %v514_v12 = vsel %vm3382_vm5, %v444_v1, %v513_v2 }
  0x3d   : > { %512 = vst [vmem:[#allocation2 + $0x40] sm:$0xf] %v511_v11  ;;  %515 = vst [vmem:[#allocation2 + $0x44] sm:$0x1] %v514_v12 }
  0x44   : > { %v543_v14 = vld [vmem:[%s3427_s11 + $0x4] sm:$0x1]  ;;  %v544_v15 = vld [vmem:[%s3427_s11 + $0xc] sm:$0x1]  ;;  %v1455_v16 = vld [vmem:[%s3427_s11] sm:$0xe] }
  0x45   : > { %v1456_v17 = vld [vmem:[%s3427_s11 + $0x8] sm:$0xe]  ;;  %v2541_v18 = vrot.slane %v1455_v16, 9  ;;  %v1484_v19 = vrot.slane %v543_v14, 5  ;;  %v1488_v20 = vrot.slane %v544_v15, 5  ;;  %v564_v21 = vshll.u32 %v543_v14, 16 }
  0x46   : > { %v2542_v22 = vrot.slane %v1456_v17, 9  ;;  %v545_v23 = vld [vmem:[%s3427_s11 + $0x14] sm:$0x1]  ;;  %v546_v24 = vld [vmem:[%s3427_s11 + $0x1c] sm:$0x1]  ;;  %v578_v25 = vshll.u32 %v544_v15, 16 }
  0x47   : > { %v1485_v26 = vsel %vm3423_vm8, %v2541_v18, %v1484_v19  ;;  %v1457_v27 = vld [vmem:[%s3427_s11 + $0x10] sm:$0xe]  ;;  %v1458_v28 = vld [vmem:[%s3427_s11 + $0x18] sm:$0xe]  ;;  %v1492_v29 = vrot.slane %v545_v23, 5  ;;  %v1496_v30 = vrot.slane %v546_v24, 5 }
  0x48   : > { %v1489_v31 = vsel %vm3423_vm8, %v2542_v22, %v1488_v20  ;;  %v2543_v32 = vrot.slane %v1457_v27, 9  ;;  %v2544_v33 = vrot.slane %v1458_v28, 9  ;;  %v3442_v34 = vld [vmem:[%s3427_s11] sm:$0xf]  ;;  %v3445_v35 = vld [vmem:[%s3427_s11 + $0x8] sm:$0xf] }
  0x49   : > { %v2565_v36 = vcombine.low %v1485_v26, %v1489_v31  ;;  %v555_v37 = vshrl.u32 %v3442_v34, 16  ;;  %v558_v38 = vshll.u32 %v3442_v34, 16  ;;  %v566_v39 = vrot.slane %v564_v21, 5  ;;  %v3450_v40 = vld [vmem:[%s3427_s11 + $0x10] sm:$0xf] }
  0x4a   : > { %v1493_v41 = vsel %vm3423_vm8, %v2543_v32, %v1492_v29  ;;  %v1497_v42 = vsel %vm3423_vm8, %v2544_v33, %v1496_v30  ;;  %v569_v43 = vshrl.u32 %v3445_v35, 16  ;;  %v572_v44 = vshll.u32 %v3445_v35, 16  ;;  %v3459_v45 = vld [vmem:[%s3427_s11 + $0x18] sm:$0xf]  ;;  %v3465_v55 = vld [vmem:[%s3427_s11 + $0x24] sm:$0x1] }
  0x4b   : > { %2913 = vmatprep.mubr.bf16.mxu1 %v2565_v36  ;;  %v2566_v46 = vcombine.low %v1493_v41, %v1497_v42  ;;  %v557_v47 = vrot.slane %v555_v37, 4  ;;  %v560_v48 = vrot.slane %v558_v38, 5  ;;  %v580_v49 = vrot.slane %v578_v25, 5  ;;  %v3470_v60 = vld [vmem:[%s3427_s11 + $0x2c] sm:$0x1]  ;;  %v3120_v25 = vld [vmem:[%s3326_s13 + $0x118] sm:$0xff]  }
  0x4c   : > { %v571_v51 = vrot.slane %v569_v43, 4  ;;  %v574_v52 = vrot.slane %v572_v44, 5  ;;  %v583_v53 = vshrl.u32 %v3450_v40, 16  ;;  %v586_v54 = vshll.u32 %v3450_v40, 16  ;;  %v1459_v61 = vld [vmem:[%s3427_s11 + $0x20] sm:$0xe] }
  0x4d   : > { %2914 = vmatmul.mubr.bf16.vlgmr.msra.gmra.mrb[0].mxu1 %v2566_v46  ;;  %v561_v56 = vor.u32 %v560_v48, %v557_v47  ;;  %v592_v57 = vshll.u32 %v545_v23, 16  ;;  %v597_v58 = vshrl.u32 %v3459_v45, 16  ;;  %v600_v59 = vshll.u32 %v3459_v45, 16  ;;  %v1460_v6 = vld [vmem:[%s3427_s11 + $0x28] sm:$0xe] }
  0x4e   : > { %2922 = vmatpush3.bf16.msra.mxu1 %v3361_v62  ;;  %v575_v0 = vor.u32 %v574_v52, %v571_v51  ;;  %v585_v1 = vrot.slane %v583_v53, 4  ;;  %v588_v2 = vrot.slane %v586_v54, 5  ;;  %v606_v4 = vshll.u32 %v546_v24, 16  ;;  %v3483_v62 = vld [vmem:[%s3427_s11 + $0x34] sm:$0x1]  ;;  %v3117_v43 = vld [vmem:[%s3326_s13 + $0x8] sm:$0xff]  }
  0x4f   : > { %v562_v7 = vrot.slane %v561_v56, 4  ;;  %v594_v8 = vrot.slane %v592_v57, 5  ;;  %v599_v9 = vrot.slane %v597_v58, 4  ;;  %v602_v10 = vrot.slane %v600_v59, 5  ;;  %2923 = vmatprep.subr.bf16.mxu1 %v3116_v50  ;;  %v1461_v16 = vld [vmem:[%s3427_s11 + $0x30] sm:$0xe] }
  0x50   : > { %v576_v11 = vrot.slane %v575_v0, 4  ;;  %v589_v12 = vor.u32 %v588_v2, %v585_v1  ;;  %v608_v14 = vrot.slane %v606_v4, 5  ;;  %v2545_v15 = vrot.slane %v1459_v61, 9  ;;  %v3490_v21 = vld [vmem:[%s3427_s11 + $0x3c] sm:$0x1]  ;;  %v3122_v53 = vld [vmem:[%s3326_s13 + $0x120] sm:$0xff]  }
  0x51   : > { %v567_v17 = vsel %vm3476_vm11, %v562_v7, %v566_v39  ;;  %v603_v18 = vor.u32 %v602_v10, %v599_v9  ;;  %v1500_v19 = vrot.slane %v3465_v55, 5  ;;  %v2546_v20 = vrot.slane %v1460_v6, 9  ;;  %v1462_v22 = vld [vmem:[%s3427_s11 + $0x38] sm:$0xe]  ;;  %v3498_v28 = vld [vmem:[%s3427_s11 + $0x20] sm:$0xf] }
  0x52   : > { %v581_v23 = vsel %vm3476_vm11, %v576_v11, %v580_v49  ;;  %v590_v24 = vrot.slane %v589_v12, 4  ;;  %2924 = vmatpush3.bf16.msra.mxu1 %v3116_v50  ;;  %v1504_v26 = vrot.slane %v3470_v60, 5  ;;  %v2547_v27 = vrot.slane %v1461_v16, 9  ;;  %v3504_v33 = vld [vmem:[%s3427_s11 + $0x28] sm:$0xf] }
  0x53   : > { %v2452_v29 = vcombine.low %v567_v17, %v581_v23  ;;  %v604_v30 = vrot.slane %v603_v18, 4  ;;  %2925 = vmatprep.subr.bf16.mxu1 %v3118_v5  ;;  %v1501_v31 = vsel %vm3423_vm8, %v2545_v15, %v1500_v19  ;;  %v1508_v32 = vrot.slane %v3483_v62, 5  ;;  %v3507_v36 = vld [vmem:[%s3427_s11 + $0x30] sm:$0xf]  ;;  %v3521_v48 = vld [vmem:[%s3427_s11 + $0x38] sm:$0xf] }
  0x54   : > { %v595_v37 = vsel %vm3476_vm11, %v590_v24, %v594_v8  ;;  %v1505_v38 = vsel %vm3423_vm8, %v2546_v20, %v1504_v26  ;;  %v2548_v39 = vrot.slane %v1462_v22, 9  ;;  %v1512_v41 = vrot.slane %v3490_v21, 5  ;;  %v3124_v9 = vld [vmem:[%s3326_s13 + $0x128] sm:$0xff]   ;;  %v3126_v22 = vld [vmem:[%s3326_s13 + $0x130] sm:$0xff]  }
  0x55   : > { %2817 = vmatprep.mubr.bf16.mxu0 %v2452_v29  ;;  %v609_v42 = vsel %vm3476_vm11, %v604_v30, %v608_v14  ;;  %v2567_v44 = vcombine.low %v1501_v31, %v1505_v38  ;;  %v1509_v46 = vsel %vm3423_vm8, %v2547_v27, %v1508_v32  ;;  %v611_v47 = vshrl.u32 %v3498_v28, 16  ;;  %v3121_v14 = vld [vmem:[%s3326_s13 + $0x18] sm:$0xff]   ;;  %v3555_v38 = vld [vmem:[%s3427_s11 + $0xc] sm:$0x1] }
  0x56   : > { %v3523_v49 = vcombine.low %v595_v37, %v609_v42  ;;  %2926 = vmatpush3.bf16.msra.mxu1 %v3118_v5  ;;  %v1513_v50 = vsel %vm3423_vm8, %v2548_v39, %v1512_v41  ;;  %v614_v51 = vshll.u32 %v3498_v28, 16  ;;  %v620_v52 = vshll.u32 %v3465_v55, 16  ;;  %v3119_v5 = vld [vmem:[%s3326_s13 + $0x10] sm:$0xff]   ;;  %v3128_v32 = vld [vmem:[%s3326_s13 + $0x138] sm:$0xff]   ;;  %v2497_v37 = vld [vmem:[%s3427_s11 + $0x8] sm:$0xf] }
  0x57   : > { %2927 = vmatprep.subr.bf16.mxu1 %v3120_v25  ;;  %2917 = vmatprep.mubr.bf16.mxu1 %v2567_v44  ;;  %v2568_v54 = vcombine.low %v1509_v46, %v1513_v50  ;;  %v613_v56 = vrot.slane %v611_v47, 4  ;;  %v625_v57 = vshrl.u32 %v3504_v33, 16  ;;  %v628_v58 = vshll.u32 %v3504_v33, 16  ;;  %v2499_v39 = vld [vmem:[%s3427_s11 + $0x10] sm:$0xf] }
  0x58   : > { %2818 = vmatmul.mubr.bf16.vlgmr.msra.gmra.mrb[0].mxu0 %v3523_v49  ;;  %v616_v59 = vrot.slane %v614_v51, 5  ;;  %v634_v61 = vshll.u32 %v3470_v60, 16  ;;  %v639_v0 = vshrl.u32 %v3507_v36, 16  ;;  %v642_v2 = vshll.u32 %v3507_v36, 16  ;;  %v3561_v44 = vld [vmem:[%s3427_s11 + $0x14] sm:$0x1] }
  0x59   : > { %2826 = vmatpush3.bf16.msra.mxu0 %v3366_v3  ;;  %2918 = vmatmul.mubr.bf16.gmra.mrb[4].mxu1 %v2568_v54  ;;  %v627_v55 = vrot.slane %v625_v57, 4  ;;  %v630_v1 = vrot.slane %v628_v58, 5  ;;  %v648_v4 = vshll.u32 %v3483_v62, 16  ;;  %v622_v7 = vrot.slane %v620_v52, 5  ;;  %v3125_v57 = vld [vmem:[%s3326_s13 + $0x28] sm:$0xff]  }
  0x5a   : > { %2827 = vmatprep.subr.bf16.mxu0 %v3117_v43  ;;  %2928 = vmatpush3.bf16.msra.mxu1 %v3120_v25  ;;  %v617_v6 = vor.u32 %v616_v59, %v613_v56  ;;  %v641_v8 = vrot.slane %v639_v0, 4  ;;  %v653_v60 = vshrl.u32 %v3521_v48, 16  ;;  %v636_v3 = vrot.slane %v634_v61, 5  ;;  %v3130_v61 = vld [vmem:[%s3326_s13 + $0x180] sm:$0xff]   ;;  %v3127_v0 = vld [vmem:[%s3326_s13 + $0x30] sm:$0xff]  }
  0x5b   : > { %2929 = vmatprep.subr.bf16.mxu1 %v3122_v53  ;;  %v631_v10 = vor.u32 %v630_v1, %v627_v55  ;;  %v644_v11 = vrot.slane %v642_v2, 5  ;;  %v656_v12 = vshll.u32 %v3521_v48, 16  ;;  %2937 = vmatprep.mubr.bf16.mxu1 %v2452_v29  ;;  %v650_v62 = vrot.slane %v648_v4, 5  ;;  %v3123_v29 = vld [vmem:[%s3326_s13 + $0x20] sm:$0xff]   ;;  %v3134_v55 = vld [vmem:[%s3326_s13 + $0x188] sm:$0xff]  }
  0x5c   : > { %v618_v15 = vrot.slane %v617_v6, 4  ;;  %v655_v16 = vrot.slane %v653_v60, 4  ;;  %v662_v17 = vshll.u32 %v3490_v21, 16  ;;  %v1138_v41 = vshrl.u32 %v2497_v37, 16  ;;  %v3129_v6 = vld [vmem:[%s3326_s13 + $0x38] sm:$0xff]   ;;  %v3132_v60 = vld [vmem:[%s3326_s13 + $0x80] sm:$0xff]  }
  0x5d   : > { %2828 = vmatpush3.bf16.msra.mxu0 %v3117_v43  ;;  %v632_v18 = vrot.slane %v631_v10, 4  ;;  %v645_v19 = vor.u32 %v644_v11, %v641_v8  ;;  %v658_v20 = vrot.slane %v656_v12, 5  ;;  %v1141_v42 = vshll.u32 %v2497_v37, 16  ;;  %v2501_v8 = vld [vmem:[%s3427_s11 + $0x18] sm:$0xf] }
  0x5e   : > { %2829 = vmatprep.subr.bf16.mxu0 %v3119_v5  ;;  %2930 = vmatpush3.bf16.msra.mxu1 %v3122_v53  ;;  %v623_v23 = vsel %vm3476_vm11, %v618_v15, %v622_v7  ;;  %v664_v26 = vrot.slane %v662_v17, 5  ;;  %v1152_v46 = vshrl.u32 %v2499_v39, 16  ;;  %v1155_v47 = vshll.u32 %v2499_v39, 16  ;;  %v3136_v7 = vld [vmem:[%s3326_s13 + $0x190] sm:$0xff]   ;;  %v2509_v37 = vld [vmem:[%s3427_s11 + $0x38] sm:$0xf] }
  0x5f   : > { %2931 = vmatprep.subr.bf16.mxu1 %v3124_v9  ;;  %v637_v24 = vsel %vm3476_vm11, %v632_v18, %v636_v3  ;;  %v646_v21 = vrot.slane %v645_v19, 4  ;;  %v659_v25 = vor.u32 %v658_v20, %v655_v16  ;;  %v2464_v51 = vcombine.low %v3442_v34, %v3445_v35  ;;  %v3138_v3 = vld [vmem:[%s3326_s13 + $0x198] sm:$0xff]   ;;  %v2505_v18 = vld [vmem:[%s3427_s11 + $0x28] sm:$0xf]  ;;  %v2507_v19 = vld [vmem:[%s3427_s11 + $0x30] sm:$0xf] }
  0x60   : > { %v2454_v27 = vcombine.low %v623_v23, %v637_v24  ;;  %v1140_v52 = vrot.slane %v1138_v41, 4  ;;  %v1143_v53 = vrot.slane %v1141_v42, 5  ;;  %v1154_v54 = vrot.slane %v1152_v46, 4  ;;  %v3135_v20 = vld [vmem:[%s3326_s13 + $0x88] sm:$0xff]   ;;  %v3137_v23 = vld [vmem:[%s3326_s13 + $0x90] sm:$0xff]   ;;  %v3139_v46 = vld [vmem:[%s3326_s13 + $0x98] sm:$0xff]  }
  0x61   : > { %2830 = vmatpush3.bf16.msra.mxu0 %v3119_v5  ;;  %v651_v30 = vsel %vm3476_vm11, %v646_v21, %v650_v62  ;;  %v660_v31 = vrot.slane %v659_v25, 4  ;;  %v1157_v56 = vrot.slane %v1155_v47, 5  ;;  %v1147_v58 = vshll.u32 %v3555_v38, 16  ;;  %v3142_v25 = vld [vmem:[%s3326_s13 + $0x1a8] sm:$0xff]  }
  0x62   : > { %2831 = vmatprep.subr.bf16.mxu0 %v3121_v14  ;;  %2932 = vmatpush3.bf16.msra.mxu1 %v3124_v9  ;;  %v1161_v59 = vshll.u32 %v3561_v44, 16  ;;  %v1144_v34 = vor.u32 %v1143_v53, %v1140_v52  ;;  %v2465_v12 = vcombine.low %v3450_v40, %v3459_v45  ;;  %v1169_v15 = vshll.u32 %v2501_v8, 16  ;;  %v3140_v40 = vld [vmem:[%s3326_s13 + $0x1a0] sm:$0xff]   ;;  %v3594_v45 = vld [vmem:[%s3427_s11 + $0x1c] sm:$0x1] }
  0x63   : > { %2933 = vmatprep.subr.bf16.mxu1 %v3126_v22  ;;  %2821 = vmatprep.mubr.bf16.mxu0 %v2454_v27  ;;  %v665_v43 = vsel %vm3476_vm11, %v660_v31, %v664_v26  ;;  %v1158_v35 = vor.u32 %v1157_v56, %v1154_v54  ;;  %v1149_v1 = vrot.slane %v1147_v58, 5  ;;  %v2466_v62 = vcombine.low %v3498_v28, %v3504_v33  ;;  %v3151_v41 = vld [vmem:[%s3427_s11 + $0x8] ss:$8 sps:$4 sm:$0xff]   ;;  %v3608_v42 = vld [vmem:[%s3427_s11 + $0x2c] sm:$0x1] }
  0x64   : > { %v2455_v50 = vcombine.low %v651_v30, %v665_v43  ;;  %v1163_v2 = vrot.slane %v1161_v59, 5  ;;  %v1145_v4 = vrot.slane %v1144_v34, 4  ;;  %v1194_v28 = vshrl.u32 %v2505_v18, 16  ;;  %v2511_v43 = vld [vmem:[%s3427_s11 + $0x40] sm:$0xf]  ;;  %v3144_v59 = vld [vmem:[%s3326_s13 + $0x1b0] sm:$0xff]  }
  0x65   : > { %2832 = vmatpush3.bf16.msra.mxu0 %v3121_v14  ;;  %v1159_v5 = vrot.slane %v1158_v35, 4  ;;  %v1166_v14 = vshrl.u32 %v2501_v8, 16  ;;  %v1197_v33 = vshll.u32 %v2505_v18, 16  ;;  %v1208_v24 = vshrl.u32 %v2507_v19, 16  ;;  %v3613_v56 = vld [vmem:[%s3427_s11 + $0x34] sm:$0x1] }
  0x66   : > { %2833 = vmatprep.subr.bf16.mxu0 %v3123_v29  ;;  %2934 = vmatpush3.bf16.msra.mxu1 %v3126_v22  ;;  %v1150_v9 = vsel %vm3476_vm11, %v1145_v4, %v1149_v1  ;;  %v3597_v22 = vld [vmem:[%s3427_s11 + $0x24] sm:$0x1]  ;;  %v1211_v21 = vshll.u32 %v2507_v19, 16  ;;  %v1175_v31 = vshll.u32 %v3594_v45, 16  ;;  %v2467_v39 = vcombine.low %v3507_v36, %v3521_v48 }
  0x67   : > { %2822 = vmatmul.mubr.bf16.gmra.mrb[4].mxu0 %v2455_v50  ;;  %2935 = vmatprep.subr.bf16.mxu1 %v3128_v32  ;;  %v1164_v10 = vsel %vm3476_vm11, %v1159_v5, %v1163_v2  ;;  %v1168_v26 = vrot.slane %v1166_v14, 4  ;;  %v1196_v47 = vrot.slane %v1194_v28, 4  ;;  %v1225_v58 = vshll.u32 %v2509_v37, 16  ;;  %v3141_v5 = vld [vmem:[%s3326_s13 + $0xa0] sm:$0xff]  }
  0x68   : > { %2841 = vmatprep.mubr.bf16.mxu0 %v2464_v51  ;;  %v3582_v11 = vcombine.low %v1150_v9, %v1164_v10  ;;  %v1210_v51 = vrot.slane %v1208_v24, 4  ;;  %v1213_v52 = vrot.slane %v1211_v21, 5  ;;  %v1236_v36 = vshrl.u32 %v2511_v43, 16  ;;  %v3148_v9 = vld [vmem:[%s3326_s13 + $0x1b8] sm:$0xff]   ;;  %v2609_v21 = vld [vmem:[%s3427_s11 + $0x8] sm:$0xe] }
  0x69   : > { %2834 = vmatpush3.bf16.msra.mxu0 %v3123_v29  ;;  %v1239_v48 = vshll.u32 %v2511_v43, 16  ;;  %v1203_v34 = vshll.u32 %v3608_v42, 16  ;;  %v1177_v1 = vrot.slane %v1175_v31, 5  ;;  %v3621_v10 = vld [vmem:[%s3427_s11 + $0x3c] sm:$0x1] }
  0x6a   : > { %2835 = vmatprep.subr.bf16.mxu0 %v3125_v57  ;;  %2936 = vmatpush3.bf16.msra.mxu1 %v3128_v32  ;;  %v1189_v32 = vshll.u32 %v3597_v22, 16  ;;  %v1214_v35 = vor.u32 %v1213_v52, %v1210_v51  ;;  %v1238_v8 = vrot.slane %v1236_v36, 4  ;;  %v1231_v19 = vshll.u32 %v3621_v10, 16  ;;  %v3165_v36 = vld [vmem:[%s3427_s11 + $0x28] ss:$8 sps:$4 sm:$0xff]  }
  0x6b   : > { %2945 = vmatprep.subr.bf16.mxu1 %v3130_v61 }
  0x6c   : > { %v1191_v4 = vrot.slane %v1189_v32, 5  ;;  %v1215_v14 = vrot.slane %v1214_v35, 4  ;;  %v3154_v32 = vld [vmem:[%s3326_s13 + $0x1c8] sm:$0xff]   ;;  %v3166_v35 = vld [vmem:[%s3427_s11 + $0x38] ss:$8 sps:$4 sm:$0xff]  }
  0x6d   : > { %2836 = vmatpush3.bf16.msra.mxu0 %v3125_v57  ;;  %2938 = vmatmul.mubr.bf16.vlgmr.msra.gmra.mrb[0].mxu1 %v3523_v49  ;;  %v2503_v49 = vld [vmem:[%s3427_s11 + $0x20] sm:$0xf]  ;;  %v1222_v57 = vshrl.u32 %v2509_v37, 16 }
  0x6e   : > { %2837 = vmatprep.subr.bf16.mxu0 %v3127_v0  ;;  %2946 = vmatpush3.bf16.msra.mxu1 %v3130_v61  ;;  %v1180_v16 = vshrl.u32 %v2503_v49, 16  ;;  %v1183_v17 = vshll.u32 %v2503_v49, 16  ;;  %v3624_v49 = vld [vmem:[%s3427_s11 + $0x44] sm:$0x1] }
  0x6f   : > { %2947 = vmatprep.subr.bf16.mxu1 %v3134_v55  ;;  %2941 = vmatprep.mubr.bf16.mxu1 %v2454_v27  ;;  %v1171_v27 = vrot.slane %v1169_v15, 5 }
  0x70   : > { %v1182_v29 = vrot.slane %v1180_v16, 4  ;;  %v1185_v30 = vrot.slane %v1183_v17, 5  ;;  %v3143_v17 = vld [vmem:[%s3326_s13 + $0xa8] sm:$0xff]  }
  0x71   : > { %2838 = vmatpush3.bf16.msra.mxu0 %v3127_v0  ;;  %v1172_v53 = vor.u32 %v1171_v27, %v1168_v26  ;;  %v1217_v0 = vshll.u32 %v3613_v56, 16  ;;  %v3146_v26 = vld [vmem:[%s3326_s13 + $0xb0] sm:$0xff]  }
  0x72   : > { %2839 = vmatprep.subr.bf16.mxu0 %v3129_v6  ;;  %2948 = vmatpush3.bf16.msra.mxu1 %v3134_v55  ;;  %v1186_v54 = vor.u32 %v1185_v30, %v1182_v29  ;;  %v1233_v29 = vrot.slane %v1231_v19, 5 }
  0x73   : > { %2949 = vmatprep.subr.bf16.mxu1 %v3136_v7  ;;  %v1173_v55 = vrot.slane %v1172_v53, 4  ;;  %v1219_v15 = vrot.slane %v1217_v0, 5  ;;  %v3159_v0 = vld [vmem:[%s3326_s13 + $0xd8] sm:$0xff]  }
  0x74   : > { %v1187_v2 = vrot.slane %v1186_v54, 4  ;;  %v3152_v54 = vld [vmem:[%s3326_s13 + $0xc0] sm:$0xff]  }
  0x75   : > { %2840 = vmatpush3.bf16.msra.mxu0 %v3129_v6  ;;  %2942 = vmatmul.mubr.bf16.gmra.mrb[4].mxu1 %v2455_v50  ;;  %v1199_v50 = vrot.slane %v1197_v33, 5  ;;  %v1224_v6 = vrot.slane %v1222_v57, 4  ;;  %v1220_v33 = vsel %vm3476_vm11, %v1215_v14, %v1219_v15  ;;  %v1951_v14 = vrot.slane %v3608_v42, 5 }
  0x76   : > { %2849 = vmatprep.subr.bf16.mxu0 %v3132_v60  ;;  %2950 = vmatpush3.bf16.msra.mxu1 %v3136_v7  ;;  %v1227_v7 = vrot.slane %v1225_v58, 5  ;;  %v1192_v16 = vsel %vm3476_vm11, %v1187_v2, %v1191_v4  ;;  %v3153_v58 = vld [vmem:[%s3427_s11 + $0x18] ss:$8 sps:$4 sm:$0xff]   ;;  %v2613_v4 = vld [vmem:[%s3427_s11 + $0x28] sm:$0xe] }
  0x77   : > { %2951 = vmatprep.subr.bf16.mxu1 %v3138_v3  ;;  %2961 = vmatprep.mubr.bf16.mxu1 %v3582_v11  ;;  %v1200_v61 = vor.u32 %v1199_v50, %v1196_v47  ;;  %v3149_v47 = vld [vmem:[%s3326_s13 + $0xb8] sm:$0xff]   ;;  %v2612_v2 = vld [vmem:[%s3427_s11 + $0x20] sm:$0xe] }
  0x78   : > { %2842 = vmatmul.mubr.bf16.vlgmr.msra.gmra.mrb[0].mxu0 %v2465_v12  ;;  %v1205_v12 = vrot.slane %v1203_v34, 5  ;;  %v1228_v18 = vor.u32 %v1227_v7, %v1224_v6  ;;  %v3162_v34 = vld [vmem:[%s3326_s13 + $0x1e8] sm:$0xff]   ;;  %v3161_v6 = vld [vmem:[%s3326_s13 + $0xe0] sm:$0xff]  }
  0x79   : > { %2850 = vmatpush3.bf16.msra.mxu0 %v3132_v60  ;;  %2845 = vmatprep.mubr.bf16.mxu0 %v2466_v62  ;;  %v1241_v60 = vrot.slane %v1239_v48, 5  ;;  %v1178_v62 = vsel %vm3476_vm11, %v1173_v55, %v1177_v1  ;;  %v3155_v48 = vld [vmem:[%s3326_s13 + $0xc8] sm:$0xff]   ;;  %v3164_v55 = vld [vmem:[%s3326_s13 + $0x1f0] sm:$0xff]   ;;  %v2611_v1 = vld [vmem:[%s3427_s11 + $0x18] sm:$0xe] }
  0x7a   : > { %2851 = vmatprep.subr.bf16.mxu0 %v3135_v20  ;;  %2952 = vmatpush3.bf16.msra.mxu1 %v3138_v3  ;;  %v1201_v3 = vrot.slane %v1200_v61, 4  ;;  %v3638_v24 = vcombine.low %v1178_v62, %v1192_v16  ;;  %v1229_v27 = vrot.slane %v1228_v18, 4  ;;  %v3157_v61 = vld [vmem:[%s3326_s13 + $0xd0] sm:$0xff]   ;;  %v2619_v7 = vrot.slane %v2611_v1, 9  ;;  %v3163_v62 = vld [vmem:[%s3326_s13 + $0xe8] sm:$0xff]  }
  0x7b   : > { %2953 = vmatprep.subr.bf16.mxu1 %v3140_v40  ;;  %v2615_v16 = vld [vmem:[%s3427_s11 + $0x38] sm:$0xe] }
  0x7c   : > { %v1206_v28 = vsel %vm3476_vm11, %v1201_v3, %v1205_v12  ;;  %v1234_v50 = vsel %vm3476_vm11, %v1229_v27, %v1233_v29  ;;  %v3168_v3 = vld [vmem:[%s3326_s13 + $0x1f8] sm:$0xff]   ;;  %v2621_v12 = vrot.slane %v2613_v4, 9  ;;  %v2623_v19 = vrot.slane %v2615_v16, 9 }
  0x7d   : > { %2852 = vmatpush3.bf16.msra.mxu0 %v3135_v20  ;;  %v1242_v20 = vor.u32 %v1241_v60, %v1238_v8  ;;  %v3644_v37 = vcombine.low %v1206_v28, %v1220_v33  ;;  %v1943_v8 = vrot.slane %v3594_v45, 5  ;;  %v2620_v60 = vrot.slane %v2612_v2, 9 }
  0x7e   : > { %2853 = vmatprep.subr.bf16.mxu0 %v3137_v23  ;;  %2954 = vmatpush3.bf16.msra.mxu1 %v3140_v40  ;;  %v1245_v40 = vshll.u32 %v3624_v49, 16  ;;  %v1963_v33 = vrot.slane %v3624_v49, 5 }
  0x7f   : > { %2955 = vmatprep.subr.bf16.mxu1 %v3142_v25  ;;  %v1243_v30 = vrot.slane %v1242_v20, 4  ;;  %v1944_v45 = vsel %vm3423_vm8, %v2619_v7, %v1943_v8  ;;  %v3167_v20 = vld [vmem:[%s3326_s13 + $0xf0] sm:$0xff]  }
  0x80   : > { %2846 = vmatmul.mubr.bf16.gmra.mrb[4].mxu0 %v2467_v39  ;;  %v1247_v31 = vrot.slane %v1245_v40, 5  ;;  %v2617_v39 = vrot.slane %v2609_v21, 9  ;;  %v3169_v21 = vld [vmem:[%s3326_s13 + $0xf8] sm:$0xff]  }
  0x81   : > { %2854 = vmatpush3.bf16.msra.mxu0 %v3137_v23  ;;  %2865 = vmatprep.mubr.bf16.mxu0 %v3151_v41  ;;  %v3150_v23 = vld [vmem:[%s3326_s13 + $0x1c0] sm:$0xff]   ;;  %v1935_v41 = vrot.slane %v3555_v38, 5  ;;  %v3156_v38 = vld [vmem:[%s3326_s13 + $0x1d0] sm:$0xff]  }
  0x82   : > { %2855 = vmatprep.subr.bf16.mxu0 %v3139_v46  ;;  %2956 = vmatpush3.bf16.msra.mxu1 %v3142_v25  ;;  %v2610_v25 = vld [vmem:[%s3427_s11 + $0x10] sm:$0xe]  ;;  %v1248_v51 = vsel %vm3476_vm11, %v1243_v30, %v1247_v31 }
  0x83   : > { %2957 = vmatprep.subr.bf16.mxu1 %v3144_v59  ;;  %v2618_v43 = vrot.slane %v2610_v25, 9  ;;  %v3660_v53 = vcombine.low %v1234_v50, %v1248_v51 }
  0x85   : > { %2856 = vmatpush3.bf16.msra.mxu0 %v3139_v46  ;;  %v1939_v46 = vrot.slane %v3561_v44, 5  ;;  %v1936_v44 = vsel %vm3423_vm8, %v2617_v39, %v1935_v41 }
  0x86   : > { %2857 = vmatprep.subr.bf16.mxu0 %v3141_v5  ;;  %2958 = vmatpush3.bf16.msra.mxu1 %v3144_v59  ;;  %v3160_v59 = vld [vmem:[%s3326_s13 + $0x1e0] sm:$0xff]   ;;  %s2433_s13 = sshll.u32 %s243_s12, 6 }
  0x87   : > { %2959 = vmatprep.subr.bf16.mxu1 %v3148_v9  ;;  %v1940_v52 = vsel %vm3423_vm8, %v2618_v43, %v1939_v46  ;;  %s3708_s18 = scalar_lea.vmem [#allocation3], %s2433_s13 }
  0x88   : > { %v2641_v57 = vcombine.low %v1936_v44, %v1940_v52 }
  0x89   : > { %2858 = vmatpush3.bf16.msra.mxu0 %v3141_v5  ;;  %v2614_v5 = vld [vmem:[%s3427_s11 + $0x30] sm:$0xe] }
  0x8a   : > { %2859 = vmatprep.subr.bf16.mxu0 %v3143_v17  ;;  %2960 = vmatpush3.bf16.msra.mxu1 %v3148_v9  ;;  %v1947_v9 = vrot.slane %v3597_v22, 5  ;;  %v2622_v15 = vrot.slane %v2614_v5, 9 }
  0x8b   : > { %2969 = vmatprep.subr.bf16.mxu1 %v3150_v23 }
  0x8c   : > { %v1948_v22 = vsel %vm3423_vm8, %v2620_v60, %v1947_v9 }
  0x8d   : > { %2860 = vmatpush3.bf16.msra.mxu0 %v3143_v17  ;;  %2962 = vmatmul.mubr.bf16.vlgmr.msra.gmra.mrb[0].mxu1 %v3638_v24  ;;  %v1952_v17 = vsel %vm3423_vm8, %v2621_v12, %v1951_v14  ;;  %v2642_v18 = vcombine.low %v1944_v45, %v1948_v22 }
  0x8e   : > { %2861 = vmatprep.subr.bf16.mxu0 %v3146_v26  ;;  %2970 = vmatpush3.bf16.msra.mxu1 %v3150_v23  ;;  %v1959_v23 = vrot.slane %v3621_v10, 5 }
  0x8f   : > { %2971 = vmatprep.subr.bf16.mxu1 %v3154_v32  ;;  %2965 = vmatprep.mubr.bf16.mxu1 %v3644_v37 }
  0x90   : > { %v1960_v25 = vsel %vm3423_vm8, %v2623_v19, %v1959_v23 }
  0x91   : > { %2862 = vmatpush3.bf16.msra.mxu0 %v3146_v26 }
  0x92   : > { %2863 = vmatprep.subr.bf16.mxu0 %v3149_v47  ;;  %2972 = vmatpush3.bf16.msra.mxu1 %v3154_v32 }
  0x93   : > { %2973 = vmatprep.subr.bf16.mxu1 %v3156_v38 }
  0x95   : > { %2864 = vmatpush3.bf16.msra.mxu0 %v3149_v47  ;;  %2966 = vmatmul.mubr.bf16.gmra.mrb[4].mxu1 %v3660_v53 }
  0x96   : > { %2873 = vmatprep.subr.bf16.mxu0 %v3152_v54  ;;  %2974 = vmatpush3.bf16.msra.mxu1 %v3156_v38 }
  0x97   : > { %2975 = vmatprep.subr.bf16.mxu1 %v3158_v63  ;;  %2985 = vmatprep.mubr.bf16.mxu1 %v2641_v57 }
  0x98   : > { %2866 = vmatmul.mubr.bf16.vlgmr.msra.gmra.mrb[0].mxu0 %v3153_v58 }
  0x99   : > { %2874 = vmatpush3.bf16.msra.mxu0 %v3152_v54  ;;  %2869 = vmatprep.mubr.bf16.mxu0 %v3165_v36 }
  0x9a   : > { %2875 = vmatprep.subr.bf16.mxu0 %v3155_v48  ;;  %2976 = vmatpush3.bf16.msra.mxu1 %v3158_v63 }
  0x9b   : > { %2977 = vmatprep.subr.bf16.mxu1 %v3160_v59 }
  0x9d   : > { %2876 = vmatpush3.bf16.msra.mxu0 %v3155_v48 }
  0x9e   : > { %2877 = vmatprep.subr.bf16.mxu0 %v3157_v61  ;;  %2978 = vmatpush3.bf16.msra.mxu1 %v3160_v59 }
  0x9f   : > { %2979 = vmatprep.subr.bf16.mxu1 %v3162_v34 }
  0xa0   : > { %2870 = vmatmul.mubr.bf16.gmra.mrb[4].mxu0 %v3166_v35 }
  0xa1   : > { %2878 = vmatpush3.bf16.msra.mxu0 %v3157_v61  ;;  %2889 = vmatprep.mubr.bf16.mxu0 %v3582_v11  ;;  %v1955_v11 = vrot.slane %v3613_v56, 5  ;;  %v2616_v56 = vld [vmem:[%s3427_s11 + $0x40] sm:$0xe]  ;;  %s2246_s11 = scalar_lea.vmem (%p3303_p5), %s3765_s4, %s2664_s29 }
  0xa2   : > { %2879 = vmatprep.subr.bf16.mxu0 %v3159_v0  ;;  %2980 = vmatpush3.bf16.msra.mxu1 %v3162_v34  ;;  %v2624_v28 = vrot.slane %v2616_v56, 9 }
  0xa3   : > { %2981 = vmatprep.subr.bf16.mxu1 %v3164_v55  ;;  %v1956_v42 = vsel %vm3423_vm8, %v2622_v15, %v1955_v11 }
  0xa4   : > { %v2643_v40 = vcombine.low %v1952_v17, %v1956_v42  ;;  %v1964_v26 = vsel %vm3423_vm8, %v2624_v28, %v1963_v33 }
  0xa5   : > { %2880 = vmatpush3.bf16.msra.mxu0 %v3159_v0  ;;  %v2644_v27 = vcombine.low %v1960_v25, %v1964_v26 }
  0xa6   : > { %2881 = vmatprep.subr.bf16.mxu0 %v3161_v6  ;;  %2982 = vmatpush3.bf16.msra.mxu1 %v3164_v55 }
  0xa7   : > { %2983 = vmatprep.subr.bf16.mxu1 %v3168_v3 }
  0xa9   : > { %2882 = vmatpush3.bf16.msra.mxu0 %v3161_v6 }
  0xaa   : > { %2883 = vmatprep.subr.bf16.mxu0 %v3163_v62  ;;  %2984 = vmatpush3.bf16.msra.mxu1 %v3168_v3 }
  0xad   : > { %2884 = vmatpush3.bf16.msra.mxu0 %v3163_v62  ;;  %2986 = vmatmul.mubr.bf16.vlgmr.msra.gmra.mrb[0].mxu1 %v2642_v18 }
  0xae   : > { %2885 = vmatprep.subr.bf16.mxu0 %v3167_v20  ;;  %2989 = vmatprep.mubr.bf16.mxu1 %v2643_v40 }
  0xb1   : > { %2886 = vmatpush3.bf16.msra.mxu0 %v3167_v20 }
  0xb2   : > { %2887 = vmatprep.subr.bf16.mxu0 %v3169_v21 }
  0xb5   : > { %2888 = vmatpush3.bf16.msra.mxu0 %v3169_v21  ;;  %2990 = vmatmul.mubr.bf16.gmra.mrb[4].mxu1 %v2644_v27 }
  0xb8   : > { %2890 = vmatmul.mubr.bf16.vlgmr.msra.gmra.mrb[0].mxu0 %v3638_v24 }
  0xb9   : > { %2893 = vmatprep.mubr.bf16.mxu0 %v3644_v37 }
  0xc0   : > { %2894 = vmatmul.mubr.bf16.gmra.mrb[4].mxu0 %v3660_v53 }
 0x180   : > { %v2987_v10 = vpop.f32.mrb[0].mxu1 }
 0x181   : > { %v2079_v49 = vpop.f32.mrb[1].mxu1  ;;  %v2133_v39 = vmul.f32 %v2987_v10, %v2987_v10 }
 0x182   : > { %v2988_v29 = vpop.f32.mrb[2].mxu1  ;;  %v2131_v31 = vmul.f32 %v2079_v49, %v2079_v49 }
 0x183   : > { %v2082_v30 = vpop.f32.mrb[3].mxu1  ;;  %v2134_v46 = vmul.f32 %v2988_v29, %v2988_v29 }
 0x184   : > { %v2118_v32 = vadd.f32 %v2082_v30, %v2079_v49  ;;  %v2132_v13 = vmul.f32 %v2082_v30, %v2082_v30 }
 0x186   : > { %v2119_v41 = vadd.f32 %v2987_v10, %v2118_v32  ;;  %v2139_v43 = vadd.f32 %v2132_v13, %v2131_v31 }
 0x188   : > { %v2140_v47 = vadd.f32 %v2139_v43, %v2133_v39  ;;  %v2991_v50 = vpop.f32.mrb[4].mxu1  ;;  %v2120_v24 = vadd.f32 %v2988_v29, %v2119_v41 }
 0x189   : > { %v2095_v51 = vpop.f32.mrb[5].mxu1  ;;  %v2137_v55 = vmul.f32 %v2991_v50, %v2991_v50 }
 0x18a   : > { %v2121_v37 = vadd.f32 %v2120_v24, %v2095_v51  ;;  %v2135_v38 = vmul.f32 %v2095_v51, %v2095_v51  ;;  %v2141_v44 = vadd.f32 %v2140_v47, %v2134_v46  ;;  %v2992_v52 = vpop.f32.mrb[6].mxu1 }
 0x18b   : > { %v2891_v53 = vpop.f32.mrb[0].mxu0  ;;  %v2098_v54 = vpop.f32.mrb[7].mxu1  ;;  %v2138_v7 = vmul.f32 %v2992_v52, %v2992_v52 }
 0x18c   : > { %v2680_v63 = vpack.c.bf16 %v2987_v10, %v2891_v53  ;;  %v1363_v57 = vpop.f32.mrb[1].mxu0  ;;  %v2142_v58 = vadd.f32 %v2141_v44, %v2135_v38  ;;  %v2122_v36 = vadd.f32 %v2121_v37, %v2098_v54  ;;  %v2136_v61 = vmul.f32 %v2098_v54, %v2098_v54 }
 0x18d   : > { %v2678_v48 = vpack.c.bf16 %v2079_v49, %v1363_v57  ;;  %v2892_v59 = vpop.f32.mrb[2].mxu0  ;;  %v1415_v34 = vmul.f32 %v1363_v57, %v1363_v57  ;;  %v1417_v60 = vmul.f32 %v2891_v53, %v2891_v53 }
 0x18e   : > { %2220 = vst [vmem:[%s3708_s18 + $0x10] sm:$0xff] %v2680_v63  ;;  %v2681_v35 = vpack.c.bf16 %v2988_v29, %v2892_v59  ;;  %v1366_v0 = vpop.f32.mrb[3].mxu0  ;;  %v2123_v1 = vadd.f32 %v2991_v50, %v2122_v36  ;;  %v2143_v6 = vadd.f32 %v2142_v58, %v2136_v61  ;;  %v1418_v15 = vmul.f32 %v2892_v59, %v2892_v59 }
 0x18f   : > { %2218 = vst [vmem:[%s3708_s18] sm:$0xff] %v2678_v48  ;;  %v1402_v2 = vadd.f32 %v1366_v0, %v1363_v57  ;;  %v1416_v4 = vmul.f32 %v1366_v0, %v1366_v0  ;;  %v2679_v5 = vpack.c.bf16 %v2082_v30, %v1366_v0 }
 0x190   : > { %2221 = vst [vmem:[%s3708_s18 + $0x18] sm:$0xff] %v2681_v35  ;;  %v2124_v8 = vadd.f32 %v2992_v52, %v2123_v1  ;;  %v2144_v12 = vadd.f32 %v2143_v6, %v2137_v55 }
 0x191   : > { %v1403_v9 = vadd.f32 %v2891_v53, %v1402_v2  ;;  %v1423_v3 = vadd.f32 %v1416_v4, %v1415_v34  ;;  %2219 = vst [vmem:[%s3708_s18 + $0x8] sm:$0xff] %v2679_v5 }
 0x192   : > { %v2125_v14 = vrot.slane %v2124_v8, 4  ;;  %v2145_v22 = vadd.f32 %v2144_v12, %v2138_v7 }
 0x193   : > { %v1424_v11 = vadd.f32 %v1423_v3, %v1417_v60  ;;  %v2895_v62 = vpop.f32.mrb[4].mxu0  ;;  %v1404_v45 = vadd.f32 %v2892_v59, %v1403_v9 }
 0x194   : > { %v2684_v16 = vpack.c.bf16 %v2991_v50, %v2895_v62  ;;  %v1379_v17 = vpop.f32.mrb[5].mxu0  ;;  %v2126_v42 = vadd.f32 %v2125_v14, %v2124_v8  ;;  %v2146_v28 = vrot.slane %v2145_v22, 4  ;;  %v1421_v30 = vmul.f32 %v2895_v62, %v2895_v62 }
 0x195   : > { %v1405_v56 = vadd.f32 %v1404_v45, %v1379_v17  ;;  %v1419_v18 = vmul.f32 %v1379_v17, %v1379_v17  ;;  %v1425_v19 = vadd.f32 %v1424_v11, %v1418_v15  ;;  %v2682_v20 = vpack.c.bf16 %v2095_v51, %v1379_v17  ;;  %v2896_v40 = vpop.f32.mrb[6].mxu0  ;;  %v2292_v2 = vld [vmem:[%s3708_s18 + $0x10] sm:$0xff] (%p3303_p5) }
 0x196   : > { %2224 = vst [vmem:[%s3708_s18 + $0x30] sm:$0xff] %v2684_v16  ;;  %v2127_v23 = vrot.slane %v2126_v42, 2  ;;  %v2685_v33 = vpack.c.bf16 %v2992_v52, %v2896_v40  ;;  %v1382_v21 = vpop.f32.mrb[7].mxu0  ;;  %v2147_v29 = vadd.f32 %v2146_v28, %v2145_v22  ;;  %v1422_v39 = vmul.f32 %v2896_v40, %v2896_v40  ;;  %v2288_v55 = vld [vmem:[%s3708_s18] sm:$0xff] (%p3303_p5)  ;;  %2293 = vst [vmem:[%s2246_s11 + $0x20] sm:$0xff] (%p3303_p5), %v2292_v2 }
 0x197   : > { %v1426_v25 = vadd.f32 %v1425_v19, %v1419_v18  ;;  %2222 = vst [vmem:[%s3708_s18 + $0x20] sm:$0xff] %v2682_v20  ;;  %v1406_v26 = vadd.f32 %v1405_v56, %v1382_v21  ;;  %v1420_v27 = vmul.f32 %v1382_v21, %v1382_v21  ;;  %v2683_v10 = vpack.c.bf16 %v2098_v54, %v1382_v21  ;;  %v2294_v4 = vld [vmem:[%s3708_s18 + $0x18] sm:$0xff] (%p3303_p5) }
 0x198   : > { %v2128_v49 = vadd.f32 %v2127_v23, %v2126_v42  ;;  %2225 = vst [vmem:[%s3708_s18 + $0x38] sm:$0xff] %v2685_v33  ;;  %v2148_v13 = vrot.slane %v2147_v29, 2  ;;  %v2290_v1 = vld [vmem:[%s3708_s18 + $0x8] sm:$0xff] (%p3303_p5)  ;;  %2289 = vst [vmem:[%s2246_s11] sm:$0xff] (%p3303_p5), %v2288_v55 }
 0x199   : > { %v1407_v31 = vadd.f32 %v2895_v62, %v1406_v26  ;;  %v1427_v32 = vadd.f32 %v1426_v25, %v1420_v27  ;;  %2223 = vst [vmem:[%s3708_s18 + $0x28] sm:$0xff] %v2683_v10  ;;  %2291 = vst [vmem:[%s2246_s11 + $0x10] sm:$0xff] (%p3303_p5), %v2290_v1 }
 0x19a   : > { %v2129_v46 = vrot.slane %v2128_v49, 1  ;;  %v2149_v47 = vadd.f32 %v2148_v13, %v2147_v29  ;;  %2295 = vst [vmem:[%s2246_s11 + $0x30] sm:$0xff] (%p3303_p5), %v2294_v4 }
 0x19b   : > { %v1408_v41 = vadd.f32 %v2896_v40, %v1407_v31  ;;  %v1428_v43 = vadd.f32 %v1427_v32, %v1421_v30 }
 0x19c   : > { %v2150_v51 = vrot.slane %v2149_v47, 1  ;;  %v2130_v44 = vadd.f32 %v2129_v46, %v2128_v49 }
 0x19d   : > { %v1409_v50 = vrot.slane %v1408_v41, 4  ;;  %v1429_v24 = vadd.f32 %v1428_v43, %v1422_v39  ;;  %v2300_v7 = vld [vmem:[%s3708_s18 + $0x30] sm:$0xff] (%p3303_p5) }
 0x19e   : > { %v2151_v52 = vadd.f32 %v2150_v51, %v2149_v47  ;;  %v2296_v5 = vld [vmem:[%s3708_s18 + $0x20] sm:$0xff] (%p3303_p5)  ;;  %2301 = vst [vmem:[%s2246_s11 + $0x60] sm:$0xff] (%p3303_p5), %v2300_v7 }
 0x19f   : > { %v1410_v37 = vadd.f32 %v1409_v50, %v1408_v41  ;;  %v1430_v38 = vrot.slane %v1429_v24, 4  ;;  %v2302_v8 = vld [vmem:[%s3708_s18 + $0x38] sm:$0xff] (%p3303_p5)  ;;  %2297 = vst [vmem:[%s2246_s11 + $0x40] sm:$0xff] (%p3303_p5), %v2296_v5 }
 0x1a0   : > { %v2152_v63 = vsel %vm468_vm2, %v2130_v44, %v2151_v52  ;;  %v2298_v6 = vld [vmem:[%s3708_s18 + $0x28] sm:$0xff] (%p3303_p5)  ;;  %2303 = vst [vmem:[%s2246_s11 + $0x70] sm:$0xff] (%p3303_p5), %v2302_v8 }
 0x1a1   : > { %v1411_v53 = vrot.slane %v1410_v37, 2  ;;  %v1431_v54 = vadd.f32 %v1430_v38, %v1429_v24  ;;  %2299 = vst [vmem:[%s2246_s11 + $0x50] sm:$0xff] (%p3303_p5), %v2298_v6 }
 0x1a3   : > { %v1412_v57 = vadd.f32 %v1411_v53, %v1410_v37  ;;  %v1432_v58 = vrot.slane %v1431_v54, 2 }
 0x1a5   : > { %v1413_v36 = vrot.slane %v1412_v57, 1  ;;  %v1433_v48 = vadd.f32 %v1432_v58, %v1431_v54 }
 0x1a7   : > { %v1434_v59 = vrot.slane %v1433_v48, 1  ;;  %v1414_v61 = vadd.f32 %v1413_v36, %v1412_v57 }
 0x1a8   : > { %2241 = sbr.rel (!%p3303_p5) target bundleno = 431 (0x1af), region = 40 }
 0x1a9   : > { %v1435_v34 = vadd.f32 %v1434_v59, %v1433_v48 }
 0x1ab   : > { %v1437_v35 = vsel %vm468_vm2, %v1414_v61, %v1435_v34 }
 0x1ac   : > { %v2153_v0 = vadd.f32 %v2152_v63, %v1437_v35 }
 0x1ae   : > { %2226 = vst [vmem:[%s273_s30] sm:$0x3] %v2153_v0 }
 0x1af PF: > { %s16_s24 = sadd.s32 1, %s3224_s24   ;;  %s3776_s18 = smov %s3204_s19 }
 0x1b0   : > { %p13_p11 = scmp.ge.s32.totalorder %s16_s24, 6   ;;  %s3777_s19 = smov %s3314_s8 }
 0x1b1   : > { %s3778_s20 = smov %s3216_s22  ;;  %s3779_s21 = smov %s3220_s23 }
 0x1b2   : > { %s3780_s22 = smov %s3783_s25  ;;  %s3781_s23 = smov %s3787_s26 }
 0x1b3   :  { %15 = sbr.rel (!%p13_p11) target bundleno = 4 (0x4), region = 123 }

// kernel: generator_forward.7
= control target key start
LH: loop header
LB: loop body
LE: loop exit
PB: predicated region body
PF: predicated region fallthrough
CT: control target
= control target key end

     0   :  { %s6881_s15 = smov 0   ;;  %s6883_s16 = smov 0   ;;  %s8883_s0 = inlined_call_operand.vmem [shape: bf16[2,16,16,128], index: 0, kind: input, shape index: {}]   ;;  %s8884_s1 = inlined_call_operand.vmem [shape: f32[1,1,128], index: 1, kind: input, shape index: {}]   ;;  %s8885_s2 = inlined_call_operand.vmem [shape: f32[1,1,128], index: 2, kind: input, shape index: {}]   ;;  %s8886_s3 = inlined_call_operand.vmem [shape: bf16[2,2,512,128], index: 3, kind: input, shape index: {}]   ;;  %s8887_s4 = inlined_call_operand.vmem [shape: bf16[2,16,2,16,256], index: 4, kind: output, shape index: {}]  }
   0x1   :  { %s6885_s17 = smov 0   ;;  %s6887_s18 = smov 0  }
   0x2   :  { %s6889_s19 = smov 0   ;;  %s6891_s20 = smov 0  }
   0x3   :  { %s6893_s21 = smov 0  }
   0x4 LB: > { %s23_s22 = sadd.s32 1, %s6845_s19  ;;  %s26_s23 = sadd.s32 1, %s6849_s20  ;;  %s6853_s21 = sphi %s6893_s21, %s14_s21   ;;  %s6849_s20 = sphi %s6891_s20, %s9026_s20   ;;  %s6845_s19 = sphi %s6889_s19, %s9025_s19   ;;  %s6841_s18 = sphi %s6887_s18, %s9024_s18   ;;  %s6837_s17 = sphi %s6885_s17, %s9023_s17   ;;  %s6833_s16 = sphi %s6883_s16, %s9022_s16   ;;  %s6829_s15 = sphi %s6881_s15, %s9021_s15  }
   0x5   : > { %p24_p0 = scmp.ge.s32.totalorder %s23_s22, 2  ;;  %s5152_s24 = sadd.s32 4294967295, %s6853_s21  }
   0x6   : > { %p139_p1 = scmp.ne.s32.totalorder %s6833_s16, %s6829_s15  ;;  %p140_p2 = scmp.eq.s32.totalorder %s5152_s24, 3 }
   0x7   : > { %s9028_s22 = smov (%p24_p0, %s23_s22), 0  ;;  %s9030_s23 = smov (!%p24_p0, %s26_s23), %s6849_s20 }
   0x8   : > { %s124_s25 = ssub.s32 %s6845_s19, %s9028_s22  ;;  %p28_p3 = scmp.ge.s32.totalorder %s9030_s23, 2 }
   0x9   : > { %p5156_p4 = scmp.ge.s32.totalorder %s6853_s21, 1  ;;  %p6927_p5 = por %p140_p2, %p139_p1 }
   0xa   : > { %p186_p6 = scmp.lt.s32.totalorder %s6853_s21, 5  ;;  %s9032_s23 = smov (%p28_p3, %s9030_s23), 0 }
   0xb   : > { %s125_s27 = ssub.s32 %s6849_s20, %s9032_s23  ;;  %s129_s29 = sadd.s32 1, %s6833_s16 }
   0xc   : > { %p187_p7 = pnand %p5156_p4, %p186_p6  ;;  %s126_s28 = sor.u32 %s125_s27, %s124_s25 }
   0xd   : > { %p127_p8 = scmp.eq.s32.totalorder %s126_s28, 0 }
   0xe   : > { %190 = sbr.rel (%p187_p7) target bundleno = 677 (0x2a5), region = 36 }
   0xf   : > { %s6938_s30 = scalar_select %p127_p8, %s6833_s16, %s129_s29  }
  0x15   : > { %p221_p9 = scmp.lt.s32.totalorder %s6841_s18, 1  ;;  %v6855_v0 = vmov 0   ;;  %p216_p10 = scmp.lt.s32.totalorder %s6837_s17, 1  ;;  %v5162_v54 = vld [vmem:[%s8884_s1] ss:$0 sm:$0xff]  ;;  %vm875_vm3 = vcmask 1043456  }
  0x16   : > { %227 = vst [vmem:[#allocation2] sm:$0xf] %v6855_v0  ;;  %228 = vst [vmem:[#allocation2 + $0x4] sm:$0xf] %v6855_v0  ;;  %vm551_vm0 = vsmask.f32 256 }
  0x17   : > { %229 = vst [vmem:[#allocation2 + $0x8] sm:$0x1] %v6855_v0  ;;  %230 = vst [vmem:[#allocation2 + $0xc] sm:$0xf] %v6855_v0  ;;  %s222_s5 = scalar_select %p221_p9, %s6841_s18, 1  ;;  %vm882_vm5 = vcmask 1040384  }
  0x18   : > { %231 = vst [vmem:[#allocation2 + $0x10] sm:$0xf] %v6855_v0  ;;  %232 = vst [vmem:[#allocation2 + $0x14] sm:$0x1] %v6855_v0  ;;  %s217_s10 = scalar_select %p216_p10, %s6837_s17, 1  ;;  %vm3279_vm8 = vcmask 1042432  }
  0x19   : > { %233 = vst [vmem:[#allocation2 + $0x18] sm:$0xf] %v6855_v0  ;;  %234 = vst [vmem:[#allocation2 + $0x1c] sm:$0xf] %v6855_v0  ;;  %s5588_s6 = sshll.u32 %s222_s5, 9  ;;  %s5621_s29 = smul.u32 12, %s6841_s18 }
  0x1a   : > { %235 = vst [vmem:[#allocation2 + $0x20] sm:$0x1] %v6855_v0  ;;  %236 = vst [vmem:[#allocation2 + $0x24] sm:$0xf] %v6855_v0  ;;  %s6947_s9 = scalar_lea.vmem %s8886_s3, %s5588_s6  ;;  %s5587_s11 = sshll.u32 %s217_s10, 7  ;;  %vm3280_vm9 = vcmask 1046532  }
  0x1b   : > { %237 = vst [vmem:[#allocation2 + $0x28] sm:$0xf] %v6855_v0  ;;  %238 = vst [vmem:[#allocation2 + $0x2c] sm:$0x1] %v6855_v0  ;;  %v6558_v1 = vld [vmem:[%s6947_s9 + $0x140] sm:$0xff]   ;;  %v6560_v3 = vld [vmem:[%s6947_s9 + $0x148] sm:$0xff]   ;;  %s6964_s14 = scalar_lea.vmem %s8883_s0, %s5587_s11 }
  0x1c   : > { %239 = vst [vmem:[#allocation2 + $0x30] sm:$0xf] %v6855_v0  ;;  %240 = vst [vmem:[#allocation2 + $0x34] sm:$0xf] %v6855_v0  ;;  %v6559_v2 = vld [vmem:[%s6947_s9 + $0x40] sm:$0xff]   ;;  %6117 = vmatprep.subr.bf16.mxu1 %v6558_v1  ;;  %v6561_v4 = vld [vmem:[%s6947_s9 + $0x48] sm:$0xff]  }
  0x1d   : > { %241 = vst [vmem:[#allocation2 + $0x38] sm:$0x1] %v6855_v0  ;;  %242 = vst [vmem:[#allocation2 + $0x3c] sm:$0xf] %v6855_v0  ;;  %6118 = vmatpush3.bf16.msra.mxu1 %v6558_v1  ;;  %5925 = vmatprep.subr.bf16.mxu0 %v6559_v2  ;;  %v6562_v5 = vld [vmem:[%s6947_s9 + $0x150] sm:$0xff]   ;;  %v6564_v7 = vld [vmem:[%s6947_s9 + $0x158] sm:$0xff]  }
  0x1e   : > { %243 = vst [vmem:[#allocation2 + $0x40] sm:$0xf] %v6855_v0  ;;  %244 = vst [vmem:[#allocation2 + $0x44] sm:$0x1] %v6855_v0  ;;  %5926 = vmatpush3.bf16.msra.mxu0 %v6559_v2  ;;  %6119 = vmatprep.subr.bf16.mxu1 %v6560_v3  ;;  %v6563_v6 = vld [vmem:[%s6947_s9 + $0x50] sm:$0xff]   ;;  %v6565_v8 = vld [vmem:[%s6947_s9 + $0x58] sm:$0xff]  }
  0x1f   : > { %245 = vst [vmem:[#allocation2 + $0x48] sm:$0xf] %v6855_v0  ;;  %246 = vst [vmem:[#allocation2 + $0x4c] sm:$0xf] %v6855_v0  ;;  %5927 = vmatprep.subr.bf16.mxu0 %v6561_v4  ;;  %v6566_v9 = vld [vmem:[%s6947_s9 + $0x160] sm:$0xff]   ;;  %v6568_v11 = vld [vmem:[%s6947_s9 + $0x168] sm:$0xff]  }
  0x20   : > { %247 = vst [vmem:[#allocation2 + $0x50] sm:$0x1] %v6855_v0  ;;  %248 = vst [vmem:[#allocation2 + $0x54] sm:$0xf] %v6855_v0  ;;  %v6567_v10 = vld [vmem:[%s6947_s9 + $0x60] sm:$0xff]   ;;  %v6569_v12 = vld [vmem:[%s6947_s9 + $0x68] sm:$0xff]  }
  0x21   : > { %249 = vst [vmem:[#allocation2 + $0x58] sm:$0xf] %v6855_v0  ;;  %250 = vst [vmem:[#allocation2 + $0x5c] sm:$0x1] %v6855_v0  ;;  %6120 = vmatpush3.bf16.msra.mxu1 %v6560_v3  ;;  %v6969_v13 = vld [vmem:[%s6964_s14] sm:$0xff]   ;;  %v6972_v14 = vld [vmem:[%s6964_s14 + $0x8] sm:$0xff]  }
  0x22   : > { %251 = vst [vmem:[#allocation2 + $0x60] sm:$0xf] %v6855_v0  ;;  %252 = vst [vmem:[#allocation2 + $0x64] sm:$0xf] %v6855_v0  ;;  %5928 = vmatpush3.bf16.msra.mxu0 %v6561_v4  ;;  %6121 = vmatprep.subr.bf16.mxu1 %v6562_v5  ;;  %v6975_v15 = vld [vmem:[%s6964_s14 + $0x10] sm:$0xff]   ;;  %v5656_v16 = vunpack.c.l.bf16 %v6969_v13  ;;  %v5657_v17 = vunpack.c.h.bf16 %v6969_v13  ;;  %v5660_v18 = vunpack.c.l.bf16 %v6972_v14  ;;  %v5720_v19 = vld [vmem:[%s6964_s14 + $0x18] sm:$0xff]   ;;  %v5661_v22 = vunpack.c.h.bf16 %v6972_v14 }
  0x23   : > { %253 = vst [vmem:[#allocation2 + $0x68] sm:$0x1] %v6855_v0  ;;  %254 = vst [vmem:[#allocation2 + $0x6c] sm:$0xf] %v6855_v0  ;;  %5929 = vmatprep.subr.bf16.mxu0 %v6563_v6  ;;  %v6982_v20 = vld [vmem:[%s6964_s14 + $0x20] sm:$0xff]   ;;  %v6985_v21 = vld [vmem:[%s6964_s14 + $0x28] sm:$0xff]   ;;  %v5664_v23 = vunpack.c.l.bf16 %v6975_v15  ;;  %v5665_v24 = vunpack.c.h.bf16 %v6975_v15  ;;  %v5668_v25 = vunpack.c.l.bf16 %v5720_v19  ;;  %v5669_v29 = vunpack.c.h.bf16 %v5720_v19 }
  0x24   : > { %255 = vst [vmem:[#allocation2 + $0x70] sm:$0xf] %v6855_v0  ;;  %256 = vst [vmem:[#allocation2 + $0x74] sm:$0x1] %v6855_v0  ;;  %v6991_v26 = vld [vmem:[%s6964_s14 + $0x30] sm:$0xff]   ;;  %v6994_v27 = vld [vmem:[%s6964_s14 + $0x38] sm:$0xff]   ;;  %v5672_v30 = vunpack.c.l.bf16 %v6982_v20  ;;  %v5673_v31 = vunpack.c.h.bf16 %v6982_v20  ;;  %v5676_v32 = vunpack.c.l.bf16 %v6985_v21  ;;  %v5677_v37 = vunpack.c.h.bf16 %v6985_v21 }
  0x25   : > { %257 = vst [vmem:[#allocation2 + $0x78] sm:$0xf] %v6855_v0  ;;  %258 = vst [vmem:[#allocation2 + $0x7c] sm:$0xf] %v6855_v0  ;;  %6122 = vmatpush3.bf16.msra.mxu1 %v6562_v5  ;;  %v6997_v28 = vld [vmem:[%s6964_s14 + $0x40] sm:$0xff]   ;;  %v7003_v33 = vld [vmem:[%s6964_s14 + $0x48] sm:$0xff]   ;;  %v5680_v38 = vunpack.c.l.bf16 %v6991_v26  ;;  %v5681_v39 = vunpack.c.h.bf16 %v6991_v26  ;;  %v5684_v40 = vunpack.c.l.bf16 %v6994_v27  ;;  %v5685_v44 = vunpack.c.h.bf16 %v6994_v27 }
  0x26   : > { %259 = vst [vmem:[#allocation2 + $0x80] sm:$0x1] %v6855_v0  ;;  %260 = vst [vmem:[#allocation2 + $0x84] sm:$0xf] %v6855_v0  ;;  %5930 = vmatpush3.bf16.msra.mxu0 %v6563_v6  ;;  %6123 = vmatprep.subr.bf16.mxu1 %v6564_v7  ;;  %v7006_v34 = vld [vmem:[%s6964_s14 + $0x50] sm:$0xff]   ;;  %v7009_v35 = vld [vmem:[%s6964_s14 + $0x58] sm:$0xff]   ;;  %v5688_v45 = vunpack.c.l.bf16 %v6997_v28  ;;  %v5689_v46 = vunpack.c.h.bf16 %v6997_v28  ;;  %v5692_v47 = vunpack.c.l.bf16 %v7003_v33  ;;  %v5693_v50 = vunpack.c.h.bf16 %v7003_v33 }
  0x27   : > { %261 = vst [vmem:[#allocation2 + $0x88] sm:$0xf] %v6855_v0  ;;  %262 = vst [vmem:[#allocation2 + $0x8c] sm:$0x1] %v6855_v0  ;;  %5931 = vmatprep.subr.bf16.mxu0 %v6565_v8  ;;  %v6570_v36 = vld [vmem:[%s6947_s9 + $0x170] sm:$0xff]   ;;  %v5729_v41 = vld [vmem:[%s6964_s14 + $0x60] sm:$0xff]   ;;  %v5696_v51 = vunpack.c.l.bf16 %v7006_v34  ;;  %v5697_v52 = vunpack.c.h.bf16 %v7006_v34  ;;  %v5700_v53 = vunpack.c.l.bf16 %v7009_v35  ;;  %v5701_v55 = vunpack.c.h.bf16 %v7009_v35 }
  0x28   : > { %263 = vst [vmem:[#allocation2 + $0x90] sm:$0xf] %v6855_v0  ;;  %264 = vst [vmem:[#allocation2 + $0x94] sm:$0xf] %v6855_v0  ;;  %v7018_v42 = vld [vmem:[%s6964_s14 + $0x68] sm:$0xff]   ;;  %v6571_v43 = vld [vmem:[%s6947_s9 + $0x70] sm:$0xff]   ;;  %v5704_v56 = vunpack.c.l.bf16 %v5729_v41  ;;  %v5705_v57 = vunpack.c.h.bf16 %v5729_v41  ;;  %v352_v1 = vmul.f32 %v5656_v16, %v5162_v54  ;;  %v353_v2 = vmul.f32 %v5657_v17, %v5162_v54 }
  0x29   : > { %265 = vst [vmem:[#allocation2 + $0x98] sm:$0x1] %v6855_v0  ;;  %266 = vst [vmem:[#allocation2 + $0x9c] sm:$0xf] %v6855_v0  ;;  %6124 = vmatpush3.bf16.msra.mxu1 %v6564_v7  ;;  %v5731_v48 = vld [vmem:[%s6964_s14 + $0x70] sm:$0xff]   ;;  %v5732_v49 = vld [vmem:[%s6964_s14 + $0x78] sm:$0xff]   ;;  %v5708_v58 = vunpack.c.l.bf16 %v7018_v42  ;;  %v5709_v60 = vunpack.c.h.bf16 %v7018_v42  ;;  %v354_v3 = vmul.f32 %v5660_v18, %v5162_v54  ;;  %v355_v4 = vmul.f32 %v5661_v22, %v5162_v54 }
  0x2a   : > { %267 = vst [vmem:[#allocation2 + $0xa0] sm:$0xf] %v6855_v0  ;;  %268 = vst [vmem:[#allocation2 + $0xa4] sm:$0x1] %v6855_v0  ;;  %5932 = vmatpush3.bf16.msra.mxu0 %v6565_v8  ;;  %6125 = vmatprep.subr.bf16.mxu1 %v6566_v9  ;;  %v6572_v59 = vld [vmem:[%s6947_s9 + $0x178] sm:$0xff]   ;;  %v5712_v61 = vunpack.c.l.bf16 %v5731_v48  ;;  %v5713_v62 = vunpack.c.h.bf16 %v5731_v48  ;;  %v5716_v63 = vunpack.c.l.bf16 %v5732_v49  ;;  %v356_v5 = vmul.f32 %v5664_v23, %v5162_v54  ;;  %s7511_s5 = scalar_lea.vmem [#allocation2], %s5621_s29 }
  0x2b   : > { %269 = vst [vmem:[#allocation2 + $0xa8] sm:$0xf] %v6855_v0  ;;  %270 = vst [vmem:[#allocation2 + $0xac] sm:$0xf] %v6855_v0  ;;  %5933 = vmatprep.subr.bf16.mxu0 %v6567_v10  ;;  %v357_v6 = vmul.f32 %v5665_v24, %v5162_v54  ;;  %v358_v7 = vmul.f32 %v5668_v25, %v5162_v54  ;;  %v359_v8 = vmul.f32 %v5669_v29, %v5162_v54  ;;  %v5163_v25 = vld [vmem:[%s8885_s2] ss:$0 sm:$0xff] }
  0x2c   : > { %271 = vst [vmem:[#allocation2 + $0xb0] sm:$0x1] %v6855_v0  ;;  %272 = vst [vmem:[#allocation2 + $0xb4] sm:$0xf] %v6855_v0  ;;  %v5717_v13 = vunpack.c.h.bf16 %v5732_v49  ;;  %v364_v14 = vmul.f32 %v5680_v38, %v5162_v54  ;;  %v365_v15 = vmul.f32 %v5681_v39, %v5162_v54  ;;  %v366_v19 = vmul.f32 %v5684_v40, %v5162_v54  ;;  %v6574_v38 = vld [vmem:[%s6947_s9] sm:$0xff]   ;;  %s213_s6 = sand.u32 1, %s6829_s15  }
  0x2d   : > { %273 = vst [vmem:[#allocation2 + $0xb8] sm:$0xf] %v6855_v0  ;;  %274 = vst [vmem:[#allocation2 + $0xbc] sm:$0x1] %v6855_v0  ;;  %6126 = vmatpush3.bf16.msra.mxu1 %v6566_v9  ;;  %v360_v9 = vmul.f32 %v5672_v30, %v5162_v54  ;;  %v367_v16 = vmul.f32 %v5685_v44, %v5162_v54  ;;  %v368_v17 = vmul.f32 %v5688_v45, %v5162_v54  ;;  %vm552_vm1 = vsmask.f32 4368 }
  0x2e   : > { %275 = vst [vmem:[#allocation2 + $0xc0] sm:$0xf] %v6855_v0  ;;  %276 = vst [vmem:[#allocation2 + $0xc4] sm:$0xf] %v6855_v0  ;;  %5934 = vmatpush3.bf16.msra.mxu0 %v6567_v10  ;;  %6127 = vmatprep.subr.bf16.mxu1 %v6568_v11  ;;  %v361_v10 = vmul.f32 %v5673_v31, %v5162_v54  ;;  %v369_v18 = vmul.f32 %v5689_v46, %v5162_v54  ;;  %vm876_vm4 = vsmask.f32 7938 }
  0x2f   : > { %277 = vst [vmem:[#allocation2 + $0xc8] sm:$0x1] %v6855_v0  ;;  %278 = vst [vmem:[#allocation2 + $0xcc] sm:$0xf] %v6855_v0  ;;  %5935 = vmatprep.subr.bf16.mxu0 %v6569_v12  ;;  %v370_v20 = vmul.f32 %v5692_v47, %v5162_v54  ;;  %v371_v21 = vmul.f32 %v5693_v50, %v5162_v54  ;;  %v372_v22 = vmul.f32 %v5696_v51, %v5162_v54  ;;  %vm1059_vm11 = vsmask.f32 3328 }
  0x30   : > { %279 = vst [vmem:[#allocation2 + $0xd0] sm:$0xf] %v6855_v0  ;;  %280 = vst [vmem:[#allocation2 + $0xd4] sm:$0x1] %v6855_v0  ;;  %v6573_v0 = vld [vmem:[%s6947_s9 + $0x78] sm:$0xff]   ;;  %v373_v23 = vmul.f32 %v5697_v52, %v5162_v54  ;;  %v374_v24 = vmul.f32 %v5700_v53, %v5162_v54  ;;  %v375_v26 = vmul.f32 %v5701_v55, %v5162_v54  ;;  %s5157_s7 = sshll.u32 %s213_s6, 8 }
  0x31   : > { %6128 = vmatpush3.bf16.msra.mxu1 %v6568_v11  ;;  %v362_v11 = vmul.f32 %v5676_v32, %v5162_v54  ;;  %v376_v27 = vmul.f32 %v5704_v56, %v5162_v54  ;;  %v377_v28 = vmul.f32 %v5705_v57, %v5162_v54  ;;  %v378_v29 = vmul.f32 %v5708_v58, %v5162_v54  ;;  %vm7198_vm2 = vmor %vm551_vm0, %vm552_vm1  ;;  %s8755_s15 = scalar_lea.vmem [#allocation3], %s5157_s7  ;;  %s5582_s8 = sshll.u32 (%p6927_p5), %s6841_s18, 2 }
  0x32   : > { %5936 = vmatpush3.bf16.msra.mxu0 %v6569_v12  ;;  %6129 = vmatprep.subr.bf16.mxu1 %v6570_v36  ;;  %v363_v12 = vmul.f32 %v5677_v37, %v5162_v54  ;;  %v379_v30 = vmul.f32 %v5709_v60, %v5162_v54  ;;  %v380_v31 = vmul.f32 %v5712_v61, %v5162_v54  ;;  %vm7364_vm6 = vmand %vm875_vm3, %vm876_vm4  ;;  %vm1060_vm12 = vsmask.f32 7440 }
  0x33   : > { %5937 = vmatprep.subr.bf16.mxu0 %v6571_v43  ;;  %v381_v32 = vmul.f32 %v5713_v62, %v5162_v54  ;;  %v382_v33 = vmul.f32 %v5716_v63, %v5162_v54  ;;  %v383_v34 = vmul.f32 %v5717_v13, %v5162_v54  ;;  %v7042_v35 = vadd.f32 %v5163_v25, %v352_v1  ;;  %vm7374_vm7 = vmand %vm882_vm5, %vm551_vm0 }
  0x34   : > { %v7046_v37 = vadd.f32 %v5163_v25, %v354_v3  ;;  %v7049_v39 = vadd.f32 %v5163_v25, %v355_v4  ;;  %v7051_v40 = vadd.f32 %v5163_v25, %v356_v5  ;;  %v7053_v41 = vadd.f32 %v5163_v25, %v357_v6  ;;  %vm7507_vm10 = vmor %vm3279_vm8, %vm3280_vm9 }
  0x35   : > { %6130 = vmatpush3.bf16.msra.mxu1 %v6570_v36  ;;  %v7044_v36 = vadd.f32 %v5163_v25, %v353_v2  ;;  %v7055_v42 = vadd.f32 %v5163_v25, %v358_v7  ;;  %v7058_v44 = vadd.f32 %v5163_v25, %v359_v8  ;;  %v7060_v45 = vadd.f32 %v5163_v25, %v360_v9  ;;  %vm7539_vm13 = vmor %vm1059_vm11, %vm1060_vm12 }
  0x36   : > { %5938 = vmatpush3.bf16.msra.mxu0 %v6571_v43  ;;  %6131 = vmatprep.subr.bf16.mxu1 %v6572_v59  ;;  %v6575_v43 = vld [vmem:[%s6947_s9 + $0x100] sm:$0xff]   ;;  %v7062_v46 = vadd.f32 %v5163_v25, %v361_v10  ;;  %v7064_v47 = vadd.f32 %v5163_v25, %v362_v11  ;;  %v7066_v48 = vadd.f32 %v5163_v25, %v363_v12  ;;  %v423_v5 = vmax.f32 %v7042_v35, 0.0 }
  0x37   : > { %5939 = vmatprep.subr.bf16.mxu0 %v6573_v0  ;;  %v7068_v49 = vadd.f32 %v5163_v25, %v364_v14  ;;  %v7070_v50 = vadd.f32 %v5163_v25, %v365_v15  ;;  %v7072_v51 = vadd.f32 %v5163_v25, %v366_v19  ;;  %v7074_v52 = vadd.f32 %v5163_v25, %v367_v16 }
  0x38   : > { %v7076_v53 = vadd.f32 %v5163_v25, %v368_v17  ;;  %v7078_v54 = vadd.f32 %v5163_v25, %v369_v18  ;;  %v7080_v55 = vadd.f32 %v5163_v25, %v370_v20  ;;  %v7082_v56 = vadd.f32 %v5163_v25, %v371_v21 }
  0x39   : > { %6132 = vmatpush3.bf16.msra.mxu1 %v6572_v59  ;;  %v7084_v57 = vadd.f32 %v5163_v25, %v372_v22  ;;  %v7086_v58 = vadd.f32 %v5163_v25, %v373_v23  ;;  %v7088_v59 = vadd.f32 %v5163_v25, %v374_v24  ;;  %v7090_v60 = vadd.f32 %v5163_v25, %v375_v26 }
  0x3a   : > { %5940 = vmatpush3.bf16.msra.mxu0 %v6573_v0  ;;  %6165 = vmatprep.subr.bf16.mxu1 %v6575_v43  ;;  %v7092_v61 = vadd.f32 %v5163_v25, %v376_v27  ;;  %v7094_v62 = vadd.f32 %v5163_v25, %v377_v28  ;;  %v7096_v63 = vadd.f32 %v5163_v25, %v378_v29  ;;  %v424_v6 = vmax.f32 %v7044_v36, 0.0 }
  0x3b   : > { %5973 = vmatprep.subr.bf16.mxu0 %v6574_v38  ;;  %v7098_v0 = vadd.f32 %v5163_v25, %v379_v30  ;;  %v7100_v1 = vadd.f32 %v5163_v25, %v380_v31  ;;  %v7102_v2 = vadd.f32 %v5163_v25, %v381_v32  ;;  %v7104_v3 = vadd.f32 %v5163_v25, %v382_v33 }
  0x3c   : > { %v7106_v4 = vadd.f32 %v5163_v25, %v383_v34  ;;  %v425_v7 = vmax.f32 %v7046_v37, 0.0  ;;  %v426_v8 = vmax.f32 %v7049_v39, 0.0  ;;  %v427_v9 = vmax.f32 %v7051_v40, 0.0 }
  0x3d   : > { %v428_v10 = vmax.f32 %v7053_v41, 0.0  ;;  %v429_v11 = vmax.f32 %v7055_v42, 0.0  ;;  %v430_v12 = vmax.f32 %v7058_v44, 0.0  ;;  %v431_v13 = vmax.f32 %v7060_v45, 0.0 }
  0x3e   : > { %v432_v14 = vmax.f32 %v7062_v46, 0.0  ;;  %v433_v15 = vmax.f32 %v7064_v47, 0.0  ;;  %v434_v19 = vmax.f32 %v7066_v48, 0.0  ;;  %v435_v16 = vmax.f32 %v7068_v49, 0.0 }
  0x3f   : > { %v436_v17 = vmax.f32 %v7070_v50, 0.0  ;;  %v437_v18 = vmax.f32 %v7072_v51, 0.0  ;;  %v438_v20 = vmax.f32 %v7074_v52, 0.0  ;;  %v439_v21 = vmax.f32 %v7076_v53, 0.0 }
  0x40   : > { %v440_v22 = vmax.f32 %v7078_v54, 0.0  ;;  %v441_v23 = vmax.f32 %v7080_v55, 0.0  ;;  %v442_v24 = vmax.f32 %v7082_v56, 0.0  ;;  %v443_v25 = vmax.f32 %v7084_v57, 0.0 }
  0x41   : > { %v444_v26 = vmax.f32 %v7086_v58, 0.0  ;;  %v445_v27 = vmax.f32 %v7088_v59, 0.0  ;;  %v446_v28 = vmax.f32 %v7090_v60, 0.0  ;;  %v447_v29 = vmax.f32 %v7092_v61, 0.0 }
  0x42   : > { %v448_v30 = vmax.f32 %v7094_v62, 0.0  ;;  %v449_v31 = vmax.f32 %v7096_v63, 0.0  ;;  %v450_v32 = vmax.f32 %v7098_v0, 0.0  ;;  %v451_v33 = vmax.f32 %v7100_v1, 0.0 }
  0x43   : > { %v452_v34 = vmax.f32 %v7102_v2, 0.0  ;;  %v453_v35 = vmax.f32 %v7104_v3, 0.0  ;;  %v454_v36 = vmax.f32 %v7106_v4, 0.0  ;;  %v5589_v37 = vpack.c.bf16 %v423_v5, %v423_v5 }
  0x44   : > { %v5590_v38 = vpack.c.bf16 %v424_v6, %v424_v6  ;;  %v5591_v39 = vpack.c.bf16 %v425_v7, %v425_v7  ;;  %v5592_v40 = vpack.c.bf16 %v426_v8, %v426_v8  ;;  %v5593_v41 = vpack.c.bf16 %v427_v9, %v427_v9 }
  0x45   : > { %v7140_v42 = vpack.c.bf16 %v428_v10, %v428_v10  ;;  %v7142_v43 = vpack.c.bf16 %v429_v11, %v429_v11  ;;  %v7144_v44 = vpack.c.bf16 %v430_v12, %v430_v12  ;;  %v7146_v45 = vpack.c.bf16 %v431_v13, %v431_v13 }
  0x46   : > { %v7148_v46 = vpack.c.bf16 %v432_v14, %v432_v14  ;;  %v7150_v47 = vpack.c.bf16 %v433_v15, %v433_v15  ;;  %v7152_v48 = vpack.c.bf16 %v434_v19, %v434_v19  ;;  %v7154_v49 = vpack.c.bf16 %v435_v16, %v435_v16  ;;  %v961_v19 = vld [vmem:[#allocation2 + $0x98] sm:$0x1] }
  0x47   : > { %v7156_v50 = vpack.c.bf16 %v436_v17, %v436_v17  ;;  %v7158_v51 = vpack.c.bf16 %v437_v18, %v437_v18  ;;  %v7160_v52 = vpack.c.bf16 %v438_v20, %v438_v20  ;;  %v7162_v53 = vpack.c.bf16 %v439_v21, %v439_v21 }
  0x48   : > { %v7164_v54 = vpack.c.bf16 %v440_v22, %v440_v22  ;;  %v7166_v55 = vpack.c.bf16 %v441_v23, %v441_v23  ;;  %v7168_v56 = vpack.c.bf16 %v442_v24, %v442_v24  ;;  %v7170_v57 = vpack.c.bf16 %v443_v25, %v443_v25 }
  0x49   : > { %v7172_v58 = vpack.c.bf16 %v444_v26, %v444_v26  ;;  %v7174_v59 = vpack.c.bf16 %v445_v27, %v445_v27  ;;  %v7176_v60 = vpack.c.bf16 %v446_v28, %v446_v28  ;;  %v7178_v61 = vpack.c.bf16 %v447_v29, %v447_v29 }
  0x4a   : > { %v7180_v62 = vpack.c.bf16 %v448_v30, %v448_v30  ;;  %v7182_v63 = vpack.c.bf16 %v449_v31, %v449_v31  ;;  %v7184_v0 = vpack.c.bf16 %v450_v32, %v450_v32  ;;  %v7186_v1 = vpack.c.bf16 %v451_v33, %v451_v33 }
  0x4b   : > { %v7188_v2 = vpack.c.bf16 %v452_v34, %v452_v34  ;;  %v7190_v3 = vpack.c.bf16 %v453_v35, %v453_v35  ;;  %v7192_v4 = vpack.c.bf16 %v454_v36, %v454_v36  ;;  %v555_v5 = vshrl.u32 %v5589_v37, 16 }
  0x4c   : > { %v558_v6 = vshll.u32 %v5589_v37, 16  ;;  %v563_v7 = vshrl.u32 %v5590_v38, 16  ;;  %v566_v8 = vshll.u32 %v5590_v38, 16  ;;  %v572_v9 = vshrl.u32 %v5591_v39, 16 }
  0x4d   : > { %v575_v10 = vshll.u32 %v5591_v39, 16  ;;  %v580_v11 = vshrl.u32 %v5592_v40, 16  ;;  %v557_v12 = vrot.slane %v555_v5, 7  ;;  %v583_v14 = vshll.u32 %v5592_v40, 16  ;;  %v922_v40 = vld [vmem:[#allocation2 + $0x54] sm:$0xf] }
  0x4e   : > { %v7194_v13 = vrot.slane %v563_v7, 7  ;;  %v589_v15 = vshrl.u32 %v5593_v41, 16  ;;  %v574_v16 = vrot.slane %v572_v9, 7  ;;  %v592_v18 = vshll.u32 %v5593_v41, 16 }
  0x4f   : > { %v7202_v17 = vrot.slane %v580_v11, 7  ;;  %v597_v20 = vshrl.u32 %v7140_v42, 16  ;;  %v7205_v21 = vor.u32 %v558_v6, %v557_v12  ;;  %v561_v22 = vrot.slane %v557_v12, 4 }
  0x50   : > { %v568_v23 = vor.u32 %v566_v8, %v7194_v13  ;;  %v570_v24 = vrot.slane %v7194_v13, 4  ;;  %v7209_v25 = vor.u32 %v575_v10, %v574_v16  ;;  %v578_v26 = vrot.slane %v574_v16, 4 }
  0x51   : > { %v585_v27 = vor.u32 %v583_v14, %v7202_v17  ;;  %v587_v28 = vrot.slane %v7202_v17, 4  ;;  %v591_v30 = vrot.slane %v589_v15, 7  ;;  %v7215_v31 = vrot.slane %v597_v20, 7  ;;  %v919_v14 = vld [vmem:[#allocation2 + $0x50] sm:$0x1] }
  0x52   : > { %v569_v29 = vsel %vm7198_vm2, %v561_v22, %v568_v23  ;;  %v600_v32 = vshll.u32 %v7140_v42, 16  ;;  %v606_v34 = vshrl.u32 %v7142_v43, 16  ;;  %v609_v35 = vshll.u32 %v7142_v43, 16 }
  0x53   : > { %v586_v33 = vsel %vm7198_vm2, %v578_v26, %v585_v27  ;;  %v614_v36 = vshrl.u32 %v7144_v44, 16  ;;  %881 = vst [vmem:[#allocation2 + $0x10] sm:$0xf] %v569_v29  ;;  %v7223_v37 = vor.u32 %v592_v18, %v591_v30  ;;  %v595_v38 = vrot.slane %v591_v30, 4 }
  0x54   : > { %v602_v39 = vor.u32 %v600_v32, %v7215_v31  ;;  %890 = vst [vmem:[#allocation2 + $0x1c] sm:$0xf] %v586_v33  ;;  %v608_v41 = vrot.slane %v606_v34, 7  ;;  %v617_v5 = vshll.u32 %v7144_v44, 16  ;;  %v623_v6 = vshrl.u32 %v7146_v45, 16 }
  0x55   : > { %v7227_v42 = vrot.slane %v614_v36, 7  ;;  %v626_v7 = vshll.u32 %v7146_v45, 16  ;;  %v631_v8 = vshrl.u32 %v7148_v46, 16  ;;  %v634_v9 = vshll.u32 %v7148_v46, 16 }
  0x56   : > { %v603_v43 = vsel %vm7198_vm2, %v595_v38, %v602_v39  ;;  %v7236_v10 = vor.u32 %v609_v35, %v608_v41  ;;  %v612_v11 = vrot.slane %v608_v41, 4  ;;  %v625_v44 = vrot.slane %v623_v6, 7 }
  0x57   : > { %v619_v12 = vor.u32 %v617_v5, %v7227_v42  ;;  %897 = vst [vmem:[#allocation2 + $0x28] sm:$0xf] %v603_v43  ;;  %v7240_v15 = vrot.slane %v631_v8, 7  ;;  %v640_v16 = vshrl.u32 %v7150_v47, 16  ;;  %v643_v18 = vshll.u32 %v7150_v47, 16 }
  0x58   : > { %v648_v46 = vshrl.u32 %v7152_v48, 16  ;;  %v651_v20 = vshll.u32 %v7152_v48, 16  ;;  %v657_v22 = vshrl.u32 %v7154_v49, 16  ;;  %v7249_v23 = vor.u32 %v626_v7, %v625_v44 }
  0x59   : > { %v620_v45 = vsel %vm7198_vm2, %v612_v11, %v619_v12  ;;  %v629_v26 = vrot.slane %v625_v44, 4  ;;  %v636_v27 = vor.u32 %v634_v9, %v7240_v15  ;;  %v642_v30 = vrot.slane %v640_v16, 7 }
  0x5a   : > { %904 = vst [vmem:[#allocation2 + $0x34] sm:$0xf] %v620_v45  ;;  %v7253_v32 = vrot.slane %v648_v46, 7  ;;  %v659_v47 = vrot.slane %v657_v22, 7  ;;  %v660_v33 = vshll.u32 %v7154_v49, 16  ;;  %v665_v48 = vshrl.u32 %v7156_v50, 16 }
  0x5b   : > { %v637_v34 = vsel %vm7198_vm2, %v629_v26, %v636_v27  ;;  %v668_v35 = vshll.u32 %v7156_v50, 16  ;;  %v674_v36 = vshrl.u32 %v7158_v51, 16  ;;  %v7261_v38 = vor.u32 %v643_v18, %v642_v30 }
  0x5c   : > { %v646_v39 = vrot.slane %v642_v30, 4  ;;  %v653_v41 = vor.u32 %v651_v20, %v7253_v32  ;;  %911 = vst [vmem:[#allocation2 + $0x40] sm:$0xf] %v637_v34  ;;  %v7265_v6 = vor.u32 %v660_v33, %v659_v47  ;;  %v663_v49 = vrot.slane %v659_v47, 4 }
  0x5d   : > { %v7267_v43 = vrot.slane %v665_v48, 7  ;;  %v676_v7 = vrot.slane %v674_v36, 7  ;;  %v677_v50 = vshll.u32 %v7158_v51, 16  ;;  %v682_v9 = vshrl.u32 %v7160_v52, 16 }
  0x5e   : > { %v654_v8 = vsel %vm7198_vm2, %v646_v39, %v653_v41  ;;  %v685_v11 = vshll.u32 %v7160_v52, 16  ;;  %v691_v18 = vshrl.u32 %v7162_v53, 16  ;;  %v694_v20 = vshll.u32 %v7162_v53, 16  ;;  %v915_v41 = vld [vmem:[#allocation2 + $0x48] sm:$0xf] }
  0x5f   : > { %v670_v12 = vor.u32 %v668_v35, %v7267_v43  ;;  %v680_v16 = vrot.slane %v676_v7, 4  ;;  %918 = vst [vmem:[#allocation2 + $0x4c] sm:$0xf] %v654_v8  ;;  %v7277_v45 = vor.u32 %v677_v50, %v676_v7  ;;  %v7279_v46 = vrot.slane %v682_v9, 7 }
  0x60   : > { %v699_v51 = vshrl.u32 %v7164_v54, 16  ;;  %v693_v52 = vrot.slane %v691_v18, 7  ;;  %v702_v26 = vshll.u32 %v7164_v54, 16  ;;  %v708_v27 = vshrl.u32 %v7166_v55, 16 }
  0x61   : > { %v671_v22 = vsel %vm7198_vm2, %v663_v49, %v670_v12  ;;  %v687_v30 = vor.u32 %v685_v11, %v7279_v46  ;;  %v711_v34 = vshll.u32 %v7166_v55, 16  ;;  %v716_v36 = vshrl.u32 %v7168_v56, 16 }
  0x62   : > { %v7289_v33 = vrot.slane %v699_v51, 7  ;;  %925 = vst [vmem:[#allocation2 + $0x58] sm:$0xf] %v671_v22  ;;  %v7292_v53 = vor.u32 %v694_v20, %v693_v52  ;;  %v697_v48 = vrot.slane %v693_v52, 4  ;;  %v710_v35 = vrot.slane %v708_v27, 7 }
  0x63   : > { %v688_v54 = vsel %vm7198_vm2, %v680_v16, %v687_v30  ;;  %v719_v49 = vshll.u32 %v7168_v56, 16  ;;  %v7302_v55 = vrot.slane %v716_v36, 7  ;;  %v725_v50 = vshrl.u32 %v7170_v57, 16  ;;  %v908_v56 = vld [vmem:[#allocation2 + $0x3c] sm:$0xf] }
  0x64   : > { %v704_v39 = vor.u32 %v702_v26, %v7289_v33  ;;  %v7300_v7 = vor.u32 %v711_v34, %v710_v35  ;;  %v714_v8 = vrot.slane %v710_v35, 4  ;;  %932 = vst [vmem:[#allocation2 + $0x64] sm:$0xf] %v688_v54  ;;  %v728_v11 = vshll.u32 %v7170_v57, 16 }
  0x65   : > { %v733_v12 = vshrl.u32 %v7172_v58, 16  ;;  %v736_v16 = vshll.u32 %v7172_v58, 16  ;;  %v721_v18 = vor.u32 %v719_v49, %v7302_v55  ;;  %v727_v20 = vrot.slane %v725_v50, 7 }
  0x66   : > { %v705_v9 = vsel %vm7198_vm2, %v697_v48, %v704_v39  ;;  %v742_v51 = vshrl.u32 %v7174_v59, 16  ;;  %v745_v52 = vshll.u32 %v7174_v59, 16  ;;  %v750_v57 = vshrl.u32 %v7176_v60, 16 }
  0x67   : > { %939 = vst [vmem:[#allocation2 + $0x70] sm:$0xf] %v705_v9  ;;  %v7313_v22 = vrot.slane %v733_v12, 7  ;;  %v753_v26 = vshll.u32 %v7176_v60, 16  ;;  %v722_v58 = vsel %vm7198_vm2, %v714_v8, %v721_v18  ;;  %v7320_v27 = vor.u32 %v728_v11, %v727_v20 }
  0x68   : > { %v731_v30 = vrot.slane %v727_v20, 4  ;;  %v744_v34 = vrot.slane %v742_v51, 7  ;;  %v7324_v36 = vrot.slane %v750_v57, 7  ;;  %v759_v59 = vshrl.u32 %v7178_v61, 16  ;;  %946 = vst [vmem:[#allocation2 + $0x7c] sm:$0xf] %v722_v58 }
  0x69   : > { %v738_v48 = vor.u32 %v736_v16, %v7313_v22  ;;  %v762_v39 = vshll.u32 %v7178_v61, 16  ;;  %v767_v49 = vshrl.u32 %v7180_v62, 16  ;;  %v770_v16 = vshll.u32 %v7180_v62, 16 }
  0x6a   : > { %v7327_v54 = vor.u32 %v745_v52, %v744_v34  ;;  %v748_v60 = vrot.slane %v744_v34, 4  ;;  %v755_v50 = vor.u32 %v753_v26, %v7324_v36  ;;  %v761_v11 = vrot.slane %v759_v59, 7 }
  0x6b   : > { %v739_v8 = vsel %vm7198_vm2, %v731_v30, %v738_v48  ;;  %v7335_v12 = vrot.slane %v767_v49, 7  ;;  %v776_v18 = vshrl.u32 %v7182_v63, 16  ;;  %v779_v20 = vshll.u32 %v7182_v63, 16 }
  0x6c   : > { %953 = vst [vmem:[#allocation2 + $0x88] sm:$0xf] %v739_v8  ;;  %v756_v61 = vsel %vm7198_vm2, %v748_v60, %v755_v50  ;;  %v7342_v51 = vor.u32 %v762_v39, %v761_v11  ;;  %v765_v52 = vrot.slane %v761_v11, 4  ;;  %v784_v57 = vshrl.u32 %v7184_v0, 16  ;;  %v878_v60 = vld [vmem:[#allocation2 + $0xc] sm:$0xf] }
  0x6d   : > { %v772_v26 = vor.u32 %v770_v16, %v7335_v12  ;;  %v778_v30 = vrot.slane %v776_v18, 7  ;;  %v787_v62 = vshll.u32 %v7184_v0, 16  ;;  %960 = vst [vmem:[#allocation2 + $0x94] sm:$0xf] %v756_v61  ;;  %v793_v63 = vshrl.u32 %v7186_v1, 16 }
  0x6e   : > { %v7348_v34 = vrot.slane %v784_v57, 7  ;;  %v796_v48 = vshll.u32 %v7186_v1, 16  ;;  %v801_v59 = vshrl.u32 %v7188_v2, 16  ;;  %v804_v50 = vshll.u32 %v7188_v2, 16  ;;  %v884_v11 = vld [vmem:[#allocation2 + $0x14] sm:$0x1] }
  0x6f   : > { %v773_v39 = vsel %vm7198_vm2, %v765_v52, %v772_v26  ;;  %v7355_v49 = vor.u32 %v779_v20, %v778_v30  ;;  %v782_v8 = vrot.slane %v778_v30, 4  ;;  %v887_v0 = vld [vmem:[#allocation2 + $0x18] sm:$0xf]  ;;  %v891_v16 = vld [vmem:[#allocation2 + $0x20] sm:$0x1]  ;;  %v795_v57 = vrot.slane %v793_v63, 7 }
  0x70   : > { %v789_v18 = vor.u32 %v787_v62, %v7348_v34  ;;  %v7360_v1 = vrot.slane %v801_v59, 7  ;;  %967 = vst [vmem:[#allocation2 + $0xa0] sm:$0xf] %v773_v39  ;;  %v810_v20 = vshrl.u32 %v7190_v3, 16  ;;  %v813_v2 = vshll.u32 %v7190_v3, 16 }
  0x71   : > { %v818_v52 = vshrl.u32 %v7192_v4, 16  ;;  %v821_v26 = vshll.u32 %v7192_v4, 16  ;;  %v894_v62 = vld [vmem:[#allocation2 + $0x24] sm:$0xf]  ;;  %v898_v63 = vld [vmem:[#allocation2 + $0x2c] sm:$0x1]  ;;  %v7380_v9 = vor.u32 %v796_v48, %v795_v57  ;;  %v879_v29 = vsel %vm7364_vm6, %v7205_v21, %v878_v60 }
  0x72   : > { %v901_v59 = vld [vmem:[#allocation2 + $0x30] sm:$0xf]  ;;  %v905_v61 = vld [vmem:[#allocation2 + $0x38] sm:$0x1]  ;;  %v790_v39 = vsel %vm7198_vm2, %v782_v8, %v789_v18  ;;  %v799_v3 = vrot.slane %v795_v57, 4  ;;  %v806_v35 = vor.u32 %v804_v50, %v7360_v1  ;;  %v808_v47 = vrot.slane %v7360_v1, 4 }
  0x73   : > { %v912_v4 = vld [vmem:[#allocation2 + $0x44] sm:$0x1]  ;;  %v812_v44 = vrot.slane %v810_v20, 7  ;;  %v7384_v5 = vrot.slane %v818_v52, 7  ;;  %v926_v8 = vld [vmem:[#allocation2 + $0x5c] sm:$0x1]  ;;  %v885_v50 = vsel %vm7374_vm7, %v570_v24, %v884_v11  ;;  %v888_v18 = vsel %vm7364_vm6, %v7209_v25, %v887_v0 }
  0x74   : > { %974 = vst [vmem:[#allocation2 + $0xac] sm:$0xf] %v790_v39  ;;  %v807_v48 = vsel %vm7198_vm2, %v799_v3, %v806_v35  ;;  %880 = vst [vmem:[#allocation2 + $0xc] sm:$0xf] %v879_v29  ;;  %v892_v21 = vsel %vm7374_vm7, %v587_v28, %v891_v16  ;;  %v929_v60 = vld [vmem:[#allocation2 + $0x60] sm:$0xf]  ;;  %v895_v17 = vsel %vm7364_vm6, %v7223_v37, %v894_v62 }
  0x75   : > { %v933_v57 = vld [vmem:[#allocation2 + $0x68] sm:$0x1]  ;;  %v936_v20 = vld [vmem:[#allocation2 + $0x6c] sm:$0xf]  ;;  %v7402_v52 = vor.u32 %v813_v2, %v812_v44  ;;  %v816_v29 = vrot.slane %v812_v44, 4  ;;  %v823_v13 = vor.u32 %v821_v26, %v7384_v5  ;;  %v825_v35 = vrot.slane %v7384_v5, 4 }
  0x76   : > { %886 = vst [vmem:[#allocation2 + $0x14] sm:$0x1] %v885_v50  ;;  %889 = vst [vmem:[#allocation2 + $0x18] sm:$0xf] %v888_v18  ;;  %v940_v24 = vld [vmem:[#allocation2 + $0x74] sm:$0x1]  ;;  %v902_v44 = vsel %vm7364_vm6, %v7236_v10, %v901_v59 }
  0x77   : > { %893 = vst [vmem:[#allocation2 + $0x20] sm:$0x1] %v892_v21  ;;  %v943_v25 = vld [vmem:[#allocation2 + $0x78] sm:$0xf]  ;;  %981 = vst [vmem:[#allocation2 + $0xb8] sm:$0xf] %v807_v48  ;;  %v824_v37 = vsel %vm7198_vm2, %v816_v29, %v823_v13 }
  0x78   : > { %v8922_v28 = vrot.slane %v7215_v31, 4  ;;  %v8923_v0 = vrot.slane %v7227_v42, 4  ;;  %v947_v2 = vld [vmem:[#allocation2 + $0x80] sm:$0x1]  ;;  %v950_v26 = vld [vmem:[#allocation2 + $0x84] sm:$0xf]  ;;  %v909_v31 = vsel %vm7364_vm6, %v7249_v23, %v908_v56 }
  0x79   : > { %v954_v39 = vld [vmem:[#allocation2 + $0x8c] sm:$0x1]  ;;  %896 = vst [vmem:[#allocation2 + $0x24] sm:$0xf] %v895_v17  ;;  %903 = vst [vmem:[#allocation2 + $0x30] sm:$0xf] %v902_v44 }
  0x7a   : > { %v899_v11 = vsel %vm7374_vm7, %v8922_v28, %v898_v63  ;;  %v906_v16 = vsel %vm7374_vm7, %v8923_v0, %v905_v61  ;;  %v8924_v10 = vrot.slane %v7240_v15, 4  ;;  %v916_v61 = vsel %vm7364_vm6, %v7261_v38, %v915_v41  ;;  %v957_v62 = vld [vmem:[#allocation2 + $0x90] sm:$0xf]  ;;  %v964_v63 = vld [vmem:[#allocation2 + $0x9c] sm:$0xf] }
  0x7b   : > { %900 = vst [vmem:[#allocation2 + $0x2c] sm:$0x1] %v899_v11  ;;  %907 = vst [vmem:[#allocation2 + $0x38] sm:$0x1] %v906_v16  ;;  %v8925_v59 = vrot.slane %v7253_v32, 4  ;;  %v923_v15 = vsel %vm7364_vm6, %v7265_v6, %v922_v40  ;;  %v8926_v56 = vrot.slane %v7267_v43, 4  ;;  %v930_v41 = vsel %vm7364_vm6, %v7277_v45, %v929_v60 }
  0x7c   : > { %v913_v42 = vsel %vm7374_vm7, %v8924_v10, %v912_v4  ;;  %910 = vst [vmem:[#allocation2 + $0x3c] sm:$0xf] %v909_v31  ;;  %917 = vst [vmem:[#allocation2 + $0x48] sm:$0xf] %v916_v61  ;;  %v968_v3 = vld [vmem:[#allocation2 + $0xa4] sm:$0x1]  ;;  %v937_v32 = vsel %vm7364_vm6, %v7292_v53, %v936_v20  ;;  %v944_v45 = vsel %vm7364_vm6, %v7300_v7, %v943_v25 }
  0x7d   : > { %914 = vst [vmem:[#allocation2 + $0x44] sm:$0x1] %v913_v42  ;;  %v920_v23 = vsel %vm7374_vm7, %v8925_v59, %v919_v14  ;;  %v927_v38 = vsel %vm7374_vm7, %v8926_v56, %v926_v8  ;;  %v971_v4 = vld [vmem:[#allocation2 + $0xa8] sm:$0xf]  ;;  %v975_v48 = vld [vmem:[#allocation2 + $0xb0] sm:$0x1]  ;;  %v958_v60 = vsel %vm7364_vm6, %v7327_v54, %v957_v62 }
  0x7e   : > { %988 = vst [vmem:[#allocation2 + $0xc4] sm:$0xf] %v824_v37  ;;  %921 = vst [vmem:[#allocation2 + $0x50] sm:$0x1] %v920_v23  ;;  %v8927_v14 = vrot.slane %v7279_v46, 4  ;;  %v8928_v6 = vrot.slane %v7289_v33, 4  ;;  %v951_v33 = vsel %vm7364_vm6, %v7320_v27, %v950_v26  ;;  %v972_v54 = vsel %vm7364_vm6, %v7355_v49, %v971_v4 }
  0x7f   : > { %924 = vst [vmem:[#allocation2 + $0x54] sm:$0xf] %v923_v15  ;;  %928 = vst [vmem:[#allocation2 + $0x5c] sm:$0x1] %v927_v38  ;;  %v978_v8 = vld [vmem:[#allocation2 + $0xb4] sm:$0xf] }
  0x80   : > { %931 = vst [vmem:[#allocation2 + $0x60] sm:$0xf] %v930_v41  ;;  %v934_v40 = vsel %vm7374_vm7, %v8927_v14, %v933_v57  ;;  %v941_v43 = vsel %vm7374_vm7, %v8928_v6, %v940_v24  ;;  %v982_v50 = vld [vmem:[#allocation2 + $0xbc] sm:$0x1]  ;;  %v985_v18 = vld [vmem:[#allocation2 + $0xc0] sm:$0xf] }
  0x81   : > { %935 = vst [vmem:[#allocation2 + $0x68] sm:$0x1] %v934_v40  ;;  %938 = vst [vmem:[#allocation2 + $0x6c] sm:$0xf] %v937_v32  ;;  %v8929_v46 = vrot.slane %v7302_v55, 4  ;;  %v8930_v21 = vrot.slane %v7313_v22, 4  ;;  %v965_v22 = vsel %vm7364_vm6, %v7342_v51, %v964_v63  ;;  %v983_v51 = vsel %vm7374_vm7, %v808_v47, %v982_v50 }
  0x82   : > { %942 = vst [vmem:[#allocation2 + $0x74] sm:$0x1] %v941_v43  ;;  %945 = vst [vmem:[#allocation2 + $0x78] sm:$0xf] %v944_v45  ;;  %v989_v57 = vld [vmem:[#allocation2 + $0xc8] sm:$0x1]  ;;  %v986_v49 = vsel %vm7364_vm6, %v7402_v52, %v985_v18 }
  0x83   : > { %v948_v53 = vsel %vm7374_vm7, %v8929_v46, %v947_v2  ;;  %v955_v7 = vsel %vm7374_vm7, %v8930_v21, %v954_v39  ;;  %952 = vst [vmem:[#allocation2 + $0x84] sm:$0xf] %v951_v33  ;;  %959 = vst [vmem:[#allocation2 + $0x90] sm:$0xf] %v958_v60  ;;  %v8931_v55 = vrot.slane %v7324_v36, 4  ;;  %v8932_v27 = vrot.slane %v7335_v12, 4 }
  0x84   : > { %949 = vst [vmem:[#allocation2 + $0x80] sm:$0x1] %v948_v53  ;;  %956 = vst [vmem:[#allocation2 + $0x8c] sm:$0x1] %v955_v7  ;;  %v8933_v36 = vrot.slane %v7348_v34, 4  ;;  %v979_v12 = vsel %vm7364_vm6, %v7380_v9, %v978_v8  ;;  %v990_v34 = vsel %vm7374_vm7, %v825_v35, %v989_v57  ;;  %v8934_v9 = vmov 0 }
  0x85   : > { %v962_v20 = vsel %vm7374_vm7, %v8931_v55, %v961_v19  ;;  %v969_v29 = vsel %vm7374_vm7, %v8932_v27, %v968_v3  ;;  %966 = vst [vmem:[#allocation2 + $0x9c] sm:$0xf] %v965_v22  ;;  %973 = vst [vmem:[#allocation2 + $0xa8] sm:$0xf] %v972_v54  ;;  %v8935_v9 = vsel %vm7507_vm10, 4294967295, %v8934_v9  ;;  %v6577_v41 = vld [vmem:[%s6947_s9 + $0x108] sm:$0xff]  }
  0x86   : > { %963 = vst [vmem:[#allocation2 + $0x98] sm:$0x1] %v962_v20  ;;  %970 = vst [vmem:[#allocation2 + $0xa4] sm:$0x1] %v969_v29  ;;  %v976_v13 = vsel %vm7374_vm7, %v8933_v36, %v975_v48  ;;  %v6782_v22 = vld [vmem:[%s6947_s9 + $0x100] sm:$0xff]  }
  0x87   : > { %977 = vst [vmem:[#allocation2 + $0xb0] sm:$0x1] %v976_v13  ;;  %980 = vst [vmem:[#allocation2 + $0xb4] sm:$0xf] %v979_v12 }
  0x88   : > { %984 = vst [vmem:[#allocation2 + $0xbc] sm:$0x1] %v983_v51  ;;  %987 = vst [vmem:[#allocation2 + $0xc0] sm:$0xf] %v986_v49  ;;  %v6579_v51 = vld [vmem:[%s6947_s9 + $0x110] sm:$0xff]  }
  0x89   : > { %991 = vst [vmem:[#allocation2 + $0xc8] sm:$0x1] %v990_v34  ;;  %8936 = vst [vmem:[#allocation4_spill] sm:$0xff] %v8935_v9 }
  0x90   : > { %v996_v5 = vld [vmem:[%s7511_s5 + $0x4] sm:$0xf]  ;;  %v1043_v47 = vld [vmem:[%s7511_s5 + $0x8] sm:$0x1]  ;;  %v3231_v58 = vld [vmem:[%s7511_s5] sm:$0xe] }
  0x91   : > { %v5389_v1 = vrot.slane %v3231_v58, 9  ;;  %v3284_v30 = vrot.slane %v996_v5, 5  ;;  %v3287_v52 = vrot.slane %v1043_v47, 5  ;;  %v998_v35 = vld [vmem:[%s7511_s5 + $0x10] sm:$0xf]  ;;  %v1072_v24 = vshll.u32 %v996_v5, 16 }
  0x92   : > { %v1044_v25 = vld [vmem:[%s7511_s5 + $0x14] sm:$0x1]  ;;  %v3232_v17 = vld [vmem:[%s7511_s5 + $0xc] sm:$0xe]  ;;  %v3291_v28 = vrot.slane %v998_v35, 5  ;;  %v1076_v11 = vshrl.u32 %v996_v5, 16 }
  0x93   : > { %v3285_v44 = vsel %vm7507_vm10, %v5389_v1, %v3284_v30  ;;  %v3286_v0 = vrot.slane %v3284_v30, 4  ;;  %v5390_v16 = vrot.slane %v3232_v17, 9  ;;  %v3294_v2 = vrot.slane %v1044_v25, 5  ;;  %v995_v26 = vld [vmem:[%s7511_s5] sm:$0xf] }
  0x94   : > { %v3293_v39 = vrot.slane %v3291_v28, 4  ;;  %v1063_v37 = vshrl.u32 %v995_v26, 16  ;;  %v1066_v31 = vshll.u32 %v995_v26, 16  ;;  %v1074_v10 = vrot.slane %v1072_v24, 5  ;;  %v997_v42 = vld [vmem:[%s7511_s5 + $0xc] sm:$0xf] }
  0x95   : > { %v3288_v61 = vsel %vm7507_vm10, %v3286_v0, %v3287_v52  ;;  %v3292_v62 = vsel %vm7507_vm10, %v5390_v16, %v3291_v28  ;;  %v1078_v19 = vrot.slane %v1076_v11, 4  ;;  %v1082_v63 = vshll.u32 %v1043_v47, 16  ;;  %v3233_v38 = vld [vmem:[%s7511_s5 + $0x18] sm:$0xe]  ;;  %v7532_v40 = vld [vmem:[%s7511_s5 + $0x1c] sm:$0xf] }
  0x96   : > { %v5421_v59 = vcombine.low %v3285_v44, %v3288_v61  ;;  %v3295_v23 = vsel %vm7507_vm10, %v3293_v39, %v3294_v2  ;;  %v1065_v15 = vrot.slane %v1063_v37, 4  ;;  %v1068_v56 = vrot.slane %v1066_v31, 5  ;;  %v7535_v32 = vld [vmem:[%s7511_s5 + $0x20] sm:$0x1]  ;;  %v7544_v18 = vld [vmem:[%s7511_s5 + $0x28] sm:$0xf] }
  0x97   : > { %v5422_v3 = vcombine.low %v3292_v62, %v3295_v23  ;;  %v1079_v4 = vor.u32 %v1078_v19, %v1074_v10  ;;  %v1084_v48 = vrot.slane %v1082_v63, 5  ;;  %v1087_v14 = vshrl.u32 %v997_v42, 16  ;;  %v3234_v7 = vld [vmem:[%s7511_s5 + $0x24] sm:$0xe]  ;;  %v7549_v27 = vld [vmem:[%s7511_s5 + $0x2c] sm:$0x1] }
  0x98   : > { %6133 = vmatprep.mubr.bf16.mxu1 %v5421_v59  ;;  %v1069_v43 = vor.u32 %v1068_v56, %v1065_v15  ;;  %v1090_v45 = vshll.u32 %v997_v42, 16  ;;  %v1096_v8 = vshll.u32 %v998_v35, 16  ;;  %v1100_v50 = vshrl.u32 %v998_v35, 16  ;;  %v999_v12 = vld [vmem:[%s7511_s5 + $0x18] sm:$0xf]  ;;  %v6576_v19 = vld [vmem:[%s6947_s9 + $0x8] sm:$0xff]  }
  0x99   : > { %6134 = vmatmul.mubr.bf16.vlgmr.msra.gmra.mrb[0].mxu1 %v5422_v3  ;;  %v1080_v46 = vrot.slane %v1079_v4, 4  ;;  %v1089_v53 = vrot.slane %v1087_v14, 4  ;;  %v1106_v33 = vshll.u32 %v1044_v25, 16  ;;  %v5391_v21 = vrot.slane %v3233_v38, 9  ;;  %v1001_v16 = vld [vmem:[%s7511_s5 + $0x24] sm:$0xf] }
  0x9a   : > { %v1070_v60 = vrot.slane %v1069_v43, 4  ;;  %v1092_v57 = vrot.slane %v1090_v45, 5  ;;  %v1098_v55 = vrot.slane %v1096_v8, 5  ;;  %v1102_v20 = vrot.slane %v1100_v50, 4  ;;  %6166 = vmatpush3.bf16.msra.mxu1 %v6782_v22  ;;  %v6581_v2 = vld [vmem:[%s6947_s9 + $0x118] sm:$0xff]   ;;  %v6578_v43 = vld [vmem:[%s6947_s9 + $0x10] sm:$0xff]  }
  0x9b   : > { %v1085_v29 = vsel %vm7539_vm13, %v1080_v46, %v1084_v48  ;;  %v1108_v54 = vrot.slane %v1106_v33, 5  ;;  %v3298_v36 = vrot.slane %v7532_v40, 5  ;;  %v3301_v13 = vrot.slane %v7535_v32, 5  ;;  %6167 = vmatprep.subr.bf16.mxu1 %v6577_v41  ;;  %v7583_v63 = vld [vmem:[%s7511_s5 + $0x34] sm:$0xf]  ;;  %v6583_v45 = vld [vmem:[%s6947_s9 + $0x120] sm:$0xff]  }
  0x9c   : > { %v1075_v49 = vsel %vm7539_vm13, %v1070_v60, %v1074_v10  ;;  %v1093_v34 = vor.u32 %v1092_v57, %v1089_v53  ;;  %v1103_v5 = vor.u32 %v1102_v20, %v1098_v55  ;;  %v5392_v47 = vrot.slane %v3234_v7, 9  ;;  %v7588_v38 = vld [vmem:[%s7511_s5 + $0x38] sm:$0x1]  ;;  %v3235_v14 = vld [vmem:[%s7511_s5 + $0x30] sm:$0xe] }
  0x9d   : > { %v7559_v58 = vcombine.low %v1075_v49, %v1085_v29  ;;  %v3299_v1 = vsel %vm7507_vm10, %v5391_v21, %v3298_v36  ;;  %v3300_v30 = vrot.slane %v3298_v36, 4  ;;  %v3305_v52 = vrot.slane %v7544_v18, 5  ;;  %v7598_v53 = vld [vmem:[%s7511_s5 + $0x40] sm:$0xf]  ;;  %v7602_v57 = vld [vmem:[%s7511_s5 + $0x44] sm:$0x1] }
  0x9e   : > { %v1094_v35 = vrot.slane %v1093_v34, 4  ;;  %v1104_v24 = vrot.slane %v1103_v5, 4  ;;  %v3308_v25 = vrot.slane %v7549_v27, 5  ;;  %v1111_v17 = vshrl.u32 %v999_v12, 16  ;;  %6168 = vmatpush3.bf16.msra.mxu1 %v6577_v41 }
  0x9f   : > { %5941 = vmatprep.mubr.bf16.mxu0 %v7559_v58  ;;  %v3302_v28 = vsel %vm7507_vm10, %v3300_v30, %v3301_v13  ;;  %v3306_v11 = vsel %vm7507_vm10, %v5392_v47, %v3305_v52  ;;  %v3307_v44 = vrot.slane %v3305_v52, 4  ;;  %v1114_v0 = vshll.u32 %v999_v12, 16  ;;  %6169 = vmatprep.subr.bf16.mxu1 %v6579_v51 }
  0xa0   : > { %v1099_v26 = vsel %vm7539_vm13, %v1094_v35, %v1098_v55  ;;  %v1109_v39 = vsel %vm7539_vm13, %v1104_v24, %v1108_v54  ;;  %v5423_v37 = vcombine.low %v3299_v1, %v3302_v28  ;;  %v1113_v31 = vrot.slane %v1111_v17, 4  ;;  %v3236_v54 = vld [vmem:[%s7511_s5 + $0x3c] sm:$0xe] }
  0xa1   : > { %v7576_v10 = vcombine.low %v1099_v26, %v1109_v39  ;;  %v3309_v42 = vsel %vm7507_vm10, %v3307_v44, %v3308_v25  ;;  %v1116_v61 = vrot.slane %v1114_v0, 5  ;;  %v1120_v62 = vshll.u32 %v7532_v40, 16  ;;  %v7630_v26 = vld [vmem:[%s7511_s5 + $0x3c] sm:$0xf]  ;;  %v6587_v39 = vld [vmem:[%s6947_s9 + $0x130] sm:$0xff]  }
  0xa2   : > { %6137 = vmatprep.mubr.bf16.mxu1 %v5423_v37  ;;  %v5424_v59 = vcombine.low %v3306_v11, %v3309_v42  ;;  %v1124_v23 = vshrl.u32 %v7532_v40, 16  ;;  %v1130_v15 = vshll.u32 %v7535_v32, 16  ;;  %v1135_v56 = vshrl.u32 %v1001_v16, 16  ;;  %6170 = vmatpush3.bf16.msra.mxu1 %v6579_v51  ;;  %v6783_v40 = vld [vmem:[%s6947_s9] sm:$0xff]   ;;  %v7610_v51 = vld [vmem:[%s7511_s5 + $0x30] sm:$0xf] }
  0xa3   : > { %5942 = vmatmul.mubr.bf16.vlgmr.msra.gmra.mrb[0].mxu0 %v7576_v10  ;;  %v1117_v41 = vor.u32 %v1116_v61, %v1113_v31  ;;  %v1122_v3 = vrot.slane %v1120_v62, 5  ;;  %v1138_v4 = vshll.u32 %v1001_v16, 16  ;;  %v1144_v48 = vshll.u32 %v7544_v18, 16  ;;  %6171 = vmatprep.subr.bf16.mxu1 %v6581_v2  ;;  %v6580_v11 = vld [vmem:[%s6947_s9 + $0x18] sm:$0xff]  }
  0xa4   : > { %5974 = vmatpush3.bf16.msra.mxu0 %v6783_v40  ;;  %6138 = vmatmul.mubr.bf16.gmra.mrb[4].mxu1 %v5424_v59  ;;  %v1126_v32 = vrot.slane %v1124_v23, 4  ;;  %v1132_v8 = vrot.slane %v1130_v15, 5  ;;  %v1137_v50 = vrot.slane %v1135_v56, 4  ;;  %v1148_v46 = vshrl.u32 %v7544_v18, 16  ;;  %v6582_v15 = vld [vmem:[%s6947_s9 + $0x20] sm:$0xff]   ;;  %v6589_v40 = vld [vmem:[%s6947_s9 + $0x138] sm:$0xff]  }
  0xa5   : > { %v1118_v33 = vrot.slane %v1117_v41, 4  ;;  %5975 = vmatprep.subr.bf16.mxu0 %v6576_v19  ;;  %v1140_v21 = vrot.slane %v1138_v4, 5  ;;  %v1146_v7 = vrot.slane %v1144_v48, 5  ;;  %v1154_v60 = vshll.u32 %v7549_v27, 16  ;;  %v6585_v27 = vld [vmem:[%s6947_s9 + $0x128] sm:$0xff]  }
  0xa6   : > { %v1127_v55 = vor.u32 %v1126_v32, %v1122_v3  ;;  %v1150_v20 = vrot.slane %v1148_v46, 4  ;;  %v5393_v22 = vrot.slane %v3235_v14, 9  ;;  %v3312_v29 = vrot.slane %v7583_v63, 5  ;;  %6172 = vmatpush3.bf16.msra.mxu1 %v6581_v2  ;;  %v3237_v48 = vld [vmem:[%s7511_s5 + $0x48] sm:$0xe] }
  0xa7   : > { %v1123_v18 = vsel %vm7539_vm13, %v1118_v33, %v1122_v3  ;;  %v1141_v36 = vor.u32 %v1140_v21, %v1137_v50  ;;  %v1156_v13 = vrot.slane %v1154_v60, 5  ;;  %v3315_v12 = vrot.slane %v7588_v38, 5  ;;  %6173 = vmatprep.subr.bf16.mxu1 %v6583_v45  ;;  %v7655_v33 = vld [vmem:[%s7511_s5 + $0x50] sm:$0x1] }
  0xa8   : > { %v1128_v49 = vrot.slane %v1127_v55, 4  ;;  %v1151_v34 = vor.u32 %v1150_v20, %v1146_v7  ;;  %5976 = vmatpush3.bf16.msra.mxu0 %v6576_v19  ;;  %v3313_v5 = vsel %vm7507_vm10, %v5393_v22, %v3312_v29  ;;  %v3314_v47 = vrot.slane %v3312_v29, 4  ;;  %v7660_v20 = vld [vmem:[%s7511_s5 + $0x58] sm:$0xf]  ;;  %v6584_v22 = vld [vmem:[%s6947_s9 + $0x28] sm:$0xff]  }
  0xa9   : > { %v1142_v1 = vrot.slane %v1141_v36, 4  ;;  %v5394_v30 = vrot.slane %v3236_v54, 9  ;;  %v3319_v52 = vrot.slane %v7598_v53, 5  ;;  %v3322_v35 = vrot.slane %v7602_v57, 5  ;;  %5977 = vmatprep.subr.bf16.mxu0 %v6578_v43 }
  0xaa   : > { %v1133_v24 = vsel %vm7539_vm13, %v1128_v49, %v1132_v8  ;;  %v1152_v25 = vrot.slane %v1151_v34, 4  ;;  %v3316_v17 = vsel %vm7507_vm10, %v3314_v47, %v3315_v12  ;;  %v1159_v28 = vshrl.u32 %v7610_v51, 16  ;;  %6174 = vmatpush3.bf16.msra.mxu1 %v6583_v45  ;;  %v7650_v45 = vld [vmem:[%s7511_s5 + $0x4c] sm:$0xf]  ;;  %v7666_v12 = vld [vmem:[%s6947_s9 + $0x180] sm:$0xff]  }
  0xab   : > { %v7623_v44 = vcombine.low %v1123_v18, %v1133_v24  ;;  %v1147_v0 = vsel %vm7539_vm13, %v1142_v1, %v1146_v7  ;;  %v5425_v16 = vcombine.low %v3313_v5, %v3316_v17  ;;  %v3320_v2 = vsel %vm7507_vm10, %v5394_v30, %v3319_v52  ;;  %6175 = vmatprep.subr.bf16.mxu1 %v6585_v27  ;;  %v7670_v34 = vld [vmem:[%s7511_s5 + $0x5c] sm:$0x1]  ;;  %v7680_v17 = vld [vmem:[%s7511_s5 + $0x48] sm:$0xf] }
  0xac   : > { %v1157_v37 = vsel %vm7539_vm13, %v1152_v25, %v1156_v13  ;;  %v3321_v31 = vrot.slane %v3319_v52, 4  ;;  %v1161_v42 = vrot.slane %v1159_v28, 4  ;;  %v1162_v61 = vshll.u32 %v7610_v51, 16  ;;  %5978 = vmatpush3.bf16.msra.mxu0 %v6578_v43  ;;  %v3238_v13 = vld [vmem:[%s7511_s5 + $0x54] sm:$0xe] }
  0xad   : > { %5945 = vmatprep.mubr.bf16.mxu0 %v7623_v44  ;;  %v7637_v62 = vcombine.low %v1147_v0, %v1157_v37  ;;  %6141 = vmatprep.mubr.bf16.mxu1 %v5425_v16  ;;  %v1168_v19 = vshll.u32 %v7583_v63, 16  ;;  %v1172_v59 = vshrl.u32 %v7583_v63, 16  ;;  %v1178_v23 = vshll.u32 %v7588_v38, 16  ;;  %v6586_v28 = vld [vmem:[%s6947_s9 + $0x30] sm:$0xff]  }
  0xae   : > { %v3323_v56 = vsel %vm7507_vm10, %v3321_v31, %v3322_v35  ;;  %v1164_v41 = vrot.slane %v1162_v61, 5  ;;  %v1183_v3 = vshrl.u32 %v7630_v26, 16  ;;  %v1186_v4 = vshll.u32 %v7630_v26, 16  ;;  %5979 = vmatprep.subr.bf16.mxu0 %v6580_v11  ;;  %6176 = vmatpush3.bf16.msra.mxu1 %v6585_v27 }
  0xaf   : > { %5946 = vmatmul.mubr.bf16.gmra.mrb[4].mxu0 %v7637_v62  ;;  %v5426_v14 = vcombine.low %v3320_v2, %v3323_v56  ;;  %v1170_v63 = vrot.slane %v1168_v19, 5  ;;  %v1174_v43 = vrot.slane %v1172_v59, 4  ;;  %v1180_v38 = vrot.slane %v1178_v23, 5  ;;  %6177 = vmatprep.subr.bf16.mxu1 %v6587_v39 }
  0xb0   : > { %v1165_v32 = vor.u32 %v1164_v41, %v1161_v42  ;;  %v1185_v8 = vrot.slane %v1183_v3, 4  ;;  %v1188_v50 = vrot.slane %v1186_v4, 5  ;;  %v1192_v46 = vshll.u32 %v7598_v53, 16  ;;  %5980 = vmatpush3.bf16.msra.mxu0 %v6580_v11 }
  0xb1   : > { %6142 = vmatmul.mubr.bf16.gmra.mrb[8].mxu1 %v5426_v14  ;;  %v1175_v21 = vor.u32 %v1174_v43, %v1170_v63  ;;  %v1196_v7 = vshrl.u32 %v7598_v53, 16  ;;  %v1202_v60 = vshll.u32 %v7602_v57, 16  ;;  %v5395_v55 = vrot.slane %v3237_v48, 9  ;;  %5981 = vmatprep.subr.bf16.mxu0 %v6582_v15  ;;  %v6588_v48 = vld [vmem:[%s6947_s9 + $0x38] sm:$0xff]  }
  0xb2   : > { %v1166_v29 = vrot.slane %v1165_v32, 4  ;;  %v1189_v54 = vor.u32 %v1188_v50, %v1185_v8  ;;  %v1194_v18 = vrot.slane %v1192_v46, 5  ;;  %v3326_v36 = vrot.slane %v7650_v45, 5  ;;  %6178 = vmatpush3.bf16.msra.mxu1 %v6587_v39  ;;  %v7691_v39 = vld [vmem:[%s7511_s5 + $0x54] sm:$0xf] }
  0xb3   : > { %v1176_v27 = vrot.slane %v1175_v21, 4  ;;  %v1198_v53 = vrot.slane %v1196_v7, 4  ;;  %v1204_v57 = vrot.slane %v1202_v60, 5  ;;  %v3329_v49 = vrot.slane %v7655_v33, 5  ;;  %6179 = vmatprep.subr.bf16.mxu1 %v6589_v40  ;;  %v3239_v32 = vld [vmem:[%s7511_s5 + $0x60] sm:$0xe] }
  0xb4   : > { %v1171_v5 = vsel %vm7539_vm13, %v1166_v29, %v1170_v63  ;;  %v1190_v47 = vrot.slane %v1189_v54, 4  ;;  %v3327_v1 = vsel %vm7507_vm10, %v5395_v55, %v3326_v36  ;;  %v3328_v30 = vrot.slane %v3326_v36, 4  ;;  %5982 = vmatpush3.bf16.msra.mxu0 %v6582_v15  ;;  %v7722_v29 = vld [vmem:[%s7511_s5 + $0x70] sm:$0xf] }
  0xb5   : > { %v1181_v52 = vsel %vm7539_vm13, %v1176_v27, %v1180_v38  ;;  %v1199_v35 = vor.u32 %v1198_v53, %v1194_v18  ;;  %v5396_v24 = vrot.slane %v3238_v13, 9  ;;  %v3333_v25 = vrot.slane %v7660_v20, 5  ;;  %5983 = vmatprep.subr.bf16.mxu0 %v6584_v22  ;;  %v7727_v27 = vld [vmem:[%s7511_s5 + $0x74] sm:$0x1]  ;;  %v7730_v53 = vld [vmem:[%s6947_s9 + $0x80] sm:$0xff]  }
  0xb6   : > { %v7683_v11 = vcombine.low %v1171_v5, %v1181_v52  ;;  %v1195_v0 = vsel %vm7539_vm13, %v1190_v47, %v1194_v18  ;;  %v3330_v16 = vsel %vm7507_vm10, %v3328_v30, %v3329_v49  ;;  %v3336_v2 = vrot.slane %v7670_v34, 5  ;;  %6180 = vmatpush3.bf16.msra.mxu1 %v6589_v40  ;;  %v7711_v40 = vld [vmem:[%s7511_s5 + $0x64] sm:$0xf] }
  0xb7   : > { %v1200_v37 = vrot.slane %v1199_v35, 4  ;;  %v5427_v31 = vcombine.low %v3327_v1, %v3330_v16  ;;  %v3334_v42 = vsel %vm7507_vm10, %v5396_v24, %v3333_v25  ;;  %v3335_v61 = vrot.slane %v3333_v25, 4  ;;  %6213 = vmatprep.subr.bf16.mxu1 %v7666_v12  ;;  %v3240_v1 = vld [vmem:[%s7511_s5 + $0x6c] sm:$0xe]  ;;  %v7736_v24 = vld [vmem:[%s7511_s5 + $0x60] sm:$0xf] }
  0xb8   : > { %5949 = vmatprep.mubr.bf16.mxu0 %v7683_v11  ;;  %v1207_v19 = vshrl.u32 %v7680_v17, 16  ;;  %v1210_v59 = vshll.u32 %v7680_v17, 16  ;;  %v1216_v23 = vshll.u32 %v7650_v45, 16  ;;  %v1220_v15 = vshrl.u32 %v7650_v45, 16  ;;  %5984 = vmatpush3.bf16.msra.mxu0 %v6584_v22 }
  0xb9   : > { %v1205_v56 = vsel %vm7539_vm13, %v1200_v37, %v1204_v57  ;;  %6145 = vmatprep.mubr.bf16.mxu1 %v5427_v31  ;;  %v3337_v41 = vsel %vm7507_vm10, %v3335_v61, %v3336_v2  ;;  %v1226_v3 = vshll.u32 %v7655_v33, 16  ;;  %v1231_v4 = vshrl.u32 %v7691_v39, 16  ;;  %5985 = vmatprep.subr.bf16.mxu0 %v6586_v28  ;;  %v7715_v33 = vld [vmem:[%s7511_s5 + $0x68] sm:$0x1] }
  0xba   : > { %v7708_v14 = vcombine.low %v1195_v0, %v1205_v56  ;;  %v5428_v63 = vcombine.low %v3334_v42, %v3337_v41  ;;  %v1209_v43 = vrot.slane %v1207_v19, 4  ;;  %v1212_v38 = vrot.slane %v1210_v59, 5 }
  0xbb   : > { %v1218_v8 = vrot.slane %v1216_v23, 5  ;;  %v1222_v50 = vrot.slane %v1220_v15, 4  ;;  %v1228_v46 = vrot.slane %v1226_v3, 5  ;;  %v1233_v21 = vrot.slane %v1231_v4, 4 }
  0xbc   : > { %5950 = vmatmul.mubr.bf16.gmra.mrb[8].mxu0 %v7708_v14  ;;  %6146 = vmatmul.mubr.bf16.gmra.mrb[12].mxu1 %v5428_v63  ;;  %v1213_v7 = vor.u32 %v1212_v38, %v1209_v43  ;;  %v1234_v60 = vshll.u32 %v7691_v39, 16  ;;  %v1240_v55 = vshll.u32 %v7660_v20, 16  ;;  %v1244_v22 = vshrl.u32 %v7660_v20, 16  ;;  %v7761_v38 = vld [vmem:[%s7511_s5 + $0x6c] sm:$0xf] }
  0xbd   : > { %v1223_v54 = vor.u32 %v1222_v50, %v1218_v8  ;;  %v1250_v18 = vshll.u32 %v7670_v34, 16  ;;  %v5397_v36 = vrot.slane %v3239_v32, 9  ;;  %v3340_v13 = vrot.slane %v7711_v40, 5  ;;  %5986 = vmatpush3.bf16.msra.mxu0 %v6586_v28 }
  0xbe   : > { %v1214_v57 = vrot.slane %v1213_v7, 4  ;;  %v1236_v49 = vrot.slane %v1234_v60, 5  ;;  %v1242_v5 = vrot.slane %v1240_v55, 5  ;;  %v1246_v47 = vrot.slane %v1244_v22, 4  ;;  %5987 = vmatprep.subr.bf16.mxu0 %v6588_v48 }
  0xbf   : > { %v1224_v30 = vrot.slane %v1223_v54, 4  ;;  %v1252_v52 = vrot.slane %v1250_v18, 5  ;;  %v3341_v34 = vsel %vm7507_vm10, %v5397_v36, %v3340_v13  ;;  %v3342_v35 = vrot.slane %v3340_v13, 4  ;;  %v7771_v54 = vld [vmem:[%s7511_s5 + $0x7c] sm:$0xf] }
  0xc0   : > { %v1219_v25 = vsel %vm7539_vm13, %v1214_v57, %v1218_v8  ;;  %v1237_v28 = vor.u32 %v1236_v49, %v1233_v21  ;;  %v1247_v0 = vor.u32 %v1246_v47, %v1242_v5  ;;  %v3343_v16 = vrot.slane %v7715_v33, 5  ;;  %v3241_v21 = vld [vmem:[%s7511_s5 + $0x78] sm:$0xe]  ;;  %v7774_v18 = vld [vmem:[%s7511_s5 + $0x80] sm:$0x1] }
  0xc1   : > { %v1229_v2 = vsel %vm7539_vm13, %v1224_v30, %v1228_v46  ;;  %v5398_v37 = vrot.slane %v3240_v1, 9  ;;  %v3347_v31 = vrot.slane %v7722_v29, 5  ;;  %v3350_v42 = vrot.slane %v7727_v27, 5  ;;  %5988 = vmatpush3.bf16.msra.mxu0 %v6588_v48  ;;  %v3242_v47 = vld [vmem:[%s7511_s5 + $0x84] sm:$0xe] }
  0xc2   : > { %v7745_v61 = vcombine.low %v1219_v25, %v1229_v2  ;;  %v1238_v19 = vrot.slane %v1237_v28, 4  ;;  %v1248_v59 = vrot.slane %v1247_v0, 4  ;;  %v3344_v23 = vsel %vm7507_vm10, %v3342_v35, %v3343_v16  ;;  %6021 = vmatprep.subr.bf16.mxu0 %v7730_v53 }
  0xc3   : > { %v5429_v15 = vcombine.low %v3341_v34, %v3344_v23  ;;  %v3348_v56 = vsel %vm7507_vm10, %v5398_v37, %v3347_v31  ;;  %v3349_v41 = vrot.slane %v3347_v31, 4  ;;  %v1255_v3 = vshrl.u32 %v7736_v24, 16 }
  0xc4   : > { %5953 = vmatprep.mubr.bf16.mxu0 %v7745_v61  ;;  %v1243_v4 = vsel %vm7539_vm13, %v1238_v19, %v1242_v5  ;;  %v1253_v48 = vsel %vm7539_vm13, %v1248_v59, %v1252_v52  ;;  %v1258_v63 = vshll.u32 %v7736_v24, 16  ;;  %v1264_v43 = vshll.u32 %v7711_v40, 16  ;;  %v7781_v5 = vld [vmem:[%s7511_s5 + $0x88] sm:$0xf] }
  0xc5   : > { %v7763_v32 = vcombine.low %v1243_v4, %v1253_v48  ;;  %6149 = vmatprep.mubr.bf16.mxu1 %v5429_v15  ;;  %v3351_v8 = vsel %vm7507_vm10, %v3349_v41, %v3350_v42  ;;  %v1257_v50 = vrot.slane %v1255_v3, 4  ;;  %v1268_v46 = vshrl.u32 %v7711_v40, 16  ;;  %v7793_v3 = vld [vmem:[%s7511_s5 + $0x78] sm:$0xf] }
  0xc6   : > { %v5430_v7 = vcombine.low %v3348_v56, %v3351_v8  ;;  %v1260_v60 = vrot.slane %v1258_v63, 5  ;;  %v1266_v55 = vrot.slane %v1264_v43, 5  ;;  %v1274_v22 = vshll.u32 %v7715_v33, 16 }
  0xc7   : > { %5954 = vmatmul.mubr.bf16.gmra.mrb[12].mxu0 %v7763_v32  ;;  %v1270_v36 = vrot.slane %v1268_v46, 4  ;;  %v1279_v13 = vshrl.u32 %v7761_v38, 16  ;;  %v1282_v57 = vshll.u32 %v7761_v38, 16  ;;  %v1288_v49 = vshll.u32 %v7722_v29, 16 }
  0xc8   : > { %6150 = vmatmul.mubr.bf16.gmra.mrb[16].mxu1 %v5430_v7  ;;  %v1261_v1 = vor.u32 %v1260_v60, %v1257_v50  ;;  %v1276_v30 = vrot.slane %v1274_v22, 5  ;;  %v1292_v33 = vshrl.u32 %v7722_v29, 16  ;;  %v1298_v52 = vshll.u32 %v7727_v27, 16  ;;  %v1054_v27 = vld [vmem:[%s7511_s5 + $0x8c] sm:$0x1] }
  0xc9   : > { %v1271_v34 = vor.u32 %v1270_v36, %v1266_v55  ;;  %v1281_v35 = vrot.slane %v1279_v13, 4  ;;  %v1284_v25 = vrot.slane %v1282_v57, 5  ;;  %v1290_v28 = vrot.slane %v1288_v49, 5 }
  0xca   : > { %v1262_v0 = vrot.slane %v1261_v1, 4  ;;  %v1294_v16 = vrot.slane %v1292_v33, 4  ;;  %v1300_v2 = vrot.slane %v1298_v52, 5  ;;  %v5399_v37 = vrot.slane %v3241_v21, 9 }
  0xcb   : > { %v1272_v31 = vrot.slane %v1271_v34, 4  ;;  %v1285_v42 = vor.u32 %v1284_v25, %v1281_v35  ;;  %v3354_v19 = vrot.slane %v7771_v54, 5  ;;  %v3357_v59 = vrot.slane %v7774_v18, 5 }
  0xcc   : > { %v1267_v23 = vsel %vm7539_vm13, %v1262_v0, %v1266_v55  ;;  %v1295_v15 = vor.u32 %v1294_v16, %v1290_v28  ;;  %v5400_v56 = vrot.slane %v3242_v47, 9  ;;  %v3361_v41 = vrot.slane %v7781_v5, 5  ;;  %v7814_v47 = vld [vmem:[%s7511_s5 + $0x84] sm:$0xf]  ;;  %v7823_v0 = vld [vmem:[%s7511_s5 + $0x94] sm:$0xf] }
  0xcd   : > { %v1277_v4 = vsel %vm7539_vm13, %v1272_v31, %v1276_v30  ;;  %v1286_v48 = vrot.slane %v1285_v42, 4  ;;  %v3355_v63 = vsel %vm7507_vm10, %v5399_v37, %v3354_v19  ;;  %v3356_v43 = vrot.slane %v3354_v19, 4  ;;  %v7826_v16 = vld [vmem:[%s7511_s5 + $0x98] sm:$0x1] }
  0xce   : > { %v7799_v8 = vcombine.low %v1267_v23, %v1277_v4  ;;  %v1296_v50 = vrot.slane %v1295_v15, 4  ;;  %v3362_v46 = vsel %vm7507_vm10, %v5400_v56, %v3361_v41  ;;  %v3363_v21 = vrot.slane %v3361_v41, 4  ;;  %v3244_v41 = vld [vmem:[%s7511_s5 + $0x9c] sm:$0xe] }
  0xcf   : > { %v1291_v7 = vsel %vm7539_vm13, %v1286_v48, %v1290_v28  ;;  %v3358_v60 = vsel %vm7507_vm10, %v3356_v43, %v3357_v59  ;;  %v3364_v55 = vrot.slane %v1054_v27, 5  ;;  %v1303_v22 = vshrl.u32 %v7793_v3, 16  ;;  %v7834_v59 = vld [vmem:[%s7511_s5 + $0xa0] sm:$0xf] }
  0xd0   : > { %5957 = vmatprep.mubr.bf16.mxu0 %v7799_v8  ;;  %v1301_v36 = vsel %vm7539_vm13, %v1296_v50, %v1300_v2  ;;  %v5431_v13 = vcombine.low %v3355_v63, %v3358_v60  ;;  %v1306_v57 = vshll.u32 %v7793_v3, 16  ;;  %v1312_v49 = vshll.u32 %v7771_v54, 16  ;;  %v3243_v2 = vld [vmem:[%s7511_s5 + $0x90] sm:$0xe]  ;;  %8939 = vst [vmem:[#allocation5_spill] sm:$0xff] %v7834_v59 }
  0xd1   : > { %v7816_v1 = vcombine.low %v1291_v7, %v1301_v36  ;;  %v3365_v30 = vsel %vm7507_vm10, %v3363_v21, %v3364_v55  ;;  %v1305_v33 = vrot.slane %v1303_v22, 4  ;;  %v1316_v52 = vshrl.u32 %v7771_v54, 16  ;;  %v1056_v60 = vld [vmem:[%s7511_s5 + $0xa4] sm:$0x1] }
  0xd2   : > { %6153 = vmatprep.mubr.bf16.mxu1 %v5431_v13  ;;  %v5432_v34 = vcombine.low %v3362_v46, %v3365_v30  ;;  %v1308_v35 = vrot.slane %v1306_v57, 5  ;;  %v1314_v25 = vrot.slane %v1312_v49, 5  ;;  %v1322_v28 = vshll.u32 %v7774_v18, 16 }
  0xd3   : > { %5958 = vmatmul.mubr.bf16.gmra.mrb[16].mxu0 %v7816_v1  ;;  %v1318_v37 = vrot.slane %v1316_v52, 4  ;;  %v1327_v31 = vshrl.u32 %v7814_v47, 16  ;;  %v1330_v42 = vshll.u32 %v7814_v47, 16  ;;  %v1336_v19 = vshll.u32 %v7781_v5, 16 }
  0xd4   : > { %6154 = vmatmul.mubr.bf16.gmra.mrb[20].mxu1 %v5432_v34  ;;  %v1309_v23 = vor.u32 %v1308_v35, %v1305_v33  ;;  %v1324_v18 = vrot.slane %v1322_v28, 5  ;;  %v1340_v15 = vshrl.u32 %v7781_v5, 16  ;;  %v1346_v56 = vshll.u32 %v1054_v27, 16  ;;  %v7845_v33 = vld [vmem:[%s7511_s5 + $0x90] sm:$0xf] }
  0xd5   : > { %v1319_v4 = vor.u32 %v1318_v37, %v1314_v25  ;;  %v1329_v48 = vrot.slane %v1327_v31, 4  ;;  %v1332_v63 = vrot.slane %v1330_v42, 5  ;;  %v1338_v43 = vrot.slane %v1336_v19, 5 }
  0xd6   : > { %v1310_v50 = vrot.slane %v1309_v23, 4  ;;  %v1342_v46 = vrot.slane %v1340_v15, 4  ;;  %v1348_v21 = vrot.slane %v1346_v56, 5  ;;  %v5401_v7 = vrot.slane %v3243_v2, 9 }
  0xd7   : > { %v1320_v55 = vrot.slane %v1319_v4, 4  ;;  %v1333_v22 = vor.u32 %v1332_v63, %v1329_v48  ;;  %v3368_v36 = vrot.slane %v7823_v0, 5  ;;  %v3371_v13 = vrot.slane %v7826_v16, 5  ;;  %v7866_v48 = vld [vmem:[%s7511_s5 + $0x9c] sm:$0xf] }
  0xd8   : > { %v1315_v27 = vsel %vm7539_vm13, %v1310_v50, %v1314_v25  ;;  %v1343_v57 = vor.u32 %v1342_v46, %v1338_v43  ;;  %v5402_v49 = vrot.slane %v3244_v41, 9  ;;  %v3375_v30 = vrot.slane %v7834_v59, 5 }
  0xd9   : > { %v1325_v52 = vsel %vm7539_vm13, %v1320_v55, %v1324_v18  ;;  %v1334_v34 = vrot.slane %v1333_v22, 4  ;;  %v3369_v35 = vsel %vm7507_vm10, %v5401_v7, %v3368_v36  ;;  %v3370_v28 = vrot.slane %v3368_v36, 4  ;;  %v7875_v36 = vld [vmem:[%s7511_s5 + $0xac] sm:$0xf] }
  0xda   : > { %v7851_v2 = vcombine.low %v1315_v27, %v1325_v52  ;;  %v1344_v37 = vrot.slane %v1343_v57, 4  ;;  %v3376_v25 = vsel %vm7507_vm10, %v5402_v49, %v3375_v30  ;;  %v3377_v31 = vrot.slane %v3375_v30, 4  ;;  %8940 = vst [vmem:[#allocation6_spill] sm:$0xff] %v7875_v36  ;;  %v3245_v52 = vld [vmem:[%s7511_s5 + $0xa8] sm:$0xe] }
  0xdb   : > { %v1339_v42 = vsel %vm7539_vm13, %v1334_v34, %v1338_v43  ;;  %v3372_v19 = vsel %vm7507_vm10, %v3370_v28, %v3371_v13  ;;  %v3378_v23 = vrot.slane %v1056_v60, 5  ;;  %v1351_v18 = vshrl.u32 %v7845_v33, 16  ;;  %v7878_v13 = vld [vmem:[%s7511_s5 + $0xb0] sm:$0x1] }
  0xdc   : > { %5961 = vmatprep.mubr.bf16.mxu0 %v7851_v2  ;;  %v1349_v15 = vsel %vm7539_vm13, %v1344_v37, %v1348_v21  ;;  %v5433_v56 = vcombine.low %v3369_v35, %v3372_v19  ;;  %v1354_v41 = vshll.u32 %v7845_v33, 16  ;;  %v1360_v4 = vshll.u32 %v7823_v0, 16  ;;  %v7887_v37 = vld [vmem:[%s7511_s5 + $0xb8] sm:$0xf] }
  0xdd   : > { %v7868_v63 = vcombine.low %v1339_v42, %v1349_v15  ;;  %v3379_v43 = vsel %vm7507_vm10, %v3377_v31, %v3378_v23  ;;  %v1353_v50 = vrot.slane %v1351_v18, 4  ;;  %v1364_v46 = vshrl.u32 %v7823_v0, 16  ;;  %8941 = vst [vmem:[#allocation7_spill] sm:$0xff] %v7887_v37  ;;  %v3246_v23 = vld [vmem:[%s7511_s5 + $0xb4] sm:$0xe] }
  0xde   : > { %6157 = vmatprep.mubr.bf16.mxu1 %v5433_v56  ;;  %v5434_v7 = vcombine.low %v3376_v25, %v3379_v43  ;;  %v1356_v55 = vrot.slane %v1354_v41, 5  ;;  %v1362_v21 = vrot.slane %v1360_v4, 5  ;;  %v1370_v22 = vshll.u32 %v7826_v16, 16  ;;  %v1058_v4 = vld [vmem:[%s7511_s5 + $0xbc] sm:$0x1] }
  0xdf   : > { %5962 = vmatmul.mubr.bf16.gmra.mrb[20].mxu0 %v7868_v63  ;;  %v1366_v27 = vrot.slane %v1364_v46, 4  ;;  %v1375_v57 = vshrl.u32 %v7866_v48, 16  ;;  %v1378_v49 = vshll.u32 %v7866_v48, 16  ;;  %v1384_v30 = vshll.u32 %v7834_v59, 16 }
  0xe0   : > { %6158 = vmatmul.mubr.bf16.gmra.mrb[24].mxu1 %v5434_v7  ;;  %v1357_v34 = vor.u32 %v1356_v55, %v1353_v50  ;;  %v1372_v35 = vrot.slane %v1370_v22, 5  ;;  %v1388_v16 = vshrl.u32 %v7834_v59, 16  ;;  %v1394_v28 = vshll.u32 %v1056_v60, 16  ;;  %v7894_v60 = vld [vmem:[%s7511_s5 + $0xa8] sm:$0xf] }
  0xe1   : > { %v1367_v25 = vor.u32 %v1366_v27, %v1362_v21  ;;  %v1377_v31 = vrot.slane %v1375_v57, 4  ;;  %v1380_v42 = vrot.slane %v1378_v49, 5  ;;  %v1386_v19 = vrot.slane %v1384_v30, 5  ;;  %8942 = vst [vmem:[#allocation8_spill] sm:$0xff] %v7894_v60 }
  0xe2   : > { %v1358_v18 = vrot.slane %v1357_v34, 4  ;;  %v1390_v15 = vrot.slane %v1388_v16, 4  ;;  %v1396_v56 = vrot.slane %v1394_v28, 5  ;;  %v5403_v41 = vrot.slane %v3245_v52, 9 }
  0xe3   : > { %v1368_v43 = vrot.slane %v1367_v25, 4  ;;  %v1381_v46 = vor.u32 %v1380_v42, %v1377_v31  ;;  %v3382_v50 = vrot.slane %v7875_v36, 5  ;;  %v3385_v7 = vrot.slane %v7878_v13, 5 }
  0xe4   : > { %v1363_v55 = vsel %vm7539_vm13, %v1358_v18, %v1362_v21  ;;  %v1391_v22 = vor.u32 %v1390_v15, %v1386_v19  ;;  %v5404_v27 = vrot.slane %v3246_v23, 9  ;;  %v3389_v57 = vrot.slane %v7887_v37, 5 }
  0xe5   : > { %v1373_v49 = vsel %vm7539_vm13, %v1368_v43, %v1372_v35  ;;  %v1382_v30 = vrot.slane %v1381_v46, 4  ;;  %v3383_v52 = vsel %vm7507_vm10, %v5403_v41, %v3382_v50  ;;  %v3384_v34 = vrot.slane %v3382_v50, 4  ;;  %v7918_v46 = vld [vmem:[%s7511_s5 + $0xb4] sm:$0xf] }
  0xe6   : > { %v7903_v16 = vcombine.low %v1363_v55, %v1373_v49  ;;  %v1392_v28 = vrot.slane %v1391_v22, 4  ;;  %v3390_v25 = vsel %vm7507_vm10, %v5404_v27, %v3389_v57  ;;  %v3391_v21 = vrot.slane %v3389_v57, 4  ;;  %8943 = vst [vmem:[#allocation9_spill] sm:$0xff] %v7918_v46 }
  0xe7   : > { %v1387_v31 = vsel %vm7539_vm13, %v1382_v30, %v1386_v19  ;;  %v3386_v42 = vsel %vm7507_vm10, %v3384_v34, %v3385_v7  ;;  %v3392_v35 = vrot.slane %v1058_v4, 5  ;;  %v1399_v23 = vshrl.u32 %v7894_v60, 16 }
  0xe8   : > { %5965 = vmatprep.mubr.bf16.mxu0 %v7903_v16  ;;  %v1397_v18 = vsel %vm7539_vm13, %v1392_v28, %v1396_v56  ;;  %v5435_v15 = vcombine.low %v3383_v52, %v3386_v42  ;;  %v1402_v41 = vshll.u32 %v7894_v60, 16  ;;  %v1408_v43 = vshll.u32 %v7875_v36, 16 }
  0xe9   : > { %v7920_v50 = vcombine.low %v1387_v31, %v1397_v18  ;;  %v3393_v19 = vsel %vm7507_vm10, %v3391_v21, %v3392_v35  ;;  %v1401_v7 = vrot.slane %v1399_v23, 4  ;;  %v1412_v55 = vshrl.u32 %v7875_v36, 16 }
  0xea   : > { %6161 = vmatprep.mubr.bf16.mxu1 %v5435_v15  ;;  %v5436_v22 = vcombine.low %v3390_v25, %v3393_v19  ;;  %v1404_v27 = vrot.slane %v1402_v41, 5  ;;  %v1410_v57 = vrot.slane %v1408_v43, 5  ;;  %v1418_v56 = vshll.u32 %v7878_v13, 16 }
  0xeb   : > { %5966 = vmatmul.mubr.bf16.gmra.mrb[24].mxu0 %v7920_v50  ;;  %v1414_v49 = vrot.slane %v1412_v55, 4  ;;  %v1423_v30 = vshrl.u32 %v7918_v46, 16  ;;  %v1426_v52 = vshll.u32 %v7918_v46, 16  ;;  %v1432_v34 = vshll.u32 %v7887_v37, 16 }
  0xec   : > { %6162 = vmatmul.mubr.bf16.gmra.mrb[28].mxu1 %v5436_v22  ;;  %v1405_v28 = vor.u32 %v1404_v27, %v1401_v7  ;;  %v1420_v21 = vrot.slane %v1418_v56, 5  ;;  %v1436_v31 = vshrl.u32 %v7887_v37, 16  ;;  %v1442_v25 = vshll.u32 %v1058_v4, 16  ;;  %v6784_v27 = vld [vmem:[%s7511_s5 + $0x4] sm:$0xf] }
  0xed   : > { %v1415_v42 = vor.u32 %v1414_v49, %v1410_v57  ;;  %v1425_v35 = vrot.slane %v1423_v30, 4  ;;  %v1428_v13 = vrot.slane %v1426_v52, 5  ;;  %v1434_v23 = vrot.slane %v1432_v34, 5  ;;  %6181 = vmatprep.mubr.bf16.mxu1 %v7559_v58  ;;  %v6785_v56 = vld [vmem:[%s7511_s5] sm:$0xf]  ;;  %v6596_v34 = vld [vmem:[%s6947_s9 + $0x188] sm:$0xff]  }
  0xee   : > { %v1406_v18 = vrot.slane %v1405_v28, 4  ;;  %v1438_v15 = vrot.slane %v1436_v31, 4  ;;  %v1444_v55 = vrot.slane %v1442_v25, 5  ;;  %v5221_v49 = vcombine.low %v6785_v56, %v6784_v27  ;;  %v5307_v31 = vld [vmem:[%s7511_s5 + $0x24] sm:$0xf] }
  0xef   : > { %v1416_v41 = vrot.slane %v1415_v42, 4  ;;  %v1429_v43 = vor.u32 %v1428_v13, %v1425_v35 }
  0xf0   : > { %v1411_v19 = vsel %vm7539_vm13, %v1406_v18, %v1410_v57  ;;  %v1439_v7 = vor.u32 %v1438_v15, %v1434_v23  ;;  %v6595_v15 = vld [vmem:[%s6947_s9 + $0x88] sm:$0xff]  }
  0xf1   : > { %v1421_v4 = vsel %vm7539_vm13, %v1416_v41, %v1420_v21  ;;  %v1430_v22 = vrot.slane %v1429_v43, 4  ;;  %v6600_v41 = vld [vmem:[%s6947_s9 + $0x190] sm:$0xff]   ;;  %v5301_v43 = vld [vmem:[%s7511_s5 + $0xc] sm:$0xf] }
  0xf2   : > { %v7940_v30 = vcombine.low %v1411_v19, %v1421_v4  ;;  %v1440_v52 = vrot.slane %v1439_v7, 4  ;;  %v5302_v19 = vld [vmem:[%s7511_s5 + $0x10] sm:$0xf]  ;;  %v2481_v7 = vshll.u32 %v5301_v43, 16  ;;  %v6787_v4 = vld [vmem:[%s7511_s5 + $0xc] sm:$0xf] }
  0xf3   : > { %v1435_v21 = vsel %vm7539_vm13, %v1430_v22, %v1434_v23  ;;  %v2487_v27 = vshll.u32 %v5302_v19, 16  ;;  %v2491_v56 = vshrl.u32 %v5302_v19, 16  ;;  %v8043_v57 = vld [vmem:[%s7511_s5 + $0x4c] sm:$0xf] }
  0xf4   : > { %5969 = vmatprep.mubr.bf16.mxu0 %v7940_v30  ;;  %v1445_v35 = vsel %vm7539_vm13, %v1440_v52, %v1444_v55  ;;  %6182 = vmatmul.mubr.bf16.vlgmr.msra.gmra.mrb[0].mxu1 %v7576_v10  ;;  %v6786_v55 = vld [vmem:[%s7511_s5 + $0x10] sm:$0xf]  ;;  %v5304_v52 = vld [vmem:[%s7511_s5 + $0x18] sm:$0xf]  ;;  %v5305_v10 = vld [vmem:[%s7511_s5 + $0x1c] sm:$0xf] }
  0xf5   : > { %v7963_v18 = vcombine.low %v1435_v21, %v1445_v35  ;;  %6214 = vmatpush3.bf16.msra.mxu1 %v7666_v12  ;;  %6185 = vmatprep.mubr.bf16.mxu1 %v7623_v44  ;;  %v6604_v44 = vld [vmem:[%s6947_s9 + $0x198] sm:$0xff]   ;;  %v2478_v12 = vshrl.u32 %v5301_v43, 16  ;;  %v5222_v22 = vcombine.low %v6787_v4, %v6786_v55  ;;  %v2483_v55 = vrot.slane %v2481_v7, 5  ;;  %v6791_v7 = vld [vmem:[%s7511_s5 + $0x24] sm:$0xf]  ;;  %8946 = vst [vmem:[#allocation12_spill] sm:$0xff] %v8043_v57 }
  0xf6   : > { %6215 = vmatprep.subr.bf16.mxu1 %v6596_v34  ;;  %v6788_v21 = vld [vmem:[%s7511_s5 + $0x1c] sm:$0xf]  ;;  %v6789_v35 = vld [vmem:[%s7511_s5 + $0x18] sm:$0xf]  ;;  %v2502_v19 = vshrl.u32 %v5304_v52, 16  ;;  %v2505_v4 = vshll.u32 %v5304_v52, 16 }
  0xf7   : > { %5970 = vmatmul.mubr.bf16.gmra.mrb[28].mxu0 %v7963_v18  ;;  %v2480_v43 = vrot.slane %v2478_v12, 4  ;;  %v2515_v23 = vshrl.u32 %v5305_v10, 16  ;;  %v6790_v12 = vld [vmem:[%s7511_s5 + $0x28] sm:$0xf]  ;;  %v2607_v58 = vshll.u32 %v8043_v57, 16  ;;  %v2611_v9 = vshrl.u32 %v8043_v57, 16 }
  0xf8   : > { %5989 = vmatprep.mubr.bf16.mxu0 %v5221_v49  ;;  %v5223_v49 = vcombine.low %v6789_v35, %v6788_v21  ;;  %v2493_v21 = vrot.slane %v2491_v56, 4  ;;  %v2511_v35 = vshll.u32 %v5305_v10, 16  ;;  %v5224_v52 = vcombine.low %v6791_v7, %v6790_v12  ;;  %v6612_v10 = vld [vmem:[%s6947_s9 + $0x1a8] sm:$0xff]   ;;  %v6793_v7 = vld [vmem:[%s7511_s5 + $0x40] sm:$0xf] }
  0xf9   : > { %6216 = vmatpush3.bf16.msra.mxu1 %v6596_v34  ;;  %v6608_v34 = vld [vmem:[%s6947_s9 + $0x1a0] sm:$0xff]   ;;  %v2504_v56 = vrot.slane %v2502_v19, 4  ;;  %v2507_v13 = vrot.slane %v2505_v4, 5  ;;  %v2517_v25 = vrot.slane %v2515_v23, 4  ;;  %v8950_v57 = vcombine.low %v7680_v17, %v7650_v45  ;;  %v8082_v45 = vld [vmem:[%s7511_s5 + $0x58] sm:$0xf] }
  0xfa   : > { %6217 = vmatprep.subr.bf16.mxu1 %v6600_v41  ;;  %v7996_v42 = vrot.slane %v2511_v35, 5  ;;  %8951 = vst [vmem:[#allocation16_spill] sm:$0xff] %v8082_v45  ;;  %v8085_v17 = vld [vmem:[%s7511_s5 + $0x44] sm:$0x1] }
  0xfb   : > { %v2508_v23 = vor.u32 %v2507_v13, %v2504_v56  ;;  %v5310_v13 = vld [vmem:[%s7511_s5 + $0x30] sm:$0xf]  ;;  %v5313_v56 = vld [vmem:[%s7511_s5 + $0x3c] sm:$0xf]  ;;  %8952 = vst [vmem:[#allocation17_spill] sm:$0xff] %v8085_v17 }
  0xfc   : > { %6186 = vmatmul.mubr.bf16.gmra.mrb[4].mxu1 %v7637_v62  ;;  %v7986_v62 = vrot.slane %v2487_v27, 5  ;;  %v5306_v27 = vld [vmem:[%s7511_s5 + $0x20] sm:$0x1]  ;;  %v2518_v35 = vor.u32 %v2517_v25, %v7996_v42 }
  0xfd   : > { %6189 = vmatprep.mubr.bf16.mxu1 %v7683_v11  ;;  %6218 = vmatpush3.bf16.msra.mxu1 %v6600_v41  ;;  %v5303_v11 = vld [vmem:[%s7511_s5 + $0x14] sm:$0x1]  ;;  %v2521_v19 = vshll.u32 %v5306_v27, 16 }
  0xfe   : > { %6219 = vmatprep.subr.bf16.mxu1 %v6604_v44  ;;  %v6599_v41 = vld [vmem:[%s6947_s9 + $0x90] sm:$0xff]  }
  0xff   : > { %5990 = vmatmul.mubr.bf16.vlgmr.msra.gmra.mrb[0].mxu0 %v5222_v22  ;;  %v2484_v22 = vor.u32 %v2483_v55, %v2480_v43  ;;  %v5308_v43 = vld [vmem:[%s7511_s5 + $0x28] sm:$0xf]  ;;  %v6603_v55 = vld [vmem:[%s6947_s9 + $0x98] sm:$0xff]   ;;  %v8020_v27 = vrot.slane %v2521_v19, 5  ;;  %v8038_v19 = vrot.slane %v2518_v35, 4 }
 0x100   : > { %6022 = vmatpush3.bf16.msra.mxu0 %v7730_v53  ;;  %5993 = vmatprep.mubr.bf16.mxu0 %v5223_v49  ;;  %v2494_v53 = vor.u32 %v2493_v21, %v7986_v62  ;;  %v2497_v49 = vshll.u32 %v5303_v11, 16  ;;  %v2529_v21 = vshll.u32 %v5307_v31, 16  ;;  %v2539_v11 = vshrl.u32 %v5308_v43, 16  ;;  %v6611_v35 = vld [vmem:[%s6947_s9 + $0xa8] sm:$0xff]  }
 0x101   : > { %6023 = vmatprep.subr.bf16.mxu0 %v6595_v15  ;;  %6220 = vmatpush3.bf16.msra.mxu1 %v6604_v44  ;;  %v6792_v44 = vld [vmem:[%s7511_s5 + $0x34] sm:$0xf]  ;;  %v8005_v4 = vrot.slane %v2484_v22, 4  ;;  %v6607_v22 = vld [vmem:[%s6947_s9 + $0xa0] sm:$0xff]  }
 0x102   : > { %6221 = vmatprep.subr.bf16.mxu1 %v6608_v34  ;;  %v5225_v12 = vcombine.low %v7610_v51, %v6792_v44  ;;  %v6616_v51 = vld [vmem:[%s6947_s9 + $0x1b0] sm:$0xff]   ;;  %v2531_v44 = vrot.slane %v2529_v21, 5  ;;  %v2553_v21 = vshll.u32 %v5310_v13, 16 }
 0x104   : > { %6024 = vmatpush3.bf16.msra.mxu0 %v6595_v15  ;;  %6190 = vmatmul.mubr.bf16.gmra.mrb[8].mxu1 %v7708_v14  ;;  %v2526_v15 = vshrl.u32 %v5307_v31, 16  ;;  %v8008_v14 = vrot.slane %v2494_v53, 4  ;;  %v8015_v31 = vld [vmem:[%s7511_s5 + $0x34] sm:$0xf]  ;;  %v8024_v53 = vld [vmem:[%s7511_s5 + $0x40] sm:$0xf] }
 0x105   : > { %6025 = vmatprep.subr.bf16.mxu0 %v6599_v41  ;;  %6193 = vmatprep.mubr.bf16.mxu1 %v7745_v61  ;;  %v8010_v61 = vrot.slane %v2497_v49, 5  ;;  %8944 = vst [vmem:[#allocation10_spill] sm:$0xff] %v8015_v31  ;;  %8945 = vst [vmem:[#allocation11_spill] sm:$0xff] %v8024_v53  ;;  %v2559_v25 = vshll.u32 %v8015_v31, 16  ;;  %v2563_v28 = vshrl.u32 %v8015_v31, 16 }
 0x106   : > { %6222 = vmatpush3.bf16.msra.mxu1 %v6608_v34  ;;  %v2535_v34 = vshll.u32 %v5308_v43, 16  ;;  %v2528_v49 = vrot.slane %v2526_v15, 4  ;;  %v8049_v15 = vrot.slane %v2539_v11, 4  ;;  %v2577_v43 = vshll.u32 %v5313_v56, 16 }
 0x107   : > { %5994 = vmatmul.mubr.bf16.gmra.mrb[4].mxu0 %v5224_v52  ;;  %6223 = vmatprep.subr.bf16.mxu1 %v6612_v10  ;;  %v5226_v52 = vcombine.low %v7630_v26, %v6793_v7  ;;  %v5316_v26 = vld [vmem:[%s7511_s5 + $0x48] sm:$0xf]  ;;  %v2550_v7 = vshrl.u32 %v5310_v13, 16  ;;  %v8076_v46 = vrot.slane %v2559_v25, 5  ;;  %v2613_v25 = vrot.slane %v2611_v9, 4 }
 0x108   : > { %5997 = vmatprep.mubr.bf16.mxu0 %v5225_v12  ;;  %6026 = vmatpush3.bf16.msra.mxu0 %v6599_v41  ;;  %v8030_v41 = vrot.slane %v2508_v23, 4  ;;  %v6620_v12 = vld [vmem:[%s6947_s9 + $0x1b8] sm:$0xff]   ;;  %v8047_v23 = vld [vmem:[%s7511_s5 + $0x2c] sm:$0x1]  ;;  %v2598_v11 = vshrl.u32 %v5316_v26, 16  ;;  %v2601_v13 = vshll.u32 %v5316_v26, 16  ;;  %v2532_v31 = vor.u32 %v2531_v44, %v2528_v49 }
 0x109   : > { %6027 = vmatprep.subr.bf16.mxu0 %v6603_v55  ;;  %8947 = vst [vmem:[#allocation13_spill] sm:$0xff] %v8047_v23  ;;  %v2552_v26 = vrot.slane %v2550_v7, 4  ;;  %v2565_v49 = vrot.slane %v2563_v28, 4  ;;  %v5319_v44 = vld [vmem:[%s7511_s5 + $0x54] sm:$0xf]  ;;  %v2579_v36 = vrot.slane %v2577_v43, 5 }
 0x10a   : > { %6224 = vmatpush3.bf16.msra.mxu1 %v6612_v10  ;;  %v8040_v10 = vrot.slane %v2535_v34, 5  ;;  %v2574_v34 = vshrl.u32 %v5313_v56, 16  ;;  %v8064_v56 = vld [vmem:[%s6947_s9 + $0x1c0] sm:$0xff]   ;;  %v8090_v28 = vrot.slane %v2532_v31, 4  ;;  %v2631_v9 = vshll.u32 %v8082_v45, 16  ;;  %v6619_v31 = vld [vmem:[%s6947_s9 + $0xb8] sm:$0xff]  }
 0x10b   : > { %6225 = vmatprep.subr.bf16.mxu1 %v6616_v51  ;;  %8948 = vst [vmem:[#allocation14_spill] sm:$0xff] %v8064_v56 }
 0x10c   : > { %6194 = vmatmul.mubr.bf16.gmra.mrb[12].mxu1 %v7763_v32  ;;  %6028 = vmatpush3.bf16.msra.mxu0 %v6603_v55  ;;  %v2583_v32 = vshll.u32 %v8024_v53, 16  ;;  %v2587_v55 = vshrl.u32 %v8024_v53, 16  ;;  %v2545_v53 = vshll.u32 %v8047_v23, 16  ;;  %v2542_v37 = vor.u32 %v8049_v15, %v8040_v10 }
 0x10d   : > { %6197 = vmatprep.mubr.bf16.mxu1 %v7799_v8  ;;  %6029 = vmatprep.subr.bf16.mxu0 %v6607_v22  ;;  %v2555_v8 = vrot.slane %v2553_v21, 5  ;;  %v2576_v23 = vrot.slane %v2574_v34, 4  ;;  %v8087_v15 = vrot.slane %v2607_v58, 5  ;;  %v8095_v21 = vld [vmem:[%s7511_s5 + $0x50] sm:$0x1]  ;;  %v2622_v34 = vshrl.u32 %v5319_v44, 16 }
 0x10e   : > { %6226 = vmatpush3.bf16.msra.mxu1 %v6616_v51  ;;  %v8068_v51 = vld [vmem:[%s7511_s5 + $0x38] sm:$0x1]  ;;  %v8079_v7 = vrot.slane %v2583_v32, 5  ;;  %v2589_v60 = vrot.slane %v2587_v55, 4  ;;  %v8092_v43 = vrot.slane %v2545_v53, 5  ;;  %8953 = vst [vmem:[#allocation18_spill] sm:$0xff] %v8095_v21  ;;  %v2566_v53 = vor.u32 %v2565_v49, %v8076_v46 }
 0x10f   : > { %5998 = vmatmul.mubr.bf16.gmra.mrb[8].mxu0 %v5226_v52  ;;  %6227 = vmatprep.subr.bf16.mxu1 %v6620_v12  ;;  %8949 = vst [vmem:[#allocation15_spill] sm:$0xff] %v8068_v51  ;;  %v6615_v52 = vld [vmem:[%s6947_s9 + $0xb0] sm:$0xff]   ;;  %v2625_v32 = vshll.u32 %v5319_v44, 16  ;;  %v2569_v55 = vshll.u32 %v8068_v51, 16  ;;  %v2635_v58 = vshrl.u32 %v8082_v45, 16  ;;  %v2617_v45 = vshll.u32 %v8095_v21, 16 }
 0x110   : > { %6001 = vmatprep.mubr.bf16.mxu0 %v8950_v57  ;;  %6030 = vmatpush3.bf16.msra.mxu0 %v6607_v22  ;;  %v2600_v57 = vrot.slane %v2598_v11, 4  ;;  %v2603_v22 = vrot.slane %v2601_v13, 5  ;;  %v5322_v11 = vld [vmem:[%s7511_s5 + $0x60] sm:$0xf]  ;;  %v2580_v13 = vor.u32 %v2579_v36, %v2576_v23  ;;  %v2590_v44 = vor.u32 %v2589_v60, %v8079_v7  ;;  %v8113_v51 = vld [vmem:[%s7511_s5 + $0x5c] sm:$0x1] }
 0x111   : > { %6031 = vmatprep.subr.bf16.mxu0 %v6611_v35  ;;  %v2624_v49 = vrot.slane %v2622_v34, 4  ;;  %v2627_v36 = vrot.slane %v2625_v32, 5  ;;  %v2646_v23 = vshrl.u32 %v5322_v11, 16  ;;  %v2649_v60 = vshll.u32 %v5322_v11, 16 }
 0x112   : > { %6228 = vmatpush3.bf16.msra.mxu1 %v6620_v12  ;;  %v2556_v12 = vor.u32 %v2555_v8, %v2552_v26  ;;  %v2604_v8 = vor.u32 %v2603_v22, %v2600_v57  ;;  %v2614_v26 = vor.u32 %v2613_v25, %v8087_v15  ;;  %v2571_v22 = vrot.slane %v2569_v55, 5 }
 0x113   : > { %6261 = vmatprep.subr.bf16.mxu1 %v8064_v56  ;;  %v8118_v25 = vrot.slane %v2631_v9, 5  ;;  %v2637_v21 = vrot.slane %v2635_v58, 4  ;;  %v2581_v34 = vrot.slane %v2580_v13, 4  ;;  %v2591_v32 = vrot.slane %v2590_v44, 4  ;;  %v8164_v44 = vld [vmem:[%s7511_s5 + $0x68] sm:$0x1] }
 0x114   : > { %6198 = vmatmul.mubr.bf16.gmra.mrb[16].mxu1 %v7816_v1  ;;  %6032 = vmatpush3.bf16.msra.mxu0 %v6611_v35  ;;  %v2593_v1 = vshll.u32 %v8085_v17, 16  ;;  %v2543_v35 = vrot.slane %v2542_v37, 4  ;;  %v8955_v37 = vcombine.low %v7736_v24, %v7711_v40  ;;  %v2557_v57 = vrot.slane %v2556_v12, 4  ;;  %v8121_v17 = vld [vmem:[%s7511_s5 + $0x64] sm:$0xf] }
 0x115   : > { %6201 = vmatprep.mubr.bf16.mxu1 %v7851_v2  ;;  %6033 = vmatprep.subr.bf16.mxu0 %v6615_v52  ;;  %v8954_v2 = vcombine.low %v7691_v39, %v7660_v20  ;;  %v8124_v20 = vld [vmem:[%s6947_s9 + $0xc0] sm:$0xff]   ;;  %v2567_v39 = vrot.slane %v2566_v53, 4  ;;  %v2605_v11 = vrot.slane %v2604_v8, 4  ;;  %v2615_v56 = vrot.slane %v2614_v26, 4 }
 0x116   : > { %v2619_v59 = vrot.slane %v2617_v45, 5  ;;  %v2641_v40 = vshll.u32 %v8113_v51, 16  ;;  %v2628_v24 = vor.u32 %v2627_v36, %v2624_v49  ;;  %v2651_v12 = vrot.slane %v2649_v60, 5 }
 0x117   : > { %6002 = vmatmul.mubr.bf16.gmra.mrb[12].mxu0 %v8954_v2  ;;  %v2595_v2 = vrot.slane %v2593_v1, 5  ;;  %v2655_v55 = vshll.u32 %v8121_v17, 16  ;;  %v2524_v9 = vsel %vm7539_vm13, %v8038_v19, %v8020_v27  ;;  %v2538_v45 = vsel %vm7539_vm13, %v8090_v28, %v8040_v10  ;;  %v5325_v10 = vld [vmem:[%s7511_s5 + $0x6c] sm:$0xf] }
 0x118   : > { %6005 = vmatprep.mubr.bf16.mxu0 %v8955_v37  ;;  %6034 = vmatpush3.bf16.msra.mxu0 %v6615_v52  ;;  %v2648_v52 = vrot.slane %v2646_v23, 4  ;;  %v2638_v58 = vor.u32 %v2637_v21, %v8118_v25  ;;  %v2659_v53 = vshrl.u32 %v8121_v17, 16  ;;  %v2562_v27 = vsel %vm7539_vm13, %v2557_v57, %v8076_v46 }
 0x119   : > { %6035 = vmatprep.subr.bf16.mxu0 %v6619_v31  ;;  %v2572_v19 = vsel %vm7539_vm13, %v2567_v39, %v2571_v22  ;;  %v2586_v28 = vsel %vm7539_vm13, %v2581_v34, %v8079_v7  ;;  %v2643_v21 = vrot.slane %v2641_v40, 5  ;;  %v8956_v46 = vcombine.low %v7761_v38, %v7722_v29  ;;  %v8172_v29 = vld [vmem:[%s7511_s5 + $0x70] sm:$0xf]  ;;  %v5331_v22 = vld [vmem:[%s7511_s5 + $0x84] sm:$0xf] }
 0x11a   : > { %v2629_v13 = vrot.slane %v2628_v24, 4  ;;  %v2652_v7 = vor.u32 %v2651_v12, %v2648_v52  ;;  %v8166_v1 = vrot.slane %v2655_v55, 5  ;;  %v2661_v8 = vrot.slane %v2659_v53, 4 }
 0x11b   : > { %v2670_v38 = vshrl.u32 %v5325_v10, 16  ;;  %v8959_v26 = vsel %vm7539_vm13, %v8005_v4, %v7986_v62  ;;  %v8195_v23 = vcombine.low %v2562_v27, %v2572_v19  ;;  %v5328_v62 = vld [vmem:[%s7511_s5 + $0x78] sm:$0xf]  ;;  %v8206_v4 = vld [vmem:[%s7511_s5 + $0x7c] sm:$0xf]  ;;  %v2665_v37 = vshll.u32 %v8164_v44, 16 }
 0x11c   : > { %6202 = vmatmul.mubr.bf16.gmra.mrb[20].mxu1 %v7868_v63  ;;  %6036 = vmatpush3.bf16.msra.mxu0 %v6619_v31  ;;  %v2548_v63 = vsel %vm7539_vm13, %v2543_v35, %v8092_v43  ;;  %v2610_v43 = vsel %vm7539_vm13, %v2605_v11, %v8087_v15  ;;  %v2620_v31 = vsel %vm7539_vm13, %v2615_v56, %v2619_v59  ;;  %v2639_v35 = vrot.slane %v2638_v58, 4  ;;  %v5334_v27 = vld [vmem:[%s7511_s5 + $0x90] sm:$0xf] }
 0x11d   : > { %6205 = vmatprep.mubr.bf16.mxu1 %v7903_v16  ;;  %6069 = vmatprep.subr.bf16.mxu0 %v8124_v20  ;;  %v2596_v16 = vsel %vm7539_vm13, %v2591_v32, %v2595_v2  ;;  %v8957_v15 = vcombine.low %v7793_v3, %v7771_v54  ;;  %v2673_v59 = vshll.u32 %v5325_v10, 16  ;;  %v8958_v56 = vsel %vm7539_vm13, %v8008_v14, %v8010_v61  ;;  %v8202_v61 = vld [vmem:[%s7511_s5 + $0x74] sm:$0x1]  ;;  %v8254_v10 = vld [vmem:[%s7511_s5 + $0x80] sm:$0x1] }
 0x11e   : > { %v8184_v49 = vcombine.low %v8959_v26, %v8958_v56  ;;  %v8961_v54 = vsel %vm7539_vm13, %v8030_v41, %v7996_v42  ;;  %v8193_v36 = vcombine.low %v2538_v45, %v2548_v63  ;;  %8964 = vst [vmem:[#allocation22_spill] sm:$0xff] %v8195_v23  ;;  %v8197_v60 = vcombine.low %v2586_v28, %v2596_v16 }
 0x11f   : > { %6006 = vmatmul.mubr.bf16.gmra.mrb[16].mxu0 %v8956_v46  ;;  %v8191_v3 = vcombine.low %v8961_v54, %v2524_v9  ;;  %v8199_v14 = vcombine.low %v2610_v43, %v2620_v31  ;;  %v2634_v42 = vsel %vm7539_vm13, %v2629_v13, %v8118_v25  ;;  %v8211_v41 = vrot.slane %v2652_v7, 4  ;;  %v8259_v43 = vld [vmem:[%s7511_s5 + $0x94] sm:$0xf]  ;;  %v5337_v31 = vld [vmem:[%s7511_s5 + $0x9c] sm:$0xf] }
 0x120   : > { %6009 = vmatprep.mubr.bf16.mxu0 %v8957_v15  ;;  %8960 = vst [vmem:[#allocation19_spill] sm:$0xff] %v8184_v49  ;;  %8963 = vst [vmem:[#allocation21_spill] sm:$0xff] %v8193_v36  ;;  %v2679_v57 = vshll.u32 %v8172_v29, 16  ;;  %v2644_v39 = vsel %vm7539_vm13, %v2639_v35, %v2643_v21  ;;  %v2662_v34 = vor.u32 %v2661_v8, %v8166_v1  ;;  %v8220_v32 = vrot.slane %v2670_v38, 4  ;;  %v8267_v8 = vld [vmem:[%s7511_s5 + $0xa0] sm:$0xf] }
 0x121   : > { %8962 = vst [vmem:[#allocation20_spill] sm:$0xff] %v8191_v3  ;;  %8965 = vst [vmem:[#allocation23_spill] sm:$0xff] %v8197_v60  ;;  %v8222_v2 = vrot.slane %v2673_v59, 5  ;;  %v2683_v25 = vshrl.u32 %v8172_v29, 16  ;;  %v2689_v11 = vshll.u32 %v8202_v61, 16  ;;  %v2694_v40 = vshrl.u32 %v5328_v62, 16 }
 0x122   : > { %v2697_v24 = vshll.u32 %v5328_v62, 16  ;;  %v2703_v52 = vshll.u32 %v8206_v4, 16  ;;  %v2707_v12 = vshrl.u32 %v8206_v4, 16  ;;  %v2718_v55 = vshrl.u32 %v5331_v22, 16  ;;  %v8270_v38 = vld [vmem:[%s7511_s5 + $0x8c] sm:$0x1] }
 0x123   : > { %v2721_v9 = vshll.u32 %v5331_v22, 16  ;;  %v8966_v45 = vcombine.low %v7814_v47, %v7781_v5  ;;  %v2658_v58 = vsel %vm7539_vm13, %v8211_v41, %v8166_v1  ;;  %v8241_v53 = vrot.slane %v2665_v37, 5 }
 0x124   : > { %6206 = vmatmul.mubr.bf16.gmra.mrb[24].mxu1 %v7920_v50  ;;  %v8228_v50 = vld [vmem:[%s7511_s5 + $0x88] sm:$0xf]  ;;  %v8243_v63 = vrot.slane %v2679_v57, 5  ;;  %v8967_v19 = vcombine.low %v7845_v33, %v7823_v0  ;;  %v8249_v5 = vrot.slane %v2662_v34, 4  ;;  %v2676_v47 = vor.u32 %v8222_v2, %v8220_v32 }
 0x125   : > { %6209 = vmatprep.mubr.bf16.mxu1 %v7940_v30  ;;  %v8235_v30 = vcombine.low %v2634_v42, %v2644_v39  ;;  %v2727_v28 = vshll.u32 %v8228_v50, 16  ;;  %v2731_v16 = vshrl.u32 %v8228_v50, 16  ;;  %v2685_v21 = vrot.slane %v2683_v25, 4 }
 0x126   : > { %v8261_v46 = vrot.slane %v2689_v11, 5  ;;  %v2696_v0 = vrot.slane %v2694_v40, 4  ;;  %v2699_v33 = vrot.slane %v2697_v24, 5  ;;  %v8264_v13 = vrot.slane %v2703_v52, 5  ;;  %v8968_v40 = vld [vmem:[#allocation5_spill] sm:$0xff] }
 0x127   : > { %6010 = vmatmul.mubr.bf16.gmra.mrb[20].mxu0 %v8966_v45  ;;  %v2709_v7 = vrot.slane %v2707_v12, 4  ;;  %v2720_v15 = vrot.slane %v2718_v55, 4  ;;  %v2723_v35 = vrot.slane %v2721_v9, 5  ;;  %v2742_v59 = vshrl.u32 %v5334_v27, 16  ;;  %v8970_v45 = vld [vmem:[#allocation8_spill] sm:$0xff] }
 0x128   : > { %6013 = vmatprep.mubr.bf16.mxu0 %v8967_v19  ;;  %v2745_v56 = vshll.u32 %v5334_v27, 16  ;;  %v2751_v26 = vshll.u32 %v8259_v43, 16  ;;  %v2755_v54 = vshrl.u32 %v8259_v43, 16  ;;  %v8275_v62 = vrot.slane %v2727_v28, 5  ;;  %v8971_v27 = vld [vmem:[#allocation6_spill] sm:$0xff] }
 0x129   : > { %v2733_v42 = vrot.slane %v2731_v16, 4  ;;  %v2766_v37 = vshrl.u32 %v5337_v31, 16  ;;  %v2769_v57 = vshll.u32 %v5337_v31, 16  ;;  %v2686_v22 = vor.u32 %v2685_v21, %v8243_v63  ;;  %v6628_v28 = vld [vmem:[%s6947_s9 + $0x1c8] sm:$0xff]   ;;  %v8299_v21 = vld [vmem:[%s7511_s5 + $0x98] sm:$0x1] }
 0x12a   : > { %v2713_v39 = vshll.u32 %v8254_v10, 16  ;;  %v2775_v34 = vshll.u32 %v8267_v8, 16  ;;  %v2779_v32 = vshrl.u32 %v8267_v8, 16  ;;  %v2700_v2 = vor.u32 %v2699_v33, %v2696_v0 }
 0x12b   : > { %v2724_v25 = vor.u32 %v2723_v35, %v2720_v15  ;;  %v2737_v11 = vshll.u32 %v8270_v38, 16  ;;  %v8969_v24 = vcombine.low %v7866_v48, %v8968_v40  ;;  %v2744_v52 = vrot.slane %v2742_v59, 4  ;;  %v5340_v59 = vld [vmem:[%s7511_s5 + $0xa8] sm:$0xf] }
 0x12c   : > { %6210 = vmatmul.mubr.bf16.gmra.mrb[28].mxu1 %v7963_v18  ;;  %v2710_v18 = vor.u32 %v2709_v7, %v8264_v13  ;;  %v2747_v12 = vrot.slane %v2745_v56, 5  ;;  %v8287_v55 = vrot.slane %v2751_v26, 5  ;;  %v2757_v9 = vrot.slane %v2755_v54, 4 }
 0x12d   : > { %6229 = vmatprep.mubr.bf16.mxu1 %v8184_v49  ;;  %v8972_v19 = vcombine.low %v8970_v45, %v8971_v27  ;;  %v2668_v16 = vsel %vm7539_vm13, %v8249_v5, %v8241_v53  ;;  %v2734_v48 = vor.u32 %v2733_v42, %v8275_v62  ;;  %v2768_v0 = vrot.slane %v2766_v37, 4 }
 0x12e   : > { %v2771_v33 = vrot.slane %v2769_v57, 5  ;;  %v2677_v31 = vrot.slane %v2676_v47, 4  ;;  %v2687_v7 = vrot.slane %v2686_v22, 4  ;;  %v8301_v15 = vrot.slane %v2775_v34, 5  ;;  %v8310_v47 = vld [vmem:[%s7511_s5 + $0xac] sm:$0xf] }
 0x12f   : > { %6014 = vmatmul.mubr.bf16.gmra.mrb[24].mxu0 %v8969_v24  ;;  %v2781_v35 = vrot.slane %v2779_v32, 4  ;;  %v2701_v56 = vrot.slane %v2700_v2, 4  ;;  %v2711_v26 = vrot.slane %v2710_v18, 4  ;;  %v2715_v54 = vrot.slane %v2713_v39, 5  ;;  %v8305_v24 = vld [vmem:[%s7511_s5 + $0xa4] sm:$0x1] }
 0x130   : > { %6017 = vmatprep.mubr.bf16.mxu0 %v8972_v19  ;;  %v2739_v40 = vrot.slane %v2737_v11, 5  ;;  %v2725_v53 = vrot.slane %v2724_v25, 4  ;;  %v2748_v5 = vor.u32 %v2747_v12, %v2744_v52  ;;  %v2758_v42 = vor.u32 %v2757_v9, %v8287_v55  ;;  %v6622_v57 = vld [vmem:[%s7511_s5 + $0xc] sm:$0xff]   ;;  %v8974_v19 = vld [vmem:[#allocation9_spill] sm:$0xff] }
 0x131   : > { %v2761_v37 = vshll.u32 %v8299_v21, 16  ;;  %v2735_v22 = vrot.slane %v2734_v48, 4  ;;  %v2772_v34 = vor.u32 %v2771_v33, %v2768_v0  ;;  %v2790_v32 = vshrl.u32 %v5340_v59, 16  ;;  %v8973_v39 = vld [vmem:[#allocation14_spill] sm:$0xff]  ;;  %v6632_v12 = vld [vmem:[%s6947_s9 + $0x1d0] sm:$0xff]  }
 0x132   : > { %v2793_v2 = vshll.u32 %v5340_v59, 16  ;;  %v2682_v18 = vsel %vm7539_vm13, %v2677_v31, %v8243_v63  ;;  %v2692_v25 = vsel %vm7539_vm13, %v2687_v7, %v8261_v46  ;;  %v2782_v11 = vor.u32 %v2781_v35, %v8301_v15  ;;  %v8975_v46 = vld [vmem:[#allocation7_spill] sm:$0xff]  ;;  %v6636_v35 = vld [vmem:[%s6947_s9 + $0x1d8] sm:$0xff]  }
 0x133   : > { %v2785_v52 = vshll.u32 %v8305_v24, 16  ;;  %v2706_v9 = vsel %vm7539_vm13, %v2701_v56, %v8264_v13  ;;  %v2716_v45 = vsel %vm7539_vm13, %v2711_v26, %v2715_v54  ;;  %v2799_v63 = vshll.u32 %v8310_v47, 16  ;;  %v5343_v7 = vld [vmem:[%s7511_s5 + $0xb4] sm:$0xf] }
 0x134   : > { %6230 = vmatmul.mubr.bf16.vlgmr.msra.gmra.mrb[0].mxu1 %v8191_v3  ;;  %v2803_v27 = vshrl.u32 %v8310_v47, 16  ;;  %v8976_v48 = vcombine.low %v8974_v19, %v8975_v46  ;;  %v2730_v0 = vsel %vm7539_vm13, %v2725_v53, %v8275_v62  ;;  %v8338_v33 = vrot.slane %v2748_v5, 4  ;;  %v8978_v46 = vld [vmem:[#allocation10_spill] sm:$0xff] }
 0x135   : > { %6262 = vmatpush3.bf16.msra.mxu1 %v8973_v39  ;;  %6233 = vmatprep.mubr.bf16.mxu1 %v8193_v36  ;;  %v8340_v13 = vrot.slane %v2758_v42, 4  ;;  %v8342_v31 = vrot.slane %v2761_v37, 5  ;;  %v2740_v59 = vsel %vm7539_vm13, %v2735_v22, %v2739_v40  ;;  %v8348_v56 = vrot.slane %v2772_v34, 4  ;;  %v8368_v42 = vld [vmem:[%s7511_s5 + $0xb0] sm:$0x1]  ;;  %v6626_v39 = vld [vmem:[%s7511_s5 + $0x24] sm:$0xff]  }
 0x136   : > { %6263 = vmatprep.subr.bf16.mxu1 %v6628_v28  ;;  %v8350_v26 = vrot.slane %v2790_v32, 4  ;;  %v8352_v62 = vrot.slane %v2793_v2, 5  ;;  %v8359_v54 = vcombine.low %v2658_v58, %v2668_v16  ;;  %v8361_v53 = vcombine.low %v2682_v18, %v2692_v25  ;;  %v8371_v37 = vld [vmem:[%s7511_s5 + $0xb8] sm:$0xf]  ;;  %v5480_v58 = vld [vmem:[%s7511_s5 + $0x30] sm:$0xe] }
 0x137   : > { %6018 = vmatmul.mubr.bf16.gmra.mrb[28].mxu0 %v8976_v48  ;;  %v8363_v5 = vrot.slane %v2782_v11, 4  ;;  %v8365_v40 = vrot.slane %v2785_v52, 5  ;;  %v2814_v1 = vshrl.u32 %v5343_v7, 16  ;;  %v2817_v41 = vshll.u32 %v5343_v7, 16  ;;  %v6625_v16 = vld [vmem:[%s7511_s5 + $0x18] sm:$0xff]   ;;  %v6640_v7 = vld [vmem:[%s6947_s9 + $0x1e0] sm:$0xff]  }
 0x138   : > { %6037 = vmatprep.mubr.bf16.mxu0 %v6622_v57  ;;  %8977 = vst [vmem:[#allocation5_spill] sm:$0xff] %v8361_v53  ;;  %v8375_v57 = vrot.slane %v2803_v27, 4  ;;  %v8379_v22 = vcombine.low %v2706_v9, %v2716_v45  ;;  %v8381_v34 = vcombine.low %v2730_v0, %v2740_v59  ;;  %v2823_v52 = vshll.u32 %v8371_v37, 16  ;;  %v5481_v9 = vld [vmem:[%s7511_s5 + $0x3c] sm:$0xe]  ;;  %v6627_v45 = vld [vmem:[%s6947_s9 + $0xc8] sm:$0xff]  }
 0x139   : > { %6264 = vmatpush3.bf16.msra.mxu1 %v6628_v28  ;;  %v8373_v28 = vrot.slane %v2799_v63, 5  ;;  %v2827_v27 = vshrl.u32 %v8371_v37, 16  ;;  %v5496_v19 = vrot.slane %v5480_v58, 9  ;;  %v4236_v48 = vrot.slane %v8978_v46, 5  ;;  %v5482_v0 = vld [vmem:[%s7511_s5 + $0x48] sm:$0xe] }
 0x13a   : > { %6265 = vmatprep.subr.bf16.mxu1 %v6632_v12  ;;  %v8414_v11 = vrot.slane %v2814_v1, 4  ;;  %v8979_v25 = vld [vmem:[#allocation15_spill] sm:$0xff]  ;;  %v5497_v32 = vrot.slane %v5481_v9, 9  ;;  %v8425_v1 = vrot.slane %v2823_v52, 5  ;;  %v5484_v52 = vld [vmem:[%s7511_s5 + $0x60] sm:$0xe] }
 0x13b   : > { %v4239_v18 = vrot.slane %v8979_v25, 5  ;;  %v8421_v58 = vsel %vm7507_vm10, %v5496_v19, %v4236_v48  ;;  %v4238_v46 = vrot.slane %v4236_v48, 4  ;;  %v8981_v2 = vld [vmem:[#allocation11_spill] sm:$0xff]  ;;  %v8983_v25 = vld [vmem:[#allocation12_spill] sm:$0xff]  ;;  %v8431_v9 = vrot.slane %v2827_v27, 4 }
 0x13c   : > { %6234 = vmatmul.mubr.bf16.gmra.mrb[4].mxu1 %v8195_v23  ;;  %v5498_v23 = vrot.slane %v5482_v0, 9  ;;  %v5483_v36 = vld [vmem:[%s7511_s5 + $0x54] sm:$0xe]  ;;  %v4260_v49 = vrot.slane %v8113_v51, 5  ;;  %v5485_v0 = vld [vmem:[%s7511_s5 + $0x6c] sm:$0xe] }
 0x13d   : > { %6237 = vmatprep.mubr.bf16.mxu1 %v8197_v60  ;;  %6266 = vmatpush3.bf16.msra.mxu1 %v6632_v12  ;;  %v8416_v12 = vrot.slane %v2817_v41, 5  ;;  %v4243_v60 = vrot.slane %v8981_v2, 5  ;;  %v8982_v41 = vld [vmem:[#allocation17_spill] sm:$0xff]  ;;  %v6631_v19 = vld [vmem:[%s6947_s9 + $0xd0] sm:$0xff]   ;;  %v8435_v2 = vsel %vm7507_vm10, %v4238_v46, %v4239_v18  ;;  %v8985_v18 = vld [vmem:[#allocation18_spill] sm:$0xff] }
 0x13e   : > { %6267 = vmatprep.subr.bf16.mxu1 %v6636_v35  ;;  %v4246_v59 = vrot.slane %v8982_v41, 5  ;;  %8984 = vst [vmem:[#allocation8_spill] sm:$0xff] %v8435_v2  ;;  %v6629_v48 = vld [vmem:[%s7511_s5 + $0x30] sm:$0xff]   ;;  %v4253_v46 = vrot.slane %v8985_v18, 5  ;;  %v6644_v41 = vld [vmem:[%s6947_s9 + $0x1e8] sm:$0xff]   ;;  %v5500_v2 = vrot.slane %v5484_v52, 9 }
 0x13f   : > { %6038 = vmatmul.mubr.bf16.vlgmr.msra.gmra.mrb[0].mxu0 %v6625_v16  ;;  %v4250_v16 = vrot.slane %v8983_v25, 5  ;;  %v8986_v25 = vld [vmem:[#allocation16_spill] sm:$0xff] }
 0x140   : > { %6070 = vmatpush3.bf16.msra.mxu0 %v8124_v20  ;;  %6041 = vmatprep.mubr.bf16.mxu0 %v6626_v39  ;;  %v8439_v20 = vsel %vm7507_vm10, %v5497_v32, %v4243_v60  ;;  %v4245_v39 = vrot.slane %v4243_v60, 4  ;;  %v5499_v32 = vrot.slane %v5483_v36, 9  ;;  %v4257_v3 = vrot.slane %v8986_v25, 5  ;;  %v5486_v36 = vld [vmem:[%s7511_s5 + $0x78] sm:$0xe] }
 0x141   : > { %6071 = vmatprep.subr.bf16.mxu0 %v6627_v45  ;;  %6268 = vmatpush3.bf16.msra.mxu1 %v6636_v35  ;;  %v8447_v35 = vsel %vm7507_vm10, %v5498_v23, %v4250_v16  ;;  %v4252_v27 = vrot.slane %v4250_v16, 4  ;;  %v6630_v23 = vld [vmem:[%s7511_s5 + $0x3c] sm:$0xff]   ;;  %v4271_v16 = vrot.slane %v8172_v29, 5 }
 0x142   : > { %6269 = vmatprep.subr.bf16.mxu1 %v6640_v7  ;;  %v8453_v60 = vsel %vm7507_vm10, %v4245_v39, %v4246_v59  ;;  %v4264_v59 = vrot.slane %v8121_v17, 5  ;;  %v6635_v51 = vld [vmem:[%s6947_s9 + $0xd8] sm:$0xff]   ;;  %v8474_v39 = vsel %vm7507_vm10, %v5499_v32, %v4257_v3  ;;  %v4259_v25 = vrot.slane %v4257_v3, 4 }
 0x143   : > { %v8464_v18 = vsel %vm7507_vm10, %v4252_v27, %v4253_v46  ;;  %v4267_v27 = vrot.slane %v8164_v44, 5  ;;  %v5501_v46 = vrot.slane %v5485_v0, 9  ;;  %v4274_v44 = vrot.slane %v8202_v61, 5  ;;  %v9003_v63 = vld [vmem:[#allocation20_spill] sm:$0xff] }
 0x144   : > { %6072 = vmatpush3.bf16.msra.mxu0 %v6627_v45  ;;  %6238 = vmatmul.mubr.bf16.gmra.mrb[8].mxu1 %v8199_v14  ;;  %v8479_v17 = vsel %vm7507_vm10, %v5500_v2, %v4264_v59  ;;  %v4266_v52 = vrot.slane %v4264_v59, 4  ;;  %v6648_v45 = vld [vmem:[%s6947_s9 + $0x1f0] sm:$0xff]   ;;  %v8485_v32 = vsel %vm7507_vm10, %v4259_v25, %v4260_v49  ;;  %v5502_v3 = vrot.slane %v5486_v36, 9  ;;  %v5487_v2 = vld [vmem:[%s7511_s5 + $0x84] sm:$0xe] }
 0x145   : > { %6073 = vmatprep.subr.bf16.mxu0 %v6631_v19  ;;  %6241 = vmatprep.mubr.bf16.mxu1 %v8235_v30  ;;  %v8498_v49 = vsel %vm7507_vm10, %v5501_v46, %v4271_v16  ;;  %v4273_v61 = vrot.slane %v4271_v16, 4  ;;  %v4281_v36 = vrot.slane %v8254_v10, 5  ;;  %v5503_v25 = vrot.slane %v5487_v2, 9  ;;  %v5489_v46 = vld [vmem:[%s7511_s5 + $0x9c] sm:$0xe] }
 0x146   : > { %6270 = vmatpush3.bf16.msra.mxu1 %v6640_v7  ;;  %v4278_v7 = vrot.slane %v8206_v4, 5  ;;  %v8494_v29 = vsel %vm7507_vm10, %v4266_v52, %v4267_v27  ;;  %v6639_v4 = vld [vmem:[%s6947_s9 + $0xe0] sm:$0xff]   ;;  %v4285_v27 = vrot.slane %v8228_v50, 5  ;;  %v4288_v52 = vrot.slane %v8270_v38, 5  ;;  %v5490_v2 = vld [vmem:[%s7511_s5 + $0xa8] sm:$0xe] }
 0x147   : > { %6042 = vmatmul.mubr.bf16.gmra.mrb[4].mxu0 %v6629_v48  ;;  %6271 = vmatprep.subr.bf16.mxu1 %v6644_v41  ;;  %v5488_v48 = vld [vmem:[%s7511_s5 + $0x90] sm:$0xe]  ;;  %v8511_v16 = vsel %vm7507_vm10, %v4273_v61, %v4274_v44  ;;  %v4292_v44 = vrot.slane %v8259_v43, 5  ;;  %v6634_v50 = vld [vmem:[%s7511_s5 + $0x54] sm:$0xff]   ;;  %v6643_v43 = vld [vmem:[%s6947_s9 + $0xe8] sm:$0xff]   ;;  %v4299_v38 = vrot.slane %v8267_v8, 5 }
 0x148   : > { %6045 = vmatprep.mubr.bf16.mxu0 %v6630_v23  ;;  %6074 = vmatpush3.bf16.msra.mxu0 %v6631_v19  ;;  %v8506_v23 = vsel %vm7507_vm10, %v5502_v3, %v4278_v7  ;;  %v4280_v59 = vrot.slane %v4278_v7, 4  ;;  %v6633_v19 = vld [vmem:[%s7511_s5 + $0x48] sm:$0xff]   ;;  %v6652_v3 = vld [vmem:[%s6947_s9 + $0x1f8] sm:$0xff]   ;;  %v8532_v61 = vsel %vm7507_vm10, %v5503_v25, %v4285_v27  ;;  %v4287_v7 = vrot.slane %v4285_v27, 4 }
 0x149   : > { %6075 = vmatprep.subr.bf16.mxu0 %v6635_v51  ;;  %v5506_v27 = vrot.slane %v5490_v2, 9  ;;  %v4306_v0 = vrot.slane %v8310_v47, 5  ;;  %v5345_v47 = vld [vmem:[%s7511_s5 + $0xbc] sm:$0x1]  ;;  %v4309_v2 = vrot.slane %v8368_v42, 5 }
 0x14a   : > { %6272 = vmatpush3.bf16.msra.mxu1 %v6644_v41  ;;  %v8522_v10 = vsel %vm7507_vm10, %v4280_v59, %v4281_v36  ;;  %v5504_v41 = vrot.slane %v5488_v48, 9  ;;  %v4295_v59 = vrot.slane %v8299_v21, 5  ;;  %v5505_v36 = vrot.slane %v5489_v46, 9  ;;  %v5492_v46 = vld [vmem:[%s7511_s5 + $0xc0] sm:$0xe] }
 0x14b   : > { %6273 = vmatprep.subr.bf16.mxu1 %v6648_v45  ;;  %v8544_v25 = vsel %vm7507_vm10, %v4287_v7, %v4288_v52  ;;  %v4302_v21 = vrot.slane %v8305_v24, 5  ;;  %v4301_v24 = vrot.slane %v4299_v38, 4  ;;  %v8577_v7 = vld [vmem:[%s7511_s5 + $0xc8] sm:$0x1]  ;;  %v5508_v8 = vrot.slane %v5492_v46, 9 }
 0x14c   : > { %6242 = vmatmul.mubr.bf16.gmra.mrb[12].mxu1 %v8359_v54  ;;  %6076 = vmatpush3.bf16.msra.mxu0 %v6635_v51  ;;  %v8539_v48 = vsel %vm7507_vm10, %v5504_v41, %v4292_v44  ;;  %v4294_v51 = vrot.slane %v4292_v44, 4  ;;  %v8557_v52 = vsel %vm7507_vm10, %v5505_v36, %v4299_v38  ;;  %v8566_v41 = vsel %vm7507_vm10, %v5506_v27, %v4306_v0  ;;  %v5347_v38 = vld [vmem:[%s7511_s5 + $0xc4] sm:$0xf] }
 0x14d   : > { %6245 = vmatprep.mubr.bf16.mxu1 %v8361_v53  ;;  %6077 = vmatprep.subr.bf16.mxu0 %v6639_v4  ;;  %8987 = vst [vmem:[#allocation6_spill] sm:$0xff] %v8539_v48  ;;  %v5491_v53 = vld [vmem:[%s7511_s5 + $0xb4] sm:$0xe]  ;;  %8989 = vst [vmem:[#allocation9_spill] sm:$0xff] %v8566_v41  ;;  %v4308_v44 = vrot.slane %v4306_v0, 4  ;;  %v4316_v36 = vrot.slane %v5345_v47, 5 }
 0x14e   : > { %6274 = vmatpush3.bf16.msra.mxu1 %v6648_v45  ;;  %v8553_v45 = vsel %vm7507_vm10, %v4294_v51, %v4295_v59  ;;  %v6647_v59 = vld [vmem:[%s6947_s9 + $0xf0] sm:$0xff]   ;;  %v4313_v51 = vrot.slane %v8371_v37, 5  ;;  %v6637_v48 = vld [vmem:[%s7511_s5 + $0x60] sm:$0xff]  }
 0x14f   : > { %6046 = vmatmul.mubr.bf16.gmra.mrb[8].mxu0 %v6633_v19  ;;  %6275 = vmatprep.subr.bf16.mxu1 %v6652_v3  ;;  %8988 = vst [vmem:[#allocation14_spill] sm:$0xff] %v8553_v45  ;;  %v5346_v19 = vld [vmem:[%s7511_s5 + $0xc0] sm:$0xf]  ;;  %v8583_v27 = vsel %vm7507_vm10, %v4308_v44, %v4309_v2  ;;  %v4320_v45 = vrot.slane %v5347_v38, 5  ;;  %v2833_v44 = vshll.u32 %v5345_v47, 16  ;;  %v2830_v47 = vor.u32 %v8431_v9, %v8425_v1 }
 0x150   : > { %6049 = vmatprep.mubr.bf16.mxu0 %v6634_v50  ;;  %6078 = vmatpush3.bf16.msra.mxu0 %v6639_v4  ;;  %v8573_v50 = vsel %vm7507_vm10, %v4301_v24, %v4302_v21  ;;  %v5507_v4 = vrot.slane %v5491_v53, 9  ;;  %8990 = vst [vmem:[#allocation7_spill] sm:$0xff] %v8583_v27  ;;  %v4315_v37 = vrot.slane %v4313_v51, 4  ;;  %v6638_v24 = vld [vmem:[%s7511_s5 + $0x6c] sm:$0xff]   ;;  %v2838_v2 = vshrl.u32 %v5346_v19, 16 }
 0x151   : > { %6079 = vmatprep.subr.bf16.mxu0 %v6643_v43  ;;  %v8597_v46 = vsel %vm7507_vm10, %v5508_v8, %v4320_v45  ;;  %v4322_v0 = vrot.slane %v4320_v45, 4  ;;  %v2841_v21 = vshll.u32 %v5346_v19, 16  ;;  %v2851_v27 = vshrl.u32 %v5347_v38, 16 }
 0x152   : > { %6276 = vmatpush3.bf16.msra.mxu1 %v6652_v3  ;;  %v8590_v53 = vsel %vm7507_vm10, %v5507_v4, %v4313_v51  ;;  %v4323_v3 = vrot.slane %v8577_v7, 5  ;;  %v2847_v4 = vshll.u32 %v5347_v38, 16  ;;  %v6651_v51 = vld [vmem:[%s6947_s9 + $0xf8] sm:$0xff]   ;;  %v8603_v41 = vsel %vm7507_vm10, %v4315_v37, %v4316_v36  ;;  %s5583_s9 = sshll.u32 (%p6927_p5), %s6837_s17, 7 }
 0x153   : > { %v5539_v8 = vcombine.low %v8590_v53, %v8603_v41  ;;  %v8991_v19 = vsel %vm7539_vm13, %v8340_v13, %v8342_v31  ;;  %v8994_v13 = vsel %vm7539_vm13, %v8348_v56, %v8301_v15  ;;  %v8996_v38 = vor.u32 %v8375_v57, %v8373_v28  ;;  %s4911_s26 = sadd.s32 (%p6927_p5), %s5583_s9, %s5582_s8 }
 0x154   : > { %6246 = vmatmul.mubr.bf16.gmra.mrb[16].mxu1 %v8379_v22  ;;  %6080 = vmatpush3.bf16.msra.mxu0 %v6643_v43  ;;  %v2820_v43 = vor.u32 %v8416_v12, %v8414_v11  ;;  %v8613_v45 = vsel %vm7507_vm10, %v4322_v0, %v4323_v3  ;;  %v8992_v11 = vsel %vm7539_vm13, %v8338_v33, %v8287_v55  ;;  %v8997_v0 = vshll.u32 %v8368_v42, 16  ;;  %s5584_s10 = sshll.u32 (%p6927_p5), %s4911_s26, 2 }
 0x155   : > { %6249 = vmatprep.mubr.bf16.mxu1 %v8381_v34  ;;  %6081 = vmatprep.subr.bf16.mxu0 %v6647_v59  ;;  %v8625_v12 = vcombine.low %v8992_v11, %v8991_v19  ;;  %v5540_v9 = vcombine.low %v8597_v46, %v8613_v45  ;;  %v8995_v55 = vor.u32 %v8352_v62, %v8350_v26  ;;  %v2807_v36 = vrot.slane %v8996_v38, 4  ;;  %v6641_v26 = vld [vmem:[%s7511_s5 + $0x78] sm:$0xff]   ;;  %v6642_v62 = vld [vmem:[%s7511_s5 + $0x84] sm:$0xff]   ;;  %v6645_v38 = vld [vmem:[%s7511_s5 + $0x90] sm:$0xff]   ;;  %s8805_s13 = scalar_lea.vmem (%p6927_p5), %s8887_s4, %s5584_s10 }
 0x156   : > { %v2811_v37 = vrot.slane %v8997_v0, 5  ;;  %v2849_v3 = vrot.slane %v2847_v4, 5  ;;  %v2821_v15 = vrot.slane %v2820_v43, 4  ;;  %v2831_v56 = vrot.slane %v2830_v47, 4 }
 0x157   : > { %6050 = vmatmul.mubr.bf16.gmra.mrb[12].mxu0 %v6637_v48  ;;  %v8993_v48 = vsel %vm7539_vm13, %v8363_v5, %v8365_v40  ;;  %v2797_v33 = vrot.slane %v8995_v55, 4  ;;  %v2840_v5 = vrot.slane %v2838_v2, 4  ;;  %v2843_v40 = vrot.slane %v2841_v21, 5  ;;  %v6795_v55 = vld [vmem:[%s7511_s5 + $0x14] sm:$0x1] }
 0x158   : > { %6053 = vmatprep.mubr.bf16.mxu0 %v6638_v24  ;;  %v8639_v31 = vcombine.low %v8994_v13, %v8993_v48  ;;  %6082 = vmatpush3.bf16.msra.mxu0 %v6647_v59  ;;  %v2853_v24 = vrot.slane %v2851_v27, 4  ;;  %v2835_v19 = vrot.slane %v2833_v44, 5  ;;  %v2812_v57 = vsel %vm7539_vm13, %v2807_v36, %v2811_v37  ;;  %v6646_v36 = vld [vmem:[%s7511_s5 + $0x9c] sm:$0xff]  }
 0x159   : > { %6083 = vmatprep.subr.bf16.mxu0 %v6651_v51  ;;  %v2802_v42 = vsel %vm7539_vm13, %v2797_v33, %v8373_v28  ;;  %v2844_v59 = vor.u32 %v2843_v40, %v2840_v5  ;;  %v2857_v21 = vshll.u32 %v8577_v7, 16  ;;  %v2826_v44 = vsel %vm7539_vm13, %v2821_v15, %v8425_v1  ;;  %v6794_v28 = vld [vmem:[%s7511_s5 + $0x10] sm:$0xf]  ;;  %v6796_v5 = vld [vmem:[%s7511_s5 + $0x1c] sm:$0xf] }
 0x15a   : > { %v2854_v27 = vor.u32 %v2853_v24, %v2849_v3  ;;  %v2836_v2 = vsel %vm7539_vm13, %v2831_v56, %v2835_v19  ;;  %v4215_v4 = vrot.slane %v6794_v28, 5  ;;  %v8666_v43 = vcombine.low %v2802_v42, %v2812_v57  ;;  %v5478_v56 = vld [vmem:[%s7511_s5 + $0x18] sm:$0xe]  ;;  %v6797_v19 = vld [vmem:[%s7511_s5 + $0x28] sm:$0xf] }
 0x15b   : > { %v8668_v47 = vcombine.low %v2826_v44, %v2836_v2  ;;  %v2845_v7 = vrot.slane %v2844_v59, 4  ;;  %v2859_v48 = vrot.slane %v2857_v21, 5  ;;  %v4218_v33 = vrot.slane %v6795_v55, 5  ;;  %v6798_v59 = vld [vmem:[%s7511_s5 + $0x20] sm:$0x1] }
 0x15c   : > { %6250 = vmatmul.mubr.bf16.gmra.mrb[20].mxu1 %v8625_v12  ;;  %6084 = vmatpush3.bf16.msra.mxu0 %v6651_v51  ;;  %v5477_v51 = vld [vmem:[%s7511_s5 + $0xc] sm:$0xe]  ;;  %v2855_v11 = vrot.slane %v2854_v27, 4  ;;  %v4217_v13 = vrot.slane %v4215_v4, 4  ;;  %v4222_v40 = vrot.slane %v6796_v5, 5  ;;  %v5494_v42 = vrot.slane %v5478_v56, 9 }
 0x15d   : > { %6253 = vmatprep.mubr.bf16.mxu1 %v8639_v31  ;;  %v5493_v1 = vrot.slane %v5477_v51, 9  ;;  %v2850_v0 = vsel %vm7539_vm13, %v2845_v7, %v2849_v3  ;;  %v4225_v27 = vrot.slane %v6798_v59, 5  ;;  %v8998_v2 = vld [vmem:[#allocation13_spill] sm:$0xff]  ;;  %v6650_v51 = vld [vmem:[%s7511_s5 + $0xb4] sm:$0xff]  }
 0x15e   : > { %v2860_v37 = vsel %vm7539_vm13, %v2855_v11, %v2859_v48  ;;  %v4219_v15 = vsel %vm7507_vm10, %v4217_v13, %v4218_v33  ;;  %v4224_v57 = vrot.slane %v4222_v40, 4  ;;  %v4232_v28 = vrot.slane %v8998_v2, 5  ;;  %v6653_v33 = vld [vmem:[%s7511_s5 + $0xc0] sm:$0xff]  }
 0x15f   : > { %6054 = vmatmul.mubr.bf16.gmra.mrb[16].mxu0 %v6641_v26  ;;  %v4216_v24 = vsel %vm7507_vm10, %v5493_v1, %v4215_v4  ;;  %v4229_v26 = vrot.slane %v6797_v19, 5  ;;  %v5364_v3 = vcombine.low %v2850_v0, %v2860_v37  ;;  %v6649_v4 = vld [vmem:[%s7511_s5 + $0xa8] sm:$0xff]   ;;  %v4223_v7 = vsel %vm7507_vm10, %v5494_v42, %v4222_v40  ;;  %v9004_v5 = vld [vmem:[#allocation21_spill] sm:$0xff] }
 0x160   : > { %6057 = vmatprep.mubr.bf16.mxu0 %v6642_v62  ;;  %v5479_v62 = vld [vmem:[%s7511_s5 + $0x24] sm:$0xe]  ;;  %v5525_v6 = vcombine.low %v4216_v24, %v4219_v15  ;;  %v4226_v11 = vsel %vm7507_vm10, %v4224_v57, %v4225_v27  ;;  %v9002_v37 = vcombine.low %v8439_v20, %v8453_v60  ;;  %v9005_v40 = vcombine.low %v8447_v35, %v8464_v18  ;;  %v9007_v15 = vld [vmem:[#allocation22_spill] sm:$0xff] }
 0x161   : > { %v5495_v21 = vrot.slane %v5479_v62, 9  ;;  %v4231_v44 = vrot.slane %v4229_v26, 4  ;;  %v5526_v13 = vcombine.low %v4223_v7, %v4226_v11  ;;  %v9006_v24 = vcombine.low %v8474_v39, %v8485_v32  ;;  %v9013_v39 = vld [vmem:[#allocation5_spill] sm:$0xff]  ;;  %v9015_v32 = vld [vmem:[#allocation14_spill] sm:$0xff] }
 0x162   : > { %v9009_v20 = vcombine.low %v8479_v17, %v8494_v29  ;;  %v9010_v60 = vcombine.low %v8498_v49, %v8511_v16  ;;  %v9011_v35 = vcombine.low %v8506_v23, %v8522_v10  ;;  %v9012_v18 = vcombine.low %v8532_v61, %v8544_v25  ;;  %v9014_v17 = vld [vmem:[#allocation6_spill] sm:$0xff]  ;;  %v9019_v49 = vld [vmem:[#allocation7_spill] sm:$0xff] }
 0x163   : > { %v4230_v48 = vsel %vm7507_vm10, %v5495_v21, %v4229_v26  ;;  %v4233_v1 = vsel %vm7507_vm10, %v4231_v44, %v4232_v28  ;;  %v9016_v29 = vcombine.low %v9014_v17, %v9015_v32 }
 0x164   : > { %6254 = vmatmul.mubr.bf16.gmra.mrb[24].mxu1 %v8666_v43  ;;  %v5527_v55 = vcombine.low %v4230_v48, %v4233_v1 }
 0x165   : > { %6257 = vmatprep.mubr.bf16.mxu1 %v8668_v47 }
 0x167   : > { %6058 = vmatmul.mubr.bf16.gmra.mrb[20].mxu0 %v6645_v38  ;;  %v8999_v38 = vld [vmem:[#allocation19_spill] sm:$0xff] }
 0x168   : > { %6061 = vmatprep.mubr.bf16.mxu0 %v6646_v36  ;;  %v9000_v36 = vld [vmem:[#allocation8_spill] sm:$0xff] }
 0x169   : > { %v9001_v0 = vcombine.low %v8421_v58, %v9000_v36  ;;  %v9008_v58 = vld [vmem:[#allocation23_spill] sm:$0xff] }
 0x16c   : > { %6258 = vmatmul.mubr.bf16.gmra.mrb[28].mxu1 %v5364_v3 }
 0x16d   : > { %6277 = vmatprep.mubr.bf16.mxu1 %v5525_v6 }
 0x16f   : > { %6062 = vmatmul.mubr.bf16.gmra.mrb[24].mxu0 %v6649_v4 }
 0x170   : > { %6065 = vmatprep.mubr.bf16.mxu0 %v6650_v51 }
 0x174   : > { %6278 = vmatmul.mubr.bf16.vlgmr.msra.gmra.mrb[0].mxu1 %v5526_v13 }
 0x175   : > { %6281 = vmatprep.mubr.bf16.mxu1 %v5527_v55 }
 0x177   : > { %6066 = vmatmul.mubr.bf16.gmra.mrb[28].mxu0 %v6653_v33 }
 0x178   : > { %6085 = vmatprep.mubr.bf16.mxu0 %v8999_v38 }
 0x17c   : > { %6282 = vmatmul.mubr.bf16.gmra.mrb[4].mxu1 %v9001_v0 }
 0x17d   : > { %6285 = vmatprep.mubr.bf16.mxu1 %v9002_v37 }
 0x17f   : > { %6086 = vmatmul.mubr.bf16.vlgmr.msra.gmra.mrb[0].mxu0 %v9003_v63 }
 0x180   : > { %6089 = vmatprep.mubr.bf16.mxu0 %v9004_v5 }
 0x184   : > { %6286 = vmatmul.mubr.bf16.gmra.mrb[8].mxu1 %v9005_v40 }
 0x185   : > { %6289 = vmatprep.mubr.bf16.mxu1 %v9006_v24 }
 0x187   : > { %6090 = vmatmul.mubr.bf16.gmra.mrb[4].mxu0 %v9007_v15 }
 0x188   : > { %6093 = vmatprep.mubr.bf16.mxu0 %v9008_v58 }
 0x18c   : > { %6290 = vmatmul.mubr.bf16.gmra.mrb[12].mxu1 %v9009_v20 }
 0x18d   : > { %6293 = vmatprep.mubr.bf16.mxu1 %v9010_v60 }
 0x18f   : > { %6094 = vmatmul.mubr.bf16.gmra.mrb[8].mxu0 %v8199_v14  ;;  %v9017_v14 = vcombine.low %v8557_v52, %v8573_v50 }
 0x190   : > { %6097 = vmatprep.mubr.bf16.mxu0 %v8235_v30  ;;  %v9018_v30 = vld [vmem:[#allocation9_spill] sm:$0xff] }
 0x191   : > { %v9020_v23 = vcombine.low %v9018_v30, %v9019_v49 }
 0x194   : > { %6294 = vmatmul.mubr.bf16.gmra.mrb[16].mxu1 %v9011_v35 }
 0x195   : > { %6297 = vmatprep.mubr.bf16.mxu1 %v9012_v18 }
 0x197   : > { %6098 = vmatmul.mubr.bf16.gmra.mrb[12].mxu0 %v8359_v54 }
 0x198   : > { %6101 = vmatprep.mubr.bf16.mxu0 %v9013_v39 }
 0x19c   : > { %6298 = vmatmul.mubr.bf16.gmra.mrb[20].mxu1 %v9016_v29 }
 0x19d   : > { %6301 = vmatprep.mubr.bf16.mxu1 %v9017_v14 }
 0x19f   : > { %6102 = vmatmul.mubr.bf16.gmra.mrb[16].mxu0 %v8379_v22 }
 0x1a0   : > { %6105 = vmatprep.mubr.bf16.mxu0 %v8381_v34 }
 0x1a4   : > { %6302 = vmatmul.mubr.bf16.gmra.mrb[24].mxu1 %v9020_v23 }
 0x1a5   : > { %6305 = vmatprep.mubr.bf16.mxu1 %v5539_v8 }
 0x1a7   : > { %6106 = vmatmul.mubr.bf16.gmra.mrb[20].mxu0 %v8625_v12 }
 0x1a8   : > { %6109 = vmatprep.mubr.bf16.mxu0 %v8639_v31 }
 0x1ac   : > { %6306 = vmatmul.mubr.bf16.gmra.mrb[28].mxu1 %v5540_v9 }
 0x1af   : > { %6110 = vmatmul.mubr.bf16.gmra.mrb[24].mxu0 %v8666_v43 }
 0x1b0   : > { %6113 = vmatprep.mubr.bf16.mxu0 %v8668_v47 }
 0x1b7   : > { %6114 = vmatmul.mubr.bf16.gmra.mrb[28].mxu0 %v5364_v3 }
 0x247   : > { %v6279_v54 = vpop.f32.mrb[0].mxu1 }
 0x248   : > { %v4487_v22 = vpop.f32.mrb[1].mxu1  ;;  %6654 = vtanh.f32 %v6279_v54 }
 0x249   : > { %v6280_v34 = vpop.f32.mrb[2].mxu1  ;;  %6656 = vtanh.f32 %v4487_v22 }
 0x24a   : > { %v4490_v16 = vpop.f32.mrb[3].mxu1  ;;  %6658 = vtanh.f32 %v6280_v34 }
 0x24b   : > { %6660 = vtanh.f32 %v4490_v16 }
 0x24f   : > { %v6283_v10 = vpop.f32.mrb[4].mxu1 }
 0x250   : > { %v4503_v61 = vpop.f32.mrb[5].mxu1 }
 0x251   : > { %v6284_v25 = vpop.f32.mrb[6].mxu1 }
 0x252   : > { %v6087_v52 = vpop.f32.mrb[0].mxu0  ;;  %v4506_v41 = vpop.f32.mrb[7].mxu1 }
 0x253   : > { %6662 = vtanh.f32 %v6087_v52  ;;  %v3023_v50 = vpop.f32.mrb[1].mxu0  ;;  %v6655_v12 = vpop.eup %6654 }
 0x254   : > { %6664 = vtanh.f32 %v3023_v50  ;;  %v6088_v53 = vpop.f32.mrb[2].mxu0  ;;  %v6657_v31 = vpop.eup %6656 }
 0x255   : > { %6666 = vtanh.f32 %v6088_v53  ;;  %v3026_v46 = vpop.f32.mrb[3].mxu0  ;;  %v6659_v56 = vpop.eup %6658 }
 0x256   : > { %6668 = vtanh.f32 %v3026_v46  ;;  %v6661_v26 = vpop.eup %6660 }
 0x257   : > { %6670 = vtanh.f32 %v6283_v10  ;;  %v6287_v8 = vpop.f32.mrb[8].mxu1 }
 0x258   : > { %6672 = vtanh.f32 %v4503_v61  ;;  %v4519_v45 = vpop.f32.mrb[9].mxu1 }
 0x259   : > { %6674 = vtanh.f32 %v6284_v25  ;;  %v6288_v9 = vpop.f32.mrb[10].mxu1 }
 0x25a   : > { %v6091_v43 = vpop.f32.mrb[4].mxu0  ;;  %6676 = vtanh.f32 %v4506_v41  ;;  %v4522_v47 = vpop.f32.mrb[11].mxu1 }
 0x25b   : > { %6678 = vtanh.f32 %v6091_v43  ;;  %v3039_v19 = vpop.f32.mrb[5].mxu0 }
 0x25c   : > { %6680 = vtanh.f32 %v3039_v19  ;;  %v6092_v62 = vpop.f32.mrb[6].mxu0 }
 0x25d   : > { %v6663_v3 = vpop.eup %6662  ;;  %6682 = vtanh.f32 %v6092_v62  ;;  %v3042_v6 = vpop.f32.mrb[7].mxu0 }
 0x25e   : > { %v6665_v42 = vpop.eup %6664  ;;  %v5624_v57 = vpack.c.bf16 %v6655_v12, %v6663_v3  ;;  %6684 = vtanh.f32 %v3042_v6 }
 0x25f   : > { %v6667_v59 = vpop.eup %6666  ;;  %v5622_v27 = vpack.c.bf16 %v6657_v31, %v6665_v42  ;;  %6686 = vtanh.f32 %v6287_v8  ;;  %v6291_v21 = vpop.f32.mrb[12].mxu1 }
 0x260   : > { %v6669_v44 = vpop.eup %6668  ;;  %4872 = vst [vmem:[%s8755_s15 + $0x10] sm:$0xff] %v5624_v57  ;;  %v5625_v2 = vpack.c.bf16 %v6659_v56, %v6667_v59  ;;  %6688 = vtanh.f32 %v4519_v45  ;;  %v4535_v28 = vpop.f32.mrb[13].mxu1 }
 0x261   : > { %v6671_v4 = vpop.eup %6670  ;;  %4870 = vst [vmem:[%s8755_s15] sm:$0xff] %v5622_v27  ;;  %v5623_v51 = vpack.c.bf16 %v6661_v26, %v6669_v44  ;;  %6690 = vtanh.f32 %v6288_v9  ;;  %v6292_v7 = vpop.f32.mrb[14].mxu1 }
 0x262   : > { %v6673_v11 = vpop.eup %6672  ;;  %4873 = vst [vmem:[%s8755_s15 + $0x18] sm:$0xff] %v5625_v2  ;;  %v6095_v48 = vpop.f32.mrb[8].mxu0  ;;  %6692 = vtanh.f32 %v4522_v47 }
 0x263   : > { %v4538_v1 = vpop.f32.mrb[15].mxu1  ;;  %v6675_v13 = vpop.eup %6674  ;;  %4871 = vst [vmem:[%s8755_s15 + $0x8] sm:$0xff] %v5623_v51  ;;  %6694 = vtanh.f32 %v6095_v48 }
 0x264   : > { %v3055_v55 = vpop.f32.mrb[9].mxu0  ;;  %v6677_v33 = vpop.eup %6676 }
 0x265   : > { %6696 = vtanh.f32 %v3055_v55  ;;  %v6096_v38 = vpop.f32.mrb[10].mxu0  ;;  %v6679_v36 = vpop.eup %6678 }
 0x266   : > { %6698 = vtanh.f32 %v6096_v38  ;;  %v3058_v0 = vpop.f32.mrb[11].mxu0  ;;  %v6681_v37 = vpop.eup %6680  ;;  %v5628_v63 = vpack.c.bf16 %v6671_v4, %v6679_v36 }
 0x267   : > { %6700 = vtanh.f32 %v3058_v0  ;;  %v6683_v5 = vpop.eup %6682  ;;  %v5626_v40 = vpack.c.bf16 %v6673_v11, %v6681_v37  ;;  %v6295_v24 = vpop.f32.mrb[16].mxu1 }
 0x268   : > { %6702 = vtanh.f32 %v6291_v21  ;;  %v6685_v15 = vpop.eup %6684  ;;  %4876 = vst [vmem:[%s8755_s15 + $0x30] sm:$0xff] %v5628_v63  ;;  %v5629_v58 = vpack.c.bf16 %v6675_v13, %v6683_v5  ;;  %v4551_v20 = vpop.f32.mrb[17].mxu1 }
 0x269   : > { %6704 = vtanh.f32 %v4535_v28  ;;  %v6687_v60 = vpop.eup %6686  ;;  %4874 = vst [vmem:[%s8755_s15 + $0x20] sm:$0xff] %v5626_v40  ;;  %v5627_v35 = vpack.c.bf16 %v6677_v33, %v6685_v15  ;;  %v6296_v18 = vpop.f32.mrb[18].mxu1 }
 0x26a   : > { %6706 = vtanh.f32 %v6292_v7  ;;  %v6689_v39 = vpop.eup %6688  ;;  %4877 = vst [vmem:[%s8755_s15 + $0x38] sm:$0xff] %v5629_v58  ;;  %v6099_v17 = vpop.f32.mrb[12].mxu0 }
 0x26b   : > { %6708 = vtanh.f32 %v4538_v1  ;;  %v4554_v32 = vpop.f32.mrb[19].mxu1  ;;  %v6691_v29 = vpop.eup %6690  ;;  %4875 = vst [vmem:[%s8755_s15 + $0x28] sm:$0xff] %v5627_v35 }
 0x26c   : > { %6710 = vtanh.f32 %v6099_v17  ;;  %v3071_v14 = vpop.f32.mrb[13].mxu0  ;;  %v6693_v30 = vpop.eup %6692 }
 0x26d   : > { %6712 = vtanh.f32 %v3071_v14  ;;  %v6100_v49 = vpop.f32.mrb[14].mxu0  ;;  %v6695_v23 = vpop.eup %6694 }
 0x26e   : > { %6714 = vtanh.f32 %v6100_v49  ;;  %v3074_v54 = vpop.f32.mrb[15].mxu0  ;;  %v5632_v34 = vpack.c.bf16 %v6687_v60, %v6695_v23 }
 0x26f   : > { %v6697_v22 = vpop.eup %6696  ;;  %6716 = vtanh.f32 %v3074_v54  ;;  %v6299_v61 = vpop.f32.mrb[20].mxu1 }
 0x270   : > { %v6699_v16 = vpop.eup %6698  ;;  %v5630_v10 = vpack.c.bf16 %v6689_v39, %v6697_v22  ;;  %6718 = vtanh.f32 %v6295_v24  ;;  %4880 = vst [vmem:[%s8755_s15 + $0x50] sm:$0xff] %v5632_v34  ;;  %v4567_v41 = vpop.f32.mrb[21].mxu1 }
 0x271   : > { %v6701_v25 = vpop.eup %6700  ;;  %v5633_v52 = vpack.c.bf16 %v6691_v29, %v6699_v16  ;;  %6720 = vtanh.f32 %v4551_v20  ;;  %v6300_v46 = vpop.f32.mrb[22].mxu1 }
 0x272   : > { %v6703_v50 = vpop.eup %6702  ;;  %4878 = vst [vmem:[%s8755_s15 + $0x40] sm:$0xff] %v5630_v10  ;;  %v5631_v53 = vpack.c.bf16 %v6693_v30, %v6701_v25  ;;  %6722 = vtanh.f32 %v6296_v18  ;;  %v6103_v45 = vpop.f32.mrb[16].mxu0 }
 0x273   : > { %v6705_v8 = vpop.eup %6704  ;;  %4881 = vst [vmem:[%s8755_s15 + $0x58] sm:$0xff] %v5633_v52  ;;  %6724 = vtanh.f32 %v4554_v32  ;;  %v4570_v12 = vpop.f32.mrb[23].mxu1 }
 0x274   : > { %v6707_v9 = vpop.eup %6706  ;;  %4879 = vst [vmem:[%s8755_s15 + $0x48] sm:$0xff] %v5631_v53  ;;  %6726 = vtanh.f32 %v6103_v45  ;;  %v3087_v31 = vpop.f32.mrb[17].mxu0 }
 0x275   : > { %v6709_v43 = vpop.eup %6708  ;;  %6728 = vtanh.f32 %v3087_v31  ;;  %v6104_v47 = vpop.f32.mrb[18].mxu0 }
 0x276   : > { %v6711_v56 = vpop.eup %6710  ;;  %6730 = vtanh.f32 %v6104_v47  ;;  %v3090_v19 = vpop.f32.mrb[19].mxu0 }
 0x277   : > { %v6713_v26 = vpop.eup %6712  ;;  %v5636_v62 = vpack.c.bf16 %v6703_v50, %v6711_v56  ;;  %6732 = vtanh.f32 %v3090_v19  ;;  %v6303_v42 = vpop.f32.mrb[24].mxu1 }
 0x278   : > { %v6715_v3 = vpop.eup %6714  ;;  %v5634_v6 = vpack.c.bf16 %v6705_v8, %v6713_v26  ;;  %6734 = vtanh.f32 %v6299_v61  ;;  %v4583_v27 = vpop.f32.mrb[25].mxu1 }
 0x279   : > { %v6717_v57 = vpop.eup %6716  ;;  %4884 = vst [vmem:[%s8755_s15 + $0x70] sm:$0xff] %v5636_v62  ;;  %v5637_v59 = vpack.c.bf16 %v6707_v9, %v6715_v3  ;;  %6736 = vtanh.f32 %v4567_v41  ;;  %v6304_v2 = vpop.f32.mrb[26].mxu1 }
 0x27a   : > { %v6719_v21 = vpop.eup %6718  ;;  %4882 = vst [vmem:[%s8755_s15 + $0x60] sm:$0xff] %v5634_v6  ;;  %v5635_v44 = vpack.c.bf16 %v6709_v43, %v6717_v57  ;;  %6738 = vtanh.f32 %v6300_v46  ;;  %v6107_v4 = vpop.f32.mrb[20].mxu0 }
 0x27b   : > { %v6721_v28 = vpop.eup %6720  ;;  %4885 = vst [vmem:[%s8755_s15 + $0x78] sm:$0xff] %v5637_v59  ;;  %6740 = vtanh.f32 %v4570_v12  ;;  %v4586_v51 = vpop.f32.mrb[27].mxu1 }
 0x27c   : > { %v6723_v7 = vpop.eup %6722  ;;  %4883 = vst [vmem:[%s8755_s15 + $0x68] sm:$0xff] %v5635_v44  ;;  %6742 = vtanh.f32 %v6107_v4  ;;  %v3103_v11 = vpop.f32.mrb[21].mxu0  ;;  %v5005_v4 = vld [vmem:[%s8755_s15 + $0x8] sm:$0xff] (%p6927_p5) }
 0x27d   : > { %v6725_v48 = vpop.eup %6724  ;;  %6744 = vtanh.f32 %v3103_v11  ;;  %v6108_v1 = vpop.f32.mrb[22].mxu0  ;;  %v5011_v11 = vld [vmem:[%s8755_s15 + $0x20] sm:$0xff] (%p6927_p5)  ;;  %5006 = vst [vmem:[%s8805_s13 + $0x8] sm:$0xff] (%p6927_p5), %v5005_v4 }
 0x27e   : > { %v6727_v13 = vpop.eup %6726  ;;  %6746 = vtanh.f32 %v6108_v1  ;;  %v3106_v55 = vpop.f32.mrb[23].mxu0  ;;  %v5015_v1 = vld [vmem:[%s8755_s15 + $0x30] sm:$0xff] (%p6927_p5)  ;;  %5012 = vst [vmem:[%s8805_s13 + $0x40] sm:$0xff] (%p6927_p5), %v5011_v11 }
 0x27f   : > { %v6729_v33 = vpop.eup %6728  ;;  %v5640_v38 = vpack.c.bf16 %v6719_v21, %v6727_v13  ;;  %6748 = vtanh.f32 %v3106_v55  ;;  %v6307_v37 = vpop.f32.mrb[28].mxu1  ;;  %v5017_v13 = vld [vmem:[%s8755_s15 + $0x38] sm:$0xff] (%p6927_p5)  ;;  %v5019_v55 = vld [vmem:[%s8755_s15 + $0x40] sm:$0xff] (%p6927_p5)  ;;  %5016 = vst [vmem:[%s8805_s13 + $0x60] sm:$0xff] (%p6927_p5), %v5015_v1 }
 0x280   : > { %v6731_v36 = vpop.eup %6730  ;;  %v5638_v0 = vpack.c.bf16 %v6721_v28, %v6729_v33  ;;  %6750 = vtanh.f32 %v6303_v42  ;;  %v4599_v40 = vpop.f32.mrb[29].mxu1  ;;  %v5003_v28 = vld [vmem:[%s8755_s15] sm:$0xff] (%p6927_p5)  ;;  %v5021_v33 = vld [vmem:[%s8755_s15 + $0x48] sm:$0xff] (%p6927_p5)  ;;  %5018 = vst [vmem:[%s8805_s13 + $0x68] sm:$0xff] (%p6927_p5), %v5017_v13  ;;  %5020 = vst [vmem:[%s8805_s13 + $0x80] sm:$0xff] (%p6927_p5), %v5019_v55 }
 0x281   : > { %v6733_v63 = vpop.eup %6732  ;;  %4888 = vst [vmem:[%s8755_s15 + $0x90] sm:$0xff] %v5640_v38  ;;  %v5641_v5 = vpack.c.bf16 %v6723_v7, %v6731_v36  ;;  %6752 = vtanh.f32 %v4583_v27  ;;  %v6308_v58 = vpop.f32.mrb[30].mxu1  ;;  %v5009_v7 = vld [vmem:[%s8755_s15 + $0x18] sm:$0xff] (%p6927_p5)  ;;  %v5023_v38 = vld [vmem:[%s8755_s15 + $0x50] sm:$0xff] (%p6927_p5)  ;;  %5004 = vst [vmem:[%s8805_s13] sm:$0xff] (%p6927_p5), %v5003_v28 }
 0x282   : > { %v6735_v24 = vpop.eup %6734  ;;  %4886 = vst [vmem:[%s8755_s15 + $0x80] sm:$0xff] %v5638_v0  ;;  %v5639_v15 = vpack.c.bf16 %v6725_v48, %v6733_v63  ;;  %6754 = vtanh.f32 %v6304_v2  ;;  %v6111_v60 = vpop.f32.mrb[24].mxu0  ;;  %v5013_v48 = vld [vmem:[%s8755_s15 + $0x28] sm:$0xff] (%p6927_p5)  ;;  %v5025_v36 = vld [vmem:[%s8755_s15 + $0x58] sm:$0xff] (%p6927_p5)  ;;  %5010 = vst [vmem:[%s8805_s13 + $0x28] sm:$0xff] (%p6927_p5), %v5009_v7 }
 0x283   : > { %v6737_v20 = vpop.eup %6736  ;;  %4889 = vst [vmem:[%s8755_s15 + $0x98] sm:$0xff] %v5641_v5  ;;  %6756 = vtanh.f32 %v4586_v51  ;;  %v4602_v35 = vpop.f32.mrb[31].mxu1  ;;  %v5007_v51 = vld [vmem:[%s8755_s15 + $0x10] sm:$0xff] (%p6927_p5)  ;;  %5014 = vst [vmem:[%s8805_s13 + $0x48] sm:$0xff] (%p6927_p5), %v5013_v48  ;;  %v5027_v0 = vld [vmem:[%s8755_s15 + $0x60] sm:$0xff] (%p6927_p5) }
 0x284   : > { %v6739_v18 = vpop.eup %6738  ;;  %4887 = vst [vmem:[%s8755_s15 + $0x88] sm:$0xff] %v5639_v15  ;;  %6758 = vtanh.f32 %v6111_v60  ;;  %v3119_v39 = vpop.f32.mrb[25].mxu0  ;;  %5008 = vst [vmem:[%s8805_s13 + $0x20] sm:$0xff] (%p6927_p5), %v5007_v51  ;;  %v5031_v63 = vld [vmem:[%s8755_s15 + $0x70] sm:$0xff] (%p6927_p5)  ;;  %v5033_v5 = vld [vmem:[%s8755_s15 + $0x78] sm:$0xff] (%p6927_p5) }
 0x285   : > { %v6741_v17 = vpop.eup %6740  ;;  %6760 = vtanh.f32 %v3119_v39  ;;  %v6112_v32 = vpop.f32.mrb[26].mxu0  ;;  %5022 = vst [vmem:[%s8805_s13 + $0x88] sm:$0xff] (%p6927_p5), %v5021_v33  ;;  %5024 = vst [vmem:[%s8805_s13 + $0xa0] sm:$0xff] (%p6927_p5), %v5023_v38 }
 0x286   : > { %v6743_v29 = vpop.eup %6742  ;;  %6762 = vtanh.f32 %v6112_v32  ;;  %v3122_v14 = vpop.f32.mrb[27].mxu0  ;;  %5026 = vst [vmem:[%s8805_s13 + $0xa8] sm:$0xff] (%p6927_p5), %v5025_v36  ;;  %5028 = vst [vmem:[%s8805_s13 + $0xc0] sm:$0xff] (%p6927_p5), %v5027_v0 }
 0x287   : > { %v6745_v30 = vpop.eup %6744  ;;  %v5644_v49 = vpack.c.bf16 %v6735_v24, %v6743_v29  ;;  %6764 = vtanh.f32 %v3122_v14  ;;  %5032 = vst [vmem:[%s8805_s13 + $0xe0] sm:$0xff] (%p6927_p5), %v5031_v63  ;;  %5034 = vst [vmem:[%s8805_s13 + $0xe8] sm:$0xff] (%p6927_p5), %v5033_v5 }
 0x288   : > { %v6747_v23 = vpop.eup %6746  ;;  %v5642_v54 = vpack.c.bf16 %v6737_v20, %v6745_v30  ;;  %6766 = vtanh.f32 %v6307_v37  ;;  %v5029_v37 = vld [vmem:[%s8755_s15 + $0x68] sm:$0xff] (%p6927_p5)  ;;  %v5039_v15 = vld [vmem:[%s8755_s15 + $0x90] sm:$0xff] (%p6927_p5) }
 0x289   : > { %v6749_v22 = vpop.eup %6748  ;;  %4892 = vst [vmem:[%s8755_s15 + $0xb0] sm:$0xff] %v5644_v49  ;;  %v5645_v34 = vpack.c.bf16 %v6739_v18, %v6747_v23  ;;  %6768 = vtanh.f32 %v4599_v40  ;;  %5030 = vst [vmem:[%s8805_s13 + $0xc8] sm:$0xff] (%p6927_p5), %v5029_v37  ;;  %v5035_v40 = vld [vmem:[%s8755_s15 + $0x80] sm:$0xff] (%p6927_p5) }
 0x28a   : > { %v6751_v16 = vpop.eup %6750  ;;  %4890 = vst [vmem:[%s8755_s15 + $0xa0] sm:$0xff] %v5642_v54  ;;  %v5643_v10 = vpack.c.bf16 %v6741_v17, %v6749_v22  ;;  %6770 = vtanh.f32 %v6308_v58  ;;  %v6115_v25 = vpop.f32.mrb[28].mxu0  ;;  %5036 = vst [vmem:[%s8805_s13 + $0x100] sm:$0xff] (%p6927_p5), %v5035_v40  ;;  %v5041_v58 = vld [vmem:[%s8755_s15 + $0x98] sm:$0xff] (%p6927_p5) }
 0x28b   : > { %v6753_v61 = vpop.eup %6752  ;;  %4893 = vst [vmem:[%s8755_s15 + $0xb8] sm:$0xff] %v5645_v34  ;;  %6772 = vtanh.f32 %v4602_v35  ;;  %v3135_v41 = vpop.f32.mrb[29].mxu0  ;;  %v5037_v24 = vld [vmem:[%s8755_s15 + $0x88] sm:$0xff] (%p6927_p5)  ;;  %5040 = vst [vmem:[%s8805_s13 + $0x120] sm:$0xff] (%p6927_p5), %v5039_v15 }
 0x28c   : > { %v6755_v52 = vpop.eup %6754  ;;  %4891 = vst [vmem:[%s8755_s15 + $0xa8] sm:$0xff] %v5643_v10  ;;  %6774 = vtanh.f32 %v6115_v25  ;;  %v6116_v53 = vpop.f32.mrb[30].mxu0  ;;  %5038 = vst [vmem:[%s8805_s13 + $0x108] sm:$0xff] (%p6927_p5), %v5037_v24 }
 0x28d   : > { %v6757_v50 = vpop.eup %6756  ;;  %6776 = vtanh.f32 %v3135_v41  ;;  %v3138_v8 = vpop.f32.mrb[31].mxu0  ;;  %5042 = vst [vmem:[%s8805_s13 + $0x128] sm:$0xff] (%p6927_p5), %v5041_v58 }
 0x28e   : > { %v6759_v46 = vpop.eup %6758  ;;  %6778 = vtanh.f32 %v6116_v53 }
 0x28f   : > { %v6761_v45 = vpop.eup %6760  ;;  %v5648_v12 = vpack.c.bf16 %v6751_v16, %v6759_v46  ;;  %6780 = vtanh.f32 %v3138_v8 }
 0x290   : > { %v6763_v9 = vpop.eup %6762  ;;  %v5646_v31 = vpack.c.bf16 %v6753_v61, %v6761_v45  ;;  %v5047_v35 = vld [vmem:[%s8755_s15 + $0xb0] sm:$0xff] (%p6927_p5) }
 0x291   : > { %v6765_v43 = vpop.eup %6764  ;;  %4896 = vst [vmem:[%s8755_s15 + $0xd0] sm:$0xff] %v5648_v12  ;;  %v5649_v47 = vpack.c.bf16 %v6755_v52, %v6763_v9  ;;  %v5043_v20 = vld [vmem:[%s8755_s15 + $0xa0] sm:$0xff] (%p6927_p5)  ;;  %5048 = vst [vmem:[%s8805_s13 + $0x160] sm:$0xff] (%p6927_p5), %v5047_v35 }
 0x292   : > { %v6767_v56 = vpop.eup %6766  ;;  %4894 = vst [vmem:[%s8755_s15 + $0xc0] sm:$0xff] %v5646_v31  ;;  %v5647_v19 = vpack.c.bf16 %v6757_v50, %v6765_v43  ;;  %5044 = vst [vmem:[%s8805_s13 + $0x140] sm:$0xff] (%p6927_p5), %v5043_v20  ;;  %v5049_v18 = vld [vmem:[%s8755_s15 + $0xb8] sm:$0xff] (%p6927_p5) }
 0x293   : > { %v6769_v26 = vpop.eup %6768  ;;  %4897 = vst [vmem:[%s8755_s15 + $0xd8] sm:$0xff] %v5649_v47  ;;  %v5045_v60 = vld [vmem:[%s8755_s15 + $0xa8] sm:$0xff] (%p6927_p5)  ;;  %5050 = vst [vmem:[%s8805_s13 + $0x168] sm:$0xff] (%p6927_p5), %v5049_v18 }
 0x294   : > { %v6771_v62 = vpop.eup %6770  ;;  %4895 = vst [vmem:[%s8755_s15 + $0xc8] sm:$0xff] %v5647_v19  ;;  %5046 = vst [vmem:[%s8805_s13 + $0x148] sm:$0xff] (%p6927_p5), %v5045_v60 }
 0x295   : > { %v6773_v3 = vpop.eup %6772 }
 0x296   : > { %v6775_v6 = vpop.eup %6774  ;;  %4908 = sbr.rel (!%p6927_p5) target bundleno = 677 (0x2a5), region = 40 }
 0x297   : > { %v6777_v42 = vpop.eup %6776  ;;  %v5652_v57 = vpack.c.bf16 %v6767_v56, %v6775_v6 }
 0x298   : > { %v6779_v59 = vpop.eup %6778  ;;  %v5650_v27 = vpack.c.bf16 %v6769_v26, %v6777_v42  ;;  %v5055_v32 = vld [vmem:[%s8755_s15 + $0xd0] sm:$0xff] (%p6927_p5) }
 0x299   : > { %v6781_v21 = vpop.eup %6780  ;;  %4900 = vst [vmem:[%s8755_s15 + $0xf0] sm:$0xff] %v5652_v57  ;;  %v5653_v44 = vpack.c.bf16 %v6771_v62, %v6779_v59  ;;  %v5051_v39 = vld [vmem:[%s8755_s15 + $0xc0] sm:$0xff] (%p6927_p5)  ;;  %5056 = vst [vmem:[%s8805_s13 + $0x1a0] sm:$0xff] (%p6927_p5), %v5055_v32 }
 0x29a   : > { %4898 = vst [vmem:[%s8755_s15 + $0xe0] sm:$0xff] %v5650_v27  ;;  %v5651_v2 = vpack.c.bf16 %v6773_v3, %v6781_v21  ;;  %5052 = vst [vmem:[%s8805_s13 + $0x180] sm:$0xff] (%p6927_p5), %v5051_v39  ;;  %v5057_v29 = vld [vmem:[%s8755_s15 + $0xd8] sm:$0xff] (%p6927_p5) }
 0x29b   : > { %4901 = vst [vmem:[%s8755_s15 + $0xf8] sm:$0xff] %v5653_v44  ;;  %v5053_v17 = vld [vmem:[%s8755_s15 + $0xc8] sm:$0xff] (%p6927_p5)  ;;  %5058 = vst [vmem:[%s8805_s13 + $0x1a8] sm:$0xff] (%p6927_p5), %v5057_v29 }
 0x29c   : > { %4899 = vst [vmem:[%s8755_s15 + $0xe8] sm:$0xff] %v5651_v2  ;;  %5054 = vst [vmem:[%s8805_s13 + $0x188] sm:$0xff] (%p6927_p5), %v5053_v17 }
 0x2a0   : > { %v5063_v49 = vld [vmem:[%s8755_s15 + $0xf0] sm:$0xff] }
 0x2a1   : > { %v5059_v14 = vld [vmem:[%s8755_s15 + $0xe0] sm:$0xff]  ;;  %5064 = vst [vmem:[%s8805_s13 + $0x1e0] sm:$0xff] %v5063_v49 }
 0x2a2   : > { %5060 = vst [vmem:[%s8805_s13 + $0x1c0] sm:$0xff] %v5059_v14  ;;  %v5065_v23 = vld [vmem:[%s8755_s15 + $0xf8] sm:$0xff] }
 0x2a3   : > { %v5061_v30 = vld [vmem:[%s8755_s15 + $0xe8] sm:$0xff]  ;;  %5066 = vst [vmem:[%s8805_s13 + $0x1e8] sm:$0xff] %v5065_v23 }
 0x2a4   : > { %5062 = vst [vmem:[%s8805_s13 + $0x1c8] sm:$0xff] %v5061_v30 }
 0x2a5 PF: > { %s14_s21 = sadd.s32 1, %s6853_s21   ;;  %s9021_s15 = smov %s6833_s16 }
 0x2a6   : > { %p11_p11 = scmp.ge.s32.totalorder %s14_s21, 6   ;;  %s9022_s16 = smov %s6938_s30 }
 0x2a7   : > { %s9023_s17 = smov %s6845_s19  ;;  %s9024_s18 = smov %s6849_s20 }
 0x2a8   : > { %s9025_s19 = smov %s9028_s22  ;;  %s9026_s20 = smov %s9032_s23 }
 0x2a9   :  { %13 = sbr.rel (!%p11_p11) target bundleno = 4 (0x4), region = 111 }

</bundles_post_ra>
